<compile_context>
chip_gen: v7x
topology: tpu7x:2x2x1
jax: 0.10.0
libtpu: 0.0.40
codegen_flags: <defaults>
</compile_context>

<pallas_src>
import functools

import jax
import jax.numpy as jnp
from jax import lax
from jax.experimental import pallas as pl
from jax.experimental.pallas import tpu as pltpu


def _round_up(x, m):
    return ((x + m - 1) // m) * m


def _vmem_limit_bytes(requested):
    """Clamp a kernel's VMEM request against physical capacity minus headroom."""
    cap = 64 * 1024 * 1024                       # conservative fallback (v7x per-TC)
    try:
        cap = int(getattr(pltpu.get_tpu_info(), "vmem_capacity_bytes", cap))
    except Exception:
        pass
    headroom = 16 * 1024 * 1024
    limit = max(int(requested), 32 * 1024 * 1024)
    limit = min(limit, cap - headroom)
    return int(max(limit, 8 * 1024 * 1024))


# ----------------------------- Pallas kernels ------------------------------

def _upconv_kernel(x_ref, w_ref, b_ref, o_ref):
    """ConvTranspose2d(kernel=2, stride=2) for one image, as two big matmuls.

    x_ref: (H1, W1, C1)         bf16 input image (one batch element, NHWC)
    w_ref: (2, C1, 2*Cupp)      bf16 per-di weight, columns ordered (dj, co)
    b_ref: (1, 2*Cupp)          f32 bias tiled over dj, co zero-padded
    o_ref: (H1, 2, W1, 2*Cupp)  bf16; element order (i, di, j, dj, co) is a
                                pure reshape away from NHWC (2H1, 2W1, Cupp).
    """
    H1, W1, C1 = x_ref.shape
    Cw = w_ref.shape[2]
    X = x_ref[...].reshape(H1 * W1, C1)              # whole-image M dim
    bias = b_ref[...]
    y0 = jnp.dot(X, w_ref[0], preferred_element_type=jnp.float32) + bias
    y1 = jnp.dot(X, w_ref[1], preferred_element_type=jnp.float32) + bias
    o_ref[:, 0, :, :] = y0.reshape(H1, W1, Cw).astype(o_ref.dtype)
    o_ref[:, 1, :, :] = y1.reshape(H1, W1, Cw).astype(o_ref.dtype)


def _make_dconv_kernel(H2, Wp):
    """Fused (pad + concat + Conv3x3+BN+ReLU + Conv3x3+BN+ReLU) for one image.

    All activations live in a row-pitched flat layout: image pixel (h, w) sits
    at flat row h*Wp + w, where the pitch Wp = round_up(W2+2, 8) is a sublane
    multiple and the conv zero padding is carried by the left/right/tail
    columns plus zero rows above/below the image.  Tap (dh, dw) of a 3x3 conv
    is then the contiguous window starting dh*Wp + dw rows into the padded
    slab: no edge masks, no staging, dh offsets sublane-aligned.
    """
    Mout = H2 * Wp               # pitched output rows (columns >= W2 are junk)
    OFF = Wp + 8                 # sublane-aligned offset of h1 inside h1f

    def kernel(up_ref, x2_ref, keep_ref, w1a_ref, w1b_ref, s1_ref,
               w2_ref, s2_ref, o_ref, h1f_ref):
        f32 = jnp.float32
        cmidp = h1f_ref.shape[1]

        def accum_taps(src_ref, wt_ref, base, acc):
            # src_ref: (Mpad, C) padded pitched slab (bf16); wt_ref: (9, C, Co).
            for dh in range(3):
                for dw in range(3):
                    start = base + dh * Wp + dw      # dh*Wp is 8-aligned
                    patch = src_ref[start:start + Mout, :]
                    acc = acc + jnp.dot(patch, wt_ref[dh * 3 + dw],
                                        preferred_element_type=f32)
            return acc

        # Conv1 over the (virtual) channel concat [up, x2]: single accumulator.
        acc1 = jnp.zeros((Mout, cmidp), f32)
        acc1 = accum_taps(up_ref, w1a_ref, 0, acc1)
        acc1 = accum_taps(x2_ref, w1b_ref, 0, acc1)

        # Folded BN1 + ReLU.  The pitched tail columns must be exactly zero
        # because they double as conv2's horizontal zero halo -> mask them.
        h1 = jnp.maximum(acc1 + s1_ref[...], 0.0) * keep_ref[...]

        # Stage h1 into its zero-haloed scratch at an aligned offset.  The
        # top/bottom halo fills are tiny (OFF rows each) and are redone every
        # grid step on purpose: the scratch is per-core and a program_id==0
        # guard would miss cores that start mid-grid under megacore sharding.
        zrows = jnp.zeros((OFF, cmidp), h1f_ref.dtype)
        h1f_ref[0:OFF, :] = zrows
        h1f_ref[OFF + Mout:OFF + Mout + OFF, :] = zrows
        h1f_ref[OFF:OFF + Mout, :] = h1.astype(h1f_ref.dtype)

        # Conv2 + folded BN2 + ReLU.  h1f holds h1 in the padded pitched layout
        # shifted by OFF - (Wp+1), so taps start at (OFF - Wp - 1) + dh*Wp + dw.
        acc2 = jnp.zeros((Mout, o_ref.shape[-1]), f32)
        acc2 = accum_taps(h1f_ref, w2_ref, OFF - Wp - 1, acc2)
        o_ref[...] = jnp.maximum(acc2 + s2_ref[...], 0.0).astype(o_ref.dtype)

    return kernel


# ------------------------------- wrappers -----------------------------------

def conv_transpose2x2(x1_nhwc, up_w, up_b, cupp):
    """ConvTranspose2d(k=2, s=2).  x1_nhwc: (N,H1,W1,C1); up_w: (C1,Cout,2,2)
    (PyTorch layout); up_b: (Cout,).  Returns (N, 2H1, 2W1, cupp) bf16 NHWC
    with channels zero-padded to cupp (a lane multiple -> dense stores)."""
    N, H1, W1, C1 = x1_nhwc.shape
    Cout = up_w.shape[1]

    # (c, co, di, dj) -> (di, c, dj, co), pad co, flatten (dj, co).
    w_r = jnp.transpose(up_w, (2, 0, 3, 1))                       # (2, C1, 2, Cout)
    w_r = jnp.pad(w_r, ((0, 0), (0, 0), (0, 0), (0, cupp - Cout)))
    w_r = w_r.reshape(2, C1, 2 * cupp).astype(jnp.bfloat16)
    b_r = jnp.tile(jnp.pad(up_b, (0, cupp - Cout)), 2).reshape(1, 2 * cupp)
    b_r = b_r.astype(jnp.float32)

    x1_bf = x1_nhwc.astype(jnp.bfloat16)

    req = (2 * (H1 * W1 * C1 * 2 + H1 * W1 * 4 * cupp * 2)        # io blocks x2 bufs
           + 2 * C1 * 2 * cupp * 2 + 2 * cupp * 4                 # weights + bias
           + H1 * W1 * 4 * cupp * 4                               # f32 temporaries
           + (4 << 20))

    out = pl.pallas_call(
        _upconv_kernel,
        out_shape=jax.ShapeDtypeStruct((N, H1, 2, W1, 2 * cupp), jnp.bfloat16),
        grid=(N,),
        in_specs=[
            pl.BlockSpec((None, H1, W1, C1), lambda n: (n, 0, 0, 0)),
            pl.BlockSpec((2, C1, 2 * cupp), lambda n: (0, 0, 0)),
            pl.BlockSpec((1, 2 * cupp), lambda n: (0, 0)),
        ],
        out_specs=pl.BlockSpec((None, H1, 2, W1, 2 * cupp),
                               lambda n: (n, 0, 0, 0, 0)),
        compiler_params=pltpu.CompilerParams(
            dimension_semantics=("parallel",),
            vmem_limit_bytes=_vmem_limit_bytes(req)),
    )(x1_bf, w_r, b_r)

    # (N, H1, 2, W1, 2, cupp) -> (N, 2H1, 2W1, cupp): pure reshape, no transpose.
    return out.reshape(N, 2 * H1, 2 * W1, cupp)


def double_conv_fused(up_p, x2, c1_w, c1_b, bn1, c2_w, c2_b, bn2,
                      cmidp, coutp, c2p, eps=1e-5):
    """Fused F.pad + channel-concat + Double_Conv.

    up_p: (N,Hu,Wu,Cupp) bf16 first concat half (channel-padded with zeros);
    x2:   (N,H2,W2,C2) second concat half (NHWC);
    c1_w: (Cmid, Cup+C2, 3, 3); c2_w: (Cout2, Cmid, 3, 3) (PyTorch layouts).
    Returns (N, H2, Wp, coutp) f32 in the row-pitched layout.
    """
    N, Hu, Wu, Cupp = up_p.shape
    _, H2, W2, C2 = x2.shape
    Cmid, Cin_cat = c1_w.shape[0], c1_w.shape[1]
    Cout2 = c2_w.shape[0]
    Cup = Cin_cat - C2                       # real channels in the up half
    assert 0 < Cup <= Cupp, (Cup, Cupp)

    dy, dx = H2 - Hu, W2 - Wu
    assert dy >= 0 and dx >= 0  # TODO(synk): negative-diff (crop) path not implemented

    Wp = _round_up(W2 + 2, 8)                # row pitch; zero cols = h-halo
    Hpad = H2 + 3                            # 1 zero row above, >=2 below
    Mpad = Hpad * Wp
    Mout = H2 * Wp

    g1, be1, mu1, va1 = bn1
    g2, be2, mu2, va2 = bn2
    scale1 = g1 / jnp.sqrt(va1 + eps)
    scale2 = g2 / jnp.sqrt(va2 + eps)
    shift1 = be1 + (c1_b - mu1) * scale1
    shift2 = be2 + (c2_b - mu2) * scale2

    # Fold BN scale into the (bf16) weights; lay out as (tap, cin, cout);
    # zero-pad every channel dim to a lane multiple; split conv1 into halves.
    w1_t = jnp.transpose(c1_w * scale1[:, None, None, None],
                         (2, 3, 1, 0)).reshape(9, Cin_cat, Cmid)
    w1a = jnp.pad(w1_t[:, :Cup, :],
                  ((0, 0), (0, Cupp - Cup), (0, cmidp - Cmid))).astype(jnp.bfloat16)
    w1b = jnp.pad(w1_t[:, Cup:, :],
                  ((0, 0), (0, c2p - C2), (0, cmidp - Cmid))).astype(jnp.bfloat16)
    s1 = jnp.pad(shift1, (0, cmidp - Cmid)).reshape(1, cmidp).astype(jnp.float32)

    w2_t = jnp.transpose(c2_w * scale2[:, None, None, None],
                         (2, 3, 1, 0)).reshape(9, Cmid, Cout2)
    w2_r = jnp.pad(w2_t, ((0, 0), (0, cmidp - Cmid),
                          (0, coutp - Cout2))).astype(jnp.bfloat16)
    s2 = jnp.pad(shift2, (0, coutp - Cout2)).reshape(1, coutp).astype(jnp.float32)

    # Pad both concat halves straight into the row-pitched zero-haloed layout
    # (this also performs the module's F.pad to x2's spatial size via dy/dx),
    # so the kernel needs no staging at all.
    rt, ct = 1 + dy // 2, 1 + dx // 2
    up_pad = jnp.pad(up_p, ((0, 0), (rt, Hpad - Hu - rt),
                            (ct, Wp - Wu - ct), (0, 0)))
    up_pad = up_pad.reshape(N, Mpad, Cupp)
    x2_pad = jnp.pad(x2.astype(jnp.bfloat16),
                     ((0, 0), (1, Hpad - H2 - 1), (1, Wp - W2 - 1),
                      (0, c2p - C2)))
    x2_pad = x2_pad.reshape(N, Mpad, c2p)

    # keep[q] = 1 for real pixels (q mod Wp < W2); the pitched tail columns of
    # h1 must be exactly zero (they are conv2's horizontal zero halo).
    keep = (jnp.arange(Mout, dtype=jnp.int32) % Wp) < W2
    keep = keep.astype(jnp.float32).reshape(Mout, 1)

    req = (2 * Mpad * (Cupp + c2p) * 2                       # input slabs (2 bufs)
           + 2 * Mout * coutp * 4                            # output slabs
           + 2 * 9 * cmidp * (Cupp + c2p + coutp) * 2        # weights
           + (Mout + 2 * (Wp + 8)) * cmidp * 2               # h1 scratch
           + Mout * (cmidp + coutp) * 4                      # live f32 accumulators
           + (8 << 20))

    kernel = _make_dconv_kernel(H2, Wp)
    out = pl.pallas_call(
        kernel,
        out_shape=jax.ShapeDtypeStruct((N, Mout, coutp), jnp.float32),
        grid=(N,),
        in_specs=[
            pl.BlockSpec((None, Mpad, Cupp), lambda n: (n, 0, 0)),
            pl.BlockSpec((None, Mpad, c2p), lambda n: (n, 0, 0)),
            pl.BlockSpec((Mout, 1), lambda n: (0, 0)),
            pl.BlockSpec((9, Cupp, cmidp), lambda n: (0, 0, 0)),
            pl.BlockSpec((9, c2p, cmidp), lambda n: (0, 0, 0)),
            pl.BlockSpec((1, cmidp), lambda n: (0, 0)),
            pl.BlockSpec((9, cmidp, coutp), lambda n: (0, 0, 0)),
            pl.BlockSpec((1, coutp), lambda n: (0, 0)),
        ],
        out_specs=pl.BlockSpec((None, Mout, coutp), lambda n: (n, 0, 0)),
        scratch_shapes=[
            pltpu.VMEM((Mout + 2 * (Wp + 8), cmidp), jnp.bfloat16),   # h1 (haloed)
        ],
        compiler_params=pltpu.CompilerParams(
            dimension_semantics=("parallel",),
            vmem_limit_bytes=_vmem_limit_bytes(req)),
    )(up_pad, x2_pad, keep, w1a, w1b, s1, w2_r, s2)

    return out.reshape(N, H2, Wp, coutp)


# --------------------------- parameters & forward ----------------------------

def init_upsample_params(key, in_channels, out_channels, dtype=jnp.float32):
    ks = jax.random.split(key, 6)
    p = {}
    # ConvTranspose2d(in_channels, out_channels, 2, 2): weight (Cin, Cout, 2, 2)
    k_up = 1.0 / (in_channels * 4) ** 0.5
    p["up_w"] = jax.random.uniform(ks[0], (in_channels, out_channels, 2, 2), dtype, -k_up, k_up)
    p["up_b"] = jax.random.uniform(ks[1], (out_channels,), dtype, -k_up, k_up)
    # Double_Conv: Conv2d(in_channels, out_channels, 3, padding=1)
    k1 = 1.0 / (in_channels * 9) ** 0.5
    p["c1_w"] = jax.random.uniform(ks[2], (out_channels, in_channels, 3, 3), dtype, -k1, k1)
    p["c1_b"] = jax.random.uniform(ks[3], (out_channels,), dtype, -k1, k1)
    # Conv2d(out_channels, out_channels, 3, padding=1)
    k2 = 1.0 / (out_channels * 9) ** 0.5
    p["c2_w"] = jax.random.uniform(ks[4], (out_channels, out_channels, 3, 3), dtype, -k2, k2)
    p["c2_b"] = jax.random.uniform(ks[5], (out_channels,), dtype, -k2, k2)
    # BatchNorm2d params (PyTorch default init; eval-mode running stats)
    for name in ("bn1", "bn2"):
        p[f"{name}_gamma"] = jnp.ones((out_channels,), dtype)
        p[f"{name}_beta"] = jnp.zeros((out_channels,), dtype)
        p[f"{name}_mean"] = jnp.zeros((out_channels,), dtype)
        p[f"{name}_var"] = jnp.ones((out_channels,), dtype)
    return p


def upsample_forward(params, x1_nchw, x2_nchw, eps=1e-5):
    # NCHW in / NCHW out (PyTorch convention); NHWC + bf16 inside.
    N, C1, H1, W1 = x1_nchw.shape
    _, C2, H2, W2 = x2_nchw.shape
    Cout = params["up_b"].shape[0]
    assert params["c1_w"].shape[1] == Cout + C2, "concat channel mismatch"

    # Lane-dense channel padding (multiples of 128) for every activation slab.
    Cupp = _round_up(Cout, 128)
    C2p = _round_up(C2, 128)
    Cmidp = _round_up(Cout, 128)
    Coutp = _round_up(Cout, 128)

    x1 = jnp.transpose(x1_nchw, (0, 2, 3, 1))
    x2 = jnp.transpose(x2_nchw, (0, 2, 3, 1))

    # x1 = self.upsample(x1): bf16 NHWC output, channel-padded, no 6-D transpose.
    up = conv_transpose2x2(x1, params["up_w"], params["up_b"], Cupp)

    # F.pad + torch.cat([x1, x2], dim=1) + Double_Conv: fused (the pad happens
    # while laying the halves out into the row-pitched layout; the concat is
    # virtual — the kernel consumes the two halves directly).
    out = double_conv_fused(
        up, x2,
        params["c1_w"], params["c1_b"],
        (params["bn1_gamma"], params["bn1_beta"], params["bn1_mean"], params["bn1_var"]),
        params["c2_w"], params["c2_b"],
        (params["bn2_gamma"], params["bn2_beta"], params["bn2_mean"], params["bn2_var"]),
        Cmidp, Coutp, C2p, eps=eps)                 # (N, H2, Wp, Coutp)

    # Drop the pitch/tail columns and the channel padding during the NCHW
    # transpose (the dropped lanes/rows were never part of the image).
    return jnp.transpose(out[:, :, :W2, :Cout], (0, 3, 1, 2))


# ------------------------------ pure-JAX reference ---------------------------

def _reference_forward(params, x1, x2, eps=1e-5):
    hp = lax.Precision.HIGHEST
    up = jnp.einsum('nchw,coij->nohiwj', x1, params["up_w"], precision=hp)
    N, Co, H, _, W, _ = up.shape
    up = up.reshape(N, Co, 2 * H, 2 * W) + params["up_b"][None, :, None, None]
    dy = x2.shape[2] - up.shape[2]
    dx = x2.shape[3] - up.shape[3]
    up = jnp.pad(up, ((0, 0), (0, 0), (dy // 2, dy - dy // 2),
                      (dx // 2, dx - dx // 2)))
    x = jnp.concatenate([up, x2], axis=1)

    def conv_bn_relu(x, w, b, g, be, mu, va):
        y = lax.conv_general_dilated(x, w, (1, 1), ((1, 1), (1, 1)),
                                     dimension_numbers=('NCHW', 'OIHW', 'NCHW'),
                                     precision=hp)
        y = y + b[None, :, None, None]
        y = (y - mu[None, :, None, None]) * (g / jnp.sqrt(va + eps))[None, :, None, None]
        y = y + be[None, :, None, None]
        return jnp.maximum(y, 0.0)

    x = conv_bn_relu(x, params["c1_w"], params["c1_b"], params["bn1_gamma"],
                     params["bn1_beta"], params["bn1_mean"], params["bn1_var"])
    x = conv_bn_relu(x, params["c2_w"], params["c2_b"], params["bn2_gamma"],
                     params["bn2_beta"], params["bn2_mean"], params["bn2_var"])
    return x


if __name__ == "__main__":
    key = jax.random.PRNGKey(0)
    kx1, kx2, kp = jax.random.split(key, 3)

    in_channels, out_channels = 8, 4
    N, H, W = 2, 8, 8                                # x1 spatial; x2 is 2x larger
    x1 = jax.random.normal(kx1, (N, in_channels, H, W), jnp.float32)
    x2 = jax.random.normal(kx2, (N, in_channels - out_channels, 2 * H, 2 * W), jnp.float32)

    params = init_upsample_params(kp, in_channels, out_channels)

    fwd = jax.jit(functools.partial(upsample_forward, params))
    out = fwd(x1, x2)
    jax.block_until_ready(out)

    assert out.shape == (N, out_channels, 2 * H, 2 * W), out.shape
    assert bool(jnp.all(out >= 0.0))                 # final ReLU

    ref = _reference_forward(params, x1, x2)
    max_err = float(jnp.max(jnp.abs(out - ref)))
    # bf16 MXU path (per review): tolerance intentionally looser than the
    # ~1e-4 an all-f32 path would need; worst-case error here is ~1e-2.
    assert max_err < 5e-2, f"mismatch vs pure-JAX reference: {max_err}"
    print("KERNEL_OK")
</pallas_src>

<mosaic_0001>
module attributes {stable_mosaic.version = 11 : i64} {
  func.func @_upconv_kernel(%arg0: i32, %arg1: memref<1x8x8x8xbf16, #tpu.memory_space<vmem>>, %arg2: memref<2x8x256xbf16, #tpu.memory_space<vmem>>, %arg3: memref<1x256xf32, #tpu.memory_space<vmem>>, %arg4: memref<1x8x2x8x256xbf16, #tpu.memory_space<vmem>>) attributes {dimension_semantics = [#tpu.dimension_semantics<parallel>], iteration_bounds = array<i64: 2>, scalar_prefetch = 0 : i64, scratch_operands = 0 : i64, tpu.core_type = #tpu.core_type<tc>, window_params = [{transform_indices = @transform_0, window_bounds = array<i64: 1, 8, 8, 8>}, {pipeline_mode = #tpu.pipeline_mode<synchronous>, transform_indices = @transform_1, window_bounds = array<i64: 2, 8, 256>}, {pipeline_mode = #tpu.pipeline_mode<synchronous>, transform_indices = @transform_2, window_bounds = array<i64: 1, 256>}, {transform_indices = @transform_3, window_bounds = array<i64: 1, 8, 2, 8, 256>}]} {
    %c0 = arith.constant 0 : index
    %c0_0 = arith.constant 0 : index
    %c0_1 = arith.constant 0 : index
    %c0_2 = arith.constant 0 : index
    %0 = vector.load %arg1[%c0, %c0_0, %c0_1, %c0_2] : memref<1x8x8x8xbf16, #tpu.memory_space<vmem>>, vector<1x8x8x8xbf16>
    %1 = vector.shape_cast %0 : vector<1x8x8x8xbf16> to vector<8x8x8xbf16>
    %2 = vector.shape_cast %1 : vector<8x8x8xbf16> to vector<64x8xbf16>
    %c0_3 = arith.constant 0 : index
    %c0_4 = arith.constant 0 : index
    %3 = vector.load %arg3[%c0_3, %c0_4] : memref<1x256xf32, #tpu.memory_space<vmem>>, vector<1x256xf32>
    %c0_5 = arith.constant 0 : index
    %c0_6 = arith.constant 0 : index
    %c0_7 = arith.constant 0 : index
    %4 = vector.load %arg2[%c0_5, %c0_6, %c0_7] : memref<2x8x256xbf16, #tpu.memory_space<vmem>>, vector<1x8x256xbf16>
    %5 = vector.shape_cast %4 : vector<1x8x256xbf16> to vector<8x256xbf16>
    %cst = arith.constant dense<0.000000e+00> : vector<64x256xf32>
    %6 = tpu.matmul %2, %5, %cst {dimension_numbers = #tpu.dot_dimension_numbers<[1], [0], [0], [1], [0, 0, 1, 1], [], []>} : vector<64x8xbf16>, vector<8x256xbf16>, vector<64x256xf32> -> vector<64x256xf32>
    %7 = vector.broadcast %3 : vector<1x256xf32> to vector<64x256xf32>
    %8 = arith.addf %6, %7 : vector<64x256xf32>
    %c1 = arith.constant 1 : index
    %c0_8 = arith.constant 0 : index
    %c0_9 = arith.constant 0 : index
    %9 = vector.load %arg2[%c1, %c0_8, %c0_9] : memref<2x8x256xbf16, #tpu.memory_space<vmem>>, vector<1x8x256xbf16>
    %10 = vector.shape_cast %9 : vector<1x8x256xbf16> to vector<8x256xbf16>
    %cst_10 = arith.constant dense<0.000000e+00> : vector<64x256xf32>
    %11 = tpu.matmul %2, %10, %cst_10 {dimension_numbers = #tpu.dot_dimension_numbers<[1], [0], [0], [1], [0, 0, 1, 1], [], []>} : vector<64x8xbf16>, vector<8x256xbf16>, vector<64x256xf32> -> vector<64x256xf32>
    %12 = vector.broadcast %3 : vector<1x256xf32> to vector<64x256xf32>
    %13 = arith.addf %11, %12 : vector<64x256xf32>
    %14 = vector.shape_cast %8 : vector<64x256xf32> to vector<8x8x256xf32>
    %15 = arith.truncf %14 : vector<8x8x256xf32> to vector<8x8x256xbf16>
    %c0_11 = arith.constant 0 : index
    %c0_12 = arith.constant 0 : index
    %c0_13 = arith.constant 0 : index
    %c0_14 = arith.constant 0 : index
    %c0_15 = arith.constant 0 : index
    %16 = vector.load %arg4[%c0_11, %c0_12, %c0_13, %c0_14, %c0_15] : memref<1x8x2x8x256xbf16, #tpu.memory_space<vmem>>, vector<1x8x1x8x256xbf16>
    %17 = vector.shape_cast %16 : vector<1x8x1x8x256xbf16> to vector<8x8x256xbf16>
    %18 = vector.shape_cast %15 : vector<8x8x256xbf16> to vector<1x8x1x8x256xbf16>
    tpu.vector_store %arg4[%c0_11, %c0_12, %c0_13, %c0_14, %c0_15], %18 {strides = array<i32>} : memref<1x8x2x8x256xbf16, #tpu.memory_space<vmem>>, vector<1x8x1x8x256xbf16>,
    %19 = vector.shape_cast %13 : vector<64x256xf32> to vector<8x8x256xf32>
    %20 = arith.truncf %19 : vector<8x8x256xf32> to vector<8x8x256xbf16>
    %c0_16 = arith.constant 0 : index
    %c0_17 = arith.constant 0 : index
    %c1_18 = arith.constant 1 : index
    %c0_19 = arith.constant 0 : index
    %c0_20 = arith.constant 0 : index
    %21 = vector.load %arg4[%c0_16, %c0_17, %c1_18, %c0_19, %c0_20] : memref<1x8x2x8x256xbf16, #tpu.memory_space<vmem>>, vector<1x8x1x8x256xbf16>
    %22 = vector.shape_cast %21 : vector<1x8x1x8x256xbf16> to vector<8x8x256xbf16>
    %23 = vector.shape_cast %20 : vector<8x8x256xbf16> to vector<1x8x1x8x256xbf16>
    tpu.vector_store %arg4[%c0_16, %c0_17, %c1_18, %c0_19, %c0_20], %23 {strides = array<i32>} : memref<1x8x2x8x256xbf16, #tpu.memory_space<vmem>>, vector<1x8x1x8x256xbf16>,
    return
  }
  func.func @transform_0(%arg0: i32) -> (i32, i32, i32, i32) {
    %c0_i32 = arith.constant 0 : i32
    %c0_i32_0 = arith.constant 0 : i32
    %c0_i32_1 = arith.constant 0 : i32
    %c0_i32_2 = arith.constant 0 : i32
    return %arg0, %c0_i32, %c0_i32_0, %c0_i32_1 : i32, i32, i32, i32
  }
  func.func @transform_1(%arg0: i32) -> (i32, i32, i32) {
    %c0_i32 = arith.constant 0 : i32
    %c0_i32_0 = arith.constant 0 : i32
    %c0_i32_1 = arith.constant 0 : i32
    %c0_i32_2 = arith.constant 0 : i32
    return %c0_i32, %c0_i32_0, %c0_i32_1 : i32, i32, i32
  }
  func.func @transform_2(%arg0: i32) -> (i32, i32) {
    %c0_i32 = arith.constant 0 : i32
    %c0_i32_0 = arith.constant 0 : i32
    %c0_i32_1 = arith.constant 0 : i32
    return %c0_i32, %c0_i32_0 : i32, i32
  }
  func.func @transform_3(%arg0: i32) -> (i32, i32, i32, i32, i32) {
    %c0_i32 = arith.constant 0 : i32
    %c0_i32_0 = arith.constant 0 : i32
    %c0_i32_1 = arith.constant 0 : i32
    %c0_i32_2 = arith.constant 0 : i32
    %c0_i32_3 = arith.constant 0 : i32
    return %arg0, %c0_i32, %c0_i32_0, %c0_i32_1, %c0_i32_2 : i32, i32, i32, i32, i32
  }
}

module attributes {stable_mosaic.version = 11 : i64} {
  func.func @kernel(%arg0: i32, %arg1: memref<1x456x128xbf16, #tpu.memory_space<vmem>>, %arg2: memref<1x456x128xbf16, #tpu.memory_space<vmem>>, %arg3: memref<384x1xf32, #tpu.memory_space<vmem>>, %arg4: memref<9x128x128xbf16, #tpu.memory_space<vmem>>, %arg5: memref<9x128x128xbf16, #tpu.memory_space<vmem>>, %arg6: memref<1x128xf32, #tpu.memory_space<vmem>>, %arg7: memref<9x128x128xbf16, #tpu.memory_space<vmem>>, %arg8: memref<1x128xf32, #tpu.memory_space<vmem>>, %arg9: memref<1x384x128xf32, #tpu.memory_space<vmem>>, %arg10: memref<448x128xbf16, #tpu.memory_space<vmem>>) attributes {dimension_semantics = [#tpu.dimension_semantics<parallel>], iteration_bounds = array<i64: 2>, scalar_prefetch = 0 : i64, scratch_operands = 1 : i64, tpu.core_type = #tpu.core_type<tc>, window_params = [{transform_indices = @transform_0, window_bounds = array<i64: 1, 456, 128>}, {transform_indices = @transform_1, window_bounds = array<i64: 1, 456, 128>}, {pipeline_mode = #tpu.pipeline_mode<synchronous>, transform_indices = @transform_2, window_bounds = array<i64: 384, 1>}, {pipeline_mode = #tpu.pipeline_mode<synchronous>, transform_indices = @transform_3, window_bounds = array<i64: 9, 128, 128>}, {pipeline_mode = #tpu.pipeline_mode<synchronous>, transform_indices = @transform_4, window_bounds = array<i64: 9, 128, 128>}, {pipeline_mode = #tpu.pipeline_mode<synchronous>, transform_indices = @transform_5, window_bounds = array<i64: 1, 128>}, {pipeline_mode = #tpu.pipeline_mode<synchronous>, transform_indices = @transform_6, window_bounds = array<i64: 9, 128, 128>}, {pipeline_mode = #tpu.pipeline_mode<synchronous>, transform_indices = @transform_7, window_bounds = array<i64: 1, 128>}, {transform_indices = @transform_8, window_bounds = array<i64: 1, 384, 128>}]} {
    %cst = arith.constant 0.000000e+00 : f32
    %0 = vector.broadcast %cst : f32 to vector<384x128xf32>
    %c0 = arith.constant 0 : index
    %c0_0 = arith.constant 0 : index
    %c0_1 = arith.constant 0 : index
    %1 = vector.load %arg1[%c0, %c0_0, %c0_1] : memref<1x456x128xbf16, #tpu.memory_space<vmem>>, vector<1x384x128xbf16>
    %2 = vector.shape_cast %1 : vector<1x384x128xbf16> to vector<384x128xbf16>
    %c0_2 = arith.constant 0 : index
    %c0_3 = arith.constant 0 : index
    %c0_4 = arith.constant 0 : index
    %3 = vector.load %arg4[%c0_2, %c0_3, %c0_4] : memref<9x128x128xbf16, #tpu.memory_space<vmem>>, vector<1x128x128xbf16>
    %4 = vector.shape_cast %3 : vector<1x128x128xbf16> to vector<128x128xbf16>
    %cst_5 = arith.constant dense<0.000000e+00> : vector<384x128xf32>
    %5 = tpu.matmul %2, %4, %cst_5 {dimension_numbers = #tpu.dot_dimension_numbers<[1], [0], [0], [1], [0, 0, 1, 1], [], []>} : vector<384x128xbf16>, vector<128x128xbf16>, vector<384x128xf32> -> vector<384x128xf32>
    %6 = arith.addf %0, %5 : vector<384x128xf32>
    %c0_6 = arith.constant 0 : index
    %c1 = arith.constant 1 : index
    %c0_7 = arith.constant 0 : index
    %7 = vector.load %arg1[%c0_6, %c1, %c0_7] : memref<1x456x128xbf16, #tpu.memory_space<vmem>>, vector<1x384x128xbf16>
    %8 = vector.shape_cast %7 : vector<1x384x128xbf16> to vector<384x128xbf16>
    %c1_8 = arith.constant 1 : index
    %c0_9 = arith.constant 0 : index
    %c0_10 = arith.constant 0 : index
    %9 = vector.load %arg4[%c1_8, %c0_9, %c0_10] : memref<9x128x128xbf16, #tpu.memory_space<vmem>>, vector<1x128x128xbf16>
    %10 = vector.shape_cast %9 : vector<1x128x128xbf16> to vector<128x128xbf16>
    %cst_11 = arith.constant dense<0.000000e+00> : vector<384x128xf32>
    %11 = tpu.matmul %8, %10, %cst_11 {dimension_numbers = #tpu.dot_dimension_numbers<[1], [0], [0], [1], [0, 0, 1, 1], [], []>} : vector<384x128xbf16>, vector<128x128xbf16>, vector<384x128xf32> -> vector<384x128xf32>
    %12 = arith.addf %6, %11 : vector<384x128xf32>
    %c0_12 = arith.constant 0 : index
    %c2 = arith.constant 2 : index
    %c0_13 = arith.constant 0 : index
    %13 = vector.load %arg1[%c0_12, %c2, %c0_13] : memref<1x456x128xbf16, #tpu.memory_space<vmem>>, vector<1x384x128xbf16>
    %14 = vector.shape_cast %13 : vector<1x384x128xbf16> to vector<384x128xbf16>
    %c2_14 = arith.constant 2 : index
    %c0_15 = arith.constant 0 : index
    %c0_16 = arith.constant 0 : index
    %15 = vector.load %arg4[%c2_14, %c0_15, %c0_16] : memref<9x128x128xbf16, #tpu.memory_space<vmem>>, vector<1x128x128xbf16>
    %16 = vector.shape_cast %15 : vector<1x128x128xbf16> to vector<128x128xbf16>
    %cst_17 = arith.constant dense<0.000000e+00> : vector<384x128xf32>
    %17 = tpu.matmul %14, %16, %cst_17 {dimension_numbers = #tpu.dot_dimension_numbers<[1], [0], [0], [1], [0, 0, 1, 1], [], []>} : vector<384x128xbf16>, vector<128x128xbf16>, vector<384x128xf32> -> vector<384x128xf32>
    %18 = arith.addf %12, %17 : vector<384x128xf32>
    %c0_18 = arith.constant 0 : index
    %c24 = arith.constant 24 : index
    %c0_19 = arith.constant 0 : index
    %19 = vector.load %arg1[%c0_18, %c24, %c0_19] : memref<1x456x128xbf16, #tpu.memory_space<vmem>>, vector<1x384x128xbf16>
    %20 = vector.shape_cast %19 : vector<1x384x128xbf16> to vector<384x128xbf16>
    %c3 = arith.constant 3 : index
    %c0_20 = arith.constant 0 : index
    %c0_21 = arith.constant 0 : index
    %21 = vector.load %arg4[%c3, %c0_20, %c0_21] : memref<9x128x128xbf16, #tpu.memory_space<vmem>>, vector<1x128x128xbf16>
    %22 = vector.shape_cast %21 : vector<1x128x128xbf16> to vector<128x128xbf16>
    %cst_22 = arith.constant dense<0.000000e+00> : vector<384x128xf32>
    %23 = tpu.matmul %20, %22, %cst_22 {dimension_numbers = #tpu.dot_dimension_numbers<[1], [0], [0], [1], [0, 0, 1, 1], [], []>} : vector<384x128xbf16>, vector<128x128xbf16>, vector<384x128xf32> -> vector<384x128xf32>
    %24 = arith.addf %18, %23 : vector<384x128xf32>
    %c0_23 = arith.constant 0 : index
    %c25 = arith.constant 25 : index
    %c0_24 = arith.constant 0 : index
    %25 = vector.load %arg1[%c0_23, %c25, %c0_24] : memref<1x456x128xbf16, #tpu.memory_space<vmem>>, vector<1x384x128xbf16>
    %26 = vector.shape_cast %25 : vector<1x384x128xbf16> to vector<384x128xbf16>
    %c4 = arith.constant 4 : index
    %c0_25 = arith.constant 0 : index
    %c0_26 = arith.constant 0 : index
    %27 = vector.load %arg4[%c4, %c0_25, %c0_26] : memref<9x128x128xbf16, #tpu.memory_space<vmem>>, vector<1x128x128xbf16>
    %28 = vector.shape_cast %27 : vector<1x128x128xbf16> to vector<128x128xbf16>
    %cst_27 = arith.constant dense<0.000000e+00> : vector<384x128xf32>
    %29 = tpu.matmul %26, %28, %cst_27 {dimension_numbers = #tpu.dot_dimension_numbers<[1], [0], [0], [1], [0, 0, 1, 1], [], []>} : vector<384x128xbf16>, vector<128x128xbf16>, vector<384x128xf32> -> vector<384x128xf32>
    %30 = arith.addf %24, %29 : vector<384x128xf32>
    %c0_28 = arith.constant 0 : index
    %c26 = arith.constant 26 : index
    %c0_29 = arith.constant 0 : index
    %31 = vector.load %arg1[%c0_28, %c26, %c0_29] : memref<1x456x128xbf16, #tpu.memory_space<vmem>>, vector<1x384x128xbf16>
    %32 = vector.shape_cast %31 : vector<1x384x128xbf16> to vector<384x128xbf16>
    %c5 = arith.constant 5 : index
    %c0_30 = arith.constant 0 : index
    %c0_31 = arith.constant 0 : index
    %33 = vector.load %arg4[%c5, %c0_30, %c0_31] : memref<9x128x128xbf16, #tpu.memory_space<vmem>>, vector<1x128x128xbf16>
    %34 = vector.shape_cast %33 : vector<1x128x128xbf16> to vector<128x128xbf16>
    %cst_32 = arith.constant dense<0.000000e+00> : vector<384x128xf32>
    %35 = tpu.matmul %32, %34, %cst_32 {dimension_numbers = #tpu.dot_dimension_numbers<[1], [0], [0], [1], [0, 0, 1, 1], [], []>} : vector<384x128xbf16>, vector<128x128xbf16>, vector<384x128xf32> -> vector<384x128xf32>
    %36 = arith.addf %30, %35 : vector<384x128xf32>
    %c0_33 = arith.constant 0 : index
    %c48 = arith.constant 48 : index
    %c0_34 = arith.constant 0 : index
    %37 = vector.load %arg1[%c0_33, %c48, %c0_34] : memref<1x456x128xbf16, #tpu.memory_space<vmem>>, vector<1x384x128xbf16>
    %38 = vector.shape_cast %37 : vector<1x384x128xbf16> to vector<384x128xbf16>
    %c6 = arith.constant 6 : index
    %c0_35 = arith.constant 0 : index
    %c0_36 = arith.constant 0 : index
    %39 = vector.load %arg4[%c6, %c0_35, %c0_36] : memref<9x128x128xbf16, #tpu.memory_space<vmem>>, vector<1x128x128xbf16>
    %40 = vector.shape_cast %39 : vector<1x128x128xbf16> to vector<128x128xbf16>
    %cst_37 = arith.constant dense<0.000000e+00> : vector<384x128xf32>
    %41 = tpu.matmul %38, %40, %cst_37 {dimension_numbers = #tpu.dot_dimension_numbers<[1], [0], [0], [1], [0, 0, 1, 1], [], []>} : vector<384x128xbf16>, vector<128x128xbf16>, vector<384x128xf32> -> vector<384x128xf32>
    %42 = arith.addf %36, %41 : vector<384x128xf32>
    %c0_38 = arith.constant 0 : index
    %c49 = arith.constant 49 : index
    %c0_39 = arith.constant 0 : index
    %43 = vector.load %arg1[%c0_38, %c49, %c0_39] : memref<1x456x128xbf16, #tpu.memory_space<vmem>>, vector<1x384x128xbf16>
    %44 = vector.shape_cast %43 : vector<1x384x128xbf16> to vector<384x128xbf16>
    %c7 = arith.constant 7 : index
    %c0_40 = arith.constant 0 : index
    %c0_41 = arith.constant 0 : index
    %45 = vector.load %arg4[%c7, %c0_40, %c0_41] : memref<9x128x128xbf16, #tpu.memory_space<vmem>>, vector<1x128x128xbf16>
    %46 = vector.shape_cast %45 : vector<1x128x128xbf16> to vector<128x128xbf16>
    %cst_42 = arith.constant dense<0.000000e+00> : vector<384x128xf32>
    %47 = tpu.matmul %44, %46, %cst_42 {dimension_numbers = #tpu.dot_dimension_numbers<[1], [0], [0], [1], [0, 0, 1, 1], [], []>} : vector<384x128xbf16>, vector<128x128xbf16>, vector<384x128xf32> -> vector<384x128xf32>
    %48 = arith.addf %42, %47 : vector<384x128xf32>
    %c0_43 = arith.constant 0 : index
    %c50 = arith.constant 50 : index
    %c0_44 = arith.constant 0 : index
    %49 = vector.load %arg1[%c0_43, %c50, %c0_44] : memref<1x456x128xbf16, #tpu.memory_space<vmem>>, vector<1x384x128xbf16>
    %50 = vector.shape_cast %49 : vector<1x384x128xbf16> to vector<384x128xbf16>
    %c8 = arith.constant 8 : index
    %c0_45 = arith.constant 0 : index
    %c0_46 = arith.constant 0 : index
    %51 = vector.load %arg4[%c8, %c0_45, %c0_46] : memref<9x128x128xbf16, #tpu.memory_space<vmem>>, vector<1x128x128xbf16>
    %52 = vector.shape_cast %51 : vector<1x128x128xbf16> to vector<128x128xbf16>
    %cst_47 = arith.constant dense<0.000000e+00> : vector<384x128xf32>
    %53 = tpu.matmul %50, %52, %cst_47 {dimension_numbers = #tpu.dot_dimension_numbers<[1], [0], [0], [1], [0, 0, 1, 1], [], []>} : vector<384x128xbf16>, vector<128x128xbf16>, vector<384x128xf32> -> vector<384x128xf32>
    %54 = arith.addf %48, %53 : vector<384x128xf32>
    %c0_48 = arith.constant 0 : index
    %c0_49 = arith.constant 0 : index
    %c0_50 = arith.constant 0 : index
    %55 = vector.load %arg2[%c0_48, %c0_49, %c0_50] : memref<1x456x128xbf16, #tpu.memory_space<vmem>>, vector<1x384x128xbf16>
    %56 = vector.shape_cast %55 : vector<1x384x128xbf16> to vector<384x128xbf16>
    %c0_51 = arith.constant 0 : index
    %c0_52 = arith.constant 0 : index
    %c0_53 = arith.constant 0 : index
    %57 = vector.load %arg5[%c0_51, %c0_52, %c0_53] : memref<9x128x128xbf16, #tpu.memory_space<vmem>>, vector<1x128x128xbf16>
    %58 = vector.shape_cast %57 : vector<1x128x128xbf16> to vector<128x128xbf16>
    %cst_54 = arith.constant dense<0.000000e+00> : vector<384x128xf32>
    %59 = tpu.matmul %56, %58, %cst_54 {dimension_numbers = #tpu.dot_dimension_numbers<[1], [0], [0], [1], [0, 0, 1, 1], [], []>} : vector<384x128xbf16>, vector<128x128xbf16>, vector<384x128xf32> -> vector<384x128xf32>
    %60 = arith.addf %54, %59 : vector<384x128xf32>
    %c0_55 = arith.constant 0 : index
    %c1_56 = arith.constant 1 : index
    %c0_57 = arith.constant 0 : index
    %61 = vector.load %arg2[%c0_55, %c1_56, %c0_57] : memref<1x456x128xbf16, #tpu.memory_space<vmem>>, vector<1x384x128xbf16>
    %62 = vector.shape_cast %61 : vector<1x384x128xbf16> to vector<384x128xbf16>
    %c1_58 = arith.constant 1 : index
    %c0_59 = arith.constant 0 : index
    %c0_60 = arith.constant 0 : index
    %63 = vector.load %arg5[%c1_58, %c0_59, %c0_60] : memref<9x128x128xbf16, #tpu.memory_space<vmem>>, vector<1x128x128xbf16>
    %64 = vector.shape_cast %63 : vector<1x128x128xbf16> to vector<128x128xbf16>
    %cst_61 = arith.constant dense<0.000000e+00> : vector<384x128xf32>
    %65 = tpu.matmul %62, %64, %cst_61 {dimension_numbers = #tpu.dot_dimension_numbers<[1], [0], [0], [1], [0, 0, 1, 1], [], []>} : vector<384x128xbf16>, vector<128x128xbf16>, vector<384x128xf32> -> vector<384x128xf32>
    %66 = arith.addf %60, %65 : vector<384x128xf32>
    %c0_62 = arith.constant 0 : index
    %c2_63 = arith.constant 2 : index
    %c0_64 = arith.constant 0 : index
    %67 = vector.load %arg2[%c0_62, %c2_63, %c0_64] : memref<1x456x128xbf16, #tpu.memory_space<vmem>>, vector<1x384x128xbf16>
    %68 = vector.shape_cast %67 : vector<1x384x128xbf16> to vector<384x128xbf16>
    %c2_65 = arith.constant 2 : index
    %c0_66 = arith.constant 0 : index
    %c0_67 = arith.constant 0 : index
    %69 = vector.load %arg5[%c2_65, %c0_66, %c0_67] : memref<9x128x128xbf16, #tpu.memory_space<vmem>>, vector<1x128x128xbf16>
    %70 = vector.shape_cast %69 : vector<1x128x128xbf16> to vector<128x128xbf16>
    %cst_68 = arith.constant dense<0.000000e+00> : vector<384x128xf32>
    %71 = tpu.matmul %68, %70, %cst_68 {dimension_numbers = #tpu.dot_dimension_numbers<[1], [0], [0], [1], [0, 0, 1, 1], [], []>} : vector<384x128xbf16>, vector<128x128xbf16>, vector<384x128xf32> -> vector<384x128xf32>
    %72 = arith.addf %66, %71 : vector<384x128xf32>
    %c0_69 = arith.constant 0 : index
    %c24_70 = arith.constant 24 : index
    %c0_71 = arith.constant 0 : index
    %73 = vector.load %arg2[%c0_69, %c24_70, %c0_71] : memref<1x456x128xbf16, #tpu.memory_space<vmem>>, vector<1x384x128xbf16>
    %74 = vector.shape_cast %73 : vector<1x384x128xbf16> to vector<384x128xbf16>
    %c3_72 = arith.constant 3 : index
    %c0_73 = arith.constant 0 : index
    %c0_74 = arith.constant 0 : index
    %75 = vector.load %arg5[%c3_72, %c0_73, %c0_74] : memref<9x128x128xbf16, #tpu.memory_space<vmem>>, vector<1x128x128xbf16>
    %76 = vector.shape_cast %75 : vector<1x128x128xbf16> to vector<128x128xbf16>
    %cst_75 = arith.constant dense<0.000000e+00> : vector<384x128xf32>
    %77 = tpu.matmul %74, %76, %cst_75 {dimension_numbers = #tpu.dot_dimension_numbers<[1], [0], [0], [1], [0, 0, 1, 1], [], []>} : vector<384x128xbf16>, vector<128x128xbf16>, vector<384x128xf32> -> vector<384x128xf32>
    %78 = arith.addf %72, %77 : vector<384x128xf32>
    %c0_76 = arith.constant 0 : index
    %c25_77 = arith.constant 25 : index
    %c0_78 = arith.constant 0 : index
    %79 = vector.load %arg2[%c0_76, %c25_77, %c0_78] : memref<1x456x128xbf16, #tpu.memory_space<vmem>>, vector<1x384x128xbf16>
    %80 = vector.shape_cast %79 : vector<1x384x128xbf16> to vector<384x128xbf16>
    %c4_79 = arith.constant 4 : index
    %c0_80 = arith.constant 0 : index
    %c0_81 = arith.constant 0 : index
    %81 = vector.load %arg5[%c4_79, %c0_80, %c0_81] : memref<9x128x128xbf16, #tpu.memory_space<vmem>>, vector<1x128x128xbf16>
    %82 = vector.shape_cast %81 : vector<1x128x128xbf16> to vector<128x128xbf16>
    %cst_82 = arith.constant dense<0.000000e+00> : vector<384x128xf32>
    %83 = tpu.matmul %80, %82, %cst_82 {dimension_numbers = #tpu.dot_dimension_numbers<[1], [0], [0], [1], [0, 0, 1, 1], [], []>} : vector<384x128xbf16>, vector<128x128xbf16>, vector<384x128xf32> -> vector<384x128xf32>
    %84 = arith.addf %78, %83 : vector<384x128xf32>
    %c0_83 = arith.constant 0 : index
    %c26_84 = arith.constant 26 : index
    %c0_85 = arith.constant 0 : index
    %85 = vector.load %arg2[%c0_83, %c26_84, %c0_85] : memref<1x456x128xbf16, #tpu.memory_space<vmem>>, vector<1x384x128xbf16>
    %86 = vector.shape_cast %85 : vector<1x384x128xbf16> to vector<384x128xbf16>
    %c5_86 = arith.constant 5 : index
    %c0_87 = arith.constant 0 : index
    %c0_88 = arith.constant 0 : index
    %87 = vector.load %arg5[%c5_86, %c0_87, %c0_88] : memref<9x128x128xbf16, #tpu.memory_space<vmem>>, vector<1x128x128xbf16>
    %88 = vector.shape_cast %87 : vector<1x128x128xbf16> to vector<128x128xbf16>
    %cst_89 = arith.constant dense<0.000000e+00> : vector<384x128xf32>
    %89 = tpu.matmul %86, %88, %cst_89 {dimension_numbers = #tpu.dot_dimension_numbers<[1], [0], [0], [1], [0, 0, 1, 1], [], []>} : vector<384x128xbf16>, vector<128x128xbf16>, vector<384x128xf32> -> vector<384x128xf32>
    %90 = arith.addf %84, %89 : vector<384x128xf32>
    %c0_90 = arith.constant 0 : index
    %c48_91 = arith.constant 48 : index
    %c0_92 = arith.constant 0 : index
    %91 = vector.load %arg2[%c0_90, %c48_91, %c0_92] : memref<1x456x128xbf16, #tpu.memory_space<vmem>>, vector<1x384x128xbf16>
    %92 = vector.shape_cast %91 : vector<1x384x128xbf16> to vector<384x128xbf16>
    %c6_93 = arith.constant 6 : index
    %c0_94 = arith.constant 0 : index
    %c0_95 = arith.constant 0 : index
    %93 = vector.load %arg5[%c6_93, %c0_94, %c0_95] : memref<9x128x128xbf16, #tpu.memory_space<vmem>>, vector<1x128x128xbf16>
    %94 = vector.shape_cast %93 : vector<1x128x128xbf16> to vector<128x128xbf16>
    %cst_96 = arith.constant dense<0.000000e+00> : vector<384x128xf32>
    %95 = tpu.matmul %92, %94, %cst_96 {dimension_numbers = #tpu.dot_dimension_numbers<[1], [0], [0], [1], [0, 0, 1, 1], [], []>} : vector<384x128xbf16>, vector<128x128xbf16>, vector<384x128xf32> -> vector<384x128xf32>
    %96 = arith.addf %90, %95 : vector<384x128xf32>
    %c0_97 = arith.constant 0 : index
    %c49_98 = arith.constant 49 : index
    %c0_99 = arith.constant 0 : index
    %97 = vector.load %arg2[%c0_97, %c49_98, %c0_99] : memref<1x456x128xbf16, #tpu.memory_space<vmem>>, vector<1x384x128xbf16>
    %98 = vector.shape_cast %97 : vector<1x384x128xbf16> to vector<384x128xbf16>
    %c7_100 = arith.constant 7 : index
    %c0_101 = arith.constant 0 : index
    %c0_102 = arith.constant 0 : index
    %99 = vector.load %arg5[%c7_100, %c0_101, %c0_102] : memref<9x128x128xbf16, #tpu.memory_space<vmem>>, vector<1x128x128xbf16>
    %100 = vector.shape_cast %99 : vector<1x128x128xbf16> to vector<128x128xbf16>
    %cst_103 = arith.constant dense<0.000000e+00> : vector<384x128xf32>
    %101 = tpu.matmul %98, %100, %cst_103 {dimension_numbers = #tpu.dot_dimension_numbers<[1], [0], [0], [1], [0, 0, 1, 1], [], []>} : vector<384x128xbf16>, vector<128x128xbf16>, vector<384x128xf32> -> vector<384x128xf32>
    %102 = arith.addf %96, %101 : vector<384x128xf32>
    %c0_104 = arith.constant 0 : index
    %c50_105 = arith.constant 50 : index
    %c0_106 = arith.constant 0 : index
    %103 = vector.load %arg2[%c0_104, %c50_105, %c0_106] : memref<1x456x128xbf16, #tpu.memory_space<vmem>>, vector<1x384x128xbf16>
    %104 = vector.shape_cast %103 : vector<1x384x128xbf16> to vector<384x128xbf16>
    %c8_107 = arith.constant 8 : index
    %c0_108 = arith.constant 0 : index
    %c0_109 = arith.constant 0 : index
    %105 = vector.load %arg5[%c8_107, %c0_108, %c0_109] : memref<9x128x128xbf16, #tpu.memory_space<vmem>>, vector<1x128x128xbf16>
    %106 = vector.shape_cast %105 : vector<1x128x128xbf16> to vector<128x128xbf16>
    %cst_110 = arith.constant dense<0.000000e+00> : vector<384x128xf32>
    %107 = tpu.matmul %104, %106, %cst_110 {dimension_numbers = #tpu.dot_dimension_numbers<[1], [0], [0], [1], [0, 0, 1, 1], [], []>} : vector<384x128xbf16>, vector<128x128xbf16>, vector<384x128xf32> -> vector<384x128xf32>
    %108 = arith.addf %102, %107 : vector<384x128xf32>
    %c0_111 = arith.constant 0 : index
    %c0_112 = arith.constant 0 : index
    %109 = vector.load %arg6[%c0_111, %c0_112] : memref<1x128xf32, #tpu.memory_space<vmem>>, vector<1x128xf32>
    %110 = vector.broadcast %109 : vector<1x128xf32> to vector<384x128xf32>
    %111 = arith.addf %108, %110 : vector<384x128xf32>
    %cst_113 = arith.constant 0.000000e+00 : f32
    %112 = vector.broadcast %cst_113 : f32 to vector<384x128xf32>
    %113 = arith.maximumf %111, %112 : vector<384x128xf32>
    %c0_114 = arith.constant 0 : index
    %c0_115 = arith.constant 0 : index
    %114 = vector.load %arg3[%c0_114, %c0_115] : memref<384x1xf32, #tpu.memory_space<vmem>>, vector<384x1xf32>
    %115 = vector.broadcast %114 : vector<384x1xf32> to vector<384x128xf32>
    %116 = arith.mulf %113, %115 : vector<384x128xf32>
    %cst_116 = arith.constant 0.000000e+00 : bf16
    %117 = vector.broadcast %cst_116 : bf16 to vector<32x128xbf16>
    %c0_117 = arith.constant 0 : index
    %c0_118 = arith.constant 0 : index
    %118 = vector.load %arg10[%c0_117, %c0_118] : memref<448x128xbf16, #tpu.memory_space<vmem>>, vector<32x128xbf16>
    tpu.vector_store %arg10[%c0_117, %c0_118], %117 {strides = array<i32>} : memref<448x128xbf16, #tpu.memory_space<vmem>>, vector<32x128xbf16>,
    %c416 = arith.constant 416 : index
    %c0_119 = arith.constant 0 : index
    %119 = vector.load %arg10[%c416, %c0_119] : memref<448x128xbf16, #tpu.memory_space<vmem>>, vector<32x128xbf16>
    tpu.vector_store %arg10[%c416, %c0_119], %117 {strides = array<i32>} : memref<448x128xbf16, #tpu.memory_space<vmem>>, vector<32x128xbf16>,
    %120 = arith.truncf %116 : vector<384x128xf32> to vector<384x128xbf16>
    %c32 = arith.constant 32 : index
    %c0_120 = arith.constant 0 : index
    %121 = vector.load %arg10[%c32, %c0_120] : memref<448x128xbf16, #tpu.memory_space<vmem>>, vector<384x128xbf16>
    tpu.vector_store %arg10[%c32, %c0_120], %120 {strides = array<i32>} : memref<448x128xbf16, #tpu.memory_space<vmem>>, vector<384x128xbf16>,
    %cst_121 = arith.constant 0.000000e+00 : f32
    %122 = vector.broadcast %cst_121 : f32 to vector<384x128xf32>
    %c7_122 = arith.constant 7 : index
    %c0_123 = arith.constant 0 : index
    %123 = vector.load %arg10[%c7_122, %c0_123] : memref<448x128xbf16, #tpu.memory_space<vmem>>, vector<384x128xbf16>
    %c0_124 = arith.constant 0 : index
    %c0_125 = arith.constant 0 : index
    %c0_126 = arith.constant 0 : index
    %124 = vector.load %arg7[%c0_124, %c0_125, %c0_126] : memref<9x128x128xbf16, #tpu.memory_space<vmem>>, vector<1x128x128xbf16>
    %125 = vector.shape_cast %124 : vector<1x128x128xbf16> to vector<128x128xbf16>
    %cst_127 = arith.constant dense<0.000000e+00> : vector<384x128xf32>
    %126 = tpu.matmul %123, %125, %cst_127 {dimension_numbers = #tpu.dot_dimension_numbers<[1], [0], [0], [1], [0, 0, 1, 1], [], []>} : vector<384x128xbf16>, vector<128x128xbf16>, vector<384x128xf32> -> vector<384x128xf32>
    %127 = arith.addf %122, %126 : vector<384x128xf32>
    %c8_128 = arith.constant 8 : index
    %c0_129 = arith.constant 0 : index
    %128 = vector.load %arg10[%c8_128, %c0_129] : memref<448x128xbf16, #tpu.memory_space<vmem>>, vector<384x128xbf16>
    %c1_130 = arith.constant 1 : index
    %c0_131 = arith.constant 0 : index
    %c0_132 = arith.constant 0 : index
    %129 = vector.load %arg7[%c1_130, %c0_131, %c0_132] : memref<9x128x128xbf16, #tpu.memory_space<vmem>>, vector<1x128x128xbf16>
    %130 = vector.shape_cast %129 : vector<1x128x128xbf16> to vector<128x128xbf16>
    %cst_133 = arith.constant dense<0.000000e+00> : vector<384x128xf32>
    %131 = tpu.matmul %128, %130, %cst_133 {dimension_numbers = #tpu.dot_dimension_numbers<[1], [0], [0], [1], [0, 0, 1, 1], [], []>} : vector<384x128xbf16>, vector<128x128xbf16>, vector<384x128xf32> -> vector<384x128xf32>
    %132 = arith.addf %127, %131 : vector<384x128xf32>
    %c9 = arith.constant 9 : index
    %c0_134 = arith.constant 0 : index
    %133 = vector.load %arg10[%c9, %c0_134] : memref<448x128xbf16, #tpu.memory_space<vmem>>, vector<384x128xbf16>
    %c2_135 = arith.constant 2 : index
    %c0_136 = arith.constant 0 : index
    %c0_137 = arith.constant 0 : index
    %134 = vector.load %arg7[%c2_135, %c0_136, %c0_137] : memref<9x128x128xbf16, #tpu.memory_space<vmem>>, vector<1x128x128xbf16>
    %135 = vector.shape_cast %134 : vector<1x128x128xbf16> to vector<128x128xbf16>
    %cst_138 = arith.constant dense<0.000000e+00> : vector<384x128xf32>
    %136 = tpu.matmul %133, %135, %cst_138 {dimension_numbers = #tpu.dot_dimension_numbers<[1], [0], [0], [1], [0, 0, 1, 1], [], []>} : vector<384x128xbf16>, vector<128x128xbf16>, vector<384x128xf32> -> vector<384x128xf32>
    %137 = arith.addf %132, %136 : vector<384x128xf32>
    %c31 = arith.constant 31 : index
    %c0_139 = arith.constant 0 : index
    %138 = vector.load %arg10[%c31, %c0_139] : memref<448x128xbf16, #tpu.memory_space<vmem>>, vector<384x128xbf16>
    %c3_140 = arith.constant 3 : index
    %c0_141 = arith.constant 0 : index
    %c0_142 = arith.constant 0 : index
    %139 = vector.load %arg7[%c3_140, %c0_141, %c0_142] : memref<9x128x128xbf16, #tpu.memory_space<vmem>>, vector<1x128x128xbf16>
    %140 = vector.shape_cast %139 : vector<1x128x128xbf16> to vector<128x128xbf16>
    %cst_143 = arith.constant dense<0.000000e+00> : vector<384x128xf32>
    %141 = tpu.matmul %138, %140, %cst_143 {dimension_numbers = #tpu.dot_dimension_numbers<[1], [0], [0], [1], [0, 0, 1, 1], [], []>} : vector<384x128xbf16>, vector<128x128xbf16>, vector<384x128xf32> -> vector<384x128xf32>
    %142 = arith.addf %137, %141 : vector<384x128xf32>
    %c32_144 = arith.constant 32 : index
    %c0_145 = arith.constant 0 : index
    %143 = vector.load %arg10[%c32_144, %c0_145] : memref<448x128xbf16, #tpu.memory_space<vmem>>, vector<384x128xbf16>
    %c4_146 = arith.constant 4 : index
    %c0_147 = arith.constant 0 : index
    %c0_148 = arith.constant 0 : index
    %144 = vector.load %arg7[%c4_146, %c0_147, %c0_148] : memref<9x128x128xbf16, #tpu.memory_space<vmem>>, vector<1x128x128xbf16>
    %145 = vector.shape_cast %144 : vector<1x128x128xbf16> to vector<128x128xbf16>
    %cst_149 = arith.constant dense<0.000000e+00> : vector<384x128xf32>
    %146 = tpu.matmul %143, %145, %cst_149 {dimension_numbers = #tpu.dot_dimension_numbers<[1], [0], [0], [1], [0, 0, 1, 1], [], []>} : vector<384x128xbf16>, vector<128x128xbf16>, vector<384x128xf32> -> vector<384x128xf32>
    %147 = arith.addf %142, %146 : vector<384x128xf32>
    %c33 = arith.constant 33 : index
    %c0_150 = arith.constant 0 : index
    %148 = vector.load %arg10[%c33, %c0_150] : memref<448x128xbf16, #tpu.memory_space<vmem>>, vector<384x128xbf16>
    %c5_151 = arith.constant 5 : index
    %c0_152 = arith.constant 0 : index
    %c0_153 = arith.constant 0 : index
    %149 = vector.load %arg7[%c5_151, %c0_152, %c0_153] : memref<9x128x128xbf16, #tpu.memory_space<vmem>>, vector<1x128x128xbf16>
    %150 = vector.shape_cast %149 : vector<1x128x128xbf16> to vector<128x128xbf16>
    %cst_154 = arith.constant dense<0.000000e+00> : vector<384x128xf32>
    %151 = tpu.matmul %148, %150, %cst_154 {dimension_numbers = #tpu.dot_dimension_numbers<[1], [0], [0], [1], [0, 0, 1, 1], [], []>} : vector<384x128xbf16>, vector<128x128xbf16>, vector<384x128xf32> -> vector<384x128xf32>
    %152 = arith.addf %147, %151 : vector<384x128xf32>
    %c55 = arith.constant 55 : index
    %c0_155 = arith.constant 0 : index
    %153 = vector.load %arg10[%c55, %c0_155] : memref<448x128xbf16, #tpu.memory_space<vmem>>, vector<384x128xbf16>
    %c6_156 = arith.constant 6 : index
    %c0_157 = arith.constant 0 : index
    %c0_158 = arith.constant 0 : index
    %154 = vector.load %arg7[%c6_156, %c0_157, %c0_158] : memref<9x128x128xbf16, #tpu.memory_space<vmem>>, vector<1x128x128xbf16>
    %155 = vector.shape_cast %154 : vector<1x128x128xbf16> to vector<128x128xbf16>
    %cst_159 = arith.constant dense<0.000000e+00> : vector<384x128xf32>
    %156 = tpu.matmul %153, %155, %cst_159 {dimension_numbers = #tpu.dot_dimension_numbers<[1], [0], [0], [1], [0, 0, 1, 1], [], []>} : vector<384x128xbf16>, vector<128x128xbf16>, vector<384x128xf32> -> vector<384x128xf32>
    %157 = arith.addf %152, %156 : vector<384x128xf32>
    %c56 = arith.constant 56 : index
    %c0_160 = arith.constant 0 : index
    %158 = vector.load %arg10[%c56, %c0_160] : memref<448x128xbf16, #tpu.memory_space<vmem>>, vector<384x128xbf16>
    %c7_161 = arith.constant 7 : index
    %c0_162 = arith.constant 0 : index
    %c0_163 = arith.constant 0 : index
    %159 = vector.load %arg7[%c7_161, %c0_162, %c0_163] : memref<9x128x128xbf16, #tpu.memory_space<vmem>>, vector<1x128x128xbf16>
    %160 = vector.shape_cast %159 : vector<1x128x128xbf16> to vector<128x128xbf16>
    %cst_164 = arith.constant dense<0.000000e+00> : vector<384x128xf32>
    %161 = tpu.matmul %158, %160, %cst_164 {dimension_numbers = #tpu.dot_dimension_numbers<[1], [0], [0], [1], [0, 0, 1, 1], [], []>} : vector<384x128xbf16>, vector<128x128xbf16>, vector<384x128xf32> -> vector<384x128xf32>
    %162 = arith.addf %157, %161 : vector<384x128xf32>
    %c57 = arith.constant 57 : index
    %c0_165 = arith.constant 0 : index
    %163 = vector.load %arg10[%c57, %c0_165] : memref<448x128xbf16, #tpu.memory_space<vmem>>, vector<384x128xbf16>
    %c8_166 = arith.constant 8 : index
    %c0_167 = arith.constant 0 : index
    %c0_168 = arith.constant 0 : index
    %164 = vector.load %arg7[%c8_166, %c0_167, %c0_168] : memref<9x128x128xbf16, #tpu.memory_space<vmem>>, vector<1x128x128xbf16>
    %165 = vector.shape_cast %164 : vector<1x128x128xbf16> to vector<128x128xbf16>
    %cst_169 = arith.constant dense<0.000000e+00> : vector<384x128xf32>
    %166 = tpu.matmul %163, %165, %cst_169 {dimension_numbers = #tpu.dot_dimension_numbers<[1], [0], [0], [1], [0, 0, 1, 1], [], []>} : vector<384x128xbf16>, vector<128x128xbf16>, vector<384x128xf32> -> vector<384x128xf32>
    %167 = arith.addf %162, %166 : vector<384x128xf32>
    %c0_170 = arith.constant 0 : index
    %c0_171 = arith.constant 0 : index
    %168 = vector.load %arg8[%c0_170, %c0_171] : memref<1x128xf32, #tpu.memory_space<vmem>>, vector<1x128xf32>
    %169 = vector.broadcast %168 : vector<1x128xf32> to vector<384x128xf32>
    %170 = arith.addf %167, %169 : vector<384x128xf32>
    %cst_172 = arith.constant 0.000000e+00 : f32
    %171 = vector.broadcast %cst_172 : f32 to vector<384x128xf32>
    %172 = arith.maximumf %170, %171 : vector<384x128xf32>
    %c0_173 = arith.constant 0 : index
    %c0_174 = arith.constant 0 : index
    %c0_175 = arith.constant 0 : index
    %173 = vector.load %arg9[%c0_173, %c0_174, %c0_175] : memref<1x384x128xf32, #tpu.memory_space<vmem>>, vector<1x384x128xf32>
    %174 = vector.shape_cast %173 : vector<1x384x128xf32> to vector<384x128xf32>
    %175 = vector.shape_cast %172 : vector<384x128xf32> to vector<1x384x128xf32>
    tpu.vector_store %arg9[%c0_173, %c0_174, %c0_175], %175 {strides = array<i32>} : memref<1x384x128xf32, #tpu.memory_space<vmem>>, vector<1x384x128xf32>,
    return
  }
  func.func @transform_0(%arg0: i32) -> (i32, i32, i32) {
    %c0_i32 = arith.constant 0 : i32
    %c0_i32_0 = arith.constant 0 : i32
    %c0_i32_1 = arith.constant 0 : i32
    return %arg0, %c0_i32, %c0_i32_0 : i32, i32, i32
  }
  func.func @transform_1(%arg0: i32) -> (i32, i32, i32) {
    %c0_i32 = arith.constant 0 : i32
    %c0_i32_0 = arith.constant 0 : i32
    %c0_i32_1 = arith.constant 0 : i32
    return %arg0, %c0_i32, %c0_i32_0 : i32, i32, i32
  }
  func.func @transform_2(%arg0: i32) -> (i32, i32) {
    %c0_i32 = arith.constant 0 : i32
    %c0_i32_0 = arith.constant 0 : i32
    %c0_i32_1 = arith.constant 0 : i32
    return %c0_i32, %c0_i32_0 : i32, i32
  }
  func.func @transform_3(%arg0: i32) -> (i32, i32, i32) {
    %c0_i32 = arith.constant 0 : i32
    %c0_i32_0 = arith.constant 0 : i32
    %c0_i32_1 = arith.constant 0 : i32
    %c0_i32_2 = arith.constant 0 : i32
    return %c0_i32, %c0_i32_0, %c0_i32_1 : i32, i32, i32
  }
  func.func @transform_4(%arg0: i32) -> (i32, i32, i32) {
    %c0_i32 = arith.constant 0 : i32
    %c0_i32_0 = arith.constant 0 : i32
    %c0_i32_1 = arith.constant 0 : i32
    %c0_i32_2 = arith.constant 0 : i32
    return %c0_i32, %c0_i32_0, %c0_i32_1 : i32, i32, i32
  }
  func.func @transform_5(%arg0: i32) -> (i32, i32) {
    %c0_i32 = arith.constant 0 : i32
    %c0_i32_0 = arith.constant 0 : i32
    %c0_i32_1 = arith.constant 0 : i32
    return %c0_i32, %c0_i32_0 : i32, i32
  }
  func.func @transform_6(%arg0: i32) -> (i32, i32, i32) {
    %c0_i32 = arith.constant 0 : i32
    %c0_i32_0 = arith.constant 0 : i32
    %c0_i32_1 = arith.constant 0 : i32
    %c0_i32_2 = arith.constant 0 : i32
    return %c0_i32, %c0_i32_0, %c0_i32_1 : i32, i32, i32
  }
  func.func @transform_7(%arg0: i32) -> (i32, i32) {
    %c0_i32 = arith.constant 0 : i32
    %c0_i32_0 = arith.constant 0 : i32
    %c0_i32_1 = arith.constant 0 : i32
    return %c0_i32, %c0_i32_0 : i32, i32
  }
  func.func @transform_8(%arg0: i32) -> (i32, i32, i32) {
    %c0_i32 = arith.constant 0 : i32
    %c0_i32_0 = arith.constant 0 : i32
    %c0_i32_1 = arith.constant 0 : i32
    return %arg0, %c0_i32, %c0_i32_0 : i32, i32, i32
  }
}

</mosaic_0001>

<bundles_post_ra>
// kernel: tile.8
= control target key start
LH: loop header
LB: loop body
LE: loop exit
PB: predicated region body
PF: predicated region fallthrough
CT: control target
= control target key end

     0   :  { %s22_s0 = inlined_call_operand.vmem [shape: f32[128], index: 0, kind: input, shape index: {}]   ;;  %s23_s1 = inlined_call_operand.vmem [shape: f32[2,128], index: 1, kind: output, shape index: {}]  }
   0x1   :  { %v4_v0 = vld [vmem:[%s22_s0] ss:$0 sm:$0xff] }
   0x2   :  { %5 = vst [vmem:[%s23_s1] sm:$0x3] %v4_v0 }

// kernel: upsample_forward.2
= control target key start
LH: loop header
LB: loop body
LE: loop exit
PB: predicated region body
PF: predicated region fallthrough
CT: control target
= control target key end

     0   :  { %s715_s12 = smov 0   ;;  %s807_s0 = inlined_call_operand.vmem [shape: bf16[2,8,8,8], index: 0, kind: input, shape index: {}]   ;;  %s808_s1 = inlined_call_operand.vmem [shape: bf16[2,8,256], index: 1, kind: input, shape index: {}]   ;;  %s809_s2 = inlined_call_operand.vmem [shape: f32[1,256], index: 2, kind: input, shape index: {}]   ;;  %s810_s3 = inlined_call_operand.vmem [shape: bf16[2,8,2,8,256], index: 3, kind: output, shape index: {}]  }
   0x1 LB: > { %s597_s13 = sadd.s32 4294967295, %s692_s12   ;;  %p601_p0 = scmp.ge.s32.totalorder %s692_s12, 1  ;;  %s692_s12 = sphi %s715_s12, %s13_s12  }
   0x2   : > { %p137_p1 = scmp.lt.s32.totalorder %s692_s12, 3 }
   0x4   : > { %p138_p2 = pnand %p601_p0, %p137_p1 }
   0x5   : > { %v181_v0 = vld [vmem:[%s808_s1] sm:$0xff] (!%p138_p2)  ;;  %vm231_vm0 = vcmask (!%p138_p2), 1043456   ;;  %v617_v1 = vld [vmem:[%s808_s1 + $0x8] sm:$0xff] (!%p138_p2)  ;;  %p161_p3 = scmp.lt.s32.totalorder (!%p138_p2), %s597_s13, 1  ;;  %v694_v6 = vmov (!%p138_p2), 0   ;;  %vm218_vm1 = vcmask (!%p138_p2), 64512   ;;  %v183_v13 = vlaneseq (!%p138_p2) }
   0x6   : > { %141 = sbr.rel (%p138_p2) target bundleno = 261 (0x105), region = 32  ;;  %v611_v2 = vcombine.high (!%p138_p2), %v181_v0, %v181_v0  ;;  %v619_v3 = vcombine.high (!%p138_p2), %v617_v1, %v617_v1  ;;  %v610_v4 = vcombine.low (!%p138_p2), %v181_v0, %v181_v0  ;;  %v618_v5 = vcombine.low (!%p138_p2), %v617_v1, %v617_v1  ;;  %270 = vmatprep.mubr.bf16.mxu0 (!%p138_p2), %v694_v6  ;;  %v180_v16 = vld [vmem:[%s809_s2] sm:$0x3] (!%p138_p2) }
   0x7   : > { %356 = vmatprep.mubr.bf16.mxu1 (!%p138_p2), %v694_v6  ;;  %v184_v14 = vshrl.u32 (!%p138_p2), %v183_v13, 7 }
   0x8   : > { %612 = vmatprep.subr.msk.bf16.mxu0 (!%p138_p2), %vm231_vm0, %v611_v2  ;;  %620 = vmatprep.subr.msk.bf16.mxu1 (!%p138_p2), %vm231_vm0, %v619_v3  ;;  %v233_v7 = vsel (!%p138_p2), %vm231_vm0, %v610_v4, 0  ;;  %v319_v8 = vsel (!%p138_p2), %vm231_vm0, %v618_v5, 0 }
   0x9   : > { %239 = vmatpush1.bf16.msra.mxu0 (!%p138_p2), %v233_v7  ;;  %325 = vmatpush1.bf16.msra.mxu1 (!%p138_p2), %v319_v8  ;;  %v185_v15 = vsub.s32 (!%p138_p2), 0, %v184_v14  ;;  %v189_v17 = vsub.s32 (!%p138_p2), 1, %v184_v14 }
   0xb   : > { %v746_v18 = vrot.slane (!%p138_p2), %v180_v16, %v185_v15  ;;  %v748_v19 = vrot.slane (!%p138_p2), %v180_v16, %v189_v17 }
   0xd   : > { %s812_s13 = smov (!%p161_p3, %s597_s13), 1 }
   0xe   : > { %s651_s18 = sshll.u32 %s812_s13, 5  ;;  %s652_s24 = sshll.u32 %s812_s13, 7 }
   0xf   : > { %s165_s21 = scalar_lea.vmem %s807_s0, %s651_s18  ;;  %s758_s27 = scalar_lea.vmem %s810_s3, %s652_s24 }
  0x10   : > { %v682_v9 = vld [vmem:[%s165_s21] sm:$0xff]   ;;  %v683_v10 = vld [vmem:[%s165_s21 + $0x8] sm:$0xff]   ;;  %v684_v11 = vld [vmem:[%s165_s21 + $0x10] sm:$0xff]  }
  0x11   : > { %613 = vmatmul.mubr.msk.bf16.vlgmr.msra.gmra.mrb[0].mxu0 %vm218_vm1, %v682_v9  ;;  %621 = vmatmul.mubr.msk.bf16.vlgmr.msra.gmra.mrb[0].mxu1 %vm218_vm1, %v682_v9  ;;  %v685_v12 = vld [vmem:[%s165_s21 + $0x18] sm:$0xff]  }
  0x12   : > { %280 = vmatprep.mubr.bf16.mxu0 %v694_v6  ;;  %366 = vmatprep.mubr.bf16.mxu1 %v694_v6 }
  0x19   : > { %614 = vmatmul.mubr.msk.bf16.gmra.mrb[4].mxu0 %vm218_vm1, %v683_v10  ;;  %622 = vmatmul.mubr.msk.bf16.gmra.mrb[4].mxu1 %vm218_vm1, %v683_v10 }
  0x1a   : > { %290 = vmatprep.mubr.bf16.mxu0 %v694_v6  ;;  %376 = vmatprep.mubr.bf16.mxu1 %v694_v6 }
  0x21   : > { %615 = vmatmul.mubr.msk.bf16.gmra.mrb[8].mxu0 %vm218_vm1, %v684_v11  ;;  %623 = vmatmul.mubr.msk.bf16.gmra.mrb[8].mxu1 %vm218_vm1, %v684_v11 }
  0x22   : > { %300 = vmatprep.mubr.bf16.mxu0 %v694_v6  ;;  %386 = vmatprep.mubr.bf16.mxu1 %v694_v6 }
  0x29   : > { %616 = vmatmul.mubr.msk.bf16.gmra.mrb[12].mxu0 %vm218_vm1, %v685_v12  ;;  %624 = vmatmul.mubr.msk.bf16.gmra.mrb[12].mxu1 %vm218_vm1, %v685_v12 }
  0xe4   : > { %v272_v20 = vpop.f32.mrb[0].mxu0  ;;  %v358_v21 = vpop.f32.mrb[0].mxu1 }
  0xe5   : > { %v273_v22 = vadd.f32 %v272_v20, %v746_v18  ;;  %v359_v23 = vadd.f32 %v358_v21, %v746_v18  ;;  %v274_v24 = vpop.f32.mrb[1].mxu0  ;;  %v360_v25 = vpop.f32.mrb[1].mxu1 }
  0xe6   : > { %v275_v26 = vadd.f32 %v274_v24, %v748_v19  ;;  %v361_v27 = vadd.f32 %v360_v25, %v748_v19  ;;  %v276_v28 = vpop.f32.mrb[2].mxu0  ;;  %v362_v29 = vpop.f32.mrb[2].mxu1 }
  0xe7   : > { %v277_v30 = vadd.f32 %v276_v28, %v746_v18  ;;  %v363_v31 = vadd.f32 %v362_v29, %v746_v18  ;;  %v278_v32 = vpop.f32.mrb[3].mxu0  ;;  %v364_v33 = vpop.f32.mrb[3].mxu1 }
  0xe8   : > { %v653_v34 = vpack.c.bf16 %v275_v26, %v273_v22  ;;  %v661_v35 = vpack.c.bf16 %v361_v27, %v359_v23  ;;  %v279_v36 = vadd.f32 %v278_v32, %v748_v19  ;;  %v365_v37 = vadd.f32 %v364_v33, %v748_v19 }
  0xea   : > { %461 = vst [vmem:[%s758_s27] sm:$0xff] %v653_v34  ;;  %641 = vst [vmem:[%s758_s27 + $0x8] sm:$0xff] %v661_v35  ;;  %v654_v38 = vpack.c.bf16 %v279_v36, %v277_v30  ;;  %v662_v39 = vpack.c.bf16 %v365_v37, %v363_v31 }
  0xec   : > { %462 = vst [vmem:[%s758_s27 + $0x10] sm:$0xff] %v654_v38  ;;  %642 = vst [vmem:[%s758_s27 + $0x18] sm:$0xff] %v662_v39  ;;  %v282_v40 = vpop.f32.mrb[4].mxu0  ;;  %v368_v41 = vpop.f32.mrb[4].mxu1 }
  0xed   : > { %v283_v42 = vadd.f32 %v282_v40, %v746_v18  ;;  %v369_v43 = vadd.f32 %v368_v41, %v746_v18  ;;  %v284_v44 = vpop.f32.mrb[5].mxu0  ;;  %v370_v45 = vpop.f32.mrb[5].mxu1 }
  0xee   : > { %v285_v46 = vadd.f32 %v284_v44, %v748_v19  ;;  %v371_v47 = vadd.f32 %v370_v45, %v748_v19  ;;  %v286_v48 = vpop.f32.mrb[6].mxu0  ;;  %v372_v49 = vpop.f32.mrb[6].mxu1 }
  0xef   : > { %v287_v50 = vadd.f32 %v286_v48, %v746_v18  ;;  %v373_v51 = vadd.f32 %v372_v49, %v746_v18  ;;  %v288_v52 = vpop.f32.mrb[7].mxu0  ;;  %v374_v53 = vpop.f32.mrb[7].mxu1 }
  0xf0   : > { %v655_v54 = vpack.c.bf16 %v285_v46, %v283_v42  ;;  %v663_v55 = vpack.c.bf16 %v371_v47, %v369_v43  ;;  %v289_v56 = vadd.f32 %v288_v52, %v748_v19  ;;  %v375_v57 = vadd.f32 %v374_v53, %v748_v19 }
  0xf2   : > { %463 = vst [vmem:[%s758_s27 + $0x20] sm:$0xff] %v655_v54  ;;  %643 = vst [vmem:[%s758_s27 + $0x28] sm:$0xff] %v663_v55  ;;  %v656_v58 = vpack.c.bf16 %v289_v56, %v287_v50  ;;  %v664_v59 = vpack.c.bf16 %v375_v57, %v373_v51 }
  0xf4   : > { %464 = vst [vmem:[%s758_s27 + $0x30] sm:$0xff] %v656_v58  ;;  %644 = vst [vmem:[%s758_s27 + $0x38] sm:$0xff] %v664_v59  ;;  %v292_v60 = vpop.f32.mrb[8].mxu0  ;;  %v378_v61 = vpop.f32.mrb[8].mxu1 }
  0xf5   : > { %v293_v62 = vadd.f32 %v292_v60, %v746_v18  ;;  %v379_v63 = vadd.f32 %v378_v61, %v746_v18  ;;  %v294_v0 = vpop.f32.mrb[9].mxu0  ;;  %v380_v1 = vpop.f32.mrb[9].mxu1 }
  0xf6   : > { %v295_v2 = vadd.f32 %v294_v0, %v748_v19  ;;  %v381_v3 = vadd.f32 %v380_v1, %v748_v19  ;;  %v296_v4 = vpop.f32.mrb[10].mxu0  ;;  %v382_v5 = vpop.f32.mrb[10].mxu1 }
  0xf7   : > { %v297_v6 = vadd.f32 %v296_v4, %v746_v18  ;;  %v383_v7 = vadd.f32 %v382_v5, %v746_v18  ;;  %v298_v8 = vpop.f32.mrb[11].mxu0  ;;  %v384_v9 = vpop.f32.mrb[11].mxu1 }
  0xf8   : > { %v657_v10 = vpack.c.bf16 %v295_v2, %v293_v62  ;;  %v665_v11 = vpack.c.bf16 %v381_v3, %v379_v63  ;;  %v299_v12 = vadd.f32 %v298_v8, %v748_v19  ;;  %v385_v13 = vadd.f32 %v384_v9, %v748_v19 }
  0xfa   : > { %465 = vst [vmem:[%s758_s27 + $0x40] sm:$0xff] %v657_v10  ;;  %645 = vst [vmem:[%s758_s27 + $0x48] sm:$0xff] %v665_v11  ;;  %v658_v14 = vpack.c.bf16 %v299_v12, %v297_v6  ;;  %v666_v15 = vpack.c.bf16 %v385_v13, %v383_v7 }
  0xfc   : > { %466 = vst [vmem:[%s758_s27 + $0x50] sm:$0xff] %v658_v14  ;;  %646 = vst [vmem:[%s758_s27 + $0x58] sm:$0xff] %v666_v15  ;;  %v302_v16 = vpop.f32.mrb[12].mxu0  ;;  %v388_v17 = vpop.f32.mrb[12].mxu1 }
  0xfd   : > { %v303_v20 = vadd.f32 %v302_v16, %v746_v18  ;;  %v389_v21 = vadd.f32 %v388_v17, %v746_v18  ;;  %v304_v22 = vpop.f32.mrb[13].mxu0  ;;  %v390_v23 = vpop.f32.mrb[13].mxu1 }
  0xfe   : > { %v305_v24 = vadd.f32 %v304_v22, %v748_v19  ;;  %v391_v25 = vadd.f32 %v390_v23, %v748_v19  ;;  %v306_v26 = vpop.f32.mrb[14].mxu0  ;;  %v392_v27 = vpop.f32.mrb[14].mxu1 }
  0xff   : > { %v307_v28 = vadd.f32 %v306_v26, %v746_v18  ;;  %v393_v29 = vadd.f32 %v392_v27, %v746_v18  ;;  %v308_v30 = vpop.f32.mrb[15].mxu0  ;;  %v394_v31 = vpop.f32.mrb[15].mxu1 }
 0x100   : > { %v659_v32 = vpack.c.bf16 %v305_v24, %v303_v20  ;;  %v667_v33 = vpack.c.bf16 %v391_v25, %v389_v21  ;;  %v309_v34 = vadd.f32 %v308_v30, %v748_v19  ;;  %v395_v35 = vadd.f32 %v394_v31, %v748_v19 }
 0x102   : > { %467 = vst [vmem:[%s758_s27 + $0x60] sm:$0xff] %v659_v32  ;;  %647 = vst [vmem:[%s758_s27 + $0x68] sm:$0xff] %v667_v33  ;;  %v660_v36 = vpack.c.bf16 %v309_v34, %v307_v28  ;;  %v668_v37 = vpack.c.bf16 %v395_v35, %v393_v29 }
 0x104   : > { %468 = vst [vmem:[%s758_s27 + $0x70] sm:$0xff] %v660_v36  ;;  %648 = vst [vmem:[%s758_s27 + $0x78] sm:$0xff] %v668_v37 }
 0x105 PF: > { %s13_s12 = sadd.s32 1, %s692_s12  }
 0x106   : > { %p10_p4 = scmp.ge.s32.totalorder %s13_s12, 4  }
 0x108   :  { %12 = sbr.rel (!%p10_p4) target bundleno = 1 (0x1), region = 64 }

// kernel: upsample_forward.3
= control target key start
LH: loop header
LB: loop body
LE: loop exit
PB: predicated region body
PF: predicated region fallthrough
CT: control target
= control target key end

     0   :  { %s20566_s27 = smov 0   ;;  %s24336_s0 = inlined_call_operand.vmem [shape: bf16[2,456,128], index: 0, kind: input, shape index: {}]   ;;  %s24337_s1 = inlined_call_operand.vmem [shape: bf16[2,456,128], index: 1, kind: input, shape index: {}]   ;;  %s24338_s2 = inlined_call_operand.vmem [shape: f32[384,1], index: 2, kind: input, shape index: {}]   ;;  %s24339_s3 = inlined_call_operand.vmem [shape: bf16[9,128,128], index: 3, kind: input, shape index: {}]   ;;  %s24340_s4 = inlined_call_operand.vmem [shape: bf16[9,128,128], index: 4, kind: input, shape index: {}]   ;;  %s24341_s5 = inlined_call_operand.vmem [shape: f32[1,128], index: 5, kind: input, shape index: {}]   ;;  %s24342_s6 = inlined_call_operand.vmem [shape: bf16[9,128,128], index: 6, kind: input, shape index: {}]   ;;  %s24343_s7 = inlined_call_operand.vmem [shape: f32[1,128], index: 7, kind: input, shape index: {}]   ;;  %s24344_s8 = inlined_call_operand.vmem [shape: f32[2,384,128], index: 8, kind: output, shape index: {}]  }
   0x1 LB: > { %s15273_s28 = sadd.s32 4294967295, %s20518_s27   ;;  %p15277_p0 = scmp.ge.s32.totalorder %s20518_s27, 1  ;;  %s20518_s27 = sphi %s20566_s27, %s18_s27  }
   0x2   : > { %p272_p1 = scmp.lt.s32.totalorder %s20518_s27, 3 }
   0x4   : > { %p273_p2 = pnand %p15277_p0, %p272_p1 }
   0x6   : > { %276 = sbr.rel (%p273_p2) target bundleno = 2558 (0x9fe), region = 52 }
   0xd   : > { %v19982_v0 = vld [vmem:[%s24339_s3 + $0x100] sm:$0xff]   ;;  %p311_p3 = scmp.lt.s32.totalorder %s15273_s28, 1  ;;  %v19983_v1 = vld [vmem:[%s24339_s3 + $0x108] sm:$0xff]   ;;  %v19984_v2 = vld [vmem:[%s24339_s3 + $0x110] sm:$0xff]   ;;  %vm532_vm0 = vsmask.f32 7424 }
   0xe   : > { %17281 = vmatprep.subr.bf16.mxu0 %v19982_v0  ;;  %v19985_v3 = vld [vmem:[%s24339_s3 + $0x118] sm:$0xff]   ;;  %v19986_v11 = vld [vmem:[%s24339_s3 + $0x120] sm:$0xff]   ;;  %v19987_v15 = vld [vmem:[%s24339_s3 + $0x128] sm:$0xff]   ;;  %vm1344_vm1 = vcmask 1046528   ;;  %vm10688_vm2 = vcmask 1043456  }
   0xf   : > { %s24641_s28 = smov (!%p311_p3, %s15273_s28), 1  ;;  %17282 = vmatpush3.bf16.msra.mxu0 %v19982_v0  ;;  %v19988_v18 = vld [vmem:[%s24339_s3 + $0x130] sm:$0xff]   ;;  %v19989_v21 = vld [vmem:[%s24339_s3 + $0x138] sm:$0xff]   ;;  %v19993_v28 = vld [vmem:[%s24339_s3 + $0x140] sm:$0xff]   ;;  %vm11035_vm3 = vsmask.f32 4352 }
  0x10   : > { %17283 = vmatprep.subr.bf16.mxu0 %v19983_v1  ;;  %s19969_s13 = smul.u32 228, %s24641_s28  ;;  %v19994_v35 = vld [vmem:[%s24339_s3 + $0x148] sm:$0xff]   ;;  %v19997_v42 = vld [vmem:[%s24339_s3 + $0x150] sm:$0xff]   ;;  %v20000_v49 = vld [vmem:[%s24339_s3 + $0x158] sm:$0xff]   ;;  %vm11575_vm4 = vsmask.f32 3328 }
  0x11   : > { %v20003_v56 = vld [vmem:[%s24339_s3 + $0x160] sm:$0xff]   ;;  %v20004_v63 = vld [vmem:[%s24339_s3 + $0x168] sm:$0xff]   ;;  %vm12072_vm5 = vsmask.f32 256  ;;  %s19970_s12 = smul.u32 384, %s24641_s28 }
  0x12   : > { %s20591_s16 = scalar_lea.vmem %s24336_s0, %s19969_s13  ;;  %s20767_s29 = scalar_lea.vmem %s24337_s1, %s19969_s13 }
  0x13   : > { %17284 = vmatpush3.bf16.msra.mxu0 %v19983_v1  ;;  %v2269_v4 = vld [vmem:[%s20591_s16 + $0xc] sm:$0xf]  ;;  %v20598_v5 = vld [vmem:[%s20591_s16 + $0x10] sm:$0xf]  ;;  %v20602_v7 = vld [vmem:[%s20591_s16 + $0x14] sm:$0xff]   ;;  %s24236_s18 = scalar_lea.vmem %s24344_s8, %s19970_s12 }
  0x14   : > { %17285 = vmatprep.subr.bf16.mxu0 %v19984_v2  ;;  %v15427_v6 = vcombine.low %v2269_v4, %v20598_v5  ;;  %v2466_v10 = vshll.u32 %v20602_v7, 16  ;;  %v20613_v17 = vld [vmem:[%s20591_s16 + $0x1c] sm:$0xff]   ;;  %v20619_v19 = vld [vmem:[%s20591_s16 + $0x24] sm:$0xff]   ;;  %v2470_v22 = vshrl.u32 %v20602_v7, 16  ;;  %v20629_v26 = vld [vmem:[%s20591_s16 + $0x2c] sm:$0xff]  }
  0x15   : > { %v2474_v20 = vshll.u32 %v20613_v17, 16  ;;  %v2478_v23 = vshrl.u32 %v20613_v17, 16  ;;  %v2482_v24 = vshll.u32 %v20619_v19, 16  ;;  %v20635_v31 = vld [vmem:[%s20591_s16 + $0x34] sm:$0xff]   ;;  %v2490_v32 = vshll.u32 %v20629_v26, 16  ;;  %v20647_v40 = vld [vmem:[%s20591_s16 + $0x3c] sm:$0xff]  }
  0x16   : > { %v2459_v8 = vshrl.u32 %v15427_v6, 16  ;;  %v2461_v9 = vshll.u32 %v15427_v6, 16  ;;  %v2468_v13 = vrot.slane %v2466_v10, 1  ;;  %v2486_v34 = vshrl.u32 %v20619_v19, 16  ;;  %v20653_v45 = vld [vmem:[%s20591_s16 + $0x44] sm:$0xff]   ;;  %v20665_v54 = vld [vmem:[%s20591_s16 + $0x4c] sm:$0xff]  }
  0x17   : > { %17286 = vmatpush3.bf16.msra.mxu0 %v19984_v2  ;;  %v2476_v25 = vrot.slane %v2474_v20, 1  ;;  %v2484_v30 = vrot.slane %v2482_v24, 1  ;;  %v2494_v37 = vshrl.u32 %v20629_v26, 16  ;;  %v2498_v38 = vshll.u32 %v20635_v31, 16  ;;  %v20671_v59 = vld [vmem:[%s20591_s16 + $0x54] sm:$0xff]   ;;  %v20683_v4 = vld [vmem:[%s20591_s16 + $0x5c] sm:$0xff]  }
  0x18   : > { %17287 = vmatprep.subr.bf16.mxu0 %v19985_v3  ;;  %v2463_v12 = vrot.slane %v2461_v9, 1  ;;  %v2472_v27 = vor.u32 %v2470_v22, %v2468_v13  ;;  %v2492_v39 = vrot.slane %v2490_v32, 1  ;;  %v2506_v46 = vshll.u32 %v20647_v40, 16  ;;  %v2999_v24 = vld [vmem:[%s20591_s16 + $0xc] sm:$0xe] }
  0x19   : > { %v2480_v29 = vor.u32 %v2478_v23, %v2476_v25  ;;  %v2488_v41 = vor.u32 %v2486_v34, %v2484_v30  ;;  %v2500_v44 = vrot.slane %v2498_v38, 1  ;;  %v2502_v48 = vshrl.u32 %v20635_v31, 16 }
  0x1a   : > { %v2464_v14 = vor.u32 %v2463_v12, %v2459_v8  ;;  %v2477_v33 = vsel %vm532_vm0, %v2472_v27, %v2476_v25  ;;  %v2496_v43 = vor.u32 %v2494_v37, %v2492_v39  ;;  %v2510_v51 = vshrl.u32 %v20647_v40, 16  ;;  %v20686_v8 = vld [vmem:[%s20591_s16 + $0x64] sm:$0xff]  }
  0x1b   : > { %17288 = vmatpush3.bf16.msra.mxu0 %v19985_v3  ;;  %v2485_v36 = vsel %vm532_vm0, %v2480_v29, %v2484_v30  ;;  %v2493_v47 = vsel %vm532_vm0, %v2488_v41, %v2492_v39  ;;  %v2514_v52 = vshll.u32 %v20653_v45, 16  ;;  %v2508_v53 = vrot.slane %v2506_v46, 1 }
  0x1c   : > { %17289 = vmatprep.subr.bf16.mxu0 %v19986_v11  ;;  %v2469_v16 = vsel %vm532_vm0, %v2464_v14, %v2468_v13  ;;  %v2501_v50 = vsel %vm532_vm0, %v2496_v43, %v2500_v44  ;;  %v2504_v55 = vor.u32 %v2502_v48, %v2500_v44  ;;  %v2522_v60 = vshll.u32 %v20665_v54, 16 }
  0x1d   : > { %17297 = vmatprep.mubr.bf16.mxu0 %v2469_v16  ;;  %v2512_v57 = vor.u32 %v2510_v51, %v2508_v53  ;;  %v2516_v58 = vrot.slane %v2514_v52, 1  ;;  %v2518_v62 = vshrl.u32 %v20653_v45, 16  ;;  %v2526_v1 = vshrl.u32 %v20665_v54, 16  ;;  %v20021_v51 = vld [vmem:[%s24339_s3 + $0x1a8] sm:$0xff]  }
  0x1e   : > { %v2509_v61 = vsel %vm532_vm0, %v2504_v55, %v2508_v53  ;;  %v2530_v2 = vshll.u32 %v20671_v59, 16  ;;  %v2524_v3 = vrot.slane %v2522_v60, 1  ;;  %v2534_v12 = vshrl.u32 %v20671_v59, 16  ;;  %v20026_v55 = vld [vmem:[%s24339_s3 + $0x1b0] sm:$0xff]   ;;  %v20760_v60 = vld [vmem:[%s24339_s3 + $0x1c0] sm:$0xff]  }
  0x1f   : > { %17290 = vmatpush3.bf16.msra.mxu0 %v19986_v11  ;;  %v2517_v0 = vsel %vm532_vm0, %v2512_v57, %v2516_v58  ;;  %v2520_v6 = vor.u32 %v2518_v62, %v2516_v58  ;;  %v20007_v11 = vld [vmem:[%s24339_s3 + $0x170] sm:$0xff]   ;;  %v2538_v13 = vshll.u32 %v20683_v4, 16  ;;  %v2542_v14 = vshrl.u32 %v20683_v4, 16 }
  0x20   : > { %17291 = vmatprep.subr.bf16.mxu0 %v19987_v15  ;;  %v2528_v9 = vor.u32 %v2526_v1, %v2524_v3  ;;  %v2532_v10 = vrot.slane %v2530_v2, 1  ;;  %v2546_v16 = vshll.u32 %v20686_v8, 16  ;;  %v2550_v29 = vshrl.u32 %v20686_v8, 16  ;;  %v20017_v2 = vld [vmem:[%s20591_s16 + $0x7c] sm:$0xff]  }
  0x21   : > { %v2540_v22 = vrot.slane %v2538_v13, 1  ;;  %v3027_v46 = vrot.slane %v20629_v26, 1  ;;  %v3031_v26 = vrot.slane %v20647_v40, 1  ;;  %v3035_v40 = vrot.slane %v20665_v54, 1 }
  0x22   : > { %v2533_v20 = vsel %vm532_vm0, %v2528_v9, %v2532_v10  ;;  %v2536_v23 = vor.u32 %v2534_v12, %v2532_v10  ;;  %v2548_v27 = vrot.slane %v2546_v16, 1  ;;  %v3039_v58 = vrot.slane %v20683_v4, 1  ;;  %v20020_v10 = vld [vmem:[%s20591_s16 + $0x8c] sm:$0xff]  }
  0x23   : > { %17292 = vmatpush3.bf16.msra.mxu0 %v19987_v15  ;;  %v2525_v15 = vsel %vm532_vm0, %v2520_v6, %v2524_v3  ;;  %v2544_v25 = vor.u32 %v2542_v14, %v2540_v22  ;;  %v20019_v3 = vld [vmem:[%s20591_s16 + $0x84] sm:$0xff]   ;;  %v3051_v14 = vrot.slane %v20020_v10, 1 }
  0x24   : > { %17293 = vmatprep.subr.bf16.mxu0 %v19988_v18  ;;  %v2541_v32 = vsel %vm532_vm0, %v2536_v23, %v2540_v22  ;;  %v3049_v9 = vrot.slane %v20019_v3, 1 }
  0x25   : > { %v2549_v34 = vsel %vm532_vm0, %v2544_v25, %v2548_v27 }
  0x26   : > { %v3052_v16 = vsel %vm1344_vm1, %v3049_v9, %v3051_v14 }
  0x27   : > { %17294 = vmatpush3.bf16.msra.mxu0 %v19988_v18  ;;  %v20010_v18 = vld [vmem:[%s24339_s3 + $0x178] sm:$0xff]  }
  0x28   : > { %17295 = vmatprep.subr.bf16.mxu0 %v19989_v21 }
  0x2b   : > { %17296 = vmatpush3.bf16.msra.mxu0 %v19989_v21  ;;  %v20701_v21 = vld [vmem:[%s20591_s16 + $0x6c] sm:$0xff]  }
  0x2c   : > { %17345 = vmatprep.subr.bf16.mxu0 %v19993_v28  ;;  %v2554_v30 = vshll.u32 %v20701_v21, 16 }
  0x2e   : > { %17298 = vmatmul.mubr.bf16.vlgmr.msra.gmra.mrb[0].mxu0 %v2477_v33  ;;  %v15476_v33 = vcombine.low %v2999_v24, %v20598_v5  ;;  %v20713_v37 = vrot.slane %v2554_v30, 1  ;;  %v3023_v5 = vrot.slane %v20613_v17, 1  ;;  %v20014_v17 = vld [vmem:[%s24339_s3 + $0x190] sm:$0xff]  }
  0x2f   : > { %17346 = vmatpush3.bf16.msra.mxu0 %v19993_v28  ;;  %17301 = vmatprep.mubr.bf16.mxu0 %v2485_v36  ;;  %v20012_v28 = vld [vmem:[%s24339_s3 + $0x180] sm:$0xff]   ;;  %v2552_v36 = vor.u32 %v2550_v29, %v2548_v27  ;;  %v20025_v24 = vld [vmem:[%s20591_s16 + $0xac] sm:$0xff]   ;;  %v20027_v27 = vld [vmem:[%s20591_s16 + $0xb4] sm:$0xff]  }
  0x30   : > { %17347 = vmatprep.subr.bf16.mxu0 %v19994_v35  ;;  %24446 = vst [vmem:[#allocation3_spill] sm:$0xff] %v20713_v37  ;;  %v3020_v38 = vrot.slane %v15476_v33, 1  ;;  %v3059_v29 = vrot.slane %v20025_v24, 1  ;;  %v3061_v30 = vrot.slane %v20027_v27, 1 }
  0x31   : > { %v2557_v39 = vsel %vm532_vm0, %v2552_v36, %v20713_v37 }
  0x33   : > { %17348 = vmatpush3.bf16.msra.mxu0 %v19994_v35  ;;  %v3021_v35 = vrot.slane %v20602_v7, 1  ;;  %v20013_v7 = vld [vmem:[%s24339_s3 + $0x188] sm:$0xff]  }
  0x34   : > { %17349 = vmatprep.subr.bf16.mxu0 %v19997_v42 }
  0x35   : > { %v3022_v41 = vsel %vm1344_vm1, %v3020_v38, %v3021_v35  ;;  %v3024_v43 = vsel %vm1344_vm1, %v3021_v35, %v3023_v5  ;;  %v3062_v35 = vsel %vm1344_vm1, %v3059_v29, %v3061_v30 }
  0x36   : > { %17302 = vmatmul.mubr.bf16.gmra.mrb[4].mxu0 %v2493_v47  ;;  %v3029_v47 = vrot.slane %v20635_v31, 1  ;;  %v3033_v31 = vrot.slane %v20653_v45, 1  ;;  %v3037_v45 = vrot.slane %v20671_v59, 1  ;;  %v3041_v59 = vrot.slane %v20686_v8, 1 }
  0x37   : > { %17350 = vmatpush3.bf16.msra.mxu0 %v19997_v42  ;;  %17305 = vmatprep.mubr.bf16.mxu0 %v2501_v50  ;;  %v3025_v42 = vrot.slane %v20619_v19, 1  ;;  %v20015_v19 = vld [vmem:[%s24339_s3 + $0x198] sm:$0xff]   ;;  %v20018_v50 = vld [vmem:[%s24339_s3 + $0x1a0] sm:$0xff]   ;;  %v3047_v8 = vrot.slane %v20017_v2, 1 }
  0x38   : > { %17351 = vmatprep.subr.bf16.mxu0 %v20000_v49  ;;  %v3032_v52 = vsel %vm1344_vm1, %v3029_v47, %v3031_v26  ;;  %v3034_v53 = vsel %vm1344_vm1, %v3031_v26, %v3033_v31  ;;  %v3036_v57 = vsel %vm1344_vm1, %v3033_v31, %v3035_v40  ;;  %v3038_v54 = vsel %vm1344_vm1, %v3035_v40, %v3037_v45  ;;  %v20050_v26 = vld [vmem:[%s24339_s3 + $0x1e0] sm:$0xff]   ;;  %v20043_v40 = vld [vmem:[%s20591_s16 + $0x58] sm:$0xff]  }
  0x39   : > { %v3026_v44 = vsel %vm1344_vm1, %v3023_v5, %v3025_v42  ;;  %v3028_v48 = vsel %vm1344_vm1, %v3025_v42, %v3027_v46  ;;  %v3040_v62 = vsel %vm1344_vm1, %v3037_v45, %v3039_v58  ;;  %v3050_v13 = vsel %vm1344_vm1, %v3047_v8, %v3049_v9  ;;  %v20039_v31 = vld [vmem:[%s20591_s16 + $0x40] sm:$0xff]   ;;  %v20061_v45 = vld [vmem:[%s24339_s3 + $0x1f8] sm:$0xff]  }
  0x3b   : > { %17352 = vmatpush3.bf16.msra.mxu0 %v20000_v49  ;;  %v3030_v49 = vsel %vm1344_vm1, %v3027_v46, %v3029_v47  ;;  %v20035_v46 = vld [vmem:[%s20591_s16 + $0x28] sm:$0xff]  }
  0x3c   : > { %17353 = vmatprep.subr.bf16.mxu0 %v20003_v56  ;;  %v20037_v47 = vld [vmem:[%s24339_s3 + $0x1c8] sm:$0xff]  }
  0x3e   : > { %17306 = vmatmul.mubr.bf16.gmra.mrb[8].mxu0 %v2509_v61  ;;  %v20016_v61 = vld [vmem:[%s20591_s16 + $0x74] sm:$0xff]  }
  0x3f   : > { %17309 = vmatprep.mubr.bf16.mxu0 %v2517_v0  ;;  %17354 = vmatpush3.bf16.msra.mxu0 %v20003_v56  ;;  %v20029_v56 = vld [vmem:[%s24339_s3 + $0x1b8] sm:$0xff]   ;;  %v3043_v0 = vrot.slane %v20701_v21, 1  ;;  %v3045_v1 = vrot.slane %v20016_v61, 1 }
  0x40   : > { %17355 = vmatprep.subr.bf16.mxu0 %v20004_v63 }
  0x41   : > { %v3044_v4 = vsel %vm1344_vm1, %v3041_v59, %v3043_v0  ;;  %v3046_v6 = vsel %vm1344_vm1, %v3043_v0, %v3045_v1  ;;  %v3048_v12 = vsel %vm1344_vm1, %v3045_v1, %v3047_v8  ;;  %v20049_v0 = vld [vmem:[%s20591_s16 + $0x80] sm:$0xff]   ;;  %v20051_v1 = vld [vmem:[%s20591_s16 + $0x88] sm:$0xff]   ;;  %v20858_v8 = vld [vmem:[%s20591_s16 + $0x38] sm:$0xff]  }
  0x42   : > { %v4169_v27 = vshrl.u32 %v20858_v8, 16 }
  0x43   : > { %17356 = vmatpush3.bf16.msra.mxu0 %v20004_v63  ;;  %v3042_v63 = vsel %vm1344_vm1, %v3039_v58, %v3041_v59  ;;  %v3944_v58 = vld [vmem:[%s20591_s16 + $0x18] sm:$0xf]  ;;  %v3945_v59 = vld [vmem:[%s20591_s16 + $0x1c] sm:$0xf] }
  0x44   : > { %17357 = vmatprep.subr.bf16.mxu0 %v20007_v11  ;;  %v20841_v61 = vcombine.low %v3944_v58, %v3945_v59 }
  0x46   : > { %17310 = vmatmul.mubr.bf16.gmra.mrb[12].mxu0 %v2525_v15  ;;  %v4136_v2 = vshll.u32 %v20841_v61, 16  ;;  %v4134_v9 = vshrl.u32 %v20841_v61, 16  ;;  %v20070_v61 = vld [vmem:[%s24339_s3 + $0x208] sm:$0xff]  }
  0x47   : > { %17313 = vmatprep.mubr.bf16.mxu0 %v2533_v20  ;;  %17358 = vmatpush3.bf16.msra.mxu0 %v20007_v11  ;;  %v20022_v11 = vld [vmem:[%s20591_s16 + $0x94] sm:$0xff]   ;;  %v20024_v20 = vld [vmem:[%s20591_s16 + $0xa4] sm:$0xff]  }
  0x48   : > { %17359 = vmatprep.subr.bf16.mxu0 %v20010_v18  ;;  %v3053_v15 = vrot.slane %v20022_v11, 1  ;;  %v3057_v23 = vrot.slane %v20024_v20, 1  ;;  %v4138_v11 = vrot.slane %v4136_v2, 1  ;;  %v20867_v20 = vld [vmem:[%s20591_s16 + $0x40] sm:$0xff]  }
  0x4a   : > { %v3054_v21 = vsel %vm1344_vm1, %v3051_v14, %v3053_v15  ;;  %v3060_v33 = vsel %vm1344_vm1, %v3057_v23, %v3059_v29  ;;  %v4177_v29 = vshrl.u32 %v20867_v20, 16 }
  0x4b   : > { %17360 = vmatpush3.bf16.msra.mxu0 %v20010_v18  ;;  %v20023_v18 = vld [vmem:[%s20591_s16 + $0x9c] sm:$0xff]  }
  0x4c   : > { %17409 = vmatprep.subr.bf16.mxu0 %v20012_v28  ;;  %v3055_v22 = vrot.slane %v20023_v18, 1  ;;  %v4165_v18 = vshll.u32 %v20858_v8, 16 }
  0x4e   : > { %17314 = vmatmul.mubr.bf16.gmra.mrb[16].mxu0 %v2541_v32  ;;  %v3056_v25 = vsel %vm1344_vm1, %v3053_v15, %v3055_v22  ;;  %v20028_v32 = vld [vmem:[%s20591_s16 + $0xbc] sm:$0xff]   ;;  %v20052_v15 = vld [vmem:[%s20591_s16 + $0x90] sm:$0xff]  }
  0x4f   : > { %17317 = vmatprep.mubr.bf16.mxu0 %v2549_v34  ;;  %v20030_v34 = vld [vmem:[%s20591_s16 + $0xc4] sm:$0xff]   ;;  %v3063_v36 = vrot.slane %v20028_v32, 1 }
  0x50   : > { %v3065_v38 = vrot.slane %v20030_v34, 1  ;;  %v20056_v32 = vld [vmem:[%s20591_s16 + $0xa8] sm:$0xff]   ;;  %v20883_v34 = vld [vmem:[%s20591_s16 + $0x50] sm:$0xff]  }
  0x52   : > { %v3066_v5 = vsel %vm1344_vm1, %v3063_v36, %v3065_v38 }
  0x56   : > { %17318 = vmatmul.mubr.bf16.gmra.mrb[20].mxu0 %v2557_v39  ;;  %v20031_v39 = vld [vmem:[%s20591_s16 + $0xcc] ss:$0 sps:$4 sm:$0x11]  }
  0x57   : > { %17361 = vmatprep.mubr.bf16.mxu0 %v3022_v41  ;;  %v3064_v41 = vsel %vm1344_vm1, %v3061_v30, %v3063_v36  ;;  %v3067_v42 = vrot.slane %v20031_v39, 1  ;;  %v20055_v30 = vld [vmem:[%s20591_s16 + $0xa0] sm:$0xff]   ;;  %v4189_v39 = vshll.u32 %v20883_v34, 16 }
  0x5e   : > { %17362 = vmatmul.mubr.bf16.vlgmr.msra.gmra.mrb[0].mxu0 %v3024_v43  ;;  %v20032_v43 = vld [vmem:[%s20591_s16 + $0x18] sm:$0xff]  }
  0x5f   : > { %17410 = vmatpush3.bf16.msra.mxu0 %v20012_v28  ;;  %17365 = vmatprep.mubr.bf16.mxu0 %v3026_v44  ;;  %v3058_v28 = vsel %vm1344_vm1, %v3055_v22, %v3057_v23  ;;  %v20033_v44 = vld [vmem:[%s20591_s16 + $0x20] sm:$0xff]   ;;  %v20871_v22 = vld [vmem:[%s20591_s16 + $0x48] sm:$0xff]  }
  0x60   : > { %17411 = vmatprep.subr.bf16.mxu0 %v20013_v7 }
  0x63   : > { %17412 = vmatpush3.bf16.msra.mxu0 %v20013_v7  ;;  %v3068_v7 = vsel %vm1344_vm1, %v3065_v38, %v3067_v42  ;;  %v20059_v42 = vld [vmem:[%s20591_s16 + $0xb8] sm:$0xff]  }
  0x64   : > { %17413 = vmatprep.subr.bf16.mxu0 %v20014_v17 }
  0x66   : > { %17366 = vmatmul.mubr.bf16.gmra.mrb[4].mxu0 %v3028_v48  ;;  %v20038_v48 = vld [vmem:[%s20591_s16 + $0x38] sm:$0xff]  }
  0x67   : > { %17369 = vmatprep.mubr.bf16.mxu0 %v3030_v49  ;;  %17414 = vmatpush3.bf16.msra.mxu0 %v20014_v17  ;;  %v20042_v17 = vld [vmem:[%s24339_s3 + $0x1d0] sm:$0xff]   ;;  %v20045_v49 = vld [vmem:[%s24339_s3 + $0x1d8] sm:$0xff]  }
  0x68   : > { %17415 = vmatprep.subr.bf16.mxu0 %v20015_v19 }
  0x6b   : > { %17416 = vmatpush3.bf16.msra.mxu0 %v20015_v19  ;;  %v20036_v19 = vld [vmem:[%s20591_s16 + $0x30] sm:$0xff]  }
  0x6c   : > { %17417 = vmatprep.subr.bf16.mxu0 %v20018_v50 }
  0x6e   : > { %17370 = vmatmul.mubr.bf16.gmra.mrb[8].mxu0 %v3032_v52  ;;  %v20058_v52 = vld [vmem:[%s24339_s3 + $0x1f0] sm:$0xff]  }
  0x6f   : > { %17373 = vmatprep.mubr.bf16.mxu0 %v3034_v53  ;;  %17418 = vmatpush3.bf16.msra.mxu0 %v20018_v50  ;;  %v20040_v50 = vld [vmem:[%s20591_s16 + $0x48] sm:$0xff]   ;;  %v20041_v53 = vld [vmem:[%s20591_s16 + $0x50] sm:$0xff]  }
  0x70   : > { %17419 = vmatprep.subr.bf16.mxu0 %v20021_v51 }
  0x73   : > { %17420 = vmatpush3.bf16.msra.mxu0 %v20021_v51  ;;  %v20053_v51 = vld [vmem:[%s24339_s3 + $0x1e8] sm:$0xff]  }
  0x74   : > { %17421 = vmatprep.subr.bf16.mxu0 %v20026_v55 }
  0x76   : > { %17374 = vmatmul.mubr.bf16.gmra.mrb[12].mxu0 %v3036_v57  ;;  %v20046_v57 = vld [vmem:[%s20591_s16 + $0x68] sm:$0xff]  }
  0x77   : > { %17377 = vmatprep.mubr.bf16.mxu0 %v3038_v54  ;;  %17422 = vmatpush3.bf16.msra.mxu0 %v20026_v55  ;;  %v20832_v55 = vld [vmem:[%s24339_s3 + $0x200] sm:$0xff]   ;;  %v20047_v54 = vld [vmem:[%s20591_s16 + $0x70] sm:$0xff]  }
  0x78   : > { %17423 = vmatprep.subr.bf16.mxu0 %v20029_v56 }
  0x7b   : > { %17424 = vmatpush3.bf16.msra.mxu0 %v20029_v56  ;;  %v20044_v56 = vld [vmem:[%s20591_s16 + $0x60] sm:$0xff]  }
  0x7c   : > { %17473 = vmatprep.subr.bf16.mxu0 %v20760_v60 }
  0x7e   : > { %17378 = vmatmul.mubr.bf16.gmra.mrb[16].mxu0 %v3040_v62  ;;  %v20844_v62 = vld [vmem:[%s20591_s16 + $0x20] sm:$0xff]  }
  0x7f   : > { %17381 = vmatprep.mubr.bf16.mxu0 %v3042_v63  ;;  %v20847_v63 = vld [vmem:[%s20591_s16 + $0x28] sm:$0xff]   ;;  %v4141_v3 = vshll.u32 %v20844_v62, 16  ;;  %v4145_v10 = vshrl.u32 %v20844_v62, 16 }
  0x86   : > { %17382 = vmatmul.mubr.bf16.gmra.mrb[20].mxu0 %v3044_v4  ;;  %v4149_v4 = vshll.u32 %v20847_v63, 16 }
  0x87   : > { %17385 = vmatprep.mubr.bf16.mxu0 %v3046_v6  ;;  %v20855_v6 = vld [vmem:[%s20591_s16 + $0x30] sm:$0xff]  }
  0x88   : > { %v4157_v14 = vshll.u32 %v20855_v6, 16  ;;  %v4161_v24 = vshrl.u32 %v20855_v6, 16 }
  0x8a   : > { %v4159_v23 = vrot.slane %v4157_v14, 1 }
  0x8e   : > { %17386 = vmatmul.mubr.bf16.gmra.mrb[24].mxu0 %v3048_v12  ;;  %v4143_v12 = vrot.slane %v4141_v3, 1  ;;  %v4163_v3 = vor.u32 %v4161_v24, %v4159_v23 }
  0x8f   : > { %17389 = vmatprep.mubr.bf16.mxu0 %v3050_v13  ;;  %v4151_v13 = vrot.slane %v4149_v4, 1 }
  0x96   : > { %17390 = vmatmul.mubr.bf16.gmra.mrb[28].mxu0 %v3052_v16  ;;  %v20054_v16 = vld [vmem:[%s20591_s16 + $0x98] sm:$0xff]  }
  0x97   : > { %17393 = vmatprep.mubr.bf16.mxu0 %v3054_v21  ;;  %v4153_v21 = vshrl.u32 %v20847_v63, 16 }
  0x9e   : > { %17394 = vmatmul.mubr.bf16.gmra.mrb[32].mxu0 %v3056_v25  ;;  %v20874_v25 = vrot.slane %v4165_v18, 1  ;;  %v20083_v18 = vld [vmem:[%s24339_s3 + $0x220] sm:$0xff]  }
  0x9f   : > { %17397 = vmatprep.mubr.bf16.mxu0 %v3058_v28  ;;  %v4173_v28 = vshll.u32 %v20867_v20, 16 }
  0xa0   : > { %v4171_v8 = vor.u32 %v4169_v27, %v20874_v25 }
  0xa1   : > { %v4175_v36 = vrot.slane %v4173_v28, 1 }
  0xa6   : > { %17398 = vmatmul.mubr.bf16.gmra.mrb[36].mxu0 %v3060_v33  ;;  %v4181_v33 = vshll.u32 %v20871_v22, 16 }
  0xa7   : > { %17401 = vmatprep.mubr.bf16.mxu0 %v3062_v35  ;;  %v20886_v35 = vld [vmem:[%s20591_s16 + $0x58] sm:$0xff]  }
  0xa8   : > { %v20888_v38 = vrot.slane %v4181_v33, 1  ;;  %v20980_v33 = vld [vmem:[%s20591_s16 + $0x98] sm:$0xff]  }
  0xae   : > { %17402 = vmatmul.mubr.bf16.gmra.mrb[40].mxu0 %v3064_v41  ;;  %v4197_v41 = vshll.u32 %v20886_v35, 16 }
  0xaf   : > { %17405 = vmatprep.mubr.bf16.mxu0 %v3066_v5  ;;  %v20057_v5 = vld [vmem:[%s20591_s16 + $0xb0] sm:$0xff]  }
  0xb6   : > { %17406 = vmatmul.mubr.bf16.gmra.mrb[44].mxu0 %v3068_v7  ;;  %v4185_v7 = vshrl.u32 %v20871_v22, 16  ;;  %v20086_v22 = vld [vmem:[%s24339_s3 + $0x228] sm:$0xff]  }
  0xb7   : > { %17425 = vmatprep.mubr.bf16.mxu0 %v20032_v43  ;;  %v4193_v43 = vshrl.u32 %v20883_v34, 16 }
  0xbe   : > { %17426 = vmatmul.mubr.bf16.vlgmr.msra.gmra.mrb[0].mxu0 %v20033_v44  ;;  %v20896_v44 = vrot.slane %v4189_v39, 1 }
  0xbf   : > { %17474 = vmatpush3.bf16.msra.mxu0 %v20760_v60  ;;  %17429 = vmatprep.mubr.bf16.mxu0 %v20035_v46  ;;  %v20048_v60 = vld [vmem:[%s20591_s16 + $0x78] sm:$0xff]   ;;  %v20898_v46 = vrot.slane %v4197_v41, 1 }
  0xc0   : > { %17475 = vmatprep.subr.bf16.mxu0 %v20037_v47  ;;  %v4195_v27 = vor.u32 %v4193_v43, %v20896_v44  ;;  %v21002_v43 = vld [vmem:[%s20591_s16 + $0xa0] sm:$0xff]  }
  0xc2   : > { %v4200_v34 = vsel %vm532_vm0, %v4195_v27, %v20898_v46 }
  0xc3   : > { %17476 = vmatpush3.bf16.msra.mxu0 %v20037_v47  ;;  %v20060_v47 = vld [vmem:[%s20591_s16 + $0xc0] sm:$0xff]  }
  0xc4   : > { %17477 = vmatprep.subr.bf16.mxu0 %v20042_v17 }
  0xc6   : > { %17430 = vmatmul.mubr.bf16.gmra.mrb[4].mxu0 %v20036_v19  ;;  %v20062_v19 = vld [vmem:[%s20591_s16 + $0xc8] sm:$0xff]  }
  0xc7   : > { %17433 = vmatprep.mubr.bf16.mxu0 %v20038_v48  ;;  %17478 = vmatpush3.bf16.msra.mxu0 %v20042_v17  ;;  %v20902_v17 = vld [vmem:[%s20591_s16 + $0x60] sm:$0xff]   ;;  %v20906_v48 = vld [vmem:[%s20591_s16 + $0x68] sm:$0xff]  }
  0xc8   : > { %17479 = vmatprep.subr.bf16.mxu0 %v20045_v49 }
  0xcb   : > { %17480 = vmatpush3.bf16.msra.mxu0 %v20045_v49  ;;  %v4201_v49 = vshrl.u32 %v20886_v35, 16  ;;  %v20094_v35 = vld [vmem:[%s24339_s3 + $0x238] sm:$0xff]  }
  0xcc   : > { %17481 = vmatprep.subr.bf16.mxu0 %v20050_v26 }
  0xce   : > { %17434 = vmatmul.mubr.bf16.gmra.mrb[8].mxu0 %v20039_v31  ;;  %v4209_v31 = vshrl.u32 %v20902_v17, 16 }
  0xcf   : > { %17437 = vmatprep.mubr.bf16.mxu0 %v20040_v50  ;;  %17482 = vmatpush3.bf16.msra.mxu0 %v20050_v26  ;;  %v4205_v26 = vshll.u32 %v20902_v17, 16  ;;  %v4213_v50 = vshll.u32 %v20906_v48, 16 }
  0xd0   : > { %17483 = vmatprep.subr.bf16.mxu0 %v20053_v51 }
  0xd3   : > { %17484 = vmatpush3.bf16.msra.mxu0 %v20053_v51  ;;  %v20063_v51 = vld [vmem:[%s20591_s16 + $0xd0] sm:$0xff]  }
  0xd4   : > { %17485 = vmatprep.subr.bf16.mxu0 %v20058_v52 }
  0xd6   : > { %17438 = vmatmul.mubr.bf16.gmra.mrb[12].mxu0 %v20041_v53  ;;  %v20914_v53 = vld [vmem:[%s20591_s16 + $0x70] sm:$0xff]  }
  0xd7   : > { %17441 = vmatprep.mubr.bf16.mxu0 %v20043_v40  ;;  %17486 = vmatpush3.bf16.msra.mxu0 %v20058_v52  ;;  %v4139_v52 = vor.u32 %v4138_v11, %v4134_v9  ;;  %v20917_v40 = vld [vmem:[%s20591_s16 + $0x78] sm:$0xff]   ;;  %v4221_v58 = vshll.u32 %v20914_v53, 16  ;;  %v4225_v2 = vshrl.u32 %v20914_v53, 16  ;;  %v20941_v9 = vld [vmem:[%s20591_s16 + $0x80] sm:$0xff]  }
  0xd8   : > { %17487 = vmatprep.subr.bf16.mxu0 %v20061_v45  ;;  %v4229_v59 = vshll.u32 %v20917_v40, 16  ;;  %v20078_v11 = vld [vmem:[%s24339_s3 + $0x218] sm:$0xff]   ;;  %v4237_v14 = vshll.u32 %v20941_v9, 16 }
  0xd9   : > { %v4223_v4 = vrot.slane %v4221_v58, 1 }
  0xda   : > { %v20937_v6 = vrot.slane %v4229_v59, 1  ;;  %v4239_v24 = vrot.slane %v4237_v14, 1  ;;  %v21042_v14 = vld [vmem:[%s20591_s16 + $0xc8] sm:$0xff]  }
  0xdb   : > { %17488 = vmatpush3.bf16.msra.mxu0 %v20061_v45  ;;  %v4144_v45 = vsel %vm532_vm0, %v4139_v52, %v4143_v12  ;;  %v4265_v52 = vshrl.u32 %v20980_v33, 16 }
  0xdc   : > { %17537 = vmatprep.subr.bf16.mxu0 %v20832_v55 }
  0xde   : > { %17442 = vmatmul.mubr.bf16.gmra.mrb[16].mxu0 %v20044_v56  ;;  %v20920_v56 = vrot.slane %v4205_v26, 1 }
  0xdf   : > { %17445 = vmatprep.mubr.bf16.mxu0 %v20046_v57  ;;  %v20922_v57 = vrot.slane %v4213_v50, 1 }
  0xe0   : > { %v4211_v41 = vor.u32 %v4209_v31, %v20920_v56  ;;  %v21014_v31 = vld [vmem:[%s20591_s16 + $0xa8] sm:$0xff]  }
  0xe6   : > { %17446 = vmatmul.mubr.bf16.gmra.mrb[20].mxu0 %v20047_v54  ;;  %v4147_v54 = vor.u32 %v4145_v10, %v4143_v12  ;;  %v20944_v10 = vld [vmem:[%s20591_s16 + $0x88] sm:$0xff]   ;;  %v4168_v12 = vsel %vm532_vm0, %v4163_v3, %v20874_v25  ;;  %v4241_v25 = vshrl.u32 %v20941_v9, 16  ;;  %v21034_v3 = vld [vmem:[%s20591_s16 + $0xc0] sm:$0xff]  }
  0xe7   : > { %17449 = vmatprep.mubr.bf16.mxu0 %v20048_v60  ;;  %v4155_v60 = vor.u32 %v4153_v21, %v4151_v13  ;;  %v4187_v21 = vor.u32 %v4185_v7, %v20888_v38 }
  0xe8   : > { %v4152_v62 = vsel %vm532_vm0, %v4147_v54, %v4151_v13  ;;  %v4233_v13 = vshrl.u32 %v20917_v40, 16  ;;  %v4273_v40 = vshrl.u32 %v21002_v43, 16  ;;  %v4243_v53 = vor.u32 %v4241_v25, %v4239_v24  ;;  %v21023_v54 = vld [vmem:[%s20591_s16 + $0xb0] sm:$0xff]  }
  0xe9   : > { %v4160_v63 = vsel %vm532_vm0, %v4155_v60, %v4159_v23  ;;  %v4192_v23 = vsel %vm532_vm0, %v4187_v21, %v20896_v44  ;;  %v4216_v44 = vsel %vm532_vm0, %v4211_v41, %v20922_v57  ;;  %v4313_v25 = vshrl.u32 %v21042_v14, 16 }
  0xea   : > { %v4235_v26 = vor.u32 %v4233_v13, %v20937_v6 }
  0xee   : > { %17450 = vmatmul.mubr.bf16.gmra.mrb[24].mxu0 %v20049_v0  ;;  %v20075_v0 = vld [vmem:[%s24339_s3 + $0x210] sm:$0xff]  }
  0xef   : > { %17453 = vmatprep.mubr.bf16.mxu0 %v20051_v1  ;;  %v4217_v1 = vshrl.u32 %v20906_v48, 16 }
  0xf1   : > { %v4219_v7 = vor.u32 %v4217_v1, %v20922_v57 }
  0xf6   : > { %17454 = vmatmul.mubr.bf16.gmra.mrb[28].mxu0 %v20052_v15  ;;  %v4179_v15 = vor.u32 %v4177_v29, %v4175_v36  ;;  %v20091_v29 = vld [vmem:[%s24339_s3 + $0x230] sm:$0xff]  }
  0xf7   : > { %17457 = vmatprep.mubr.bf16.mxu0 %v20054_v16  ;;  %v4245_v16 = vshll.u32 %v20944_v10, 16 }
  0xf8   : > { %v4184_v20 = vsel %vm532_vm0, %v4179_v15, %v20888_v38  ;;  %v4249_v38 = vshrl.u32 %v20944_v10, 16  ;;  %v21045_v15 = vld [vmem:[%s20591_s16 + $0xd0] sm:$0xff]  }
  0xf9   : > { %v4247_v28 = vrot.slane %v4245_v16, 1  ;;  %v4317_v27 = vshll.u32 %v21045_v15, 16 }
  0xfb   : > { %v4251_v57 = vor.u32 %v4249_v38, %v4247_v28  ;;  %v4248_v58 = vsel %vm532_vm0, %v4243_v53, %v4247_v28  ;;  %v4321_v38 = vshrl.u32 %v21045_v15, 16 }
  0xfe   : > { %17458 = vmatmul.mubr.bf16.gmra.mrb[32].mxu0 %v20055_v30  ;;  %v4203_v30 = vor.u32 %v4201_v49, %v20898_v46  ;;  %v4224_v46 = vsel %vm532_vm0, %v4219_v7, %v4223_v4  ;;  %v4269_v49 = vshll.u32 %v21002_v43, 16 }
  0xff   : > { %17461 = vmatprep.mubr.bf16.mxu0 %v20056_v32  ;;  %v20977_v32 = vld [vmem:[%s20591_s16 + $0x90] sm:$0xff]  }
 0x100   : > { %v4253_v39 = vshll.u32 %v20977_v32, 16  ;;  %v4257_v17 = vshrl.u32 %v20977_v32, 16 }
 0x106   : > { %17462 = vmatmul.mubr.bf16.gmra.mrb[36].mxu0 %v20057_v5  ;;  %v4261_v5 = vshll.u32 %v20980_v33, 16 }
 0x107   : > { %17465 = vmatprep.mubr.bf16.mxu0 %v20059_v42  ;;  %v20998_v42 = vld [vmem:[%s24340_s4] sm:$0xff]  }
 0x108   : > { %v4263_v48 = vrot.slane %v4261_v5, 1  ;;  %v4674_v5 = vld [vmem:[%s20591_s16 + $0x18] sm:$0xe] }
 0x10a   : > { %v4267_v1 = vor.u32 %v4265_v52, %v4263_v48 }
 0x10e   : > { %17466 = vmatmul.mubr.bf16.gmra.mrb[40].mxu0 %v20060_v47  ;;  %v4255_v47 = vrot.slane %v4253_v39, 1 }
 0x10f   : > { %17469 = vmatprep.mubr.bf16.mxu0 %v20062_v19  ;;  %v4227_v19 = vor.u32 %v4225_v2, %v4223_v4  ;;  %v21031_v2 = vld [vmem:[%s20591_s16 + $0xb8] sm:$0xff]  }
 0x110   : > { %v4256_v59 = vsel %vm532_vm0, %v4251_v57, %v4255_v47  ;;  %v4293_v10 = vshll.u32 %v21031_v2, 16  ;;  %v20099_v57 = vld [vmem:[%s24340_s4 + $0x8] sm:$0xff]  }
 0x111   : > { %v4232_v50 = vsel %vm532_vm0, %v4227_v19, %v20937_v6 }
 0x116   : > { %17470 = vmatmul.mubr.bf16.gmra.mrb[44].mxu0 %v20063_v51  ;;  %v4240_v51 = vsel %vm532_vm0, %v4235_v26, %v4239_v24  ;;  %v4309_v24 = vshll.u32 %v21042_v14, 16  ;;  %v20475_v26 = vld [vmem:[%s20591_s16 + $0x20] sm:$0xff]  }
 0x117   : > { %17489 = vmatprep.mubr.bf16.mxu0 %v4144_v45  ;;  %v4271_v45 = vrot.slane %v4269_v49, 1 }
 0x119   : > { %v4272_v6 = vsel %vm532_vm0, %v4267_v1, %v4271_v45  ;;  %v20101_v1 = vld [vmem:[%s24340_s4 + $0x18] sm:$0xff]  }
 0x11e   : > { %17490 = vmatmul.mubr.bf16.vlgmr.msra.gmra.mrb[0].mxu0 %v4152_v62  ;;  %v4259_v62 = vor.u32 %v4257_v17, %v4255_v47 }
 0x11f   : > { %17538 = vmatpush3.bf16.msra.mxu0 %v20832_v55  ;;  %17493 = vmatprep.mubr.bf16.mxu0 %v4160_v63  ;;  %v4176_v55 = vsel %vm532_vm0, %v4171_v8, %v4175_v36  ;;  %v4208_v36 = vsel %vm532_vm0, %v4203_v30, %v20920_v56  ;;  %v4277_v56 = vshll.u32 %v21014_v31, 16  ;;  %v4285_v63 = vshll.u32 %v21023_v54, 16 }
 0x120   : > { %17539 = vmatprep.subr.bf16.mxu0 %v20070_v61  ;;  %v4264_v4 = vsel %vm532_vm0, %v4259_v62, %v4263_v48  ;;  %v20479_v62 = vld [vmem:[%s20591_s16 + $0x40] sm:$0xff]  }
 0x121   : > { %v4279_v60 = vrot.slane %v4277_v56, 1  ;;  %v4287_v8 = vrot.slane %v4285_v63, 1  ;;  %v4704_v63 = vrot.slane %v20479_v62, 1 }
 0x123   : > { %17540 = vmatpush3.bf16.msra.mxu0 %v20070_v61  ;;  %v4281_v61 = vshrl.u32 %v21014_v31, 16 }
 0x124   : > { %17541 = vmatprep.subr.bf16.mxu0 %v20075_v0 }
 0x125   : > { %v4283_v13 = vor.u32 %v4281_v61, %v4279_v60 }
 0x126   : > { %17494 = vmatmul.mubr.bf16.gmra.mrb[4].mxu0 %v4168_v12  ;;  %v4297_v12 = vshrl.u32 %v21031_v2, 16 }
 0x127   : > { %17497 = vmatprep.mubr.bf16.mxu0 %v4176_v55  ;;  %17542 = vmatpush3.bf16.msra.mxu0 %v20075_v0  ;;  %v4289_v0 = vshrl.u32 %v21023_v54, 16  ;;  %v4301_v55 = vshll.u32 %v21034_v3, 16 }
 0x128   : > { %17543 = vmatprep.subr.bf16.mxu0 %v20078_v11 }
 0x129   : > { %v4291_v21 = vor.u32 %v4289_v0, %v4287_v8  ;;  %v20100_v0 = vld [vmem:[%s24340_s4 + $0x10] sm:$0xff]  }
 0x12b   : > { %17544 = vmatpush3.bf16.msra.mxu0 %v20078_v11  ;;  %v4275_v11 = vor.u32 %v4273_v40, %v4271_v45  ;;  %v20476_v40 = vld [vmem:[%s20591_s16 + $0x28] sm:$0xff]   ;;  %v20477_v45 = vld [vmem:[%s20591_s16 + $0x30] sm:$0xff]  }
 0x12c   : > { %17545 = vmatprep.subr.bf16.mxu0 %v20083_v18  ;;  %v4698_v53 = vrot.slane %v20476_v40, 1  ;;  %v4700_v56 = vrot.slane %v20477_v45, 1  ;;  %v20140_v40 = vld [vmem:[%s24339_s3 + $0x68] sm:$0xff]   ;;  %v4728_v45 = vrot.slane %v21002_v43, 1  ;;  %v21161_v43 = vld [vmem:[%s20591_s16 + $0x10] sm:$0xff]  }
 0x12d   : > { %v4280_v16 = vsel %vm532_vm0, %v4275_v11, %v4279_v60  ;;  %v20478_v60 = vld [vmem:[%s20591_s16 + $0x38] sm:$0xff]  }
 0x12e   : > { %17498 = vmatmul.mubr.bf16.gmra.mrb[8].mxu0 %v4184_v20  ;;  %v4305_v20 = vshrl.u32 %v21034_v3, 16  ;;  %v4702_v61 = vrot.slane %v20478_v60, 1 }
 0x12f   : > { %17501 = vmatprep.mubr.bf16.mxu0 %v4192_v23  ;;  %17546 = vmatpush3.bf16.msra.mxu0 %v20083_v18  ;;  %v4288_v18 = vsel %vm532_vm0, %v4283_v13, %v4287_v8  ;;  %v4303_v23 = vrot.slane %v4301_v55, 1  ;;  %v20103_v55 = vld [vmem:[%s24340_s4 + $0x28] sm:$0xff]  }
 0x130   : > { %17547 = vmatprep.subr.bf16.mxu0 %v20086_v22 }
 0x131   : > { %v4307_v41 = vor.u32 %v4305_v20, %v4303_v23 }
 0x133   : > { %17548 = vmatpush3.bf16.msra.mxu0 %v20086_v22  ;;  %v4295_v22 = vrot.slane %v4293_v10, 1  ;;  %v20481_v10 = vld [vmem:[%s20591_s16 + $0x50] sm:$0xff]  }
 0x134   : > { %17549 = vmatprep.subr.bf16.mxu0 %v20091_v29  ;;  %v4708_v11 = vrot.slane %v20481_v10, 1 }
 0x135   : > { %v4299_v28 = vor.u32 %v4297_v12, %v4295_v22  ;;  %v4296_v30 = vsel %vm532_vm0, %v4291_v21, %v4295_v22  ;;  %v20102_v12 = vld [vmem:[%s24340_s4 + $0x20] sm:$0xff]  }
 0x136   : > { %17502 = vmatmul.mubr.bf16.gmra.mrb[12].mxu0 %v4200_v34  ;;  %v4311_v34 = vrot.slane %v4309_v24, 1  ;;  %v20483_v22 = vld [vmem:[%s20591_s16 + $0x60] sm:$0xff]  }
 0x137   : > { %17505 = vmatprep.mubr.bf16.mxu0 %v4208_v36  ;;  %17550 = vmatpush3.bf16.msra.mxu0 %v20091_v29  ;;  %v21054_v29 = vld [vmem:[%s20591_s16 + $0xd8] ss:$0 sps:$4 sm:$0x11]   ;;  %v4319_v36 = vrot.slane %v4317_v27, 1  ;;  %v4712_v20 = vrot.slane %v20483_v22, 1 }
 0x138   : > { %17551 = vmatprep.subr.bf16.mxu0 %v20094_v35  ;;  %v4325_v39 = vshll.u32 %v21054_v29, 16  ;;  %v4315_v7 = vor.u32 %v4313_v25, %v4311_v34  ;;  %v20105_v27 = vld [vmem:[%s24340_s4 + $0x38] sm:$0xff]  }
 0x139   : > { %v4323_v48 = vor.u32 %v4321_v38, %v4319_v36  ;;  %v21113_v38 = vld [vmem:[%s24340_s4 + $0x40] sm:$0xff]  }
 0x13a   : > { %v4320_v17 = vsel %vm532_vm0, %v4315_v7, %v4319_v36  ;;  %v4327_v19 = vrot.slane %v4325_v39, 1  ;;  %v20132_v7 = vld [vmem:[%s24339_s3 + $0x50] sm:$0xff]  }
 0x13b   : > { %17552 = vmatpush3.bf16.msra.mxu0 %v20094_v35  ;;  %v4304_v35 = vsel %vm532_vm0, %v4299_v28, %v4303_v23  ;;  %v20104_v23 = vld [vmem:[%s24340_s4 + $0x30] sm:$0xff]   ;;  %v20128_v28 = vld [vmem:[%s24339_s3 + $0x40] sm:$0xff]  }
 0x13c   : > { %17601 = vmatprep.subr.bf16.mxu0 %v20998_v42  ;;  %17025 = vmatprep.subr.bf16.mxu1 %v20128_v28 }
 0x13d   : > { %17026 = vmatpush3.bf16.msra.mxu1 %v20128_v28 }
 0x13e   : > { %17506 = vmatmul.mubr.bf16.gmra.mrb[16].mxu0 %v4216_v44  ;;  %v4312_v44 = vsel %vm532_vm0, %v4307_v41, %v4311_v34  ;;  %v20485_v34 = vld [vmem:[%s20591_s16 + $0x70] sm:$0xff]  }
 0x13f   : > { %17509 = vmatprep.mubr.bf16.mxu0 %v4224_v46  ;;  %v20474_v46 = vld [vmem:[%s20591_s16 + $0x1c] sm:$0xf]  ;;  %v4716_v36 = vrot.slane %v20485_v34, 1 }
 0x140   : > { %v15598_v47 = vcombine.low %v4674_v5, %v20474_v46  ;;  %v20131_v5 = vld [vmem:[%s24339_s3 + $0x48] sm:$0xff]  }
 0x141   : > { %17027 = vmatprep.subr.bf16.mxu1 %v20131_v5 }
 0x142   : > { %v4695_v49 = vrot.slane %v15598_v47, 1  ;;  %v4720_v47 = vrot.slane %v20941_v9, 1  ;;  %17028 = vmatpush3.bf16.msra.mxu1 %v20131_v5  ;;  %v4724_v9 = vrot.slane %v20977_v32, 1  ;;  %v4726_v32 = vrot.slane %v20980_v33, 1 }
 0x143   : > { %17029 = vmatprep.subr.bf16.mxu1 %v20132_v7 }
 0x144   : > { %v4727_v60 = vsel %vm1344_vm1, %v4724_v9, %v4726_v32  ;;  %v4729_v62 = vsel %vm1344_vm1, %v4726_v32, %v4728_v45  ;;  %v21212_v32 = vld [vmem:[%s20591_s16 + $0x40] sm:$0xff]  }
 0x146   : > { %17510 = vmatmul.mubr.bf16.gmra.mrb[20].mxu0 %v4232_v50  ;;  %v4696_v50 = vrot.slane %v20475_v26, 1  ;;  %17030 = vmatpush3.bf16.msra.mxu1 %v20132_v7  ;;  %v20487_v26 = vld [vmem:[%s20591_s16 + $0x88] sm:$0xff]  }
 0x147   : > { %17513 = vmatprep.mubr.bf16.mxu0 %v4240_v51  ;;  %v4328_v51 = vsel %vm532_vm0, %v4323_v48, %v4327_v19  ;;  %v20136_v48 = vld [vmem:[%s24339_s3 + $0x58] sm:$0xff]  }
 0x148   : > { %v4697_v52 = vsel %vm1344_vm1, %v4695_v49, %v4696_v50  ;;  %v20137_v49 = vld [vmem:[%s24339_s3 + $0x60] sm:$0xff]   ;;  %17031 = vmatprep.subr.bf16.mxu1 %v20136_v48 }
 0x14a   : > { %17032 = vmatpush3.bf16.msra.mxu1 %v20136_v48 }
 0x14b   : > { %17033 = vmatprep.subr.bf16.mxu1 %v20137_v49 }
 0x14e   : > { %17514 = vmatmul.mubr.bf16.gmra.mrb[24].mxu0 %v4248_v58  ;;  %v4699_v58 = vsel %vm1344_vm1, %v4696_v50, %v4698_v53  ;;  %v4722_v50 = vrot.slane %v20487_v26, 1  ;;  %17034 = vmatpush3.bf16.msra.mxu1 %v20137_v49  ;;  %v4740_v49 = vrot.slane %v21045_v15, 1 }
 0x14f   : > { %17517 = vmatprep.mubr.bf16.mxu0 %v4256_v59  ;;  %v4701_v59 = vsel %vm1344_vm1, %v4698_v53, %v4700_v56  ;;  %v20142_v53 = vld [vmem:[%s24339_s3 + $0x70] sm:$0xff]   ;;  %17035 = vmatprep.subr.bf16.mxu1 %v20140_v40 }
 0x152   : > { %17036 = vmatpush3.bf16.msra.mxu1 %v20140_v40 }
 0x153   : > { %17037 = vmatprep.subr.bf16.mxu1 %v20142_v53 }
 0x156   : > { %17518 = vmatmul.mubr.bf16.gmra.mrb[28].mxu0 %v4264_v4  ;;  %v4703_v4 = vsel %vm1344_vm1, %v4700_v56, %v4702_v61  ;;  %v327_v56 = vld [vmem:[%s20591_s16] sm:$0xf]  ;;  %17038 = vmatpush3.bf16.msra.mxu1 %v20142_v53 }
 0x157   : > { %17521 = vmatprep.mubr.bf16.mxu0 %v4272_v6  ;;  %v4705_v6 = vsel %vm1344_vm1, %v4702_v61, %v4704_v63 }
 0x15e   : > { %17522 = vmatmul.mubr.bf16.gmra.mrb[32].mxu0 %v4280_v16 }
 0x15f   : > { %17525 = vmatprep.mubr.bf16.mxu0 %v4288_v18  ;;  %v20482_v18 = vld [vmem:[%s20591_s16 + $0x58] sm:$0xff]  }
 0x160   : > { %v4710_v21 = vrot.slane %v20482_v18, 1  ;;  %v21174_v18 = vld [vmem:[%s20591_s16 + $0x18] sm:$0xff]  }
 0x162   : > { %v4711_v24 = vsel %vm1344_vm1, %v4708_v11, %v4710_v21  ;;  %v4713_v25 = vsel %vm1344_vm1, %v4710_v21, %v4712_v20 }
 0x166   : > { %17526 = vmatmul.mubr.bf16.gmra.mrb[36].mxu0 %v4296_v30  ;;  %v20484_v30 = vld [vmem:[%s20591_s16 + $0x68] sm:$0xff]  }
 0x167   : > { %17529 = vmatprep.mubr.bf16.mxu0 %v4304_v35  ;;  %v4714_v35 = vrot.slane %v20484_v30, 1  ;;  %v4736_v30 = vrot.slane %v21034_v3, 1 }
 0x169   : > { %v4715_v39 = vsel %vm1344_vm1, %v4712_v20, %v4714_v35  ;;  %v4717_v41 = vsel %vm1344_vm1, %v4714_v35, %v4716_v36  ;;  %v21180_v20 = vld [vmem:[%s20591_s16 + $0x20] sm:$0xff]  }
 0x16a   : > { %v569_v3 = vshrl.u32 %v21180_v20, 16 }
 0x16e   : > { %17530 = vmatmul.mubr.bf16.gmra.mrb[40].mxu0 %v4312_v44  ;;  %v20486_v44 = vld [vmem:[%s20591_s16 + $0x78] sm:$0xff]  }
 0x16f   : > { %17533 = vmatprep.mubr.bf16.mxu0 %v4320_v17  ;;  %v4718_v46 = vrot.slane %v20486_v44, 1 }
 0x171   : > { %v4719_v17 = vsel %vm1344_vm1, %v4716_v36, %v4718_v46  ;;  %v4721_v19 = vsel %vm1344_vm1, %v4718_v46, %v4720_v47 }
 0x176   : > { %17534 = vmatmul.mubr.bf16.gmra.mrb[44].mxu0 %v4328_v51  ;;  %v4723_v51 = vsel %vm1344_vm1, %v4720_v47, %v4722_v50 }
 0x177   : > { %17553 = vmatprep.mubr.bf16.mxu0 %v4697_v52  ;;  %v4725_v52 = vsel %vm1344_vm1, %v4722_v50, %v4724_v9 }
 0x17e   : > { %17554 = vmatmul.mubr.bf16.vlgmr.msra.gmra.mrb[0].mxu0 %v4699_v58 }
 0x17f   : > { %17602 = vmatpush3.bf16.msra.mxu0 %v20998_v42  ;;  %17557 = vmatprep.mubr.bf16.mxu0 %v4701_v59  ;;  %v20480_v42 = vld [vmem:[%s20591_s16 + $0x48] sm:$0xff]  }
 0x180   : > { %17603 = vmatprep.subr.bf16.mxu0 %v20099_v57  ;;  %v4706_v8 = vrot.slane %v20480_v42, 1  ;;  %v21154_v59 = vld [vmem:[%s20591_s16 + $0x8] sm:$0xff]   ;;  %v549_v42 = vshll.u32 %v21161_v43, 16 }
 0x181   : > { %v541_v33 = vshll.u32 %v21154_v59, 16 }
 0x182   : > { %v4707_v13 = vsel %vm1344_vm1, %v4704_v63, %v4706_v8  ;;  %v4709_v16 = vsel %vm1344_vm1, %v4706_v8, %v4708_v11  ;;  %v20145_v63 = vld [vmem:[%s24339_s3 + $0x78] sm:$0xff]   ;;  %v4730_v8 = vrot.slane %v21014_v31, 1  ;;  %v4732_v11 = vrot.slane %v21023_v54, 1 }
 0x183   : > { %17604 = vmatpush3.bf16.msra.mxu0 %v20099_v57  ;;  %v21148_v57 = vld [vmem:[%s20591_s16 + $0x4] sm:$0xf]  ;;  %17039 = vmatprep.subr.bf16.mxu1 %v20145_v63  ;;  %v557_v31 = vshll.u32 %v21174_v18, 16  ;;  %v553_v54 = vshrl.u32 %v21161_v43, 16 }
 0x184   : > { %17605 = vmatprep.subr.bf16.mxu0 %v20100_v0  ;;  %v21151_v58 = vcombine.low %v327_v56, %v21148_v57  ;;  %17040 = vmatpush3.bf16.msra.mxu1 %v20145_v63  ;;  %v4731_v21 = vsel %vm1344_vm1, %v4728_v45, %v4730_v8  ;;  %v4733_v22 = vsel %vm1344_vm1, %v4730_v8, %v4732_v11 }
 0x186   : > { %17558 = vmatmul.mubr.bf16.gmra.mrb[4].mxu0 %v4703_v4  ;;  %v536_v61 = vshll.u32 %v21151_v58, 16  ;;  %v543_v4 = vrot.slane %v541_v33, 1 }
 0x187   : > { %17561 = vmatprep.mubr.bf16.mxu0 %v4705_v6  ;;  %17606 = vmatpush3.bf16.msra.mxu0 %v20100_v0  ;;  %v534_v0 = vshrl.u32 %v21151_v58, 16  ;;  %v545_v6 = vshrl.u32 %v21154_v59, 16 }
 0x188   : > { %17607 = vmatprep.subr.bf16.mxu0 %v20101_v1 }
 0x18b   : > { %17608 = vmatpush3.bf16.msra.mxu0 %v20101_v1  ;;  %v538_v1 = vrot.slane %v536_v61, 1  ;;  %v4742_v61 = vrot.slane %v21054_v29, 1  ;;  %v21227_v29 = vld [vmem:[%s20591_s16 + $0x50] sm:$0xff]  }
 0x18c   : > { %17609 = vmatprep.subr.bf16.mxu0 %v20102_v12 }
 0x18d   : > { %v539_v10 = vor.u32 %v538_v1, %v534_v0 }
 0x18e   : > { %17562 = vmatmul.mubr.bf16.gmra.mrb[8].mxu0 %v4707_v13 }
 0x18f   : > { %17565 = vmatprep.mubr.bf16.mxu0 %v4709_v16  ;;  %17610 = vmatpush3.bf16.msra.mxu0 %v20102_v12  ;;  %v547_v12 = vor.u32 %v545_v6, %v543_v4  ;;  %v544_v13 = vsel %vm532_vm0, %v539_v10, %v543_v4  ;;  %v21221_v4 = vld [vmem:[%s20591_s16 + $0x48] sm:$0xff]   ;;  %v4743_v6 = vsel %vm1344_vm1, %v4740_v49, %v4742_v61  ;;  %v601_v10 = vshrl.u32 %v21212_v32, 16  ;;  %v21277_v61 = vld [vmem:[%s20591_s16 + $0x78] sm:$0xff]  }
 0x190   : > { %17611 = vmatprep.subr.bf16.mxu0 %v20103_v55  ;;  %17041 = vmatprep.mubr.bf16.mxu1 %v544_v13  ;;  %v605_v8 = vshll.u32 %v21221_v4, 16 }
 0x193   : > { %17612 = vmatpush3.bf16.msra.mxu0 %v20103_v55  ;;  %v551_v55 = vrot.slane %v549_v42, 1  ;;  %v20106_v42 = vld [vmem:[%s20767_s29] sm:$0xff]  }
 0x194   : > { %17613 = vmatprep.subr.bf16.mxu0 %v20104_v23 }
 0x195   : > { %v552_v16 = vsel %vm532_vm0, %v547_v12, %v551_v55  ;;  %v555_v28 = vor.u32 %v553_v54, %v551_v55  ;;  %v609_v12 = vshrl.u32 %v21221_v4, 16  ;;  %v613_v55 = vshll.u32 %v21227_v29, 16 }
 0x196   : > { %17566 = vmatmul.mubr.bf16.gmra.mrb[12].mxu0 %v4711_v24  ;;  %17042 = vmatmul.mubr.bf16.vlgmr.msra.gmra.mrb[0].mxu1 %v552_v16  ;;  %v561_v24 = vshrl.u32 %v21174_v18, 16 }
 0x197   : > { %17569 = vmatprep.mubr.bf16.mxu0 %v4713_v25  ;;  %17614 = vmatpush3.bf16.msra.mxu0 %v20104_v23  ;;  %v559_v23 = vrot.slane %v557_v31, 1  ;;  %v565_v25 = vshll.u32 %v21180_v20, 16  ;;  %v20107_v31 = vld [vmem:[%s20767_s29 + $0x8] sm:$0xff]  }
 0x198   : > { %17615 = vmatprep.subr.bf16.mxu0 %v20105_v27 }
 0x199   : > { %v563_v35 = vor.u32 %v561_v24, %v559_v23  ;;  %v567_v34 = vrot.slane %v565_v25, 1  ;;  %v560_v36 = vsel %vm532_vm0, %v555_v28, %v559_v23  ;;  %v21236_v23 = vld [vmem:[%s20591_s16 + $0x58] sm:$0xff]   ;;  %v20109_v24 = vld [vmem:[%s20767_s29 + $0x10] sm:$0xff]   ;;  %v20111_v25 = vld [vmem:[%s24340_s4 + $0x48] sm:$0xff]  }
 0x19a   : > { %17045 = vmatprep.mubr.bf16.mxu1 %v560_v36  ;;  %v21244_v28 = vld [vmem:[%s20591_s16 + $0x60] sm:$0xff]  }
 0x19b   : > { %17616 = vmatpush3.bf16.msra.mxu0 %v20105_v27  ;;  %v4734_v27 = vrot.slane %v21031_v2, 1  ;;  %v21196_v2 = vld [vmem:[%s20591_s16 + $0x30] sm:$0xff]   ;;  %v571_v48 = vor.u32 %v569_v3, %v567_v34  ;;  %v629_v36 = vshll.u32 %v21244_v28, 16 }
 0x19c   : > { %17665 = vmatprep.subr.bf16.mxu0 %v21113_v38  ;;  %v585_v15 = vshrl.u32 %v21196_v2, 16 }
 0x19d   : > { %v4735_v5 = vsel %vm1344_vm1, %v4732_v11, %v4734_v27  ;;  %v4737_v7 = vsel %vm1344_vm1, %v4734_v27, %v4736_v30  ;;  %v607_v11 = vrot.slane %v605_v8, 1  ;;  %v621_v27 = vshll.u32 %v21236_v23, 16 }
 0x19e   : > { %17570 = vmatmul.mubr.bf16.gmra.mrb[16].mxu0 %v4715_v39  ;;  %v568_v39 = vsel %vm532_vm0, %v563_v35, %v567_v34  ;;  %v625_v34 = vshrl.u32 %v21236_v23, 16 }
 0x19f   : > { %17573 = vmatprep.mubr.bf16.mxu0 %v4717_v41  ;;  %v21190_v41 = vld [vmem:[%s20591_s16 + $0x28] sm:$0xff]   ;;  %17046 = vmatmul.mubr.bf16.gmra.mrb[4].mxu1 %v568_v39  ;;  %v611_v16 = vor.u32 %v609_v12, %v607_v11  ;;  %v623_v35 = vrot.slane %v621_v27, 1 }
 0x1a0   : > { %v573_v44 = vshll.u32 %v21190_v41, 16  ;;  %v577_v47 = vshrl.u32 %v21190_v41, 16 }
 0x1a2   : > { %v575_v46 = vrot.slane %v573_v44, 1  ;;  %v631_v44 = vrot.slane %v629_v36, 1  ;;  %v20188_v36 = vld [vmem:[%s24339_s3] sm:$0xff]  }
 0x1a3   : > { %17089 = vmatprep.subr.bf16.mxu1 %v20188_v36 }
 0x1a4   : > { %v579_v26 = vor.u32 %v577_v47, %v575_v46  ;;  %v576_v9 = vsel %vm532_vm0, %v571_v48, %v575_v46  ;;  %v20110_v46 = vld [vmem:[%s20767_s29 + $0x18] sm:$0xff]   ;;  %17090 = vmatpush3.bf16.msra.mxu1 %v20188_v36  ;;  %v21368_v36 = vld [vmem:[%s20591_s16 + $0xc0] ss:$0 sps:$4 sm:$0x11]  }
 0x1a5   : > { %17049 = vmatprep.mubr.bf16.mxu1 %v576_v9 }
 0x1a6   : > { %17574 = vmatmul.mubr.bf16.gmra.mrb[20].mxu0 %v4719_v17  ;;  %v581_v17 = vshll.u32 %v21196_v2, 16 }
 0x1a7   : > { %17577 = vmatprep.mubr.bf16.mxu0 %v4721_v19  ;;  %v4738_v19 = vrot.slane %v21042_v14, 1 }
 0x1a8   : > { %v583_v50 = vrot.slane %v581_v17, 1  ;;  %v21257_v17 = vld [vmem:[%s20591_s16 + $0x68] sm:$0xff]  }
 0x1a9   : > { %v4739_v40 = vsel %vm1344_vm1, %v4736_v30, %v4738_v19  ;;  %v4741_v53 = vsel %vm1344_vm1, %v4738_v19, %v4740_v49  ;;  %v617_v30 = vshrl.u32 %v21227_v29, 16  ;;  %v20119_v19 = vld [vmem:[%s24340_s4 + $0x58] sm:$0xff]   ;;  %v637_v48 = vshll.u32 %v21257_v17, 16  ;;  %v21265_v49 = vld [vmem:[%s20591_s16 + $0x70] sm:$0xff]  }
 0x1aa   : > { %v641_v9 = vshrl.u32 %v21257_v17, 16 }
 0x1ae   : > { %17578 = vmatmul.mubr.bf16.gmra.mrb[24].mxu0 %v4723_v51  ;;  %v584_v51 = vsel %vm532_vm0, %v579_v26, %v583_v50  ;;  %v633_v26 = vshrl.u32 %v21244_v28, 16 }
 0x1af   : > { %17581 = vmatprep.mubr.bf16.mxu0 %v4725_v52  ;;  %v21206_v52 = vld [vmem:[%s20591_s16 + $0x38] sm:$0xff]   ;;  %17050 = vmatmul.mubr.bf16.gmra.mrb[8].mxu1 %v584_v51  ;;  %v645_v51 = vshll.u32 %v21265_v49, 16 }
 0x1b0   : > { %v589_v14 = vshll.u32 %v21206_v52, 16  ;;  %v593_v56 = vshrl.u32 %v21206_v52, 16 }
 0x1b2   : > { %v591_v45 = vrot.slane %v589_v14, 1 }
 0x1b4   : > { %v595_v33 = vor.u32 %v593_v56, %v591_v45  ;;  %v20113_v56 = vld [vmem:[%s20767_s29 + $0x28] sm:$0xff]  }
 0x1b6   : > { %17582 = vmatmul.mubr.bf16.gmra.mrb[28].mxu0 %v4727_v60  ;;  %v597_v60 = vshll.u32 %v21212_v32, 16 }
 0x1b7   : > { %17585 = vmatprep.mubr.bf16.mxu0 %v4729_v62  ;;  %v587_v62 = vor.u32 %v585_v15, %v583_v50  ;;  %v639_v50 = vrot.slane %v637_v48, 1  ;;  %v647_v15 = vrot.slane %v645_v51, 1 }
 0x1b8   : > { %v599_v63 = vrot.slane %v597_v60, 1 }
 0x1b9   : > { %v592_v0 = vsel %vm532_vm0, %v587_v62, %v591_v45  ;;  %v643_v14 = vor.u32 %v641_v9, %v639_v50  ;;  %v20114_v62 = vld [vmem:[%s20767_s29 + $0x30] sm:$0xff]  }
 0x1ba   : > { %17053 = vmatprep.mubr.bf16.mxu1 %v592_v0  ;;  %v600_v1 = vsel %vm532_vm0, %v595_v33, %v599_v63  ;;  %v603_v13 = vor.u32 %v601_v10, %v599_v63  ;;  %v20127_v33 = vld [vmem:[%s24340_s4 + $0x68] sm:$0xff]   ;;  %v653_v63 = vshll.u32 %v21277_v61, 16  ;;  %v21285_v0 = vld [vmem:[%s20591_s16 + $0x80] sm:$0xff]  }
 0x1bb   : > { %17054 = vmatmul.mubr.bf16.gmra.mrb[12].mxu1 %v600_v1  ;;  %v648_v60 = vsel %vm532_vm0, %v643_v14, %v647_v15  ;;  %v649_v1 = vshrl.u32 %v21265_v49, 16  ;;  %v661_v8 = vshll.u32 %v21285_v0, 16  ;;  %v665_v27 = vshrl.u32 %v21285_v0, 16  ;;  %v20194_v14 = vld [vmem:[%s24339_s3 + $0x10] sm:$0xff]  }
 0x1bd   : > { %v651_v10 = vor.u32 %v649_v1, %v647_v15  ;;  %v20122_v1 = vld [vmem:[%s20767_s29 + $0x60] sm:$0xff]  }
 0x1be   : > { %17586 = vmatmul.mubr.bf16.gmra.mrb[32].mxu0 %v4731_v21  ;;  %v615_v21 = vrot.slane %v613_v55, 1  ;;  %v663_v55 = vrot.slane %v661_v8, 1  ;;  %v20198_v8 = vld [vmem:[%s24339_s3 + $0x18] sm:$0xff]  }
 0x1bf   : > { %17589 = vmatprep.mubr.bf16.mxu0 %v4733_v22  ;;  %v608_v22 = vsel %vm532_vm0, %v603_v13, %v607_v11  ;;  %v20135_v11 = vld [vmem:[%s24340_s4 + $0x70] sm:$0xff]  }
 0x1c0   : > { %17057 = vmatprep.mubr.bf16.mxu1 %v608_v22  ;;  %v616_v54 = vsel %vm532_vm0, %v611_v16, %v615_v21  ;;  %v619_v39 = vor.u32 %v617_v30, %v615_v21  ;;  %v20115_v16 = vld [vmem:[%s20767_s29 + $0x38] sm:$0xff]   ;;  %v21297_v22 = vld [vmem:[%s20591_s16 + $0x88] sm:$0xff]  }
 0x1c2   : > { %v624_v3 = vsel %vm532_vm0, %v619_v39, %v623_v35  ;;  %v667_v39 = vor.u32 %v665_v27, %v663_v55 }
 0x1c3   : > { %17058 = vmatmul.mubr.bf16.gmra.mrb[16].mxu1 %v616_v54  ;;  %v20141_v54 = vld [vmem:[%s24340_s4 + $0x78] sm:$0xff]  }
 0x1c4   : > { %17061 = vmatprep.mubr.bf16.mxu1 %v624_v3 }
 0x1c6   : > { %17590 = vmatmul.mubr.bf16.gmra.mrb[36].mxu0 %v4735_v5  ;;  %v20116_v5 = vld [vmem:[%s24340_s4 + $0x50] sm:$0xff]  }
 0x1c7   : > { %17593 = vmatprep.mubr.bf16.mxu0 %v4737_v7  ;;  %v627_v7 = vor.u32 %v625_v34, %v623_v35  ;;  %v673_v35 = vshrl.u32 %v21297_v22, 16 }
 0x1c9   : > { %v632_v47 = vsel %vm532_vm0, %v627_v7, %v631_v44 }
 0x1cb   : > { %17062 = vmatmul.mubr.bf16.gmra.mrb[20].mxu1 %v632_v47 }
 0x1ce   : > { %17594 = vmatmul.mubr.bf16.gmra.mrb[40].mxu0 %v4739_v40  ;;  %v635_v40 = vor.u32 %v633_v26, %v631_v44  ;;  %v21328_v26 = vld [vmem:[%s20591_s16 + $0xa0] sm:$0xff]  }
 0x1cf   : > { %17597 = vmatprep.mubr.bf16.mxu0 %v4741_v53  ;;  %v20124_v53 = vld [vmem:[%s24340_s4 + $0x60] sm:$0xff]  }
 0x1d0   : > { %v640_v45 = vsel %vm532_vm0, %v635_v40, %v639_v50  ;;  %v20191_v50 = vld [vmem:[%s24339_s3 + $0x8] sm:$0xff]  }
 0x1d1   : > { %17065 = vmatprep.mubr.bf16.mxu1 %v640_v45  ;;  %17091 = vmatprep.subr.bf16.mxu1 %v20191_v50 }
 0x1d2   : > { %17092 = vmatpush3.bf16.msra.mxu1 %v20191_v50 }
 0x1d3   : > { %17066 = vmatmul.mubr.bf16.gmra.mrb[24].mxu1 %v648_v60  ;;  %17093 = vmatprep.subr.bf16.mxu1 %v20194_v14 }
 0x1d6   : > { %17598 = vmatmul.mubr.bf16.gmra.mrb[44].mxu0 %v4743_v6  ;;  %v655_v6 = vrot.slane %v653_v63, 1  ;;  %v21343_v63 = vld [vmem:[%s20591_s16 + $0xa8] sm:$0xff]   ;;  %17094 = vmatpush3.bf16.msra.mxu1 %v20194_v14  ;;  %v20211_v14 = vld [vmem:[%s24339_s3 + $0x38] sm:$0xff]  }
 0x1d7   : > { %17617 = vmatprep.mubr.bf16.mxu0 %v20106_v42  ;;  %v657_v42 = vshrl.u32 %v21277_v61, 16  ;;  %17095 = vmatprep.subr.bf16.mxu1 %v20198_v8 }
 0x1d8   : > { %v656_v13 = vsel %vm532_vm0, %v651_v10, %v655_v6  ;;  %v697_v10 = vshrl.u32 %v21328_v26, 16 }
 0x1d9   : > { %v659_v12 = vor.u32 %v657_v42, %v655_v6  ;;  %17069 = vmatprep.mubr.bf16.mxu1 %v656_v13  ;;  %v701_v6 = vshll.u32 %v21343_v63, 16  ;;  %v21348_v42 = vld [vmem:[%s20591_s16 + $0xb0] sm:$0xff]   ;;  %v20201_v13 = vld [vmem:[%s24339_s3 + $0x20] sm:$0xff]  }
 0x1da   : > { %17096 = vmatpush3.bf16.msra.mxu1 %v20198_v8  ;;  %v20139_v8 = vld [vmem:[%s20767_s29 + $0xa8] sm:$0xff]  }
 0x1db   : > { %v664_v21 = vsel %vm532_vm0, %v659_v12, %v663_v55  ;;  %v705_v12 = vshrl.u32 %v21343_v63, 16  ;;  %v709_v55 = vshll.u32 %v21348_v42, 16  ;;  %17097 = vmatprep.subr.bf16.mxu1 %v20201_v13 }
 0x1dc   : > { %17070 = vmatmul.mubr.bf16.gmra.mrb[28].mxu1 %v664_v21 }
 0x1de   : > { %17618 = vmatmul.mubr.bf16.vlgmr.msra.gmra.mrb[0].mxu0 %v20107_v31  ;;  %v20117_v31 = vld [vmem:[%s20767_s29 + $0x40] sm:$0xff]   ;;  %17098 = vmatpush3.bf16.msra.mxu1 %v20201_v13  ;;  %v21409_v13 = vld [vmem:[%s20767_s29 + $0x10] sm:$0xff]  }
 0x1df   : > { %17666 = vmatpush3.bf16.msra.mxu0 %v21113_v38  ;;  %17621 = vmatprep.mubr.bf16.mxu0 %v20109_v24  ;;  %v20112_v38 = vld [vmem:[%s20767_s29 + $0x20] sm:$0xff]   ;;  %v669_v24 = vshll.u32 %v21297_v22, 16 }
 0x1e0   : > { %17667 = vmatprep.subr.bf16.mxu0 %v20111_v25 }
 0x1e1   : > { %v671_v30 = vrot.slane %v669_v24, 1  ;;  %v20123_v24 = vld [vmem:[%s20767_s29 + $0x68] sm:$0xff]  }
 0x1e3   : > { %17668 = vmatpush3.bf16.msra.mxu0 %v20111_v25  ;;  %v21305_v25 = vld [vmem:[%s20591_s16 + $0x90] sm:$0xff]   ;;  %v675_v7 = vor.u32 %v673_v35, %v671_v30  ;;  %v672_v3 = vsel %vm532_vm0, %v667_v39, %v671_v30  ;;  %v21363_v30 = vld [vmem:[%s20591_s16 + $0xb8] sm:$0xff]   ;;  %v20204_v39 = vld [vmem:[%s24339_s3 + $0x28] sm:$0xff]  }
 0x1e4   : > { %17669 = vmatprep.subr.bf16.mxu0 %v20116_v5  ;;  %v677_v34 = vshll.u32 %v21305_v25, 16  ;;  %17073 = vmatprep.mubr.bf16.mxu1 %v672_v3  ;;  %v681_v9 = vshrl.u32 %v21305_v25, 16  ;;  %v20125_v35 = vld [vmem:[%s20767_s29 + $0x70] sm:$0xff]   ;;  %v721_v3 = vshrl.u32 %v21363_v30, 16 }
 0x1e5   : > { %17099 = vmatprep.subr.bf16.mxu1 %v20204_v39 }
 0x1e6   : > { %17622 = vmatmul.mubr.bf16.gmra.mrb[4].mxu0 %v20110_v46  ;;  %v679_v44 = vrot.slane %v677_v34, 1  ;;  %v20118_v46 = vld [vmem:[%s20767_s29 + $0x48] sm:$0xff]   ;;  %v717_v34 = vshll.u32 %v21363_v30, 16  ;;  %17100 = vmatpush3.bf16.msra.mxu1 %v20204_v39 }
 0x1e7   : > { %17625 = vmatprep.mubr.bf16.mxu0 %v20112_v38  ;;  %17670 = vmatpush3.bf16.msra.mxu0 %v20116_v5  ;;  %v21316_v5 = vld [vmem:[%s24340_s4 + $0x80] sm:$0xff]   ;;  %v21322_v38 = vld [vmem:[%s20591_s16 + $0x98] sm:$0xff]  }
 0x1e8   : > { %17671 = vmatprep.subr.bf16.mxu0 %v20119_v19  ;;  %v680_v47 = vsel %vm532_vm0, %v675_v7, %v679_v44  ;;  %v685_v48 = vshll.u32 %v21322_v38, 16  ;;  %v689_v40 = vshrl.u32 %v21322_v38, 16  ;;  %v683_v15 = vor.u32 %v681_v9, %v679_v44 }
 0x1e9   : > { %17074 = vmatmul.mubr.bf16.gmra.mrb[32].mxu1 %v680_v47  ;;  %v713_v7 = vshrl.u32 %v21348_v42, 16  ;;  %v719_v44 = vrot.slane %v717_v34, 1  ;;  %v20208_v47 = vld [vmem:[%s24339_s3 + $0x30] sm:$0xff]   ;;  %v5827_v34 = vshrl.u32 %v21409_v13, 16 }
 0x1ea   : > { %v687_v51 = vrot.slane %v685_v48, 1  ;;  %17101 = vmatprep.subr.bf16.mxu1 %v20208_v47 }
 0x1eb   : > { %17672 = vmatpush3.bf16.msra.mxu0 %v20119_v19  ;;  %v20120_v19 = vld [vmem:[%s20767_s29 + $0x50] sm:$0xff]   ;;  %v723_v48 = vor.u32 %v721_v3, %v719_v44  ;;  %17102 = vmatpush3.bf16.msra.mxu1 %v20208_v47 }
 0x1ec   : > { %17673 = vmatprep.subr.bf16.mxu0 %v20124_v53  ;;  %v691_v45 = vor.u32 %v689_v40, %v687_v51  ;;  %v688_v60 = vsel %vm532_vm0, %v683_v15, %v687_v51  ;;  %v20126_v51 = vld [vmem:[%s20767_s29 + $0x78] sm:$0xff]   ;;  %17103 = vmatprep.subr.bf16.mxu1 %v20211_v14  ;;  %v20130_v15 = vld [vmem:[%s20767_s29 + $0x88] sm:$0xff]  }
 0x1ed   : > { %17077 = vmatprep.mubr.bf16.mxu1 %v688_v60  ;;  %v20134_v60 = vld [vmem:[%s20767_s29 + $0x98] sm:$0xff]  }
 0x1ee   : > { %17626 = vmatmul.mubr.bf16.gmra.mrb[8].mxu0 %v20113_v56 }
 0x1ef   : > { %17629 = vmatprep.mubr.bf16.mxu0 %v20114_v62  ;;  %17674 = vmatpush3.bf16.msra.mxu0 %v20124_v53  ;;  %v693_v53 = vshll.u32 %v21328_v26, 16  ;;  %v20121_v62 = vld [vmem:[%s20767_s29 + $0x58] sm:$0xff]  }
 0x1f0   : > { %17675 = vmatprep.subr.bf16.mxu0 %v20127_v33  ;;  %17104 = vmatpush3.bf16.msra.mxu1 %v20211_v14 }
 0x1f1   : > { %v695_v56 = vrot.slane %v693_v53, 1  ;;  %v20129_v53 = vld [vmem:[%s20767_s29 + $0x80] sm:$0xff]  }
 0x1f3   : > { %17676 = vmatpush3.bf16.msra.mxu0 %v20127_v33  ;;  %v696_v33 = vsel %vm532_vm0, %v691_v45, %v695_v56  ;;  %v20133_v45 = vld [vmem:[%s20767_s29 + $0x90] sm:$0xff]  }
 0x1f4   : > { %17677 = vmatprep.subr.bf16.mxu0 %v20135_v11  ;;  %17078 = vmatmul.mubr.bf16.gmra.mrb[36].mxu1 %v696_v33 }
 0x1f6   : > { %17630 = vmatmul.mubr.bf16.gmra.mrb[12].mxu0 %v20115_v16  ;;  %v699_v16 = vor.u32 %v697_v10, %v695_v56  ;;  %v21393_v56 = vld [vmem:[%s20767_s29 + $0x4] sm:$0xf]  ;;  %v20143_v10 = vld [vmem:[%s20767_s29 + $0xb0] sm:$0xff]  }
 0x1f7   : > { %17633 = vmatprep.mubr.bf16.mxu0 %v20117_v31  ;;  %17678 = vmatpush3.bf16.msra.mxu0 %v20135_v11  ;;  %v703_v11 = vrot.slane %v701_v6, 1  ;;  %v711_v31 = vrot.slane %v709_v55, 1 }
 0x1f8   : > { %17679 = vmatprep.subr.bf16.mxu0 %v20141_v54 }
 0x1f9   : > { %v707_v21 = vor.u32 %v705_v12, %v703_v11 }
 0x1fb   : > { %17680 = vmatpush3.bf16.msra.mxu0 %v20141_v54  ;;  %v704_v54 = vsel %vm532_vm0, %v699_v16, %v703_v11  ;;  %v712_v27 = vsel %vm532_vm0, %v707_v21, %v711_v31 }
 0x1fc   : > { %17729 = vmatprep.subr.bf16.mxu0 %v21316_v5  ;;  %17081 = vmatprep.mubr.bf16.mxu1 %v704_v54  ;;  %v20144_v54 = vld [vmem:[%s20767_s29 + $0xb8] sm:$0xff]  }
 0x1fd   : > { %17082 = vmatmul.mubr.bf16.gmra.mrb[40].mxu1 %v712_v27 }
 0x1fe   : > { %17634 = vmatmul.mubr.bf16.gmra.mrb[16].mxu0 %v20118_v46  ;;  %v725_v46 = vshll.u32 %v21368_v36, 16 }
 0x1ff   : > { %17637 = vmatprep.mubr.bf16.mxu0 %v20120_v19  ;;  %v715_v19 = vor.u32 %v713_v7, %v711_v31  ;;  %v21412_v31 = vld [vmem:[%s20767_s29 + $0x18] sm:$0xff]  }
 0x200   : > { %v727_v50 = vrot.slane %v725_v46, 1  ;;  %v5831_v39 = vshll.u32 %v21412_v31, 16 }
 0x201   : > { %v720_v9 = vsel %vm532_vm0, %v715_v19, %v719_v44  ;;  %v21423_v44 = vld [vmem:[%s20767_s29 + $0x20] sm:$0xff]   ;;  %v21426_v19 = vld [vmem:[%s20767_s29 + $0x28] sm:$0xff]  }
 0x202   : > { %17085 = vmatprep.mubr.bf16.mxu1 %v720_v9  ;;  %v728_v40 = vsel %vm532_vm0, %v723_v48, %v727_v50  ;;  %v5833_v47 = vrot.slane %v5831_v39, 1  ;;  %v5839_v48 = vshll.u32 %v21423_v44, 16  ;;  %v5835_v9 = vshrl.u32 %v21412_v31, 16  ;;  %v20180_v39 = vld [vmem:[%s24340_s4 + $0xa0] sm:$0xff]  }
 0x203   : > { %v5847_v14 = vshll.u32 %v21426_v19, 16 }
 0x205   : > { %17086 = vmatmul.mubr.bf16.gmra.mrb[44].mxu1 %v728_v40  ;;  %v20157_v40 = vld [vmem:[%s24340_s4 + $0x88] sm:$0xff]  }
 0x206   : > { %17638 = vmatmul.mubr.bf16.gmra.mrb[20].mxu0 %v20121_v62  ;;  %17105 = vmatprep.mubr.bf16.mxu1 %v21151_v58  ;;  %v5618_v58 = vld [vmem:[%s20767_s29] sm:$0xf] }
 0x207   : > { %17641 = vmatprep.mubr.bf16.mxu0 %v20122_v1  ;;  %v20138_v62 = vld [vmem:[%s20767_s29 + $0xa0] sm:$0xff]   ;;  %v15655_v33 = vcombine.low %v5618_v58, %v21393_v56  ;;  %v21401_v1 = vld [vmem:[%s20767_s29 + $0x8] sm:$0xff]   ;;  %v5837_v58 = vor.u32 %v5835_v9, %v5833_v47 }
 0x208   : > { %v5815_v55 = vshll.u32 %v21401_v1, 16  ;;  %v5819_v27 = vshrl.u32 %v21401_v1, 16  ;;  %v20185_v9 = vld [vmem:[%s24340_s4 + $0xa8] sm:$0xff]  }
 0x209   : > { %v5810_v6 = vshll.u32 %v15655_v33, 16  ;;  %v5808_v11 = vshrl.u32 %v15655_v33, 16  ;;  %v21444_v33 = vld [vmem:[%s20767_s29 + $0x38] sm:$0xff]  }
 0x20a   : > { %v5817_v21 = vrot.slane %v5815_v55, 1  ;;  %v5863_v55 = vshll.u32 %v21444_v33, 16 }
 0x20b   : > { %v5812_v12 = vrot.slane %v5810_v6, 1  ;;  %v20166_v6 = vld [vmem:[%s24340_s4 + $0x90] sm:$0xff]  }
 0x20c   : > { %v5821_v3 = vor.u32 %v5819_v27, %v5817_v21 }
 0x20d   : > { %17106 = vmatmul.mubr.bf16.vlgmr.msra.gmra.mrb[0].mxu1 %v21154_v59  ;;  %v5813_v16 = vor.u32 %v5812_v12, %v5808_v11  ;;  %v5851_v11 = vshrl.u32 %v21426_v19, 16 }
 0x20e   : > { %17642 = vmatmul.mubr.bf16.gmra.mrb[24].mxu0 %v20123_v24  ;;  %17109 = vmatprep.mubr.bf16.mxu1 %v21161_v43  ;;  %v5823_v24 = vshll.u32 %v21409_v13, 16 }
 0x20f   : > { %17645 = vmatprep.mubr.bf16.mxu0 %v20125_v35  ;;  %v5818_v35 = vsel %vm532_vm0, %v5813_v16, %v5817_v21  ;;  %v20171_v16 = vld [vmem:[%s24340_s4 + $0x98] sm:$0xff]  }
 0x210   : > { %v5825_v7 = vrot.slane %v5823_v24, 1 }
 0x212   : > { %v5829_v46 = vor.u32 %v5827_v34, %v5825_v7  ;;  %v5826_v50 = vsel %vm532_vm0, %v5821_v3, %v5825_v7  ;;  %v21464_v34 = vld [vmem:[%s20767_s29 + $0x48] sm:$0xff]  }
 0x215   : > { %17110 = vmatmul.mubr.bf16.gmra.mrb[4].mxu1 %v21174_v18 }
 0x216   : > { %17646 = vmatmul.mubr.bf16.gmra.mrb[28].mxu0 %v20126_v51  ;;  %17113 = vmatprep.mubr.bf16.mxu1 %v21180_v20  ;;  %v5834_v51 = vsel %vm532_vm0, %v5829_v46, %v5833_v47  ;;  %v5867_v46 = vshrl.u32 %v21444_v33, 16 }
 0x217   : > { %17649 = vmatprep.mubr.bf16.mxu0 %v20129_v53  ;;  %v5843_v53 = vshrl.u32 %v21423_v44, 16 }
 0x21d   : > { %17114 = vmatmul.mubr.bf16.gmra.mrb[8].mxu1 %v21190_v41 }
 0x21e   : > { %17650 = vmatmul.mubr.bf16.gmra.mrb[32].mxu0 %v20130_v15  ;;  %17117 = vmatprep.mubr.bf16.mxu1 %v21196_v2  ;;  %v5841_v15 = vrot.slane %v5839_v48, 1 }
 0x21f   : > { %17653 = vmatprep.mubr.bf16.mxu0 %v20133_v45  ;;  %v21440_v45 = vld [vmem:[%s20767_s29 + $0x30] sm:$0xff]  }
 0x220   : > { %v5859_v12 = vshrl.u32 %v21440_v45, 16 }
 0x225   : > { %17118 = vmatmul.mubr.bf16.gmra.mrb[12].mxu1 %v21206_v52 }
 0x226   : > { %17654 = vmatmul.mubr.bf16.gmra.mrb[36].mxu0 %v20134_v60  ;;  %17121 = vmatprep.mubr.bf16.mxu1 %v21212_v32  ;;  %v5845_v60 = vor.u32 %v5843_v53, %v5841_v15 }
 0x227   : > { %17657 = vmatprep.mubr.bf16.mxu0 %v20138_v62  ;;  %v5849_v62 = vrot.slane %v5847_v14, 1 }
 0x229   : > { %v5853_v24 = vor.u32 %v5851_v11, %v5849_v62 }
 0x22d   : > { %17122 = vmatmul.mubr.bf16.gmra.mrb[16].mxu1 %v21221_v4 }
 0x22e   : > { %17658 = vmatmul.mubr.bf16.gmra.mrb[40].mxu0 %v20139_v8  ;;  %17125 = vmatprep.mubr.bf16.mxu1 %v21227_v29  ;;  %v5855_v8 = vshll.u32 %v21440_v45, 16 }
 0x22f   : > { %17661 = vmatprep.mubr.bf16.mxu0 %v20143_v10  ;;  %v5842_v10 = vsel %vm532_vm0, %v5837_v58, %v5841_v15  ;;  %v21484_v58 = vld [vmem:[%s20767_s29 + $0x58] sm:$0xff]  }
 0x230   : > { %v5857_v21 = vrot.slane %v5855_v8, 1  ;;  %v5883_v8 = vshrl.u32 %v21464_v34, 16 }
 0x232   : > { %v5861_v27 = vor.u32 %v5859_v12, %v5857_v21  ;;  %v5858_v3 = vsel %vm532_vm0, %v5853_v24, %v5857_v21  ;;  %v20205_v12 = vld [vmem:[%s24340_s4 + $0xb8] sm:$0xff]   ;;  %v20219_v21 = vld [vmem:[%s24339_s3 + $0x80] sm:$0xff]  }
 0x233   : > { %17153 = vmatprep.subr.bf16.mxu1 %v20219_v21 }
 0x234   : > { %17154 = vmatpush3.bf16.msra.mxu1 %v20219_v21 }
 0x235   : > { %17126 = vmatmul.mubr.bf16.gmra.mrb[20].mxu1 %v21236_v23 }
 0x236   : > { %17662 = vmatmul.mubr.bf16.gmra.mrb[44].mxu0 %v20144_v54  ;;  %17129 = vmatprep.mubr.bf16.mxu1 %v21244_v28  ;;  %v21461_v54 = vld [vmem:[%s20767_s29 + $0x40] sm:$0xff]  }
 0x237   : > { %17681 = vmatprep.mubr.bf16.mxu0 %v5818_v35  ;;  %v5865_v35 = vrot.slane %v5863_v55, 1  ;;  %v5871_v7 = vshll.u32 %v21461_v54, 16  ;;  %v5875_v48 = vshrl.u32 %v21461_v54, 16 }
 0x239   : > { %v5866_v47 = vsel %vm532_vm0, %v5861_v27, %v5865_v35  ;;  %v5869_v53 = vor.u32 %v5867_v46, %v5865_v35 }
 0x23d   : > { %17130 = vmatmul.mubr.bf16.gmra.mrb[24].mxu1 %v21257_v17 }
 0x23e   : > { %17682 = vmatmul.mubr.bf16.vlgmr.msra.gmra.mrb[0].mxu0 %v5826_v50  ;;  %v5879_v50 = vshll.u32 %v21464_v34, 16  ;;  %17133 = vmatprep.mubr.bf16.mxu1 %v21265_v49 }
 0x23f   : > { %17730 = vmatpush3.bf16.msra.mxu0 %v21316_v5  ;;  %17685 = vmatprep.mubr.bf16.mxu0 %v5834_v51  ;;  %v5850_v5 = vsel %vm532_vm0, %v5845_v60, %v5849_v62  ;;  %v5873_v51 = vrot.slane %v5871_v7, 1  ;;  %v20197_v60 = vld [vmem:[%s24340_s4 + $0xb0] sm:$0xff]   ;;  %v21512_v7 = vld [vmem:[%s24340_s4 + $0xc0] sm:$0xff]  }
 0x240   : > { %17731 = vmatprep.subr.bf16.mxu0 %v20157_v40  ;;  %v5881_v15 = vrot.slane %v5879_v50, 1 }
 0x241   : > { %v5877_v14 = vor.u32 %v5875_v48, %v5873_v51 }
 0x242   : > { %v5885_v24 = vor.u32 %v5883_v8, %v5881_v15  ;;  %v21533_v8 = vld [vmem:[%s20767_s29 + $0x78] sm:$0xff]  }
 0x243   : > { %17732 = vmatpush3.bf16.msra.mxu0 %v20157_v40  ;;  %v21481_v40 = vld [vmem:[%s20767_s29 + $0x50] sm:$0xff]   ;;  %v5927_v21 = vshll.u32 %v21533_v8, 16 }
 0x244   : > { %17733 = vmatprep.subr.bf16.mxu0 %v20166_v6  ;;  %v5887_v62 = vshll.u32 %v21481_v40, 16  ;;  %v5891_v11 = vshrl.u32 %v21481_v40, 16 }
 0x245   : > { %17134 = vmatmul.mubr.bf16.gmra.mrb[28].mxu1 %v21277_v61 }
 0x246   : > { %17686 = vmatmul.mubr.bf16.gmra.mrb[4].mxu0 %v5842_v10  ;;  %v5882_v10 = vsel %vm532_vm0, %v5877_v14, %v5881_v15  ;;  %17137 = vmatprep.mubr.bf16.mxu1 %v21285_v0  ;;  %v5889_v55 = vrot.slane %v5887_v62, 1  ;;  %v21527_v14 = vld [vmem:[%s20767_s29 + $0x70] sm:$0xff]  }
 0x247   : > { %17689 = vmatprep.mubr.bf16.mxu0 %v5850_v5  ;;  %17734 = vmatpush3.bf16.msra.mxu0 %v20166_v6  ;;  %v5874_v6 = vsel %vm532_vm0, %v5869_v53, %v5873_v51  ;;  %v5895_v5 = vshll.u32 %v21484_v58, 16  ;;  %v20220_v51 = vld [vmem:[%s24339_s3 + $0x88] sm:$0xff]   ;;  %v20221_v15 = vld [vmem:[%s24339_s3 + $0x90] sm:$0xff]  }
 0x248   : > { %17735 = vmatprep.subr.bf16.mxu0 %v20171_v16  ;;  %v5893_v27 = vor.u32 %v5891_v11, %v5889_v55  ;;  %v5890_v46 = vsel %vm532_vm0, %v5885_v24, %v5889_v55  ;;  %17155 = vmatprep.subr.bf16.mxu1 %v20220_v51  ;;  %v5923_v55 = vshrl.u32 %v21527_v14, 16  ;;  %v20223_v24 = vld [vmem:[%s24339_s3 + $0x98] sm:$0xff]  }
 0x249   : > { %v5897_v35 = vrot.slane %v5895_v5, 1  ;;  %17156 = vmatpush3.bf16.msra.mxu1 %v20220_v51 }
 0x24a   : > { %17157 = vmatprep.subr.bf16.mxu1 %v20221_v15 }
 0x24b   : > { %17736 = vmatpush3.bf16.msra.mxu0 %v20171_v16  ;;  %v21501_v16 = vld [vmem:[%s20767_s29 + $0x60] sm:$0xff]   ;;  %v5898_v48 = vsel %vm532_vm0, %v5893_v27, %v5897_v35 }
 0x24c   : > { %17737 = vmatprep.subr.bf16.mxu0 %v20180_v39  ;;  %v5907_v50 = vshrl.u32 %v21501_v16, 16 }
 0x24d   : > { %17138 = vmatmul.mubr.bf16.gmra.mrb[32].mxu1 %v21297_v22 }
 0x24e   : > { %17690 = vmatmul.mubr.bf16.gmra.mrb[8].mxu0 %v5858_v3  ;;  %v5903_v3 = vshll.u32 %v21501_v16, 16  ;;  %17141 = vmatprep.mubr.bf16.mxu1 %v21305_v25 }
 0x24f   : > { %17693 = vmatprep.mubr.bf16.mxu0 %v5866_v47  ;;  %17738 = vmatpush3.bf16.msra.mxu0 %v20180_v39  ;;  %v21507_v39 = vld [vmem:[%s20767_s29 + $0x68] sm:$0xff]   ;;  %v5899_v47 = vshrl.u32 %v21484_v58, 16 }
 0x250   : > { %17739 = vmatprep.subr.bf16.mxu0 %v20185_v9  ;;  %v5905_v53 = vrot.slane %v5903_v3, 1  ;;  %v5915_v5 = vshrl.u32 %v21507_v39, 16  ;;  %17158 = vmatpush3.bf16.msra.mxu1 %v20221_v15  ;;  %v20224_v3 = vld [vmem:[%s24339_s3 + $0xa0] sm:$0xff]  }
 0x251   : > { %17159 = vmatprep.subr.bf16.mxu1 %v20223_v24 }
 0x252   : > { %v5909_v62 = vor.u32 %v5907_v50, %v5905_v53  ;;  %v21553_v50 = vld [vmem:[%s20767_s29 + $0x88] sm:$0xff]  }
 0x253   : > { %17740 = vmatpush3.bf16.msra.mxu0 %v20185_v9  ;;  %v5911_v9 = vshll.u32 %v21507_v39, 16 }
 0x254   : > { %17741 = vmatprep.subr.bf16.mxu0 %v20197_v60  ;;  %17160 = vmatpush3.bf16.msra.mxu1 %v20223_v24  ;;  %v21573_v24 = vld [vmem:[%s20767_s29 + $0x98] sm:$0xff]  }
 0x255   : > { %17142 = vmatmul.mubr.bf16.gmra.mrb[36].mxu1 %v21322_v38  ;;  %17161 = vmatprep.subr.bf16.mxu1 %v20224_v3 }
 0x256   : > { %17694 = vmatmul.mubr.bf16.gmra.mrb[12].mxu0 %v5874_v6  ;;  %v5913_v6 = vrot.slane %v5911_v9, 1  ;;  %17145 = vmatprep.mubr.bf16.mxu1 %v21328_v26 }
 0x257   : > { %17697 = vmatprep.mubr.bf16.mxu0 %v5882_v10  ;;  %17742 = vmatpush3.bf16.msra.mxu0 %v20197_v60  ;;  %v5901_v60 = vor.u32 %v5899_v47, %v5897_v35  ;;  %v5919_v10 = vshll.u32 %v21527_v14, 16  ;;  %v21547_v35 = vld [vmem:[%s20767_s29 + $0x80] sm:$0xff]  }
 0x258   : > { %17743 = vmatprep.subr.bf16.mxu0 %v20205_v12  ;;  %v5935_v9 = vshll.u32 %v21547_v35, 16  ;;  %17162 = vmatpush3.bf16.msra.mxu1 %v20224_v3 }
 0x259   : > { %v5906_v11 = vsel %vm532_vm0, %v5901_v60, %v5905_v53  ;;  %v5921_v27 = vrot.slane %v5919_v10, 1  ;;  %v5931_v53 = vshrl.u32 %v21533_v8, 16  ;;  %v5939_v60 = vshrl.u32 %v21547_v35, 16 }
 0x25a   : > { %v5937_v10 = vrot.slane %v5935_v9, 1  ;;  %v5959_v9 = vshll.u32 %v21573_v24, 16 }
 0x25b   : > { %17744 = vmatpush3.bf16.msra.mxu0 %v20205_v12  ;;  %v5914_v12 = vsel %vm532_vm0, %v5909_v62, %v5913_v6  ;;  %v5925_v47 = vor.u32 %v5923_v55, %v5921_v27  ;;  %v5943_v62 = vshll.u32 %v21553_v50, 16 }
 0x25c   : > { %17793 = vmatprep.subr.bf16.mxu0 %v21512_v7  ;;  %v5941_v55 = vor.u32 %v5939_v60, %v5937_v10  ;;  %v5961_v37 = vrot.slane %v5959_v9, 1  ;;  %v21604_v9 = vld [vmem:[%s20767_s29 + $0xb0] sm:$0xff]  }
 0x25d   : > { %17146 = vmatmul.mubr.bf16.gmra.mrb[40].mxu1 %v21343_v63 }
 0x25e   : > { %17698 = vmatmul.mubr.bf16.gmra.mrb[16].mxu0 %v5890_v46  ;;  %v5917_v46 = vor.u32 %v5915_v5, %v5913_v6  ;;  %17149 = vmatprep.mubr.bf16.mxu1 %v21348_v42  ;;  %v20225_v6 = vld [vmem:[%s24339_s3 + $0xa8] sm:$0xff]   ;;  %v20227_v5 = vld [vmem:[%s24339_s3 + $0xb0] sm:$0xff]  }
 0x25f   : > { %17701 = vmatprep.mubr.bf16.mxu0 %v5898_v48  ;;  %v5929_v48 = vrot.slane %v5927_v21, 1  ;;  %17163 = vmatprep.subr.bf16.mxu1 %v20225_v6  ;;  %v5945_v21 = vrot.slane %v5943_v62, 1  ;;  %v21588_v62 = vld [vmem:[%s20767_s29 + $0xa0] sm:$0xff]  }
 0x260   : > { %v5922_v51 = vsel %vm532_vm0, %v5917_v46, %v5921_v27  ;;  %17164 = vmatpush3.bf16.msra.mxu1 %v20225_v6  ;;  %v5947_v46 = vshrl.u32 %v21553_v50, 16  ;;  %v1346_v6 = vrot.slane %v21154_v59, 1 }
 0x261   : > { %v5930_v15 = vsel %vm532_vm0, %v5925_v47, %v5929_v48  ;;  %17165 = vmatprep.subr.bf16.mxu1 %v20227_v5  ;;  %v5946_v47 = vsel %vm532_vm0, %v5941_v55, %v5945_v21 }
 0x264   : > { %17166 = vmatpush3.bf16.msra.mxu1 %v20227_v5 }
 0x265   : > { %17150 = vmatmul.mubr.bf16.gmra.mrb[44].mxu1 %v21363_v30 }
 0x266   : > { %17702 = vmatmul.mubr.bf16.gmra.mrb[20].mxu0 %v5906_v11  ;;  %v21567_v11 = vld [vmem:[%s20767_s29 + $0x90] sm:$0xff]  }
 0x267   : > { %17705 = vmatprep.mubr.bf16.mxu0 %v5914_v12  ;;  %24447 = vst [vmem:[#allocation4_spill] sm:$0xff] %v21567_v11  ;;  %v5933_v12 = vor.u32 %v5931_v53, %v5929_v48  ;;  %v5951_v27 = vshll.u32 %v21567_v11, 16  ;;  %v5955_v48 = vshrl.u32 %v21567_v11, 16  ;;  %v20228_v53 = vld [vmem:[%s24339_s3 + $0xb8] sm:$0xff]   ;;  %v21593_v11 = vld [vmem:[%s20767_s29 + $0xa8] sm:$0xff]  }
 0x268   : > { %17167 = vmatprep.subr.bf16.mxu1 %v20228_v53 }
 0x269   : > { %v5938_v3 = vsel %vm532_vm0, %v5933_v12, %v5937_v10  ;;  %v5953_v60 = vrot.slane %v5951_v27, 1  ;;  %v1348_v10 = vrot.slane %v21161_v43, 1  ;;  %v5949_v12 = vor.u32 %v5947_v46, %v5945_v21  ;;  %17168 = vmatpush3.bf16.msra.mxu1 %v20228_v53 }
 0x26a   : > { %v5963_v43 = vshrl.u32 %v21573_v24, 16  ;;  %v5971_v46 = vshrl.u32 %v21588_v62, 16  ;;  %v1350_v53 = vrot.slane %v21174_v18, 1 }
 0x26b   : > { %v5957_v5 = vor.u32 %v5955_v48, %v5953_v60  ;;  %v5954_v59 = vsel %vm532_vm0, %v5949_v12, %v5953_v60  ;;  %v21609_v12 = vld [vmem:[%s20767_s29 + $0xb8] sm:$0xff]  }
 0x26d   : > { %v5962_v21 = vsel %vm532_vm0, %v5957_v5, %v5961_v37 }
 0x26e   : > { %17706 = vmatmul.mubr.bf16.gmra.mrb[24].mxu0 %v5922_v51  ;;  %v1323_v51 = vld [vmem:[%s20591_s16] sm:$0xe] }
 0x26f   : > { %17709 = vmatprep.mubr.bf16.mxu0 %v5930_v15  ;;  %v15354_v15 = vcombine.low %v1323_v51, %v21148_v57  ;;  %v1349_v57 = vsel %vm1344_vm1, %v1346_v6, %v1348_v10  ;;  %v5965_v51 = vor.u32 %v5963_v43, %v5961_v37  ;;  %v5979_v37 = vshrl.u32 %v21593_v11, 16 }
 0x270   : > { %v1356_v43 = vrot.slane %v21196_v2, 1 }
 0x271   : > { %v1345_v55 = vrot.slane %v15354_v15, 1  ;;  %v1352_v15 = vrot.slane %v21180_v20, 1  ;;  %v5987_v20 = vshrl.u32 %v21604_v9, 16 }
 0x273   : > { %v1347_v27 = vsel %vm1344_vm1, %v1345_v55, %v1346_v6  ;;  %v1351_v55 = vsel %vm1344_vm1, %v1348_v10, %v1350_v53  ;;  %v1353_v5 = vsel %vm1344_vm1, %v1350_v53, %v1352_v15 }
 0x274   : > { %17169 = vmatprep.mubr.bf16.mxu1 %v1347_v27 }
 0x275   : > { %17170 = vmatmul.mubr.bf16.vlgmr.msra.gmra.mrb[0].mxu1 %v1349_v57  ;;  %v5983_v57 = vshll.u32 %v21604_v9, 16 }
 0x276   : > { %17710 = vmatmul.mubr.bf16.gmra.mrb[28].mxu0 %v5938_v3  ;;  %v5967_v3 = vshll.u32 %v21588_v62, 16  ;;  %17173 = vmatprep.mubr.bf16.mxu1 %v1351_v55 }
 0x277   : > { %17713 = vmatprep.mubr.bf16.mxu0 %v5946_v47  ;;  %v5975_v47 = vshll.u32 %v21593_v11, 16  ;;  %v5985_v10 = vrot.slane %v5983_v57, 1  ;;  %v1358_v57 = vrot.slane %v21206_v52, 1  ;;  %v1362_v52 = vrot.slane %v21221_v4, 1  ;;  %v20214_v4 = vld [vmem:[%s24340_s4 + $0xc8] sm:$0xff]  }
 0x278   : > { %v5969_v48 = vrot.slane %v5967_v3, 1  ;;  %v5991_v3 = vshll.u32 %v21609_v12, 16 }
 0x279   : > { %v5977_v6 = vrot.slane %v5975_v47, 1  ;;  %v5989_v47 = vor.u32 %v5987_v20, %v5985_v10  ;;  %v6370_v20 = vrot.slane %v21401_v1, 1  ;;  %v6374_v1 = vrot.slane %v21412_v31, 1 }
 0x27a   : > { %v5973_v60 = vor.u32 %v5971_v46, %v5969_v48  ;;  %v5970_v27 = vsel %vm532_vm0, %v5965_v51, %v5969_v48  ;;  %v21622_v46 = vld [vmem:[%s20767_s29 + $0xc0] ss:$0 sps:$4 sm:$0x11]   ;;  %v5993_v48 = vrot.slane %v5991_v3, 1  ;;  %v1359_v3 = vsel %vm1344_vm1, %v1356_v43, %v1358_v57 }
 0x27b   : > { %v6376_v31 = vrot.slane %v21423_v44, 1  ;;  %v20216_v44 = vld [vmem:[%s24340_s4 + $0xd8] sm:$0xff]  }
 0x27c   : > { %v5978_v18 = vsel %vm532_vm0, %v5973_v60, %v5977_v6  ;;  %v6348_v60 = vld [vmem:[%s20767_s29] sm:$0xe]  ;;  %v5994_v2 = vsel %vm532_vm0, %v5989_v47, %v5993_v48 }
 0x27d   : > { %17174 = vmatmul.mubr.bf16.gmra.mrb[4].mxu1 %v1353_v5  ;;  %v5995_v5 = vshrl.u32 %v21609_v12, 16 }
 0x27e   : > { %17714 = vmatmul.mubr.bf16.gmra.mrb[32].mxu0 %v5954_v59  ;;  %v1354_v59 = vrot.slane %v21190_v41, 1  ;;  %v5999_v41 = vshll.u32 %v21622_v46, 16 }
 0x27f   : > { %17717 = vmatprep.mubr.bf16.mxu0 %v5962_v21  ;;  %v5981_v21 = vor.u32 %v5979_v37, %v5977_v6  ;;  %v15704_v6 = vcombine.low %v6348_v60, %v21393_v56  ;;  %v20215_v60 = vld [vmem:[%s24340_s4 + $0xd0] sm:$0xff]  }
 0x280   : > { %v1355_v51 = vsel %vm1344_vm1, %v1352_v15, %v1354_v59  ;;  %v1357_v53 = vsel %vm1344_vm1, %v1354_v59, %v1356_v43  ;;  %v1360_v15 = vrot.slane %v21212_v32, 1  ;;  %v6001_v37 = vrot.slane %v5999_v41, 1 }
 0x281   : > { %17177 = vmatprep.mubr.bf16.mxu1 %v1355_v51  ;;  %v5986_v55 = vsel %vm532_vm0, %v5981_v21, %v5985_v10  ;;  %v1364_v32 = vrot.slane %v21227_v29, 1  ;;  %v6372_v21 = vrot.slane %v21409_v13, 1  ;;  %v1366_v29 = vrot.slane %v21236_v23, 1 }
 0x282   : > { %v1361_v10 = vsel %vm1344_vm1, %v1358_v57, %v1360_v15  ;;  %v1363_v43 = vsel %vm1344_vm1, %v1360_v15, %v1362_v52  ;;  %v1368_v13 = vrot.slane %v21244_v28, 1  ;;  %v6377_v23 = vsel %vm1344_vm1, %v6374_v1, %v6376_v31 }
 0x283   : > { %v1365_v47 = vsel %vm1344_vm1, %v1362_v52, %v1364_v32  ;;  %v6375_v51 = vsel %vm1344_vm1, %v6372_v21, %v6374_v1  ;;  %v6380_v41 = vrot.slane %v21440_v45, 1  ;;  %v20218_v45 = vld [vmem:[%s24340_s4 + $0xe8] sm:$0xff]   ;;  %v6388_v52 = vrot.slane %v21481_v40, 1 }
 0x285   : > { %17178 = vmatmul.mubr.bf16.gmra.mrb[8].mxu1 %v1357_v53  ;;  %v6378_v53 = vrot.slane %v21426_v19, 1  ;;  %v1370_v19 = vrot.slane %v21257_v17, 1 }
 0x286   : > { %17718 = vmatmul.mubr.bf16.gmra.mrb[36].mxu0 %v5970_v27  ;;  %v5997_v27 = vor.u32 %v5995_v5, %v5993_v48  ;;  %17181 = vmatprep.mubr.bf16.mxu1 %v1359_v3  ;;  %v6373_v48 = vsel %vm1344_vm1, %v6370_v20, %v6372_v21  ;;  %v1369_v5 = vsel %vm1344_vm1, %v1366_v29, %v1368_v13  ;;  %v21703_v21 = vld [vmem:[%s24340_s4 + $0x100] sm:$0xff]  }
 0x287   : > { %17721 = vmatprep.mubr.bf16.mxu0 %v5978_v18  ;;  %v6369_v18 = vrot.slane %v15704_v6, 1  ;;  %v6379_v28 = vsel %vm1344_vm1, %v6376_v31, %v6378_v53  ;;  %v20217_v6 = vld [vmem:[%s24340_s4 + $0xe0] sm:$0xff]   ;;  %v1371_v57 = vsel %vm1344_vm1, %v1368_v13, %v1370_v19  ;;  %v6381_v17 = vsel %vm1344_vm1, %v6378_v53, %v6380_v41 }
 0x288   : > { %v6002_v59 = vsel %vm532_vm0, %v5997_v27, %v6001_v37  ;;  %v1376_v27 = vrot.slane %v21285_v0, 1  ;;  %v6384_v37 = vrot.slane %v21461_v54, 1  ;;  %v20226_v54 = vld [vmem:[%s24340_s4 + $0xf8] sm:$0xff]   ;;  %v1388_v31 = vrot.slane %v21348_v42, 1  ;;  %v20261_v53 = vld [vmem:[%s24339_s3 + $0xe0] sm:$0xff]  }
 0x289   : > { %v6371_v56 = vsel %vm1344_vm1, %v6369_v18, %v6370_v20  ;;  %v6386_v18 = vrot.slane %v21464_v34, 1  ;;  %v20222_v20 = vld [vmem:[%s24340_s4 + $0xf0] sm:$0xff]   ;;  %v1378_v34 = vrot.slane %v21297_v22, 1 }
 0x28b   : > { %v6387_v0 = vsel %vm1344_vm1, %v6384_v37, %v6386_v18  ;;  %v1379_v22 = vsel %vm1344_vm1, %v1376_v27, %v1378_v34  ;;  %v6389_v1 = vsel %vm1344_vm1, %v6386_v18, %v6388_v52  ;;  %v20277_v18 = vld [vmem:[%s20591_s16 + $0x24] sm:$0xff]  }
 0x28d   : > { %17182 = vmatmul.mubr.bf16.gmra.mrb[12].mxu1 %v1361_v10 }
 0x28e   : > { %17722 = vmatmul.mubr.bf16.gmra.mrb[40].mxu0 %v5986_v55  ;;  %17185 = vmatprep.mubr.bf16.mxu1 %v1363_v43  ;;  %v1367_v55 = vsel %vm1344_vm1, %v1364_v32, %v1366_v29  ;;  %v6390_v32 = vrot.slane %v21484_v58, 1  ;;  %v20255_v58 = vld [vmem:[%s24339_s3 + $0xc8] sm:$0xff]   ;;  %v1382_v43 = vrot.slane %v21322_v38, 1 }
 0x28f   : > { %17725 = vmatprep.mubr.bf16.mxu0 %v5994_v2  ;;  %v6382_v2 = vrot.slane %v21444_v33, 1  ;;  %v1374_v33 = vrot.slane %v21277_v61, 1 }
 0x290   : > { %v6391_v40 = vsel %vm1344_vm1, %v6388_v52, %v6390_v32 }
 0x291   : > { %v1377_v10 = vsel %vm1344_vm1, %v1374_v33, %v1376_v27  ;;  %v6385_v61 = vsel %vm1344_vm1, %v6382_v2, %v6384_v37  ;;  %v20489_v27 = vld [vmem:[%s24339_s3 + $0x108] sm:$0xff]   ;;  %v20276_v37 = vld [vmem:[%s20591_s16 + $0x1c] sm:$0xff]  }
 0x295   : > { %17186 = vmatmul.mubr.bf16.gmra.mrb[16].mxu1 %v1365_v47  ;;  %v1384_v47 = vrot.slane %v21328_v26, 1 }
 0x296   : > { %17726 = vmatmul.mubr.bf16.gmra.mrb[44].mxu0 %v6002_v59  ;;  %17189 = vmatprep.mubr.bf16.mxu1 %v1367_v55  ;;  %v1380_v59 = vrot.slane %v21305_v25, 1  ;;  %v6398_v55 = vrot.slane %v21533_v8, 1  ;;  %v1390_v8 = vrot.slane %v21363_v30, 1 }
 0x297   : > { %17745 = vmatprep.mubr.bf16.mxu0 %v6371_v56  ;;  %v20252_v56 = vld [vmem:[%s24339_s3 + $0xc0] sm:$0xff]   ;;  %v1385_v13 = vsel %vm1344_vm1, %v1382_v43, %v1384_v47 }
 0x298   : > { %v1381_v25 = vsel %vm1344_vm1, %v1378_v34, %v1380_v59  ;;  %17217 = vmatprep.subr.bf16.mxu1 %v20252_v56  ;;  %v1383_v29 = vsel %vm1344_vm1, %v1380_v59, %v1382_v43  ;;  %v6414_v34 = vrot.slane %v21609_v12, 1  ;;  %v20492_v59 = vld [vmem:[%s24339_s3 + $0x120] sm:$0xff]   ;;  %v20291_v43 = vld [vmem:[%s20591_s16 + $0x54] sm:$0xff]  }
 0x299   : > { %17218 = vmatpush3.bf16.msra.mxu1 %v20252_v56  ;;  %v20285_v12 = vld [vmem:[%s20591_s16 + $0x3c] sm:$0xff]  }
 0x29a   : > { %17219 = vmatprep.subr.bf16.mxu1 %v20255_v58 }
 0x29d   : > { %17190 = vmatmul.mubr.bf16.gmra.mrb[20].mxu1 %v1369_v5 }
 0x29e   : > { %17746 = vmatmul.mubr.bf16.vlgmr.msra.gmra.mrb[0].mxu0 %v6373_v48  ;;  %17193 = vmatprep.mubr.bf16.mxu1 %v1371_v57  ;;  %v20256_v48 = vld [vmem:[%s24339_s3 + $0xd0] sm:$0xff]  }
 0x29f   : > { %17794 = vmatpush3.bf16.msra.mxu0 %v21512_v7  ;;  %17749 = vmatprep.mubr.bf16.mxu0 %v6375_v51  ;;  %v1372_v7 = vrot.slane %v21265_v49, 1  ;;  %v6383_v49 = vsel %vm1344_vm1, %v6380_v41, %v6382_v2  ;;  %v6392_v51 = vrot.slane %v21501_v16, 1  ;;  %v20260_v16 = vld [vmem:[%s24339_s3 + $0xd8] sm:$0xff]   ;;  %v1391_v41 = vsel %vm1344_vm1, %v1388_v31, %v1390_v8 }
 0x2a0   : > { %17795 = vmatprep.subr.bf16.mxu0 %v20214_v4  ;;  %17220 = vmatpush3.bf16.msra.mxu1 %v20255_v58  ;;  %v20290_v58 = vld [vmem:[%s20591_s16 + $0x4c] sm:$0xff]  }
 0x2a1   : > { %v1373_v15 = vsel %vm1344_vm1, %v1370_v19, %v1372_v7  ;;  %v1375_v3 = vsel %vm1344_vm1, %v1372_v7, %v1374_v33  ;;  %17221 = vmatprep.subr.bf16.mxu1 %v20256_v48  ;;  %v6393_v38 = vsel %vm1344_vm1, %v6390_v32, %v6392_v51  ;;  %v6400_v19 = vrot.slane %v21547_v35, 1  ;;  %v20269_v35 = vld [vmem:[%s24339_s3 + $0xf8] sm:$0xff]  }
 0x2a2   : > { %v6402_v7 = vrot.slane %v21553_v50, 1  ;;  %v20270_v50 = vld [vmem:[%s20591_s16 + $0xc] sm:$0xff]   ;;  %v6416_v32 = vrot.slane %v21622_v46, 1  ;;  %v20495_v46 = vld [vmem:[%s24339_s3 + $0x138] sm:$0xff]  }
 0x2a3   : > { %17796 = vmatpush3.bf16.msra.mxu0 %v20214_v4  ;;  %v6394_v4 = vrot.slane %v21507_v39, 1  ;;  %v1386_v39 = vrot.slane %v21343_v63, 1  ;;  %v6401_v30 = vsel %vm1344_vm1, %v6398_v55, %v6400_v19 }
 0x2a4   : > { %17797 = vmatprep.subr.bf16.mxu0 %v20215_v60  ;;  %17222 = vmatpush3.bf16.msra.mxu1 %v20256_v48  ;;  %v20233_v48 = vld [vmem:[%s20767_s29 + $0x1c] sm:$0xff]  }
 0x2a5   : > { %17194 = vmatmul.mubr.bf16.gmra.mrb[24].mxu1 %v1373_v15  ;;  %v6395_v26 = vsel %vm1344_vm1, %v6392_v51, %v6394_v4  ;;  %17223 = vmatprep.subr.bf16.mxu1 %v20260_v16  ;;  %v1387_v5 = vsel %vm1344_vm1, %v1384_v47, %v1386_v39  ;;  %v20271_v15 = vld [vmem:[%s20591_s16 + $0x14] sm:$0xff]   ;;  %v20235_v51 = vld [vmem:[%s24340_s4 + $0x108] sm:$0xff]  }
 0x2a6   : > { %17750 = vmatmul.mubr.bf16.gmra.mrb[4].mxu0 %v6377_v23  ;;  %17197 = vmatprep.mubr.bf16.mxu1 %v1375_v3  ;;  %v1389_v23 = vsel %vm1344_vm1, %v1386_v39, %v1388_v31  ;;  %v20490_v3 = vld [vmem:[%s24339_s3 + $0x110] sm:$0xff]   ;;  %v20248_v31 = vld [vmem:[%s24340_s4 + $0x120] sm:$0xff]  }
 0x2a7   : > { %17753 = vmatprep.mubr.bf16.mxu0 %v6379_v28  ;;  %17798 = vmatpush3.bf16.msra.mxu0 %v20215_v60  ;;  %v6396_v60 = vrot.slane %v21527_v14, 1  ;;  %v20264_v14 = vld [vmem:[%s24339_s3 + $0xe8] sm:$0xff]   ;;  %v1392_v28 = vrot.slane %v21368_v36, 1  ;;  %v6403_v36 = vsel %vm1344_vm1, %v6400_v19, %v6402_v7  ;;  %v20231_v47 = vld [vmem:[%s20767_s29 + $0x14] sm:$0xff]   ;;  %v21845_v19 = vld [vmem:[%s24340_s4 + $0x140] sm:$0xff]  }
 0x2a8   : > { %17799 = vmatprep.subr.bf16.mxu0 %v20216_v44  ;;  %17224 = vmatpush3.bf16.msra.mxu1 %v20260_v16  ;;  %v20299_v16 = vld [vmem:[%s20591_s16 + $0x6c] sm:$0xff]   ;;  %v20300_v39 = vld [vmem:[%s20591_s16 + $0x74] sm:$0xff]  }
 0x2a9   : > { %17225 = vmatprep.subr.bf16.mxu1 %v20261_v53  ;;  %v6397_v63 = vsel %vm1344_vm1, %v6394_v4, %v6396_v60  ;;  %v6399_v42 = vsel %vm1344_vm1, %v6396_v60, %v6398_v55  ;;  %v1393_v2 = vsel %vm1344_vm1, %v1390_v8, %v1392_v28  ;;  %v20295_v4 = vld [vmem:[%s20591_s16 + $0x5c] sm:$0xff]   ;;  %v20251_v55 = vld [vmem:[%s24340_s4 + $0x128] sm:$0xff]  }
 0x2aa   : > { %v20238_v60 = vld [vmem:[%s20767_s29 + $0x3c] sm:$0xff]   ;;  %v20309_v28 = vld [vmem:[%s20591_s16 + $0x8c] sm:$0xff]  }
 0x2ab   : > { %17800 = vmatpush3.bf16.msra.mxu0 %v20216_v44  ;;  %v20266_v44 = vld [vmem:[%s24339_s3 + $0xf0] sm:$0xff]   ;;  %v20265_v8 = vld [vmem:[%s24340_s4 + $0x138] sm:$0xff]  }
 0x2ac   : > { %17801 = vmatprep.subr.bf16.mxu0 %v20217_v6  ;;  %17226 = vmatpush3.bf16.msra.mxu1 %v20261_v53  ;;  %v20237_v53 = vld [vmem:[%s20767_s29 + $0x34] sm:$0xff]  }
 0x2ad   : > { %17198 = vmatmul.mubr.bf16.gmra.mrb[28].mxu1 %v1377_v10  ;;  %17227 = vmatprep.subr.bf16.mxu1 %v20264_v14 }
 0x2ae   : > { %17754 = vmatmul.mubr.bf16.gmra.mrb[8].mxu0 %v6381_v17  ;;  %17201 = vmatprep.mubr.bf16.mxu1 %v1379_v22  ;;  %v6406_v17 = vrot.slane %v21573_v24, 1  ;;  %v6408_v24 = vrot.slane %v21588_v62, 1  ;;  %v20491_v62 = vld [vmem:[%s24339_s3 + $0x118] sm:$0xff]   ;;  %v20286_v22 = vld [vmem:[%s20591_s16 + $0x44] sm:$0xff]  }
 0x2af   : > { %17757 = vmatprep.mubr.bf16.mxu0 %v6383_v49  ;;  %17802 = vmatpush3.bf16.msra.mxu0 %v20217_v6  ;;  %v24448_v6 = vld [vmem:[#allocation4_spill] sm:$0xff]  ;;  %v20488_v49 = vld [vmem:[%s24339_s3 + $0x100] sm:$0xff]  }
 0x2b0   : > { %17803 = vmatprep.subr.bf16.mxu0 %v20218_v45  ;;  %17228 = vmatpush3.bf16.msra.mxu1 %v20264_v14  ;;  %v6404_v57 = vrot.slane %v24448_v6, 1  ;;  %v6409_v10 = vsel %vm1344_vm1, %v6406_v17, %v6408_v24  ;;  %v20241_v14 = vld [vmem:[%s20767_s29 + $0x4c] sm:$0xff]   ;;  %v20319_v6 = vld [vmem:[%s20591_s16 + $0xb4] sm:$0xff]  }
 0x2b1   : > { %17229 = vmatprep.subr.bf16.mxu1 %v20266_v44 }
 0x2b2   : > { %v6407_v33 = vsel %vm1344_vm1, %v6404_v57, %v6406_v17  ;;  %v20323_v17 = vld [vmem:[%s20591_s16 + $0xbc] sm:$0xff]  }
 0x2b3   : > { %17804 = vmatpush3.bf16.msra.mxu0 %v20218_v45  ;;  %v6405_v45 = vsel %vm1344_vm1, %v6402_v7, %v6404_v57  ;;  %v20242_v7 = vld [vmem:[%s20767_s29 + $0x54] sm:$0xff]  }
 0x2b4   : > { %17805 = vmatprep.subr.bf16.mxu0 %v20222_v20  ;;  %17230 = vmatpush3.bf16.msra.mxu1 %v20266_v44  ;;  %v20310_v44 = vld [vmem:[%s20591_s16 + $0x94] sm:$0xff]  }
 0x2b5   : > { %17202 = vmatmul.mubr.bf16.gmra.mrb[32].mxu1 %v1381_v25  ;;  %17231 = vmatprep.subr.bf16.mxu1 %v20269_v35  ;;  %v20494_v25 = vld [vmem:[%s24339_s3 + $0x130] sm:$0xff]  }
 0x2b6   : > { %17758 = vmatmul.mubr.bf16.gmra.mrb[12].mxu0 %v6385_v61  ;;  %17205 = vmatprep.mubr.bf16.mxu1 %v1383_v29  ;;  %v20296_v29 = vld [vmem:[%s20591_s16 + $0x64] sm:$0xff]   ;;  %v20247_v57 = vld [vmem:[%s20767_s29 + $0x74] sm:$0xff]  }
 0x2b7   : > { %17761 = vmatprep.mubr.bf16.mxu0 %v6387_v0  ;;  %17806 = vmatpush3.bf16.msra.mxu0 %v20222_v20  ;;  %v6410_v20 = vrot.slane %v21593_v11, 1  ;;  %v20281_v11 = vld [vmem:[%s20591_s16 + $0x2c] sm:$0xff]   ;;  %v6412_v0 = vrot.slane %v21604_v9, 1 }
 0x2b8   : > { %17807 = vmatprep.subr.bf16.mxu0 %v20226_v54  ;;  %17232 = vmatpush3.bf16.msra.mxu1 %v20269_v35  ;;  %v20493_v9 = vld [vmem:[%s24339_s3 + $0x128] sm:$0xff]  }
 0x2b9   : > { %18753 = vmatprep.subr.bf16.mxu1 %v20488_v49  ;;  %v6411_v61 = vsel %vm1344_vm1, %v6408_v24, %v6410_v20  ;;  %v6413_v56 = vsel %vm1344_vm1, %v6410_v20, %v6412_v0  ;;  %v6415_v52 = vsel %vm1344_vm1, %v6412_v0, %v6414_v34  ;;  %v20246_v35 = vld [vmem:[%s20767_s29 + $0x6c] sm:$0xff]  }
 0x2bb   : > { %17808 = vmatpush3.bf16.msra.mxu0 %v20226_v54  ;;  %v20282_v54 = vld [vmem:[%s20591_s16 + $0x34] sm:$0xff]  }
 0x2bc   : > { %17857 = vmatprep.subr.bf16.mxu0 %v21703_v21 }
 0x2bd   : > { %17206 = vmatmul.mubr.bf16.gmra.mrb[36].mxu1 %v1385_v13  ;;  %v20240_v13 = vld [vmem:[%s24340_s4 + $0x110] sm:$0xff]  }
 0x2be   : > { %17762 = vmatmul.mubr.bf16.gmra.mrb[16].mxu0 %v6389_v1  ;;  %17209 = vmatprep.mubr.bf16.mxu1 %v1387_v5  ;;  %v6417_v1 = vsel %vm1344_vm1, %v6414_v34, %v6416_v32  ;;  %v20304_v5 = vld [vmem:[%s20591_s16 + $0x7c] sm:$0xff]  }
 0x2bf   : > { %17765 = vmatprep.mubr.bf16.mxu0 %v6391_v40  ;;  %v20230_v40 = vld [vmem:[%s20767_s29 + $0xc] sm:$0xff]  }
 0x2c5   : > { %17210 = vmatmul.mubr.bf16.gmra.mrb[40].mxu1 %v1389_v23  ;;  %v20305_v23 = vld [vmem:[%s20591_s16 + $0x84] sm:$0xff]  }
 0x2c6   : > { %17766 = vmatmul.mubr.bf16.gmra.mrb[20].mxu0 %v6393_v38  ;;  %17213 = vmatprep.mubr.bf16.mxu1 %v1391_v41  ;;  %v20234_v38 = vld [vmem:[%s20767_s29 + $0x24] sm:$0xff]   ;;  %v20244_v41 = vld [vmem:[%s20767_s29 + $0x5c] sm:$0xff]  }
 0x2c7   : > { %17769 = vmatprep.mubr.bf16.mxu0 %v6395_v26  ;;  %v20236_v26 = vld [vmem:[%s20767_s29 + $0x2c] sm:$0xff]  }
 0x2cd   : > { %17214 = vmatmul.mubr.bf16.gmra.mrb[44].mxu1 %v1393_v2  ;;  %v20313_v2 = vld [vmem:[%s20591_s16 + $0x9c] sm:$0xff]  }
 0x2ce   : > { %17770 = vmatmul.mubr.bf16.gmra.mrb[24].mxu0 %v6397_v63  ;;  %17233 = vmatprep.mubr.bf16.mxu1 %v20270_v50  ;;  %v20259_v63 = vld [vmem:[%s24340_s4 + $0x130] sm:$0xff]  }
 0x2cf   : > { %17773 = vmatprep.mubr.bf16.mxu0 %v6399_v42  ;;  %v20239_v42 = vld [vmem:[%s20767_s29 + $0x44] sm:$0xff]   ;;  %v20318_v50 = vld [vmem:[%s20591_s16 + $0xac] sm:$0xff]  }
 0x2d5   : > { %17234 = vmatmul.mubr.bf16.vlgmr.msra.gmra.mrb[0].mxu1 %v20271_v15  ;;  %v20249_v15 = vld [vmem:[%s20767_s29 + $0x7c] sm:$0xff]  }
 0x2d6   : > { %17774 = vmatmul.mubr.bf16.gmra.mrb[28].mxu0 %v6401_v30  ;;  %18761 = vmatpush3.bf16.msra.mxu1 %v20488_v49  ;;  %v20314_v30 = vld [vmem:[%s20591_s16 + $0xa4] sm:$0xff]  }
 0x2d7   : > { %17777 = vmatprep.mubr.bf16.mxu0 %v6403_v36  ;;  %18754 = vmatprep.subr.bf16.mxu1 %v20489_v27  ;;  %v20245_v36 = vld [vmem:[%s20767_s29 + $0x64] sm:$0xff]  }
 0x2d8   : > { %17237 = vmatprep.mubr.bf16.mxu1 %v20276_v37  ;;  %v20324_v49 = vld [vmem:[%s20591_s16 + $0xc4] sm:$0xff]   ;;  %v20497_v37 = vld [vmem:[%s20591_s16 + $0x6c] sm:$0xff]  }
 0x2da   : > { %18762 = vmatpush3.bf16.msra.mxu1 %v20489_v27  ;;  %v20496_v27 = vld [vmem:[%s20591_s16 + $0x74] sm:$0xff]  }
 0x2db   : > { %18755 = vmatprep.subr.bf16.mxu1 %v20490_v3  ;;  %v2562_v24 = vshll.u32 %v20496_v27, 16 }
 0x2dd   : > { %17238 = vmatmul.mubr.bf16.gmra.mrb[4].mxu1 %v20277_v18  ;;  %v2558_v18 = vshrl.u32 %v20497_v37, 16  ;;  %v2564_v20 = vrot.slane %v2562_v24, 1 }
 0x2de   : > { %17778 = vmatmul.mubr.bf16.gmra.mrb[32].mxu0 %v6405_v45  ;;  %18763 = vmatpush3.bf16.msra.mxu1 %v20490_v3  ;;  %v20250_v45 = vld [vmem:[%s20767_s29 + $0x84] sm:$0xff]   ;;  %v2566_v3 = vshrl.u32 %v20496_v27, 16 }
 0x2df   : > { %17781 = vmatprep.mubr.bf16.mxu0 %v6407_v33  ;;  %18756 = vmatprep.subr.bf16.mxu1 %v20491_v62  ;;  %v20253_v33 = vld [vmem:[%s20767_s29 + $0x8c] sm:$0xff]   ;;  %v21897_v27 = vld [vmem:[%s20767_s29 + $0x24] sm:$0xff]  }
 0x2e0   : > { %17241 = vmatprep.mubr.bf16.mxu1 %v20281_v11  ;;  %v2568_v0 = vor.u32 %v2566_v3, %v2564_v20 }
 0x2e2   : > { %18764 = vmatpush3.bf16.msra.mxu1 %v20491_v62  ;;  %v24449_v62 = vld [vmem:[#allocation3_spill] sm:$0xff] }
 0x2e3   : > { %18757 = vmatprep.subr.bf16.mxu1 %v20492_v59  ;;  %v2560_v11 = vor.u32 %v2558_v18, %v24449_v62 }
 0x2e5   : > { %17242 = vmatmul.mubr.bf16.gmra.mrb[8].mxu1 %v20282_v54  ;;  %v2565_v34 = vsel %vm532_vm0, %v2560_v11, %v2564_v20  ;;  %v20268_v20 = vld [vmem:[%s20767_s29 + $0xc4] sm:$0xff]  }
 0x2e6   : > { %17782 = vmatmul.mubr.bf16.gmra.mrb[36].mxu0 %v6409_v10  ;;  %18765 = vmatpush3.bf16.msra.mxu1 %v20492_v59  ;;  %v20498_v10 = vld [vmem:[%s20591_s16 + $0x7c] sm:$0xff]   ;;  %v20254_v59 = vld [vmem:[%s20767_s29 + $0x94] sm:$0xff]  }
 0x2e7   : > { %17785 = vmatprep.mubr.bf16.mxu0 %v6411_v61  ;;  %18758 = vmatprep.subr.bf16.mxu1 %v20493_v9  ;;  %v2570_v61 = vshll.u32 %v20498_v10, 16  ;;  %v2574_v32 = vshrl.u32 %v20498_v10, 16 }
 0x2e8   : > { %17245 = vmatprep.mubr.bf16.mxu1 %v20285_v12 }
 0x2e9   : > { %v2572_v54 = vrot.slane %v2570_v61, 1 }
 0x2ea   : > { %18766 = vmatpush3.bf16.msra.mxu1 %v20493_v9  ;;  %v20499_v9 = vld [vmem:[%s20591_s16 + $0x84] sm:$0xff]  }
 0x2eb   : > { %18759 = vmatprep.subr.bf16.mxu1 %v20494_v25  ;;  %v2578_v12 = vshll.u32 %v20499_v9, 16 }
 0x2ed   : > { %17246 = vmatmul.mubr.bf16.gmra.mrb[12].mxu1 %v20286_v22  ;;  %v2580_v22 = vrot.slane %v2578_v12, 1 }
 0x2ee   : > { %17786 = vmatmul.mubr.bf16.gmra.mrb[40].mxu0 %v6413_v56  ;;  %18767 = vmatpush3.bf16.msra.mxu1 %v20494_v25  ;;  %v2573_v56 = vsel %vm532_vm0, %v2568_v0, %v2572_v54  ;;  %v2582_v25 = vshrl.u32 %v20499_v9, 16  ;;  %v7506_v0 = vshll.u32 %v21897_v27, 16 }
 0x2ef   : > { %17789 = vmatprep.mubr.bf16.mxu0 %v6415_v52  ;;  %18760 = vmatprep.subr.bf16.mxu1 %v20495_v46  ;;  %v20257_v52 = vld [vmem:[%s20767_s29 + $0x9c] sm:$0xff]  }
 0x2f0   : > { %17249 = vmatprep.mubr.bf16.mxu1 %v20290_v58  ;;  %v2584_v58 = vor.u32 %v2582_v25, %v2580_v22 }
 0x2f2   : > { %18768 = vmatpush3.bf16.msra.mxu1 %v20495_v46  ;;  %v2576_v46 = vor.u32 %v2574_v32, %v2572_v54  ;;  %v20505_v54 = vld [vmem:[%s20591_s16 + $0xb4] sm:$0xff]   ;;  %v20506_v32 = vld [vmem:[%s20591_s16 + $0xbc] sm:$0xff]  }
 0x2f3   : > { %v2630_v12 = vshrl.u32 %v20505_v54, 16 }
 0x2f5   : > { %17250 = vmatmul.mubr.bf16.gmra.mrb[16].mxu1 %v20291_v43 }
 0x2f6   : > { %17790 = vmatmul.mubr.bf16.gmra.mrb[44].mxu0 %v6417_v1  ;;  %17253 = vmatprep.mubr.bf16.mxu1 %v20295_v4  ;;  %v20500_v1 = vld [vmem:[%s20591_s16 + $0x8c] sm:$0xff]   ;;  %v20258_v4 = vld [vmem:[%s20767_s29 + $0xa4] sm:$0xff]  }
 0x2f7   : > { %17809 = vmatprep.mubr.bf16.mxu0 %v20230_v40  ;;  %v2586_v40 = vshll.u32 %v20500_v1, 16 }
 0x2f9   : > { %v2588_v43 = vrot.slane %v2586_v40, 1 }
 0x2fd   : > { %17254 = vmatmul.mubr.bf16.gmra.mrb[20].mxu1 %v20296_v29  ;;  %v2589_v29 = vsel %vm532_vm0, %v2584_v58, %v2588_v43  ;;  %v21913_v58 = vld [vmem:[%s20767_s29 + $0x34] sm:$0xff]  }
 0x2fe   : > { %17810 = vmatmul.mubr.bf16.vlgmr.msra.gmra.mrb[0].mxu0 %v20231_v47  ;;  %17257 = vmatprep.mubr.bf16.mxu1 %v20299_v16  ;;  %v7293_v47 = vld [vmem:[%s20767_s29 + $0xc] sm:$0xf]  ;;  %v2590_v16 = vshrl.u32 %v20500_v1, 16 }
 0x2ff   : > { %17858 = vmatpush3.bf16.msra.mxu0 %v21703_v21  ;;  %17813 = vmatprep.mubr.bf16.mxu0 %v20233_v48  ;;  %v20243_v21 = vld [vmem:[%s24340_s4 + $0x118] sm:$0xff]   ;;  %v21874_v48 = vld [vmem:[%s20767_s29 + $0x10] sm:$0xf] }
 0x300   : > { %17859 = vmatprep.subr.bf16.mxu0 %v20235_v51 }
 0x303   : > { %17860 = vmatpush3.bf16.msra.mxu0 %v20235_v51  ;;  %v2581_v51 = vsel %vm532_vm0, %v2576_v46, %v2580_v22  ;;  %v2634_v22 = vshll.u32 %v20506_v32, 16  ;;  %v7508_v46 = vrot.slane %v7506_v0, 1 }
 0x304   : > { %17861 = vmatprep.subr.bf16.mxu0 %v20240_v13 }
 0x305   : > { %17258 = vmatmul.mubr.bf16.gmra.mrb[24].mxu1 %v20300_v39 }
 0x306   : > { %17814 = vmatmul.mubr.bf16.gmra.mrb[4].mxu0 %v20234_v38  ;;  %17261 = vmatprep.mubr.bf16.mxu1 %v20304_v5  ;;  %v15777_v38 = vcombine.low %v7293_v47, %v21874_v48  ;;  %v21884_v5 = vld [vmem:[%s20767_s29 + $0x14] sm:$0xff]   ;;  %v2636_v47 = vrot.slane %v2634_v22, 1 }
 0x307   : > { %17817 = vmatprep.mubr.bf16.mxu0 %v20236_v26  ;;  %17862 = vmatpush3.bf16.msra.mxu0 %v20240_v13  ;;  %v20262_v13 = vld [vmem:[%s20767_s29 + $0xac] sm:$0xff]   ;;  %v20501_v26 = vld [vmem:[%s20591_s16 + $0x94] sm:$0xff]   ;;  %v7494_v61 = vshrl.u32 %v21884_v5, 16 }
 0x308   : > { %17863 = vmatprep.subr.bf16.mxu0 %v20243_v21 }
 0x30b   : > { %17864 = vmatpush3.bf16.msra.mxu0 %v20243_v21  ;;  %v2594_v21 = vshll.u32 %v20501_v26, 16 }
 0x30c   : > { %17865 = vmatprep.subr.bf16.mxu0 %v20248_v31 }
 0x30d   : > { %17262 = vmatmul.mubr.bf16.gmra.mrb[28].mxu1 %v20305_v23  ;;  %v2596_v39 = vrot.slane %v2594_v21, 1  ;;  %v7485_v23 = vshll.u32 %v15777_v38, 16  ;;  %v20280_v21 = vld [vmem:[%s24340_s4 + $0x148] sm:$0xff]  }
 0x30e   : > { %17818 = vmatmul.mubr.bf16.gmra.mrb[8].mxu0 %v20237_v53  ;;  %17265 = vmatprep.mubr.bf16.mxu1 %v20309_v28  ;;  %v20502_v53 = vld [vmem:[%s20591_s16 + $0x9c] sm:$0xff]  }
 0x30f   : > { %17821 = vmatprep.mubr.bf16.mxu0 %v20238_v60  ;;  %17866 = vmatpush3.bf16.msra.mxu0 %v20248_v31  ;;  %v2598_v31 = vshrl.u32 %v20501_v26, 16  ;;  %v2602_v60 = vshll.u32 %v20502_v53, 16 }
 0x310   : > { %17867 = vmatprep.subr.bf16.mxu0 %v20251_v55 }
 0x313   : > { %17868 = vmatpush3.bf16.msra.mxu0 %v20251_v55  ;;  %v2592_v55 = vor.u32 %v2590_v16, %v2588_v43 }
 0x314   : > { %17869 = vmatprep.subr.bf16.mxu0 %v20259_v63 }
 0x315   : > { %17266 = vmatmul.mubr.bf16.gmra.mrb[32].mxu1 %v20310_v44  ;;  %v20267_v44 = vld [vmem:[%s20767_s29 + $0xbc] sm:$0xff]  }
 0x316   : > { %17822 = vmatmul.mubr.bf16.gmra.mrb[12].mxu0 %v20239_v42  ;;  %17269 = vmatprep.mubr.bf16.mxu1 %v20313_v2  ;;  %v2604_v42 = vrot.slane %v2602_v60, 1  ;;  %v7490_v2 = vshll.u32 %v21884_v5, 16  ;;  %v2638_v60 = vshrl.u32 %v20506_v32, 16  ;;  %v21968_v32 = vld [vmem:[%s20767_s29 + $0x5c] sm:$0xff]  }
 0x317   : > { %17825 = vmatprep.mubr.bf16.mxu0 %v20241_v14  ;;  %17870 = vmatpush3.bf16.msra.mxu0 %v20259_v63  ;;  %v2600_v63 = vor.u32 %v2598_v31, %v2596_v39  ;;  %v2597_v14 = vsel %vm532_vm0, %v2592_v55, %v2596_v39  ;;  %v7522_v39 = vshll.u32 %v21913_v58, 16  ;;  %v20507_v31 = vld [vmem:[%s20591_s16 + $0xc4] sm:$0xff]  }
 0x318   : > { %17871 = vmatprep.subr.bf16.mxu0 %v20265_v8 }
 0x319   : > { %v2605_v28 = vsel %vm532_vm0, %v2600_v63, %v2604_v42 }
 0x31b   : > { %17872 = vmatpush3.bf16.msra.mxu0 %v20265_v8  ;;  %v20263_v8 = vld [vmem:[%s20767_s29 + $0xb4] sm:$0xff]  }
 0x31c   : > { %17921 = vmatprep.subr.bf16.mxu0 %v21845_v19 }
 0x31d   : > { %17270 = vmatmul.mubr.bf16.gmra.mrb[36].mxu1 %v20314_v30  ;;  %v20503_v30 = vld [vmem:[%s20591_s16 + $0xa4] sm:$0xff]  }
 0x31e   : > { %17826 = vmatmul.mubr.bf16.gmra.mrb[16].mxu0 %v20242_v7  ;;  %17273 = vmatprep.mubr.bf16.mxu1 %v20318_v50  ;;  %v7483_v7 = vshrl.u32 %v15777_v38, 16  ;;  %v21893_v50 = vld [vmem:[%s20767_s29 + $0x1c] sm:$0xff]   ;;  %v7510_v38 = vshrl.u32 %v21897_v27, 16 }
 0x31f   : > { %17829 = vmatprep.mubr.bf16.mxu0 %v20244_v41  ;;  %v7487_v41 = vrot.slane %v7485_v23, 1  ;;  %v7498_v3 = vshll.u32 %v21893_v50, 16  ;;  %v7502_v11 = vshrl.u32 %v21893_v50, 16  ;;  %v21928_v23 = vld [vmem:[%s20767_s29 + $0x3c] sm:$0xff]  }
 0x325   : > { %17274 = vmatmul.mubr.bf16.gmra.mrb[40].mxu1 %v20319_v6 }
 0x326   : > { %17830 = vmatmul.mubr.bf16.gmra.mrb[20].mxu0 %v20245_v36  ;;  %17277 = vmatprep.mubr.bf16.mxu1 %v20323_v17  ;;  %v2610_v36 = vshll.u32 %v20503_v30, 16 }
 0x327   : > { %17833 = vmatprep.mubr.bf16.mxu0 %v20246_v35  ;;  %v2606_v35 = vshrl.u32 %v20502_v53, 16  ;;  %v2642_v53 = vshll.u32 %v20507_v31, 16 }
 0x328   : > { %v2612_v6 = vrot.slane %v2610_v36, 1 }
 0x329   : > { %v2644_v63 = vrot.slane %v2642_v53, 1  ;;  %v21989_v53 = vld [vmem:[%s20767_s29 + $0x74] sm:$0xff]  }
 0x32d   : > { %17278 = vmatmul.mubr.bf16.gmra.mrb[44].mxu1 %v20324_v49  ;;  %v2608_v49 = vor.u32 %v2606_v35, %v2604_v42  ;;  %v2646_v42 = vshrl.u32 %v20507_v31, 16 }
 0x32e   : > { %17834 = vmatmul.mubr.bf16.gmra.mrb[24].mxu0 %v20247_v57  ;;  %17321 = vmatprep.mubr.bf16.mxu1 %v2565_v34  ;;  %v2614_v57 = vshrl.u32 %v20503_v30, 16  ;;  %v2626_v34 = vshll.u32 %v20505_v54, 16  ;;  %v20289_v30 = vld [vmem:[%s24340_s4 + $0x150] sm:$0xff]  }
 0x32f   : > { %17837 = vmatprep.mubr.bf16.mxu0 %v20249_v15  ;;  %v20504_v15 = vld [vmem:[%s20591_s16 + $0xac] sm:$0xff]   ;;  %v2613_v18 = vsel %vm532_vm0, %v2608_v49, %v2612_v6  ;;  %v2648_v36 = vor.u32 %v2646_v42, %v2644_v63 }
 0x330   : > { %v2618_v17 = vshll.u32 %v20504_v15, 16  ;;  %v2616_v24 = vor.u32 %v2614_v57, %v2612_v6  ;;  %v2628_v9 = vrot.slane %v2626_v34, 1  ;;  %v7530_v57 = vshll.u32 %v21928_v23, 16 }
 0x332   : > { %v2620_v37 = vrot.slane %v2618_v17, 1  ;;  %v2632_v43 = vor.u32 %v2630_v12, %v2628_v9  ;;  %v7526_v17 = vshrl.u32 %v21913_v58, 16 }
 0x334   : > { %v2621_v10 = vsel %vm532_vm0, %v2616_v24, %v2620_v37  ;;  %v20294_v24 = vld [vmem:[%s24340_s4 + $0x158] sm:$0xff]  }
 0x335   : > { %17322 = vmatmul.mubr.bf16.vlgmr.msra.gmra.mrb[24].mxu1 %v2573_v56  ;;  %v7500_v56 = vrot.slane %v7498_v3, 1 }
 0x336   : > { %17838 = vmatmul.mubr.bf16.gmra.mrb[28].mxu0 %v20250_v45  ;;  %17325 = vmatprep.mubr.bf16.mxu1 %v2581_v51  ;;  %v7488_v45 = vor.u32 %v7487_v41, %v7483_v7  ;;  %v7524_v41 = vrot.slane %v7522_v39, 1 }
 0x337   : > { %17841 = vmatprep.mubr.bf16.mxu0 %v20253_v33  ;;  %v7492_v33 = vrot.slane %v7490_v2, 1  ;;  %v7504_v40 = vor.u32 %v7502_v11, %v7500_v56  ;;  %v21933_v2 = vld [vmem:[%s20767_s29 + $0x44] sm:$0xff]  }
 0x338   : > { %v7542_v54 = vshrl.u32 %v21933_v2, 16 }
 0x339   : > { %v7493_v62 = vsel %vm532_vm0, %v7488_v45, %v7492_v33  ;;  %v7496_v25 = vor.u32 %v7494_v61, %v7492_v33  ;;  %v7509_v26 = vsel %vm532_vm0, %v7504_v40, %v7508_v46  ;;  %v7534_v45 = vshrl.u32 %v21928_v23, 16  ;;  %v21953_v61 = vld [vmem:[%s20767_s29 + $0x54] sm:$0xff]   ;;  %v21971_v40 = vld [vmem:[%s20767_s29 + $0x64] sm:$0xff]  }
 0x33a   : > { %v7538_v33 = vshll.u32 %v21933_v2, 16  ;;  %v7574_v42 = vshrl.u32 %v21971_v40, 16 }
 0x33d   : > { %17326 = vmatmul.mubr.bf16.gmra.mrb[28].mxu1 %v2589_v29  ;;  %v2637_v29 = vsel %vm532_vm0, %v2632_v43, %v2636_v47  ;;  %v7562_v43 = vshll.u32 %v21968_v32, 16 }
 0x33e   : > { %17842 = vmatmul.mubr.bf16.gmra.mrb[32].mxu0 %v20254_v59  ;;  %17329 = vmatprep.mubr.bf16.mxu1 %v2597_v14  ;;  %v2622_v59 = vshrl.u32 %v20504_v15, 16  ;;  %v20508_v14 = vld [vmem:[%s20591_s16 + $0xcc] ss:$0 sps:$4 sm:$0x11]  }
 0x33f   : > { %17845 = vmatprep.mubr.bf16.mxu0 %v20257_v52  ;;  %v21909_v52 = vld [vmem:[%s20767_s29 + $0x2c] sm:$0xff]  }
 0x340   : > { %v2624_v1 = vor.u32 %v2622_v59, %v2620_v37  ;;  %v7518_v16 = vshrl.u32 %v21909_v52, 16  ;;  %v7532_v37 = vrot.slane %v7530_v57, 1 }
 0x342   : > { %v2629_v51 = vsel %vm532_vm0, %v2624_v1, %v2628_v9  ;;  %v7536_v3 = vor.u32 %v7534_v45, %v7532_v37  ;;  %v20308_v9 = vld [vmem:[%s24340_s4 + $0x168] sm:$0xff]  }
 0x345   : > { %17330 = vmatmul.mubr.bf16.gmra.mrb[32].mxu1 %v2605_v28  ;;  %v7512_v28 = vor.u32 %v7510_v38, %v7508_v46  ;;  %v20317_v46 = vld [vmem:[%s24340_s4 + $0x170] sm:$0xff]   ;;  %v20322_v38 = vld [vmem:[%s24340_s4 + $0x178] sm:$0xff]  }
 0x346   : > { %17846 = vmatmul.mubr.bf16.gmra.mrb[36].mxu0 %v20258_v4  ;;  %17333 = vmatprep.mubr.bf16.mxu1 %v2613_v18  ;;  %v7514_v4 = vshll.u32 %v21909_v52, 16  ;;  %v21950_v18 = vld [vmem:[%s20767_s29 + $0x4c] sm:$0xff]  }
 0x347   : > { %17849 = vmatprep.mubr.bf16.mxu0 %v20262_v13  ;;  %v7501_v13 = vsel %vm532_vm0, %v7496_v25, %v7500_v56  ;;  %v7546_v11 = vshll.u32 %v21950_v18, 16  ;;  %v7550_v59 = vshrl.u32 %v21950_v18, 16  ;;  %v7554_v56 = vshll.u32 %v21953_v61, 16 }
 0x348   : > { %v7516_v55 = vrot.slane %v7514_v4, 1 }
 0x349   : > { %v7548_v12 = vrot.slane %v7546_v11, 1  ;;  %v7556_v1 = vrot.slane %v7554_v56, 1  ;;  %v22028_v56 = vld [vmem:[%s20767_s29 + $0x9c] sm:$0xff]  }
 0x34a   : > { %v7520_v7 = vor.u32 %v7518_v16, %v7516_v55  ;;  %v7517_v15 = vsel %vm532_vm0, %v7512_v28, %v7516_v55  ;;  %v7586_v28 = vshll.u32 %v21989_v53, 16 }
 0x34b   : > { %v7552_v25 = vor.u32 %v7550_v59, %v7548_v12 }
 0x34c   : > { %v7525_v49 = vsel %vm532_vm0, %v7520_v7, %v7524_v41  ;;  %v22004_v7 = vld [vmem:[%s20767_s29 + $0x7c] sm:$0xff]  }
 0x34d   : > { %17334 = vmatmul.mubr.bf16.gmra.mrb[36].mxu1 %v2621_v10  ;;  %v7540_v10 = vrot.slane %v7538_v33, 1  ;;  %v7557_v4 = vsel %vm532_vm0, %v7552_v25, %v7556_v1  ;;  %v22016_v33 = vld [vmem:[%s20767_s29 + $0x8c] sm:$0xff]   ;;  %v22031_v25 = vld [vmem:[%s20767_s29 + $0xa4] sm:$0xff]  }
 0x34e   : > { %17850 = vmatmul.mubr.bf16.gmra.mrb[40].mxu0 %v20263_v8  ;;  %17337 = vmatprep.mubr.bf16.mxu1 %v2629_v51  ;;  %v2650_v8 = vshll.u32 %v20508_v14, 16  ;;  %v7558_v51 = vshrl.u32 %v21953_v61, 16 }
 0x34f   : > { %17853 = vmatprep.mubr.bf16.mxu0 %v20267_v44  ;;  %v2640_v44 = vor.u32 %v2638_v60, %v2636_v47  ;;  %v7541_v34 = vsel %vm532_vm0, %v7536_v3, %v7540_v10  ;;  %v7544_v22 = vor.u32 %v7542_v54, %v7540_v10  ;;  %v21994_v60 = vld [vmem:[%s24340_s4 + $0x180] sm:$0xff]   ;;  %v22019_v3 = vld [vmem:[%s20767_s29 + $0x94] sm:$0xff]   ;;  %v7610_v10 = vshll.u32 %v22016_v33, 16 }
 0x350   : > { %v2652_v35 = vrot.slane %v2650_v8, 1  ;;  %v7560_v16 = vor.u32 %v7558_v51, %v7556_v1  ;;  %v7614_v54 = vshrl.u32 %v22016_v33, 16  ;;  %v7626_v1 = vshll.u32 %v22028_v56, 16 }
 0x351   : > { %v2645_v6 = vsel %vm532_vm0, %v2640_v44, %v2644_v63  ;;  %v7549_v47 = vsel %vm532_vm0, %v7544_v22, %v7548_v12  ;;  %v7612_v59 = vrot.slane %v7610_v10, 1  ;;  %v7630_v51 = vshrl.u32 %v22028_v56, 16 }
 0x353   : > { %v7616_v12 = vor.u32 %v7614_v54, %v7612_v59 }
 0x355   : > { %17338 = vmatmul.mubr.bf16.gmra.mrb[40].mxu1 %v2637_v29  ;;  %v7566_v29 = vshrl.u32 %v21968_v32, 16 }
 0x356   : > { %17854 = vmatmul.mubr.bf16.gmra.mrb[44].mxu0 %v20268_v20  ;;  %17341 = vmatprep.mubr.bf16.mxu1 %v2645_v6  ;;  %v7528_v20 = vor.u32 %v7526_v17, %v7524_v41  ;;  %v7594_v6 = vshll.u32 %v22004_v7, 16  ;;  %v7598_v17 = vshrl.u32 %v22004_v7, 16 }
 0x357   : > { %17873 = vmatprep.mubr.bf16.mxu0 %v7493_v62  ;;  %v20303_v62 = vld [vmem:[%s24340_s4 + $0x160] sm:$0xff]  }
 0x358   : > { %v7533_v0 = vsel %vm532_vm0, %v7528_v20, %v7532_v37  ;;  %v7596_v45 = vrot.slane %v7594_v6, 1  ;;  %v22055_v6 = vld [vmem:[%s20767_s29 + $0xc4] sm:$0xff]  }
 0x359   : > { %v7670_v54 = vshrl.u32 %v22055_v6, 16 }
 0x35a   : > { %v7600_v37 = vor.u32 %v7598_v17, %v7596_v45 }
 0x35e   : > { %17874 = vmatmul.mubr.bf16.vlgmr.msra.gmra.mrb[0].mxu0 %v7501_v13  ;;  %v7570_v13 = vshll.u32 %v21971_v40, 16 }
 0x35f   : > { %17922 = vmatpush3.bf16.msra.mxu0 %v21845_v19  ;;  %17877 = vmatprep.mubr.bf16.mxu0 %v7509_v26  ;;  %v2653_v19 = vsel %vm532_vm0, %v2648_v36, %v2652_v35  ;;  %v7564_v26 = vrot.slane %v7562_v43, 1  ;;  %v7588_v36 = vrot.slane %v7586_v28, 1  ;;  %v22007_v35 = vld [vmem:[%s20767_s29 + $0x84] sm:$0xff]   ;;  %v7622_v43 = vshrl.u32 %v22019_v3, 16 }
 0x360   : > { %17923 = vmatprep.subr.bf16.mxu0 %v20280_v21  ;;  %17342 = vmatmul.mubr.bf16.gmra.mrb[44].mxu1 %v2653_v19  ;;  %v7572_v31 = vrot.slane %v7570_v13, 1  ;;  %v7590_v19 = vshrl.u32 %v21989_v53, 16  ;;  %v7606_v11 = vshrl.u32 %v22007_v35, 16  ;;  %v22040_v13 = vld [vmem:[%s20767_s29 + $0xac] sm:$0xff]  }
 0x361   : > { %v7568_v39 = vor.u32 %v7566_v29, %v7564_v26  ;;  %v7565_v63 = vsel %vm532_vm0, %v7560_v16, %v7564_v26  ;;  %v7628_v29 = vrot.slane %v7626_v1, 1 }
 0x362   : > { %v7576_v41 = vor.u32 %v7574_v42, %v7572_v31 }
 0x363   : > { %17924 = vmatpush3.bf16.msra.mxu0 %v20280_v21  ;;  %v21986_v21 = vld [vmem:[%s20767_s29 + $0x6c] sm:$0xff]   ;;  %v7573_v14 = vsel %vm532_vm0, %v7568_v39, %v7572_v31  ;;  %v7632_v26 = vor.u32 %v7630_v51, %v7628_v29  ;;  %v22043_v39 = vld [vmem:[%s20767_s29 + $0xb4] sm:$0xff]   ;;  %v7642_v31 = vshll.u32 %v22040_v13, 16  ;;  %v8047_v51 = vrot.slane %v21893_v50, 1 }
 0x364   : > { %17925 = vmatprep.subr.bf16.mxu0 %v20289_v30  ;;  %v7578_v55 = vshll.u32 %v21986_v21, 16  ;;  %v7582_v8 = vshrl.u32 %v21986_v21, 16  ;;  %v20330_v50 = vld [vmem:[%s24340_s4 + $0x190] sm:$0xff]  }
 0x365   : > { %v7644_v28 = vrot.slane %v7642_v31, 1  ;;  %v20332_v31 = vld [vmem:[%s24340_s4 + $0x1a0] sm:$0xff]  }
 0x366   : > { %17878 = vmatmul.mubr.bf16.gmra.mrb[4].mxu0 %v7517_v15  ;;  %v7580_v44 = vrot.slane %v7578_v55, 1 }
 0x367   : > { %17881 = vmatprep.mubr.bf16.mxu0 %v7525_v49  ;;  %17926 = vmatpush3.bf16.msra.mxu0 %v20289_v30  ;;  %v7602_v49 = vshll.u32 %v22007_v35, 16 }
 0x368   : > { %17927 = vmatprep.subr.bf16.mxu0 %v20294_v24  ;;  %v7584_v30 = vor.u32 %v7582_v8, %v7580_v44  ;;  %v7581_v57 = vsel %vm532_vm0, %v7576_v41, %v7580_v44  ;;  %v7650_v8 = vshll.u32 %v22043_v39, 16  ;;  %v22052_v44 = vld [vmem:[%s20767_s29 + $0xbc] sm:$0xff]  }
 0x369   : > { %v7604_v20 = vrot.slane %v7602_v49, 1  ;;  %v7662_v49 = vshrl.u32 %v22052_v44, 16 }
 0x36a   : > { %v7589_v15 = vsel %vm532_vm0, %v7584_v30, %v7588_v36 }
 0x36b   : > { %17928 = vmatpush3.bf16.msra.mxu0 %v20294_v24  ;;  %v7592_v24 = vor.u32 %v7590_v19, %v7588_v36  ;;  %v7652_v36 = vrot.slane %v7650_v8, 1 }
 0x36c   : > { %17929 = vmatprep.subr.bf16.mxu0 %v20303_v62 }
 0x36e   : > { %17882 = vmatmul.mubr.bf16.gmra.mrb[8].mxu0 %v7533_v0  ;;  %v7605_v0 = vsel %vm532_vm0, %v7600_v37, %v7604_v20 }
 0x36f   : > { %17885 = vmatprep.mubr.bf16.mxu0 %v7541_v34  ;;  %17930 = vmatpush3.bf16.msra.mxu0 %v20303_v62  ;;  %v7597_v62 = vsel %vm532_vm0, %v7592_v24, %v7596_v45  ;;  %v7618_v34 = vshll.u32 %v22019_v3, 16  ;;  %v7666_v45 = vshll.u32 %v22055_v6, 16 }
 0x370   : > { %17931 = vmatprep.subr.bf16.mxu0 %v20308_v9 }
 0x371   : > { %v7620_v22 = vrot.slane %v7618_v34, 1 }
 0x373   : > { %17932 = vmatpush3.bf16.msra.mxu0 %v20308_v9  ;;  %v7608_v9 = vor.u32 %v7606_v11, %v7604_v20  ;;  %v22064_v20 = vld [vmem:[%s20767_s29 + $0xcc] ss:$0 sps:$4 sm:$0x11]   ;;  %v8023_v11 = vld [vmem:[%s20767_s29 + $0xc] sm:$0xe] }
 0x374   : > { %17933 = vmatprep.subr.bf16.mxu0 %v20317_v46  ;;  %v7674_v34 = vshll.u32 %v22064_v20, 16 }
 0x376   : > { %17886 = vmatmul.mubr.bf16.gmra.mrb[12].mxu0 %v7549_v47  ;;  %v7621_v47 = vsel %vm532_vm0, %v7616_v12, %v7620_v22 }
 0x377   : > { %17889 = vmatprep.mubr.bf16.mxu0 %v7557_v4  ;;  %17934 = vmatpush3.bf16.msra.mxu0 %v20317_v46  ;;  %v7613_v46 = vsel %vm532_vm0, %v7608_v9, %v7612_v59  ;;  %v7634_v4 = vshll.u32 %v22031_v25, 16  ;;  %v15826_v9 = vcombine.low %v8023_v11, %v21874_v48 }
 0x378   : > { %17935 = vmatprep.subr.bf16.mxu0 %v20322_v38 }
 0x379   : > { %v7636_v16 = vrot.slane %v7634_v4, 1  ;;  %v8044_v1 = vrot.slane %v15826_v9, 1  ;;  %v8049_v4 = vrot.slane %v21897_v27, 1 }
 0x37b   : > { %17936 = vmatpush3.bf16.msra.mxu0 %v20322_v38  ;;  %v7624_v38 = vor.u32 %v7622_v43, %v7620_v22  ;;  %v7637_v42 = vsel %vm532_vm0, %v7632_v26, %v7636_v16  ;;  %v7676_v22 = vrot.slane %v7674_v34, 1  ;;  %v8050_v48 = vsel %vm1344_vm1, %v8047_v51, %v8049_v4 }
 0x37c   : > { %17985 = vmatprep.subr.bf16.mxu0 %v21994_v60  ;;  %v8053_v26 = vrot.slane %v21913_v58, 1  ;;  %v8057_v58 = vrot.slane %v21933_v2, 1  ;;  %v8061_v2 = vrot.slane %v21953_v61, 1  ;;  %v8065_v61 = vrot.slane %v21971_v40, 1 }
 0x37d   : > { %v7629_v55 = vsel %vm532_vm0, %v7624_v38, %v7628_v29  ;;  %v20329_v38 = vld [vmem:[%s24340_s4 + $0x188] sm:$0xff]  }
 0x37e   : > { %17890 = vmatmul.mubr.bf16.gmra.mrb[16].mxu0 %v7565_v63  ;;  %v7638_v63 = vshrl.u32 %v22031_v25, 16 }
 0x37f   : > { %17893 = vmatprep.mubr.bf16.mxu0 %v7573_v14  ;;  %v7646_v14 = vshrl.u32 %v22040_v13, 16 }
 0x380   : > { %v7640_v41 = vor.u32 %v7638_v63, %v7636_v16 }
 0x381   : > { %v7648_v30 = vor.u32 %v7646_v14, %v7644_v28  ;;  %v20334_v14 = vld [vmem:[%s24340_s4 + $0x1b0] sm:$0xff]  }
 0x382   : > { %v7645_v19 = vsel %vm532_vm0, %v7640_v41, %v7644_v28  ;;  %v20335_v41 = vld [vmem:[%s24340_s4 + $0x1b8] sm:$0xff]  }
 0x383   : > { %v7653_v17 = vsel %vm532_vm0, %v7648_v30, %v7652_v36  ;;  %v22118_v30 = vld [vmem:[%s24340_s4 + $0x1c0] sm:$0xff]  }
 0x386   : > { %17894 = vmatmul.mubr.bf16.gmra.mrb[20].mxu0 %v7581_v57  ;;  %v7658_v57 = vshll.u32 %v22052_v44, 16 }
 0x387   : > { %17897 = vmatprep.mubr.bf16.mxu0 %v7589_v15  ;;  %v7654_v15 = vshrl.u32 %v22043_v39, 16 }
 0x388   : > { %v7660_v24 = vrot.slane %v7658_v57, 1 }
 0x389   : > { %v7656_v37 = vor.u32 %v7654_v15, %v7652_v36  ;;  %v8069_v15 = vrot.slane %v21989_v53, 1 }
 0x38a   : > { %v7664_v10 = vor.u32 %v7662_v49, %v7660_v24 }
 0x38e   : > { %17898 = vmatmul.mubr.bf16.gmra.mrb[24].mxu0 %v7597_v62  ;;  %v7668_v62 = vrot.slane %v7666_v45, 1 }
 0x38f   : > { %17901 = vmatprep.mubr.bf16.mxu0 %v7605_v0  ;;  %v7661_v0 = vsel %vm532_vm0, %v7656_v37, %v7660_v24 }
 0x390   : > { %v7669_v59 = vsel %vm532_vm0, %v7664_v10, %v7668_v62  ;;  %v7672_v12 = vor.u32 %v7670_v54, %v7668_v62  ;;  %v8071_v10 = vrot.slane %v22004_v7, 1  ;;  %v8077_v7 = vrot.slane %v22019_v3, 1 }
 0x392   : > { %v7677_v43 = vsel %vm532_vm0, %v7672_v12, %v7676_v22 }
 0x396   : > { %17902 = vmatmul.mubr.bf16.gmra.mrb[28].mxu0 %v7613_v46  ;;  %v8045_v46 = vrot.slane %v21884_v5, 1  ;;  %v8051_v5 = vrot.slane %v21909_v52, 1  ;;  %v8055_v52 = vrot.slane %v21928_v23, 1  ;;  %v8059_v23 = vrot.slane %v21950_v18, 1 }
 0x397   : > { %17905 = vmatprep.mubr.bf16.mxu0 %v7621_v47  ;;  %v8063_v18 = vrot.slane %v21968_v32, 1  ;;  %v8067_v32 = vrot.slane %v21986_v21, 1  ;;  %v8073_v21 = vrot.slane %v22007_v35, 1 }
 0x398   : > { %v8046_v47 = vsel %vm1344_vm1, %v8044_v1, %v8045_v46  ;;  %v8048_v29 = vsel %vm1344_vm1, %v8045_v46, %v8047_v51  ;;  %v8052_v27 = vsel %vm1344_vm1, %v8049_v4, %v8051_v5  ;;  %v8054_v16 = vsel %vm1344_vm1, %v8051_v5, %v8053_v26 }
 0x399   : > { %v8058_v63 = vsel %vm1344_vm1, %v8055_v52, %v8057_v58  ;;  %v8060_v8 = vsel %vm1344_vm1, %v8057_v58, %v8059_v23  ;;  %v8062_v28 = vsel %vm1344_vm1, %v8059_v23, %v8061_v2  ;;  %v8064_v36 = vsel %vm1344_vm1, %v8061_v2, %v8063_v18 }
 0x39a   : > { %v8066_v57 = vsel %vm1344_vm1, %v8063_v18, %v8065_v61  ;;  %v8068_v45 = vsel %vm1344_vm1, %v8065_v61, %v8067_v32  ;;  %v8070_v24 = vsel %vm1344_vm1, %v8067_v32, %v8069_v15  ;;  %v8074_v54 = vsel %vm1344_vm1, %v8071_v10, %v8073_v21  ;;  %v20337_v18 = vld [vmem:[%s20767_s29 + $0x20] sm:$0xff]   ;;  %v20339_v61 = vld [vmem:[%s20767_s29 + $0x28] sm:$0xff]  }
 0x39e   : > { %17906 = vmatmul.mubr.bf16.gmra.mrb[32].mxu0 %v7629_v55  ;;  %v8056_v55 = vsel %vm1344_vm1, %v8053_v26, %v8055_v52  ;;  %v8089_v52 = vrot.slane %v22055_v6, 1 }
 0x39f   : > { %17909 = vmatprep.mubr.bf16.mxu0 %v7637_v42  ;;  %v20333_v42 = vld [vmem:[%s24340_s4 + $0x1a8] sm:$0xff]  }
 0x3a6   : > { %17910 = vmatmul.mubr.bf16.gmra.mrb[36].mxu0 %v7645_v19 }
 0x3a7   : > { %17913 = vmatprep.mubr.bf16.mxu0 %v7653_v17 }
 0x3a8   : > { %v22123_v19 = vpop.f32.mrb[0].mxu1 }
 0x3a9   : > { %v22126_v40 = vpop.f32.mrb[1].mxu1 }
 0x3aa   : > { %v22129_v17 = vpop.f32.mrb[2].mxu1 }
 0x3ab   : > { %v22131_v49 = vpop.f32.mrb[3].mxu1 }
 0x3ae   : > { %17914 = vmatmul.mubr.bf16.gmra.mrb[40].mxu0 %v7661_v0  ;;  %v8072_v0 = vsel %vm1344_vm1, %v8069_v15, %v8071_v10  ;;  %v20346_v15 = vld [vmem:[%s24340_s4 + $0x1d0] sm:$0xff]  }
 0x3af   : > { %17917 = vmatprep.mubr.bf16.mxu0 %v7669_v59  ;;  %v8075_v59 = vrot.slane %v22016_v33, 1  ;;  %v8081_v33 = vrot.slane %v22031_v25, 1  ;;  %v20340_v10 = vld [vmem:[%s20767_s29 + $0x30] sm:$0xff]  }
 0x3b0   : > { %v22135_v37 = vpop.f32.mrb[4].mxu1 }
 0x3b1   : > { %v22138_v62 = vpop.f32.mrb[5].mxu1  ;;  %v8076_v22 = vsel %vm1344_vm1, %v8073_v21, %v8075_v59  ;;  %v8078_v1 = vsel %vm1344_vm1, %v8075_v59, %v8077_v7  ;;  %v20342_v21 = vld [vmem:[%s20767_s29 + $0x38] sm:$0xff]   ;;  %v20354_v59 = vld [vmem:[%s24340_s4 + $0x1e0] sm:$0xff]  }
 0x3b2   : > { %v22141_v11 = vpop.f32.mrb[6].mxu1 }
 0x3b3   : > { %v22143_v53 = vpop.f32.mrb[7].mxu1 }
 0x3b6   : > { %17918 = vmatmul.mubr.bf16.gmra.mrb[44].mxu0 %v7677_v43  ;;  %v8079_v43 = vrot.slane %v22028_v56, 1  ;;  %v8085_v56 = vrot.slane %v22043_v39, 1 }
 0x3b7   : > { %17937 = vmatprep.mubr.bf16.mxu0 %v8046_v47 }
 0x3b8   : > { %v22147_v34 = vpop.f32.mrb[8].mxu1  ;;  %v8080_v4 = vsel %vm1344_vm1, %v8077_v7, %v8079_v43 }
 0x3b9   : > { %v22150_v9 = vpop.f32.mrb[9].mxu1 }
 0x3ba   : > { %v22153_v12 = vpop.f32.mrb[10].mxu1 }
 0x3bb   : > { %v22155_v35 = vpop.f32.mrb[11].mxu1 }
 0x3be   : > { %17938 = vmatmul.mubr.bf16.vlgmr.msra.gmra.mrb[0].mxu0 %v8048_v29  ;;  %v8082_v29 = vsel %vm1344_vm1, %v8079_v43, %v8081_v33  ;;  %v20344_v43 = vld [vmem:[%s20767_s29 + $0x48] sm:$0xff]  }
 0x3bf   : > { %17986 = vmatpush3.bf16.msra.mxu0 %v21994_v60  ;;  %17941 = vmatprep.mubr.bf16.mxu0 %v8050_v48  ;;  %v20331_v60 = vld [vmem:[%s24340_s4 + $0x198] sm:$0xff]  }
 0x3c0   : > { %17987 = vmatprep.subr.bf16.mxu0 %v20329_v38  ;;  %v22159_v46 = vpop.f32.mrb[12].mxu1 }
 0x3c1   : > { %v22162_v47 = vpop.f32.mrb[13].mxu1 }
 0x3c2   : > { %v22165_v51 = vpop.f32.mrb[14].mxu1 }
 0x3c3   : > { %17988 = vmatpush3.bf16.msra.mxu0 %v20329_v38  ;;  %v22167_v3 = vpop.f32.mrb[15].mxu1  ;;  %v8083_v38 = vrot.slane %v22040_v13, 1 }
 0x3c4   : > { %17989 = vmatprep.subr.bf16.mxu0 %v20330_v50 }
 0x3c6   : > { %17942 = vmatmul.mubr.bf16.gmra.mrb[4].mxu0 %v8052_v27  ;;  %v8086_v27 = vsel %vm1344_vm1, %v8083_v38, %v8085_v56 }
 0x3c7   : > { %17945 = vmatprep.mubr.bf16.mxu0 %v8054_v16  ;;  %17990 = vmatpush3.bf16.msra.mxu0 %v20330_v50  ;;  %v8084_v50 = vsel %vm1344_vm1, %v8081_v33, %v8083_v38  ;;  %v20357_v33 = vld [vmem:[%s24340_s4 + $0x1e8] sm:$0xff]   ;;  %v20362_v38 = vld [vmem:[%s24340_s4 + $0x1f0] sm:$0xff]  }
 0x3c8   : > { %17991 = vmatprep.subr.bf16.mxu0 %v20331_v60  ;;  %v22171_v48 = vpop.f32.mrb[16].mxu1 }
 0x3c9   : > { %v22174_v5 = vpop.f32.mrb[17].mxu1 }
 0x3ca   : > { %v22177_v26 = vpop.f32.mrb[18].mxu1 }
 0x3cb   : > { %17992 = vmatpush3.bf16.msra.mxu0 %v20331_v60  ;;  %v22179_v25 = vpop.f32.mrb[19].mxu1  ;;  %v8087_v60 = vrot.slane %v22052_v44, 1  ;;  %v8091_v44 = vrot.slane %v22064_v20, 1 }
 0x3cc   : > { %17993 = vmatprep.subr.bf16.mxu0 %v20332_v31 }
 0x3cd   : > { %v8092_v2 = vsel %vm1344_vm1, %v8089_v52, %v8091_v44  ;;  %v22275_v44 = vld [vmem:[%s24340_s4 + $0x200] sm:$0xff]  }
 0x3ce   : > { %17946 = vmatmul.mubr.bf16.gmra.mrb[8].mxu0 %v8056_v55  ;;  %v8090_v55 = vsel %vm1344_vm1, %v8087_v60, %v8089_v52  ;;  %v20365_v52 = vld [vmem:[%s24340_s4 + $0x1f8] sm:$0xff]  }
 0x3cf   : > { %17949 = vmatprep.mubr.bf16.mxu0 %v8058_v63  ;;  %17994 = vmatpush3.bf16.msra.mxu0 %v20332_v31  ;;  %v8088_v31 = vsel %vm1344_vm1, %v8085_v56, %v8087_v60  ;;  %v20347_v60 = vld [vmem:[%s20767_s29 + $0x58] sm:$0xff]  }
 0x3d0   : > { %17995 = vmatprep.subr.bf16.mxu0 %v20333_v42  ;;  %v22183_v16 = vpop.f32.mrb[20].mxu1 }
 0x3d1   : > { %v22186_v13 = vpop.f32.mrb[21].mxu1 }
 0x3d2   : > { %24450 = vst [vmem:[#allocation4_spill] sm:$0xff] %v22186_v13  ;;  %v22189_v39 = vpop.f32.mrb[22].mxu1 }
 0x3d3   : > { %17996 = vmatpush3.bf16.msra.mxu0 %v20333_v42  ;;  %24451 = vst [vmem:[#allocation3_spill] sm:$0xff] %v22189_v39  ;;  %v22191_v58 = vpop.f32.mrb[23].mxu1 }
 0x3d4   : > { %17997 = vmatprep.subr.bf16.mxu0 %v20334_v14  ;;  %24452 = vst [vmem:[#allocation5_spill] sm:$0xff] %v22191_v58  ;;  %v9698_v58 = vld [vmem:[%s20767_s29 + $0x18] sm:$0xe] }
 0x3d6   : > { %17950 = vmatmul.mubr.bf16.gmra.mrb[12].mxu0 %v8060_v8 }
 0x3d7   : > { %17953 = vmatprep.mubr.bf16.mxu0 %v8062_v28  ;;  %17998 = vmatpush3.bf16.msra.mxu0 %v20334_v14  ;;  %v20336_v14 = vld [vmem:[%s20767_s29 + $0x18] sm:$0xff]  }
 0x3d8   : > { %17999 = vmatprep.subr.bf16.mxu0 %v20335_v41 }
 0x3db   : > { %18000 = vmatpush3.bf16.msra.mxu0 %v20335_v41 }
 0x3dc   : > { %18049 = vmatprep.subr.bf16.mxu0 %v22118_v30 }
 0x3de   : > { %17954 = vmatmul.mubr.bf16.gmra.mrb[16].mxu0 %v8064_v36  ;;  %v20341_v36 = vld [vmem:[%s24340_s4 + $0x1c8] sm:$0xff]  }
 0x3df   : > { %17957 = vmatprep.mubr.bf16.mxu0 %v8066_v57 }
 0x3e6   : > { %17958 = vmatmul.mubr.bf16.gmra.mrb[20].mxu0 %v8068_v45 }
 0x3e7   : > { %17961 = vmatprep.mubr.bf16.mxu0 %v8070_v24 }
 0x3ee   : > { %17962 = vmatmul.mubr.bf16.gmra.mrb[24].mxu0 %v8072_v0 }
 0x3ef   : > { %17965 = vmatprep.mubr.bf16.mxu0 %v8074_v54 }
 0x3f6   : > { %17966 = vmatmul.mubr.bf16.gmra.mrb[28].mxu0 %v8076_v22 }
 0x3f7   : > { %17969 = vmatprep.mubr.bf16.mxu0 %v8078_v1  ;;  %v20343_v1 = vld [vmem:[%s20767_s29 + $0x40] sm:$0xff]  }
 0x3fe   : > { %17970 = vmatmul.mubr.bf16.gmra.mrb[32].mxu0 %v8080_v4 }
 0x3ff   : > { %17973 = vmatprep.mubr.bf16.mxu0 %v8082_v29 }
 0x406   : > { %17974 = vmatmul.mubr.bf16.gmra.mrb[36].mxu0 %v8084_v50 }
 0x407   : > { %17977 = vmatprep.mubr.bf16.mxu0 %v8086_v27  ;;  %v20345_v27 = vld [vmem:[%s20767_s29 + $0x50] sm:$0xff]  }
 0x408   : > { %v22195_v63 = vpop.f32.mrb[24].mxu1 }
 0x409   : > { %24453 = vst [vmem:[#allocation6_spill] sm:$0xff] %v22195_v63  ;;  %v22198_v42 = vpop.f32.mrb[25].mxu1 }
 0x40a   : > { %24454 = vst [vmem:[#allocation7_spill] sm:$0xff] %v22198_v42  ;;  %v22200_v23 = vpop.f32.mrb[26].mxu1  ;;  %v22613_v42 = vld [vmem:[%s20767_s29 + $0xd0] sm:$0xff]  }
 0x40b   : > { %24455 = vst [vmem:[#allocation8_spill] sm:$0xff] %v22200_v23  ;;  %v22202_v6 = vpop.f32.mrb[27].mxu1 }
 0x40c   : > { %24456 = vst [vmem:[#allocation9_spill] sm:$0xff] %v22202_v6 }
 0x40e   : > { %17978 = vmatmul.mubr.bf16.gmra.mrb[40].mxu0 %v8088_v31 }
 0x40f   : > { %17981 = vmatprep.mubr.bf16.mxu0 %v8090_v55 }
 0x410   : > { %v22206_v8 = vpop.f32.mrb[28].mxu1 }
 0x411   : > { %24457 = vst [vmem:[#allocation10_spill] sm:$0xff] %v22206_v8  ;;  %v22208_v28 = vpop.f32.mrb[29].mxu1 }
 0x412   : > { %24458 = vst [vmem:[#allocation11_spill] sm:$0xff] %v22208_v28  ;;  %v22210_v41 = vpop.f32.mrb[30].mxu1  ;;  %v22562_v28 = vld [vmem:[%s20767_s29 + $0xb0] sm:$0xff]  }
 0x413   : > { %24459 = vst [vmem:[#allocation12_spill] sm:$0xff] %v22210_v41  ;;  %v22212_v20 = vpop.f32.mrb[31].mxu1  ;;  %v9313_v8 = vshrl.u32 %v22562_v28, 16 }
 0x414   : > { %24460 = vst [vmem:[#allocation13_spill] sm:$0xff] %v22212_v20  ;;  %v22538_v20 = vld [vmem:[%s20767_s29 + $0xa0] sm:$0xff]  }
 0x416   : > { %17982 = vmatmul.mubr.bf16.gmra.mrb[44].mxu0 %v8092_v2 }
 0x417   : > { %18001 = vmatprep.mubr.bf16.mxu0 %v20336_v14 }
 0x418   : > { %v22219_v57 = vpop.f32.mrb[32].mxu1 }
 0x419   : > { %24461 = vst [vmem:[#allocation14_spill] sm:$0xff] %v22219_v57  ;;  %v22222_v32 = vpop.f32.mrb[33].mxu1 }
 0x41a   : > { %24462 = vst [vmem:[#allocation15_spill] sm:$0xff] %v22222_v32  ;;  %v22227_v45 = vpop.f32.mrb[34].mxu1  ;;  %v22490_v32 = vld [vmem:[%s20767_s29 + $0x80] sm:$0xff]  }
 0x41b   : > { %24463 = vst [vmem:[#allocation16_spill] sm:$0xff] %v22227_v45  ;;  %v22229_v24 = vpop.f32.mrb[35].mxu1 }
 0x41c   : > { %24464 = vst [vmem:[#allocation17_spill] sm:$0xff] %v22229_v24  ;;  %v22460_v24 = vld [vmem:[%s20767_s29 + $0x70] sm:$0xff]  }
 0x41e   : > { %18002 = vmatmul.mubr.bf16.vlgmr.msra.gmra.mrb[0].mxu0 %v20337_v18  ;;  %v20348_v18 = vld [vmem:[%s20767_s29 + $0x60] sm:$0xff]  }
 0x41f   : > { %18050 = vmatpush3.bf16.msra.mxu0 %v22118_v30  ;;  %18005 = vmatprep.mubr.bf16.mxu0 %v20339_v61  ;;  %v20349_v30 = vld [vmem:[%s24340_s4 + $0x1d8] sm:$0xff]   ;;  %v20350_v61 = vld [vmem:[%s20767_s29 + $0x68] sm:$0xff]  }
 0x420   : > { %18051 = vmatprep.subr.bf16.mxu0 %v20341_v36  ;;  %v22236_v0 = vpop.f32.mrb[36].mxu1 }
 0x421   : > { %24465 = vst [vmem:[#allocation18_spill] sm:$0xff] %v22236_v0  ;;  %v22238_v54 = vpop.f32.mrb[37].mxu1 }
 0x422   : > { %24466 = vst [vmem:[#allocation19_spill] sm:$0xff] %v22238_v54  ;;  %v22243_v7 = vpop.f32.mrb[38].mxu1  ;;  %v22430_v54 = vld [vmem:[%s20767_s29 + $0x60] sm:$0xff]  }
 0x423   : > { %18052 = vmatpush3.bf16.msra.mxu0 %v20341_v36  ;;  %24467 = vst [vmem:[#allocation20_spill] sm:$0xff] %v22243_v7  ;;  %v22245_v22 = vpop.f32.mrb[39].mxu1  ;;  %v20351_v36 = vld [vmem:[%s20767_s29 + $0x70] sm:$0xff]  }
 0x424   : > { %18053 = vmatprep.subr.bf16.mxu0 %v20346_v15  ;;  %24468 = vst [vmem:[#allocation21_spill] sm:$0xff] %v22245_v22 }
 0x426   : > { %18006 = vmatmul.mubr.bf16.gmra.mrb[4].mxu0 %v20340_v10  ;;  %v20353_v10 = vld [vmem:[%s20767_s29 + $0x80] sm:$0xff]  }
 0x427   : > { %18009 = vmatprep.mubr.bf16.mxu0 %v20342_v21  ;;  %18054 = vmatpush3.bf16.msra.mxu0 %v20346_v15  ;;  %v20352_v15 = vld [vmem:[%s20767_s29 + $0x78] sm:$0xff]   ;;  %v20355_v21 = vld [vmem:[%s20767_s29 + $0x88] sm:$0xff]  }
 0x428   : > { %18055 = vmatprep.subr.bf16.mxu0 %v20349_v30  ;;  %v22252_v4 = vpop.f32.mrb[40].mxu1 }
 0x429   : > { %24469 = vst [vmem:[#allocation22_spill] sm:$0xff] %v22252_v4  ;;  %v22254_v29 = vpop.f32.mrb[41].mxu1 }
 0x42a   : > { %24470 = vst [vmem:[#allocation23_spill] sm:$0xff] %v22254_v29  ;;  %v22259_v56 = vpop.f32.mrb[42].mxu1 }
 0x42b   : > { %18056 = vmatpush3.bf16.msra.mxu0 %v20349_v30  ;;  %24471 = vst [vmem:[#allocation24_spill] sm:$0xff] %v22259_v56  ;;  %v22261_v50 = vpop.f32.mrb[43].mxu1  ;;  %v20356_v30 = vld [vmem:[%s20767_s29 + $0x90] sm:$0xff]   ;;  %v22390_v56 = vld [vmem:[%s20767_s29 + $0x48] sm:$0xff]  }
 0x42c   : > { %18057 = vmatprep.subr.bf16.mxu0 %v20354_v59  ;;  %24472 = vst [vmem:[#allocation25_spill] sm:$0xff] %v22261_v50  ;;  %v22372_v50 = vld [vmem:[%s20767_s29 + $0x40] sm:$0xff]  }
 0x42e   : > { %18010 = vmatmul.mubr.bf16.gmra.mrb[8].mxu0 %v20343_v1  ;;  %v10216_v1 = vld [vmem:[%s24338_s2] sm:$0xff] }
 0x42f   : > { %18013 = vmatprep.mubr.bf16.mxu0 %v20344_v43  ;;  %18058 = vmatpush3.bf16.msra.mxu0 %v20354_v59  ;;  %v20358_v59 = vld [vmem:[%s20767_s29 + $0x98] sm:$0xff]   ;;  %v24347_v43 = vmov 0  }
 0x430   : > { %18059 = vmatprep.subr.bf16.mxu0 %v20357_v33  ;;  %19980 = vset.pattern.permute.xlu0 %v24347_v43  ;;  %10552 = vst [vmem:[#allocation2] sm:$0xff] %v24347_v43  ;;  %10553 = vst [vmem:[#allocation2 + $0x8] sm:$0xff] %v24347_v43 }
 0x431   : > { %10554 = vst [vmem:[#allocation2 + $0xd0] sm:$0xff] %v24347_v43  ;;  %10555 = vst [vmem:[#allocation2 + $0xd8] sm:$0xff] %v24347_v43  ;;  %10266 = vperm.xlu0 %19980, %v10216_v1   ;;  %19981 = vset.pattern.permute.xlu1 %v24347_v43  ;;  %v22327_v1 = vld [vmem:[%s20767_s29 + $0x20] sm:$0xff]   ;;  %v20367_v43 = vld [vmem:[%s20767_s29 + $0xd0] sm:$0xff]  }
 0x433   : > { %18060 = vmatpush3.bf16.msra.mxu0 %v20357_v33  ;;  %v22268_v31 = vpop.f32.mrb[44].mxu1  ;;  %v20359_v33 = vld [vmem:[%s20767_s29 + $0xa0] sm:$0xff]  }
 0x434   : > { %18061 = vmatprep.subr.bf16.mxu0 %v20362_v38  ;;  %24473 = vst [vmem:[#allocation26_spill] sm:$0xff] %v22268_v31  ;;  %v22270_v55 = vpop.f32.mrb[45].mxu1 }
 0x435   : > { %24474 = vst [vmem:[#allocation27_spill] sm:$0xff] %v22270_v55  ;;  %v22277_v2 = vpop.f32.mrb[46].mxu1  ;;  %v10230_v55 = vld [vmem:[%s24338_s2 + $0x70] sm:$0xff] }
 0x436   : > { %18014 = vmatmul.mubr.bf16.gmra.mrb[12].mxu0 %v20345_v27  ;;  %24475 = vst [vmem:[#allocation28_spill] sm:$0xff] %v22277_v2  ;;  %v22279_v14 = vpop.f32.mrb[47].mxu1  ;;  %v10218_v27 = vld [vmem:[%s24338_s2 + $0x10] sm:$0xff]  ;;  %v10229_v2 = vld [vmem:[%s24338_s2 + $0x68] sm:$0xff] }
 0x437   : > { %18017 = vmatprep.mubr.bf16.mxu0 %v20347_v60  ;;  %18062 = vmatpush3.bf16.msra.mxu0 %v20362_v38  ;;  %24476 = vst [vmem:[#allocation29_spill] sm:$0xff] %v22279_v14  ;;  %v20360_v38 = vld [vmem:[%s20767_s29 + $0xa8] sm:$0xff]  }
 0x438   : > { %18063 = vmatprep.subr.bf16.mxu0 %v20365_v52  ;;  %v10217_v60 = vld [vmem:[%s24338_s2 + $0x8] sm:$0xff]  ;;  %10276 = vperm.xlu1 %19981, %v10218_v27   ;;  %v10224_v27 = vld [vmem:[%s24338_s2 + $0x40] sm:$0xff] }
 0x439   : > { %10271 = vperm.xlu0 %19980, %v10217_v60   ;;  %v20364_v60 = vld [vmem:[%s20767_s29 + $0xc0] sm:$0xff]  }
 0x43b   : > { %18064 = vmatpush3.bf16.msra.mxu0 %v20365_v52  ;;  %v10219_v52 = vld [vmem:[%s24338_s2 + $0x18] sm:$0xff] }
 0x43c   : > { %18113 = vmatprep.subr.bf16.mxu0 %v22275_v44  ;;  %10281 = vperm.xlu1 %19981, %v10219_v52   ;;  %v20366_v52 = vld [vmem:[%s20767_s29 + $0xc8] sm:$0xff]  }
 0x43e   : > { %18018 = vmatmul.mubr.bf16.gmra.mrb[16].mxu0 %v20348_v18  ;;  %v8968_v18 = vld [vmem:[%s20767_s29 + $0x18] sm:$0xf] }
 0x43f   : > { %18021 = vmatprep.mubr.bf16.mxu0 %v20350_v61  ;;  %v22312_v61 = vld [vmem:[%s20767_s29 + $0x1c] sm:$0xf] }
 0x440   : > { %v15948_v13 = vcombine.low %v9698_v58, %v22312_v61 }
 0x446   : > { %18022 = vmatmul.mubr.bf16.gmra.mrb[20].mxu0 %v20351_v36  ;;  %v10220_v36 = vld [vmem:[%s24338_s2 + $0x20] sm:$0xff] }
 0x447   : > { %18025 = vmatprep.mubr.bf16.mxu0 %v20352_v15  ;;  %v20361_v15 = vld [vmem:[%s20767_s29 + $0xb0] sm:$0xff]   ;;  %10286 = vperm.xlu0 %19980, %v10220_v36  }
 0x44e   : > { %18026 = vmatmul.mubr.bf16.gmra.mrb[24].mxu0 %v20353_v10  ;;  %v20363_v10 = vld [vmem:[%s20767_s29 + $0xb8] sm:$0xff]  }
 0x44f   : > { %18029 = vmatprep.mubr.bf16.mxu0 %v20355_v21  ;;  %v15899_v21 = vcombine.low %v8968_v18, %v22312_v61 }
 0x451   : > { %v9158_v18 = vshrl.u32 %v15899_v21, 16 }
 0x456   : > { %18030 = vmatmul.mubr.bf16.gmra.mrb[28].mxu0 %v20356_v30  ;;  %v10221_v30 = vld [vmem:[%s24338_s2 + $0x28] sm:$0xff] }
 0x457   : > { %18033 = vmatprep.mubr.bf16.mxu0 %v20358_v59  ;;  %v10222_v59 = vld [vmem:[%s24338_s2 + $0x30] sm:$0xff]  ;;  %10291 = vperm.xlu1 %19981, %v10221_v30   ;;  %v10225_v30 = vld [vmem:[%s24338_s2 + $0x48] sm:$0xff] }
 0x458   : > { %10296 = vperm.xlu0 %19980, %v10222_v59   ;;  %v10226_v59 = vld [vmem:[%s24338_s2 + $0x50] sm:$0xff] }
 0x45c   : > { %10306 = vperm.xlu0 %19980, %v10224_v27   ;;  %v10227_v27 = vld [vmem:[%s24338_s2 + $0x58] sm:$0xff] }
 0x45e   : > { %18034 = vmatmul.mubr.bf16.gmra.mrb[32].mxu0 %v20359_v33  ;;  %v9160_v33 = vshll.u32 %v15899_v21, 16 }
 0x45f   : > { %18037 = vmatprep.mubr.bf16.mxu0 %v20360_v38  ;;  %v10223_v38 = vld [vmem:[%s24338_s2 + $0x38] sm:$0xff] }
 0x460   : > { %10301 = vperm.xlu1 %19981, %v10223_v38   ;;  %v9162_v36 = vrot.slane %v9160_v33, 1  ;;  %v22348_v33 = vld [vmem:[%s20767_s29 + $0x30] sm:$0xff]   ;;  %10316 = vperm.xlu0 %19980, %v10226_v59   ;;  %v22363_v59 = vld [vmem:[%s20767_s29 + $0x38] sm:$0xff]  }
 0x462   : > { %v9163_v38 = vor.u32 %v9162_v36, %v9158_v18 }
 0x464   : > { %10311 = vperm.xlu1 %19981, %v10225_v30  }
 0x466   : > { %18038 = vmatmul.mubr.bf16.gmra.mrb[36].mxu0 %v20361_v15  ;;  %v9165_v15 = vshll.u32 %v22327_v1, 16 }
 0x467   : > { %18041 = vmatprep.mubr.bf16.mxu0 %v20363_v10  ;;  %v22339_v10 = vld [vmem:[%s20767_s29 + $0x28] sm:$0xff]  }
 0x468   : > { %v9167_v21 = vrot.slane %v9165_v15, 1  ;;  %v9173_v14 = vshll.u32 %v22339_v10, 16  ;;  %10321 = vperm.xlu1 %19981, %v10227_v27   ;;  %v9177_v36 = vshrl.u32 %v22339_v10, 16  ;;  %v9181_v15 = vshll.u32 %v22348_v33, 16 }
 0x46a   : > { %v9168_v18 = vsel %vm532_vm0, %v9163_v38, %v9167_v21  ;;  %v9175_v30 = vrot.slane %v9173_v14, 1  ;;  %v9183_v31 = vrot.slane %v9181_v15, 1  ;;  %v10231_v14 = vld [vmem:[%s24338_s2 + $0x78] sm:$0xff] }
 0x46c   : > { %10331 = vperm.xlu1 %19981, %v10229_v2   ;;  %v9179_v38 = vor.u32 %v9177_v36, %v9175_v30  ;;  %v9185_v2 = vshrl.u32 %v22348_v33, 16  ;;  %v9197_v36 = vshll.u32 %v22372_v50, 16 }
 0x46e   : > { %18042 = vmatmul.mubr.bf16.gmra.mrb[40].mxu0 %v20364_v60  ;;  %v10228_v60 = vld [vmem:[%s24338_s2 + $0x60] sm:$0xff]  ;;  %v9199_v29 = vrot.slane %v9197_v36, 1  ;;  %v9209_v36 = vshrl.u32 %v22390_v56, 16 }
 0x46f   : > { %18045 = vmatprep.mubr.bf16.mxu0 %v20366_v52  ;;  %v9169_v52 = vshrl.u32 %v22327_v1, 16  ;;  %10326 = vperm.xlu0 %19980, %v10228_v60   ;;  %v9189_v60 = vshll.u32 %v22363_v59, 16 }
 0x470   : > { %10341 = vperm.xlu1 %19981, %v10231_v14  }
 0x471   : > { %v9171_v27 = vor.u32 %v9169_v52, %v9167_v21  ;;  %v9184_v52 = vsel %vm532_vm0, %v9179_v38, %v9183_v31  ;;  %v9191_v15 = vrot.slane %v9189_v60, 1  ;;  %v9187_v38 = vor.u32 %v9185_v2, %v9183_v31  ;;  %v20379_v60 = vld [vmem:[%s24340_s4 + $0x210] sm:$0xff]   ;;  %v10236_v31 = vld [vmem:[%s24338_s2 + $0xa0] sm:$0xff] }
 0x473   : > { %10336 = vperm.xlu0 %19980, %v10230_v55   ;;  %v9176_v21 = vsel %vm532_vm0, %v9171_v27, %v9175_v30  ;;  %v20374_v55 = vld [vmem:[%s24340_s4 + $0x208] sm:$0xff]   ;;  %v10234_v27 = vld [vmem:[%s24338_s2 + $0x90] sm:$0xff]  ;;  %v9192_v2 = vsel %vm532_vm0, %v9187_v38, %v9191_v15 }
 0x474   : > { %v10233_v30 = vld [vmem:[%s24338_s2 + $0x88] sm:$0xff]  ;;  %v10238_v38 = vld [vmem:[%s24338_s2 + $0xb0] sm:$0xff] }
 0x475   : > { %10351 = vperm.xlu1 %19981, %v10233_v30  }
 0x476   : > { %18046 = vmatmul.mubr.bf16.gmra.mrb[44].mxu0 %v20367_v43  ;;  %v10232_v43 = vld [vmem:[%s24338_s2 + $0x80] sm:$0xff] }
 0x477   : > { %18065 = vmatprep.mubr.bf16.mxu0 %v9168_v18  ;;  %v9193_v18 = vshrl.u32 %v22363_v59, 16  ;;  %10346 = vperm.xlu0 %19980, %v10232_v43   ;;  %v22400_v43 = vld [vmem:[%s20767_s29 + $0x50] sm:$0xff]  }
 0x478   : > { %v9213_v30 = vshll.u32 %v22400_v43, 16 }
 0x479   : > { %v9195_v14 = vor.u32 %v9193_v18, %v9191_v15  ;;  %v22421_v15 = vld [vmem:[%s20767_s29 + $0x58] sm:$0xff]  }
 0x47a   : > { %v9215_v7 = vrot.slane %v9213_v30, 1  ;;  %v20390_v30 = vld [vmem:[%s24340_s4 + $0x228] sm:$0xff]  }
 0x47b   : > { %10356 = vperm.xlu0 %19980, %v10234_v27   ;;  %v9200_v18 = vsel %vm532_vm0, %v9195_v14, %v9199_v29  ;;  %v20382_v27 = vld [vmem:[%s24340_s4 + $0x218] sm:$0xff]  }
 0x47e   : > { %18066 = vmatmul.mubr.bf16.vlgmr.msra.gmra.mrb[0].mxu0 %v9176_v21  ;;  %v10235_v21 = vld [vmem:[%s24338_s2 + $0x98] sm:$0xff] }
 0x47f   : > { %18114 = vmatpush3.bf16.msra.mxu0 %v22275_v44  ;;  %18069 = vmatprep.mubr.bf16.mxu0 %v9184_v52  ;;  %v9205_v44 = vshll.u32 %v22390_v56, 16  ;;  %v9201_v52 = vshrl.u32 %v22372_v50, 16 }
 0x480   : > { %18115 = vmatprep.subr.bf16.mxu0 %v20374_v55  ;;  %10361 = vperm.xlu1 %19981, %v10235_v21   ;;  %v20387_v21 = vld [vmem:[%s24340_s4 + $0x220] sm:$0xff]  }
 0x481   : > { %10366 = vperm.xlu0 %19980, %v10236_v31   ;;  %v9207_v4 = vrot.slane %v9205_v44, 1  ;;  %v9203_v14 = vor.u32 %v9201_v52, %v9199_v29  ;;  %v10239_v44 = vld [vmem:[%s24338_s2 + $0xb8] sm:$0xff]  ;;  %v9221_v31 = vshll.u32 %v22421_v15, 16  ;;  %v10240_v29 = vld [vmem:[%s24338_s2 + $0xc0] sm:$0xff] }
 0x483   : > { %18116 = vmatpush3.bf16.msra.mxu0 %v20374_v55  ;;  %v10237_v55 = vld [vmem:[%s24338_s2 + $0xa8] sm:$0xff]  ;;  %v9211_v22 = vor.u32 %v9209_v36, %v9207_v4  ;;  %v9229_v36 = vshll.u32 %v22430_v54, 16 }
 0x484   : > { %18117 = vmatprep.subr.bf16.mxu0 %v20379_v60  ;;  %10371 = vperm.xlu1 %19981, %v10237_v55   ;;  %v9223_v55 = vrot.slane %v9221_v31, 1  ;;  %v10243_v31 = vld [vmem:[%s24338_s2 + $0xd8] sm:$0xff] }
 0x485   : > { %10376 = vperm.xlu0 %19980, %v10238_v38   ;;  %v9216_v52 = vsel %vm532_vm0, %v9211_v22, %v9215_v7  ;;  %v10241_v22 = vld [vmem:[%s24338_s2 + $0xc8] sm:$0xff]  ;;  %v9231_v0 = vrot.slane %v9229_v36, 1  ;;  %v20398_v36 = vld [vmem:[%s24340_s4 + $0x238] sm:$0xff]  }
 0x486   : > { %18070 = vmatmul.mubr.bf16.gmra.mrb[4].mxu0 %v9192_v2  ;;  %v9217_v2 = vshrl.u32 %v22400_v43, 16 }
 0x487   : > { %18073 = vmatprep.mubr.bf16.mxu0 %v9200_v18  ;;  %18118 = vmatpush3.bf16.msra.mxu0 %v20379_v60  ;;  %v9208_v60 = vsel %vm532_vm0, %v9203_v14, %v9207_v4  ;;  %v9225_v18 = vshrl.u32 %v22421_v15, 16  ;;  %v22451_v4 = vld [vmem:[%s20767_s29 + $0x68] sm:$0xff]  }
 0x488   : > { %18119 = vmatprep.subr.bf16.mxu0 %v20382_v27  ;;  %10381 = vperm.xlu1 %19981, %v10239_v44   ;;  %v9219_v38 = vor.u32 %v9217_v2, %v9215_v7  ;;  %v20395_v44 = vld [vmem:[%s24340_s4 + $0x230] sm:$0xff]   ;;  %v10244_v7 = vld [vmem:[%s24338_s2 + $0xe0] sm:$0xff] }
 0x489   : > { %10386 = vperm.xlu0 %19980, %v10240_v29   ;;  %v9227_v14 = vor.u32 %v9225_v18, %v9223_v55  ;;  %v9237_v29 = vshll.u32 %v22451_v4, 16  ;;  %v9245_v18 = vshll.u32 %v22460_v24, 16 }
 0x48b   : > { %18120 = vmatpush3.bf16.msra.mxu0 %v20382_v27  ;;  %v10242_v27 = vld [vmem:[%s24338_s2 + $0xd0] sm:$0xff]  ;;  %v9232_v2 = vsel %vm532_vm0, %v9227_v14, %v9231_v0  ;;  %v9247_v45 = vrot.slane %v9245_v18, 1  ;;  %v22505_v18 = vld [vmem:[%s20767_s29 + $0x88] sm:$0xff]  }
 0x48c   : > { %18121 = vmatprep.subr.bf16.mxu0 %v20387_v21  ;;  %10391 = vperm.xlu1 %19981, %v10241_v22   ;;  %v9239_v22 = vrot.slane %v9237_v29, 1 }
 0x48d   : > { %10396 = vperm.xlu0 %19980, %v10242_v27   ;;  %v10246_v27 = vld [vmem:[%s24338_s2 + $0xf0] sm:$0xff] }
 0x48e   : > { %18074 = vmatmul.mubr.bf16.gmra.mrb[8].mxu0 %v9208_v60  ;;  %v9233_v60 = vshrl.u32 %v22430_v54, 16 }
 0x48f   : > { %18077 = vmatprep.mubr.bf16.mxu0 %v9216_v52  ;;  %18122 = vmatpush3.bf16.msra.mxu0 %v20387_v21  ;;  %v9224_v21 = vsel %vm532_vm0, %v9219_v38, %v9223_v55  ;;  %v9241_v52 = vshrl.u32 %v22451_v4, 16  ;;  %v22481_v55 = vld [vmem:[%s20767_s29 + $0x78] sm:$0xff]  }
 0x490   : > { %18123 = vmatprep.subr.bf16.mxu0 %v20390_v30  ;;  %10401 = vperm.xlu1 %19981, %v10243_v31   ;;  %v9235_v38 = vor.u32 %v9233_v60, %v9231_v0  ;;  %v10247_v31 = vld [vmem:[%s24338_s2 + $0xf8] sm:$0xff]  ;;  %v9253_v29 = vshll.u32 %v22481_v55, 16  ;;  %v9257_v60 = vshrl.u32 %v22481_v55, 16 }
 0x491   : > { %10406 = vperm.xlu0 %19980, %v10244_v7   ;;  %v9243_v14 = vor.u32 %v9241_v52, %v9239_v22  ;;  %v10248_v7 = vld [vmem:[%s24338_s2 + $0x100] sm:$0xff] }
 0x492   : > { %v9240_v0 = vsel %vm532_vm0, %v9235_v38, %v9239_v22  ;;  %v9255_v52 = vrot.slane %v9253_v29, 1  ;;  %v10249_v22 = vld [vmem:[%s24338_s2 + $0x108] sm:$0xff]  ;;  %v9269_v29 = vshll.u32 %v22505_v18, 16 }
 0x493   : > { %18124 = vmatpush3.bf16.msra.mxu0 %v20390_v30  ;;  %v10245_v30 = vld [vmem:[%s24338_s2 + $0xe8] sm:$0xff] }
 0x494   : > { %18125 = vmatprep.subr.bf16.mxu0 %v20395_v44  ;;  %10411 = vperm.xlu1 %19981, %v10245_v30  }
 0x495   : > { %10416 = vperm.xlu0 %19980, %v10246_v27   ;;  %v9259_v27 = vor.u32 %v9257_v60, %v9255_v52 }
 0x496   : > { %18078 = vmatmul.mubr.bf16.gmra.mrb[12].mxu0 %v9224_v21  ;;  %v9248_v21 = vsel %vm532_vm0, %v9243_v14, %v9247_v45  ;;  %v22514_v14 = vld [vmem:[%s20767_s29 + $0x90] sm:$0xff]  }
 0x497   : > { %18081 = vmatprep.mubr.bf16.mxu0 %v9232_v2  ;;  %18126 = vmatpush3.bf16.msra.mxu0 %v20395_v44  ;;  %v9249_v44 = vshrl.u32 %v22460_v24, 16  ;;  %v9261_v2 = vshll.u32 %v22490_v32, 16  ;;  %v9277_v60 = vshll.u32 %v22514_v14, 16 }
 0x498   : > { %18127 = vmatprep.subr.bf16.mxu0 %v20398_v36  ;;  %10421 = vperm.xlu1 %19981, %v10247_v31   ;;  %v10251_v31 = vld [vmem:[%s24338_s2 + $0x118] sm:$0xff] }
 0x499   : > { %10426 = vperm.xlu0 %19980, %v10248_v7   ;;  %v9251_v30 = vor.u32 %v9249_v44, %v9247_v45  ;;  %v9263_v38 = vrot.slane %v9261_v2, 1  ;;  %v10252_v7 = vld [vmem:[%s24338_s2 + $0x120] sm:$0xff]  ;;  %v9265_v45 = vshrl.u32 %v22490_v32, 16  ;;  %v9271_v2 = vrot.slane %v9269_v29, 1 }
 0x49a   : > { %v9279_v57 = vrot.slane %v9277_v60, 1 }
 0x49b   : > { %18128 = vmatpush3.bf16.msra.mxu0 %v20398_v36  ;;  %v10250_v36 = vld [vmem:[%s24338_s2 + $0x110] sm:$0xff]  ;;  %v9264_v44 = vsel %vm532_vm0, %v9259_v27, %v9263_v38 }
 0x49c   : > { %10431 = vperm.xlu1 %19981, %v10249_v22   ;;  %v22529_v22 = vld [vmem:[%s20767_s29 + $0x98] sm:$0xff]  }
 0x49d   : > { %10436 = vperm.xlu0 %19980, %v10250_v36   ;;  %v10253_v36 = vld [vmem:[%s24338_s2 + $0x128] sm:$0xff]  ;;  %v9285_v29 = vshll.u32 %v22529_v22, 16 }
 0x49e   : > { %18082 = vmatmul.mubr.bf16.gmra.mrb[16].mxu0 %v9240_v0  ;;  %v9256_v0 = vsel %vm532_vm0, %v9251_v30, %v9255_v52  ;;  %v10254_v52 = vld [vmem:[%s24338_s2 + $0x130] sm:$0xff]  ;;  %v9267_v30 = vor.u32 %v9265_v45, %v9263_v38  ;;  %v9281_v38 = vshrl.u32 %v22514_v14, 16 }
 0x49f   : > { %18085 = vmatprep.mubr.bf16.mxu0 %v9248_v21  ;;  %v9273_v21 = vshrl.u32 %v22505_v18, 16  ;;  %v9287_v60 = vrot.slane %v9285_v29, 1 }
 0x4a0   : > { %10441 = vperm.xlu1 %19981, %v10251_v31   ;;  %v10255_v31 = vld [vmem:[%s24338_s2 + $0x138] sm:$0xff] }
 0x4a1   : > { %10446 = vperm.xlu0 %19980, %v10252_v7   ;;  %v9275_v27 = vor.u32 %v9273_v21, %v9271_v2  ;;  %v10256_v7 = vld [vmem:[%s24338_s2 + $0x140] sm:$0xff]  ;;  %v9293_v21 = vshll.u32 %v22538_v20, 16 }
 0x4a3   : > { %v9280_v45 = vsel %vm532_vm0, %v9275_v27, %v9279_v57  ;;  %v9295_v41 = vrot.slane %v9293_v21, 1 }
 0x4a4   : > { %10451 = vperm.xlu1 %19981, %v10253_v36   ;;  %v22553_v36 = vld [vmem:[%s20767_s29 + $0xa8] sm:$0xff]  }
 0x4a5   : > { %10456 = vperm.xlu0 %19980, %v10254_v52   ;;  %v10257_v52 = vld [vmem:[%s24338_s2 + $0x148] sm:$0xff]  ;;  %v9301_v29 = vshll.u32 %v22553_v36, 16 }
 0x4a6   : > { %18086 = vmatmul.mubr.bf16.gmra.mrb[20].mxu0 %v9256_v0  ;;  %v9272_v0 = vsel %vm532_vm0, %v9267_v30, %v9271_v2  ;;  %v10258_v2 = vld [vmem:[%s24338_s2 + $0x150] sm:$0xff]  ;;  %v9283_v30 = vor.u32 %v9281_v38, %v9279_v57  ;;  %v9297_v57 = vshrl.u32 %v22538_v20, 16 }
 0x4a7   : > { %18089 = vmatprep.mubr.bf16.mxu0 %v9264_v44  ;;  %v9289_v44 = vshrl.u32 %v22529_v22, 16  ;;  %v9303_v21 = vrot.slane %v9301_v29, 1 }
 0x4a8   : > { %10461 = vperm.xlu1 %19981, %v10255_v31   ;;  %v10259_v31 = vld [vmem:[%s24338_s2 + $0x158] sm:$0xff] }
 0x4a9   : > { %10466 = vperm.xlu0 %19980, %v10256_v7   ;;  %v9291_v27 = vor.u32 %v9289_v44, %v9287_v60  ;;  %v10260_v7 = vld [vmem:[%s24338_s2 + $0x160] sm:$0xff]  ;;  %v9309_v44 = vshll.u32 %v22562_v28, 16 }
 0x4ab   : > { %v9296_v38 = vsel %vm532_vm0, %v9291_v27, %v9295_v41  ;;  %v20402_v27 = vld [vmem:[%s24342_s6 + $0x40] sm:$0xff]  }
 0x4ac   : > { %10471 = vperm.xlu1 %19981, %v10257_v52   ;;  %v22577_v52 = vld [vmem:[%s20767_s29 + $0xb8] sm:$0xff]   ;;  %18177 = vmatprep.subr.bf16.mxu1 %v20402_v27 }
 0x4ad   : > { %10476 = vperm.xlu0 %19980, %v10258_v2   ;;  %v10261_v2 = vld [vmem:[%s24338_s2 + $0x168] sm:$0xff]  ;;  %18178 = vmatpush3.bf16.msra.mxu1 %v20402_v27 }
 0x4ae   : > { %18090 = vmatmul.mubr.bf16.gmra.mrb[24].mxu0 %v9272_v0  ;;  %v9288_v0 = vsel %vm532_vm0, %v9283_v30, %v9287_v60  ;;  %v10262_v60 = vld [vmem:[%s24338_s2 + $0x170] sm:$0xff]  ;;  %v9299_v30 = vor.u32 %v9297_v57, %v9295_v41  ;;  %v9317_v41 = vshll.u32 %v22577_v52, 16  ;;  %v22607_v27 = vld [vmem:[%s20767_s29 + $0xc8] sm:$0xff]  }
 0x4af   : > { %18093 = vmatprep.mubr.bf16.mxu0 %v9280_v45  ;;  %v9305_v45 = vshrl.u32 %v22553_v36, 16  ;;  %v9333_v63 = vshll.u32 %v22607_v27, 16 }
 0x4b0   : > { %10481 = vperm.xlu1 %19981, %v10259_v31   ;;  %v20403_v31 = vld [vmem:[%s24342_s6 + $0x48] sm:$0xff]   ;;  %v9304_v57 = vsel %vm532_vm0, %v9299_v30, %v9303_v21  ;;  %v9319_v6 = vrot.slane %v9317_v41, 1  ;;  %v20405_v30 = vld [vmem:[%s24342_s6 + $0x58] sm:$0xff]   ;;  %v9341_v41 = vshll.u32 %v22613_v42, 16 }
 0x4b1   : > { %10486 = vperm.xlu0 %19980, %v10260_v7   ;;  %v9307_v29 = vor.u32 %v9305_v45, %v9303_v21  ;;  %v9311_v7 = vrot.slane %v9309_v44, 1  ;;  %18179 = vmatprep.subr.bf16.mxu1 %v20403_v31  ;;  %v20404_v45 = vld [vmem:[%s24342_s6 + $0x50] sm:$0xff]  }
 0x4b2   : > { %18180 = vmatpush3.bf16.msra.mxu1 %v20403_v31 }
 0x4b3   : > { %v9312_v44 = vsel %vm532_vm0, %v9307_v29, %v9311_v7  ;;  %v9315_v21 = vor.u32 %v9313_v8, %v9311_v7  ;;  %18181 = vmatprep.subr.bf16.mxu1 %v20404_v45  ;;  %v9337_v7 = vshrl.u32 %v22607_v27, 16 }
 0x4b4   : > { %10491 = vperm.xlu1 %19981, %v10261_v2   ;;  %v9321_v2 = vshrl.u32 %v22577_v52, 16 }
 0x4b5   : > { %10496 = vperm.xlu0 %19980, %v10262_v60  }
 0x4b6   : > { %18094 = vmatmul.mubr.bf16.gmra.mrb[28].mxu0 %v9288_v0  ;;  %v22592_v0 = vld [vmem:[%s20767_s29 + $0xc0] sm:$0xff]   ;;  %v9323_v23 = vor.u32 %v9321_v2, %v9319_v6  ;;  %18182 = vmatpush3.bf16.msra.mxu1 %v20404_v45  ;;  %v22622_v2 = vld [vmem:[%s20767_s29 + $0xd8] ss:$0 sps:$4 sm:$0x11]   ;;  %v9343_v45 = vrot.slane %v9341_v41, 1  ;;  %v9724_v41 = vrot.slane %v22348_v33, 1 }
 0x4b7   : > { %18097 = vmatprep.mubr.bf16.mxu0 %v9296_v38  ;;  %v10263_v38 = vld [vmem:[%s24338_s2 + $0x178] sm:$0xff]  ;;  %v9325_v60 = vshll.u32 %v22592_v0, 16  ;;  %v9329_v31 = vshrl.u32 %v22592_v0, 16  ;;  %18183 = vmatprep.subr.bf16.mxu1 %v20405_v30  ;;  %v9732_v33 = vrot.slane %v22400_v43, 1  ;;  %v9740_v43 = vrot.slane %v22460_v24, 1 }
 0x4b8   : > { %10501 = vperm.xlu1 %19981, %v10263_v38   ;;  %v9320_v38 = vsel %vm532_vm0, %v9315_v21, %v9319_v6  ;;  %v9345_v21 = vshrl.u32 %v22613_v42, 16  ;;  %v9748_v24 = vrot.slane %v22514_v14, 1  ;;  %v9756_v14 = vrot.slane %v22562_v28, 1 }
 0x4b9   : > { %v9327_v29 = vrot.slane %v9325_v60, 1  ;;  %v9764_v28 = vrot.slane %v22613_v42, 1  ;;  %v20407_v42 = vld [vmem:[%s24342_s6 + $0x68] sm:$0xff]  }
 0x4ba   : > { %18184 = vmatpush3.bf16.msra.mxu1 %v20405_v30 }
 0x4bb   : > { %v9328_v8 = vsel %vm532_vm0, %v9323_v23, %v9327_v29  ;;  %v9349_v23 = vshll.u32 %v22622_v2, 16 }
 0x4bd   : > { %v9351_v30 = vrot.slane %v9349_v23, 1 }
 0x4be   : > { %18098 = vmatmul.mubr.bf16.gmra.mrb[32].mxu0 %v9304_v57  ;;  %v9335_v57 = vrot.slane %v9333_v63, 1  ;;  %v9347_v63 = vor.u32 %v9345_v21, %v9343_v45 }
 0x4bf   : > { %18101 = vmatprep.mubr.bf16.mxu0 %v9312_v44  ;;  %v9331_v44 = vor.u32 %v9329_v31, %v9327_v29  ;;  %v9719_v29 = vrot.slane %v15948_v13, 1  ;;  %v9726_v13 = vrot.slane %v22363_v59, 1  ;;  %v9734_v59 = vrot.slane %v22421_v15, 1 }
 0x4c0   : > { %v9339_v60 = vor.u32 %v9337_v7, %v9335_v57  ;;  %v9352_v31 = vsel %vm532_vm0, %v9347_v63, %v9351_v30  ;;  %v9722_v7 = vrot.slane %v22339_v10, 1  ;;  %v9730_v10 = vrot.slane %v22390_v56, 1 }
 0x4c1   : > { %v9336_v6 = vsel %vm532_vm0, %v9331_v44, %v9335_v57  ;;  %v9727_v61 = vsel %vm1344_vm1, %v9724_v41, %v9726_v13  ;;  %v9738_v56 = vrot.slane %v22451_v4, 1  ;;  %v9742_v15 = vrot.slane %v22481_v55, 1 }
 0x4c2   : > { %v9344_v39 = vsel %vm532_vm0, %v9339_v60, %v9343_v45  ;;  %v9725_v58 = vsel %vm1344_vm1, %v9722_v7, %v9724_v41  ;;  %v9733_v60 = vsel %vm1344_vm1, %v9730_v10, %v9732_v33  ;;  %v9735_v45 = vsel %vm1344_vm1, %v9732_v33, %v9734_v59 }
 0x4c3   : > { %v9741_v23 = vsel %vm1344_vm1, %v9738_v56, %v9740_v43  ;;  %v9743_v63 = vsel %vm1344_vm1, %v9740_v43, %v9742_v15  ;;  %v9746_v4 = vrot.slane %v22505_v18, 1  ;;  %v9750_v55 = vrot.slane %v22529_v22, 1 }
 0x4c4   : > { %v9754_v18 = vrot.slane %v22553_v36, 1  ;;  %v9758_v22 = vrot.slane %v22577_v52, 1  ;;  %v9762_v36 = vrot.slane %v22607_v27, 1  ;;  %v9766_v52 = vrot.slane %v22622_v2, 1  ;;  %v20408_v27 = vld [vmem:[%s24342_s6 + $0x70] sm:$0xff]   ;;  %v20409_v2 = vld [vmem:[%s24342_s6 + $0x78] sm:$0xff]  }
 0x4c5   : > { %v24477_v33 = vmov 0  }
 0x4c6   : > { %18102 = vmatmul.mubr.bf16.gmra.mrb[36].mxu0 %v9320_v38  ;;  %v9720_v38 = vrot.slane %v22327_v1, 1  ;;  %v9757_v41 = vsel %vm1344_vm1, %v9754_v18, %v9756_v14 }
 0x4c7   : > { %18105 = vmatprep.mubr.bf16.mxu0 %v9328_v8 }
 0x4c8   : > { %v9721_v8 = vsel %vm1344_vm1, %v9719_v29, %v9720_v38  ;;  %v9723_v57 = vsel %vm1344_vm1, %v9720_v38, %v9722_v7  ;;  %v9749_v38 = vsel %vm1344_vm1, %v9746_v4, %v9748_v24 }
 0x4ce   : > { %18106 = vmatmul.mubr.bf16.gmra.mrb[40].mxu0 %v9336_v6 }
 0x4cf   : > { %18109 = vmatprep.mubr.bf16.mxu0 %v9344_v39  ;;  %v9728_v39 = vrot.slane %v22372_v50, 1  ;;  %v9736_v50 = vrot.slane %v22430_v54, 1  ;;  %v9744_v54 = vrot.slane %v22490_v32, 1  ;;  %v9752_v32 = vrot.slane %v22538_v20, 1 }
 0x4d0   : > { %v9760_v20 = vrot.slane %v22592_v0, 1  ;;  %v20406_v0 = vld [vmem:[%s24342_s6 + $0x60] sm:$0xff]  }
 0x4d1   : > { %v9729_v1 = vsel %vm1344_vm1, %v9726_v13, %v9728_v39  ;;  %v9731_v44 = vsel %vm1344_vm1, %v9728_v39, %v9730_v10  ;;  %v9737_v6 = vsel %vm1344_vm1, %v9734_v59, %v9736_v50  ;;  %v9739_v21 = vsel %vm1344_vm1, %v9736_v50, %v9738_v56  ;;  %18185 = vmatprep.subr.bf16.mxu1 %v20406_v0  ;;  %v22699_v59 = vld [vmem:[%s24342_s6] sm:$0xff]   ;;  %v10277_v56 = vpop.permute.xlu1 %10276 }
 0x4d2   : > { %v9745_v30 = vsel %vm1344_vm1, %v9742_v15, %v9744_v54  ;;  %v9747_v29 = vsel %vm1344_vm1, %v9744_v54, %v9746_v4  ;;  %v9755_v7 = vsel %vm1344_vm1, %v9752_v32, %v9754_v18  ;;  %v9763_v13 = vsel %vm1344_vm1, %v9760_v20, %v9762_v36  ;;  %18186 = vmatpush3.bf16.msra.mxu1 %v20406_v0  ;;  %v22731_v18 = vld [vmem:[%s24341_s5] ss:$0 sm:$0xff] }
 0x4d3   : > { %v9765_v39 = vsel %vm1344_vm1, %v9762_v36, %v9764_v28  ;;  %18187 = vmatprep.subr.bf16.mxu1 %v20407_v42  ;;  %v11585_v50 = vrot.slane %v24477_v33, 5 }
 0x4d6   : > { %18110 = vmatmul.mubr.bf16.gmra.mrb[44].mxu0 %v9352_v31  ;;  %v9751_v31 = vsel %vm1344_vm1, %v9748_v24, %v9750_v55  ;;  %18188 = vmatpush3.bf16.msra.mxu1 %v20407_v42 }
 0x4d7   : > { %18129 = vmatprep.mubr.bf16.mxu0 %v9721_v8  ;;  %v9753_v8 = vsel %vm1344_vm1, %v9750_v55, %v9752_v32  ;;  %18189 = vmatprep.subr.bf16.mxu1 %v20408_v27 }
 0x4da   : > { %18190 = vmatpush3.bf16.msra.mxu1 %v20408_v27 }
 0x4db   : > { %18191 = vmatprep.subr.bf16.mxu1 %v20409_v2 }
 0x4de   : > { %18130 = vmatmul.mubr.bf16.vlgmr.msra.gmra.mrb[0].mxu0 %v9723_v57  ;;  %v9759_v57 = vsel %vm1344_vm1, %v9756_v14, %v9758_v22  ;;  %18192 = vmatpush3.bf16.msra.mxu1 %v20409_v2 }
 0x4df   : > { %18133 = vmatprep.mubr.bf16.mxu0 %v9725_v58  ;;  %v9761_v58 = vsel %vm1344_vm1, %v9758_v22, %v9760_v20  ;;  %18241 = vmatprep.subr.bf16.mxu1 %v22699_v59 }
 0x4e6   : > { %18134 = vmatmul.mubr.bf16.gmra.mrb[4].mxu0 %v9727_v61  ;;  %v9767_v61 = vsel %vm1344_vm1, %v9764_v28, %v9766_v52 }
 0x4e7   : > { %18137 = vmatprep.mubr.bf16.mxu0 %v9729_v1  ;;  %v10645_v1 = vld [vmem:[#allocation2] sm:$0xf0] }
 0x4e8   : > { %v10689_v10 = vrot.slane %v10645_v1, 4 }
 0x4ee   : > { %18138 = vmatmul.mubr.bf16.gmra.mrb[8].mxu0 %v9731_v44  ;;  %v22692_v44 = vrot.slane %v24477_v33, 4 }
 0x4ef   : > { %18141 = vmatprep.mubr.bf16.mxu0 %v9733_v60 }
 0x4f0   : > { %v10691_v60 = vsel %vm10688_vm2, %v10689_v10, %v22692_v44 }
 0x4f1   : > { %18193 = vmatprep.mubr.bf16.mxu1 %v10691_v60 }
 0x4f6   : > { %18142 = vmatmul.mubr.bf16.gmra.mrb[12].mxu0 %v9735_v45  ;;  %v22704_v45 = vor.u32 %v11585_v50, %v22692_v44 }
 0x4f7   : > { %18145 = vmatprep.mubr.bf16.mxu0 %v9737_v6  ;;  %v10267_v6 = vpop.permute.xlu0 %10266 }
 0x4fb   : > { %v10272_v43 = vpop.permute.xlu0 %10271 }
 0x4fe   : > { %18146 = vmatmul.mubr.bf16.gmra.mrb[16].mxu0 %v9739_v21  ;;  %v10282_v21 = vpop.permute.xlu1 %10281 }
 0x4ff   : > { %18149 = vmatprep.mubr.bf16.mxu0 %v9741_v23  ;;  %v22706_v23 = vpop.permute.xlu0 %10286 }
 0x502   : > { %v22708_v15 = vpop.permute.xlu1 %10291 }
 0x503   : > { %v22710_v54 = vpop.permute.xlu0 %10296 }
 0x506   : > { %18150 = vmatmul.mubr.bf16.gmra.mrb[20].mxu0 %v9743_v63  ;;  %v10302_v63 = vpop.permute.xlu1 %10301 }
 0x507   : > { %18153 = vmatprep.mubr.bf16.mxu0 %v9745_v30  ;;  %v22712_v30 = vpop.permute.xlu0 %10306 }
 0x50a   : > { %v22714_v4 = vpop.permute.xlu1 %10311 }
 0x50b   : > { %v22716_v24 = vpop.permute.xlu0 %10316 }
 0x50e   : > { %18154 = vmatmul.mubr.bf16.gmra.mrb[24].mxu0 %v9747_v29  ;;  %v22718_v29 = vpop.permute.xlu1 %10321 }
 0x50f   : > { %18157 = vmatprep.mubr.bf16.mxu0 %v9749_v38  ;;  %v22720_v38 = vpop.permute.xlu0 %10326 }
 0x512   : > { %v22722_v55 = vpop.permute.xlu1 %10331 }
 0x513   : > { %v22724_v32 = vpop.permute.xlu0 %10336 }
 0x516   : > { %18158 = vmatmul.mubr.bf16.gmra.mrb[28].mxu0 %v9751_v31  ;;  %v22726_v31 = vpop.permute.xlu1 %10341 }
 0x517   : > { %18161 = vmatprep.mubr.bf16.mxu0 %v9753_v8  ;;  %v22737_v36 = vpop.permute.xlu0 %10346 }
 0x51a   : > { %v22742_v0 = vpop.permute.xlu1 %10351 }
 0x51b   : > { %v22746_v60 = vpop.permute.xlu0 %10356 }
 0x51e   : > { %18162 = vmatmul.mubr.bf16.gmra.mrb[32].mxu0 %v9755_v7 }
 0x51f   : > { %18165 = vmatprep.mubr.bf16.mxu0 %v9757_v41 }
 0x526   : > { %18166 = vmatmul.mubr.bf16.gmra.mrb[36].mxu0 %v9759_v57 }
 0x527   : > { %18169 = vmatprep.mubr.bf16.mxu0 %v9761_v58 }
 0x52e   : > { %18170 = vmatmul.mubr.bf16.gmra.mrb[40].mxu0 %v9763_v13 }
 0x52f   : > { %18173 = vmatprep.mubr.bf16.mxu0 %v9765_v39 }
 0x536   : > { %18174 = vmatmul.mubr.bf16.gmra.mrb[44].mxu0 %v9767_v61 }
 0x5b1   : > { %v18131_v8 = vpop.f32.mrb[0].mxu0 }
 0x5b2   : > { %v18769_v14 = vadd.f32 %v18131_v8, %v22123_v19  ;;  %v9874_v7 = vpop.f32.mrb[1].mxu0 }
 0x5b3   : > { %v18770_v41 = vadd.f32 %v9874_v7, %v22126_v40  ;;  %v18132_v22 = vpop.f32.mrb[2].mxu0 }
 0x5b4   : > { %v10122_v20 = vadd.f32 %v18769_v14, %v22731_v18  ;;  %v18771_v57 = vadd.f32 %v18132_v22, %v22129_v17  ;;  %v9877_v58 = vpop.f32.mrb[3].mxu0 }
 0x5b5   : > { %v10120_v28 = vadd.f32 %v18770_v41, %v22731_v18  ;;  %v18772_v13 = vadd.f32 %v9877_v58, %v22131_v49 }
 0x5b6   : > { %v10170_v39 = vmax.f32 %v10122_v20, 0.0  ;;  %v10123_v52 = vadd.f32 %v18771_v57, %v22731_v18  ;;  %v22753_v57 = vpop.permute.xlu1 %10361 }
 0x5b7   : > { %v10168_v19 = vmax.f32 %v10120_v28, 0.0  ;;  %v10121_v40 = vadd.f32 %v18772_v13, %v22731_v18 }
 0x5b8   : > { %v10171_v61 = vmax.f32 %v10123_v52, 0.0  ;;  %v10506_v2 = vmul.f32 %v10277_v56, %v10170_v39  ;;  %v20411_v39 = vld [vmem:[%s24342_s6 + $0x8] sm:$0xff]  }
 0x5b9   : > { %v10169_v42 = vmax.f32 %v10121_v40, 0.0  ;;  %v18135_v27 = vpop.f32.mrb[4].mxu0  ;;  %v10504_v50 = vmul.f32 %v10267_v6, %v10168_v19 }
 0x5ba   : > { %v10507_v17 = vmul.f32 %v10282_v21, %v10171_v61  ;;  %v18773_v1 = vadd.f32 %v18135_v27, %v22135_v37  ;;  %v9890_v10 = vpop.f32.mrb[5].mxu0 }
 0x5bb   : > { %v10505_v49 = vmul.f32 %v10272_v43, %v10169_v42  ;;  %v18774_v8 = vadd.f32 %v9890_v10, %v22138_v62  ;;  %v18136_v14 = vpop.f32.mrb[6].mxu0 }
 0x5bc   : > { %v22749_v7 = vpack.c.bf16 %v10507_v17, %v10506_v2  ;;  %v10126_v41 = vadd.f32 %v18773_v1, %v22731_v18  ;;  %v18775_v22 = vadd.f32 %v18136_v14, %v22141_v11  ;;  %v9893_v20 = vpop.f32.mrb[7].mxu0  ;;  %v22775_v1 = vpop.permute.xlu1 %10371 }
 0x5bd   : > { %v22755_v56 = vpack.c.bf16 %v10505_v49, %v10504_v50  ;;  %v10124_v37 = vadd.f32 %v18774_v8, %v22731_v18  ;;  %v18776_v21 = vadd.f32 %v9893_v20, %v22143_v53  ;;  %v22768_v53 = vpop.permute.xlu0 %10366 }
 0x5be   : > { %24478 = vst [vmem:[#allocation30_spill] sm:$0xff] %v22749_v7  ;;  %10581 = vst [vmem:[#allocation2 + $0x18] sm:$0xff] %v22749_v7  ;;  %v10174_v6 = vmax.f32 %v10126_v41, 0.0  ;;  %v10127_v62 = vadd.f32 %v18775_v22, %v22731_v18  ;;  %v10694_v43 = vrot.slane %v22749_v7, 4 }
 0x5bf   : > { %10580 = vst [vmem:[#allocation2 + $0x10] sm:$0xff] %v22755_v56  ;;  %v10172_v58 = vmax.f32 %v10124_v37, 0.0  ;;  %v10125_v11 = vadd.f32 %v18776_v21, %v22731_v18  ;;  %v10692_v28 = vrot.slane %v22755_v56, 4 }
 0x5c0   : > { %v10175_v13 = vmax.f32 %v10127_v62, 0.0  ;;  %v10510_v42 = vmul.f32 %v22710_v54, %v10174_v6 }
 0x5c1   : > { %v10173_v52 = vmax.f32 %v10125_v11, 0.0  ;;  %v18139_v19 = vpop.f32.mrb[8].mxu0  ;;  %v10693_v40 = vsel %vm10688_vm2, %v22692_v44, %v10692_v28  ;;  %v10695_v61 = vsel %vm10688_vm2, %v10692_v28, %v10694_v43  ;;  %v10508_v10 = vmul.f32 %v22706_v23, %v10172_v58  ;;  %v20412_v23 = vld [vmem:[%s24342_s6 + $0x10] sm:$0xff]   ;;  %v22803_v58 = vpop.permute.xlu1 %10381 }
 0x5c2   : > { %v10511_v27 = vmul.f32 %v10302_v63, %v10175_v13  ;;  %v18777_v2 = vadd.f32 %v18139_v19, %v22147_v34  ;;  %v9906_v17 = vpop.f32.mrb[9].mxu0  ;;  %18194 = vmatmul.mubr.bf16.vlgmr.msra.gmra.mrb[48].mxu1 %v10693_v40 }
 0x5c3   : > { %v10509_v50 = vmul.f32 %v22708_v15, %v10173_v52  ;;  %v18778_v49 = vadd.f32 %v9906_v17, %v22150_v9  ;;  %v18140_v8 = vpop.f32.mrb[10].mxu0  ;;  %18197 = vmatprep.mubr.bf16.mxu1 %v10695_v61  ;;  %18242 = vmatpush3.bf16.msra.mxu1 %v22699_v59 }
 0x5c4   : > { %v22781_v14 = vpack.c.bf16 %v10511_v27, %v10510_v42  ;;  %v10130_v54 = vadd.f32 %v18777_v2, %v22731_v18  ;;  %v18779_v34 = vadd.f32 %v18140_v8, %v22153_v12  ;;  %v9909_v63 = vpop.f32.mrb[11].mxu0  ;;  %18243 = vmatprep.subr.bf16.mxu1 %v20411_v39  ;;  %v22795_v12 = vpop.permute.xlu0 %10376 }
 0x5c5   : > { %v22788_v41 = vpack.c.bf16 %v10509_v50, %v10508_v10  ;;  %v10128_v9 = vadd.f32 %v18778_v49, %v22731_v18  ;;  %v18780_v15 = vadd.f32 %v9909_v63, %v22155_v35  ;;  %v20413_v35 = vld [vmem:[%s24342_s6 + $0x18] sm:$0xff]  }
 0x5c6   : > { %10583 = vst [vmem:[#allocation2 + $0x28] sm:$0xff] %v22781_v14  ;;  %v10178_v59 = vmax.f32 %v10130_v54, 0.0  ;;  %v10131_v22 = vadd.f32 %v18779_v34, %v22731_v18  ;;  %v10698_v20 = vrot.slane %v22781_v14, 4  ;;  %v22829_v54 = vpop.permute.xlu1 %10391 }
 0x5c7   : > { %10582 = vst [vmem:[#allocation2 + $0x20] sm:$0xff] %v22788_v41  ;;  %v10176_v37 = vmax.f32 %v10128_v9, 0.0  ;;  %v10129_v21 = vadd.f32 %v18780_v15, %v22731_v18  ;;  %v10696_v6 = vrot.slane %v22788_v41, 4  ;;  %18244 = vmatpush3.bf16.msra.mxu1 %v20411_v39  ;;  %v10604_v15 = vld [vmem:[#allocation2] sm:$0xf8] }
 0x5c8   : > { %v10179_v62 = vmax.f32 %v10131_v22, 0.0  ;;  %18245 = vmatprep.subr.bf16.mxu1 %v20412_v23  ;;  %v10514_v19 = vmul.f32 %v22716_v24, %v10178_v59 }
 0x5c9   : > { %v10177_v11 = vmax.f32 %v10129_v21, 0.0  ;;  %v18143_v28 = vpop.f32.mrb[12].mxu0  ;;  %v10697_v13 = vsel %vm10688_vm2, %v10694_v43, %v10696_v6  ;;  %v10699_v52 = vsel %vm10688_vm2, %v10696_v6, %v10698_v20  ;;  %v10512_v42 = vmul.f32 %v22712_v30, %v10176_v37  ;;  %v22820_v30 = vpop.permute.xlu0 %10386 }
 0x5ca   : > { %v10515_v40 = vmul.f32 %v22718_v29, %v10179_v62  ;;  %v18781_v39 = vadd.f32 %v18143_v28, %v22159_v46  ;;  %v9922_v61 = vpop.f32.mrb[13].mxu0  ;;  %18198 = vmatmul.mubr.bf16.gmra.mrb[52].mxu1 %v10697_v13  ;;  %v20414_v46 = vld [vmem:[%s24342_s6 + $0x20] sm:$0xff]  }
 0x5cb   : > { %v10513_v27 = vmul.f32 %v22714_v4, %v10177_v11  ;;  %v18782_v2 = vadd.f32 %v9922_v61, %v22162_v47  ;;  %v18144_v17 = vpop.f32.mrb[14].mxu0  ;;  %18201 = vmatprep.mubr.bf16.mxu1 %v10699_v52  ;;  %18246 = vmatpush3.bf16.msra.mxu1 %v20412_v23  ;;  %v11040_v61 = vshll.u32 %v10604_v15, 16 }
 0x5cc   : > { %v22813_v43 = vpack.c.bf16 %v10515_v40, %v10514_v19  ;;  %v10134_v10 = vadd.f32 %v18781_v39, %v22731_v18  ;;  %v18783_v24 = vadd.f32 %v18144_v17, %v22165_v51  ;;  %v9925_v29 = vpop.f32.mrb[15].mxu0  ;;  %18247 = vmatprep.subr.bf16.mxu1 %v20413_v35 }
 0x5cd   : > { %v22822_v4 = vpack.c.bf16 %v10513_v27, %v10512_v42  ;;  %v10132_v47 = vadd.f32 %v18782_v2, %v22731_v18  ;;  %v18784_v50 = vadd.f32 %v9925_v29, %v22167_v3  ;;  %v20415_v3 = vld [vmem:[%s24342_s6 + $0x28] sm:$0xff]   ;;  %v22842_v28 = vpop.permute.xlu0 %10396  ;;  %v22861_v2 = vrot.slane %v24477_v33, 3  ;;  %v20417_v33 = vld [vmem:[%s24342_s6 + $0x38] sm:$0xff]  }
 0x5ce   : > { %10585 = vst [vmem:[#allocation2 + $0x38] sm:$0xff] %v22813_v43  ;;  %v10182_v49 = vmax.f32 %v10134_v10, 0.0  ;;  %v10135_v8 = vadd.f32 %v18783_v24, %v22731_v18  ;;  %v10702_v51 = vrot.slane %v22813_v43, 4  ;;  %v24350_v24 = vshrl.u32 %v22749_v7, 16 }
 0x5cf   : > { %10584 = vst [vmem:[#allocation2 + $0x30] sm:$0xff] %v22822_v4  ;;  %v10180_v34 = vmax.f32 %v10132_v47, 0.0  ;;  %v10133_v63 = vadd.f32 %v18784_v50, %v22731_v18  ;;  %v10700_v23 = vrot.slane %v22822_v4, 4  ;;  %18248 = vmatpush3.bf16.msra.mxu1 %v20413_v35 }
 0x5d0   : > { %v10183_v9 = vmax.f32 %v10135_v8, 0.0  ;;  %18249 = vmatprep.subr.bf16.mxu1 %v20414_v46  ;;  %v10518_v6 = vmul.f32 %v22724_v32, %v10182_v49  ;;  %v22875_v49 = vrot.slane %v11040_v61, 4  ;;  %v11054_v8 = vshrl.u32 %v22755_v56, 16 }
 0x5d1   : > { %v10181_v59 = vmax.f32 %v10133_v63, 0.0  ;;  %v18147_v22 = vpop.f32.mrb[16].mxu0  ;;  %v10701_v37 = vsel %vm10688_vm2, %v10698_v20, %v10700_v23  ;;  %v10703_v21 = vsel %vm10688_vm2, %v10700_v23, %v10702_v51  ;;  %v10516_v13 = vmul.f32 %v22720_v38, %v10180_v34  ;;  %v20416_v38 = vld [vmem:[%s24342_s6 + $0x30] sm:$0xff]   ;;  %v22878_v34 = vpop.permute.xlu0 %10406 }
 0x5d2   : > { %v10519_v62 = vmul.f32 %v22726_v31, %v10183_v9  ;;  %v18785_v11 = vadd.f32 %v18147_v22, %v22171_v48  ;;  %v9938_v35 = vpop.f32.mrb[17].mxu0  ;;  %18202 = vmatmul.mubr.bf16.gmra.mrb[56].mxu1 %v10701_v37  ;;  %v11037_v20 = vshrl.u32 %v10604_v15, 16  ;;  %v24364_v15 = vshll.u32 %v22755_v56, 16 }
 0x5d3   : > { %v10517_v52 = vmul.f32 %v22722_v55, %v10181_v59  ;;  %v18786_v19 = vadd.f32 %v9938_v35, %v22174_v5  ;;  %v18148_v40 = vpop.f32.mrb[18].mxu0  ;;  %18205 = vmatprep.mubr.bf16.mxu1 %v10703_v21  ;;  %18250 = vmatpush3.bf16.msra.mxu1 %v20414_v46  ;;  %v22854_v55 = vpop.permute.xlu1 %10401  ;;  %v24479_v35 = vld [vmem:[#allocation4_spill] sm:$0xff] }
 0x5d4   : > { %v22847_v39 = vpack.c.bf16 %v10519_v62, %v10518_v6  ;;  %v10138_v32 = vadd.f32 %v18785_v11, %v22731_v18  ;;  %v18787_v48 = vadd.f32 %v18148_v40, %v22177_v26  ;;  %v9941_v31 = vpop.f32.mrb[19].mxu0  ;;  %18251 = vmatprep.subr.bf16.mxu1 %v20415_v3  ;;  %v22873_v50 = vrot.slane %v11037_v20, 3 }
 0x5d5   : > { %v22856_v5 = vpack.c.bf16 %v10517_v52, %v10516_v13  ;;  %v10136_v42 = vadd.f32 %v18786_v19, %v22731_v18  ;;  %v18788_v27 = vadd.f32 %v9941_v31, %v22179_v25  ;;  %v22890_v6 = vrot.slane %v24350_v24, 3  ;;  %v24480_v19 = vld [vmem:[#allocation3_spill] sm:$0xff]  ;;  %v24481_v31 = vld [vmem:[#allocation5_spill] sm:$0xff] }
 0x5d6   : > { %10587 = vst [vmem:[#allocation2 + $0x48] sm:$0xff] %v22847_v39  ;;  %v10186_v26 = vmax.f32 %v10138_v32, 0.0  ;;  %v10139_v17 = vadd.f32 %v18787_v48, %v22731_v18  ;;  %v10706_v10 = vrot.slane %v22847_v39, 4  ;;  %v22902_v32 = vrot.slane %v11054_v8, 3 }
 0x5d7   : > { %10586 = vst [vmem:[#allocation2 + $0x40] sm:$0xff] %v22856_v5  ;;  %v10184_v29 = vmax.f32 %v10136_v42, 0.0  ;;  %v10137_v46 = vadd.f32 %v18788_v27, %v22731_v18  ;;  %v10704_v47 = vrot.slane %v22856_v5, 4  ;;  %18252 = vmatpush3.bf16.msra.mxu1 %v20415_v3  ;;  %v22892_v62 = vpop.permute.xlu1 %10411  ;;  %v22915_v61 = vrot.slane %v24364_v15, 4  ;;  %v24501_v15 = vld [vmem:[#allocation22_spill] sm:$0xff] }
 0x5d8   : > { %v10187_v25 = vmax.f32 %v10139_v17, 0.0  ;;  %18253 = vmatprep.subr.bf16.mxu1 %v20416_v38  ;;  %v10522_v59 = vmul.f32 %v22746_v60, %v10186_v26  ;;  %v24349_v60 = vshll.u32 %v22749_v7, 16  ;;  %v22920_v17 = vrot.slane %v11054_v8, 4 }
 0x5d9   : > { %v10185_v63 = vmax.f32 %v10137_v46, 0.0  ;;  %v18151_v23 = vpop.f32.mrb[20].mxu0  ;;  %v10705_v9 = vsel %vm10688_vm2, %v10702_v51, %v10704_v47  ;;  %v10707_v3 = vsel %vm10688_vm2, %v10704_v47, %v10706_v10  ;;  %v10520_v51 = vmul.f32 %v22737_v36, %v10184_v29  ;;  %v22907_v36 = vld [vmem:[%s24342_s6 + $0x80] sm:$0xff]   ;;  %v22922_v29 = vpop.permute.xlu0 %10416 }
 0x5da   : > { %v10523_v22 = vmul.f32 %v22753_v57, %v10187_v25  ;;  %v18789_v37 = vadd.f32 %v18151_v23, %v22183_v16  ;;  %v9954_v21 = vpop.f32.mrb[21].mxu0  ;;  %18206 = vmatmul.mubr.bf16.gmra.mrb[60].mxu1 %v10705_v9  ;;  %v24358_v9 = vshrl.u32 %v22847_v39, 16 }
 0x5db   : > { %v10521_v11 = vmul.f32 %v22742_v0, %v10185_v63  ;;  %v18790_v13 = vadd.f32 %v9954_v21, %v24479_v35  ;;  %v18152_v52 = vpop.f32.mrb[22].mxu0  ;;  %18209 = vmatprep.mubr.bf16.mxu1 %v10707_v3  ;;  %18254 = vmatpush3.bf16.msra.mxu1 %v20416_v38  ;;  %v22929_v63 = vrot.slane %v24349_v60, 4  ;;  %v24356_v3 = vshll.u32 %v22847_v39, 16 }
 0x5dc   : > { %v22898_v16 = vpack.c.bf16 %v10523_v22, %v10522_v59  ;;  %v10142_v57 = vadd.f32 %v18789_v37, %v22731_v18  ;;  %v18791_v40 = vadd.f32 %v18152_v52, %v24480_v19  ;;  %v9957_v20 = vpop.f32.mrb[23].mxu0  ;;  %18255 = vmatprep.subr.bf16.mxu1 %v20417_v33  ;;  %v22935_v59 = vpop.permute.xlu1 %10421  ;;  %v11119_v19 = vrot.slane %v24358_v9, 3 }
 0x5dd   : > { %v22909_v0 = vpack.c.bf16 %v10521_v11, %v10520_v51  ;;  %v10140_v48 = vadd.f32 %v18790_v13, %v22731_v18  ;;  %v18792_v38 = vadd.f32 %v9957_v20, %v24481_v31  ;;  %v24482_v13 = vld [vmem:[#allocation6_spill] sm:$0xff] }
 0x5de   : > { %10589 = vst [vmem:[#allocation2 + $0x58] sm:$0xff] %v22898_v16  ;;  %v10190_v42 = vmax.f32 %v10142_v57, 0.0  ;;  %v10143_v27 = vadd.f32 %v18791_v40, %v22731_v18  ;;  %v10710_v26 = vrot.slane %v22898_v16, 4  ;;  %v24483_v40 = vld [vmem:[#allocation7_spill] sm:$0xff] }
 0x5df   : > { %10588 = vst [vmem:[#allocation2 + $0x50] sm:$0xff] %v22909_v0  ;;  %v10188_v46 = vmax.f32 %v10140_v48, 0.0  ;;  %v10141_v47 = vadd.f32 %v18792_v38, %v22731_v18  ;;  %v10708_v25 = vrot.slane %v22909_v0, 4  ;;  %18256 = vmatpush3.bf16.msra.mxu1 %v20417_v33  ;;  %v24484_v38 = vld [vmem:[#allocation8_spill] sm:$0xff] }
 0x5e0   : > { %v10191_v23 = vmax.f32 %v10143_v27, 0.0  ;;  %18305 = vmatprep.subr.bf16.mxu1 %v22907_v36  ;;  %v10526_v22 = vmul.f32 %v22795_v12, %v10190_v42 }
 0x5e1   : > { %v10189_v37 = vmax.f32 %v10141_v47, 0.0  ;;  %v18155_v21 = vpop.f32.mrb[24].mxu0  ;;  %v10709_v33 = vsel %vm10688_vm2, %v10706_v10, %v10708_v25  ;;  %v10711_v51 = vsel %vm10688_vm2, %v10708_v25, %v10710_v26  ;;  %v10524_v11 = vmul.f32 %v22768_v53, %v10188_v46 }
 0x5e2   : > { %v10527_v35 = vmul.f32 %v22803_v58, %v10191_v23  ;;  %v18793_v52 = vadd.f32 %v18155_v21, %v24482_v13  ;;  %v9970_v57 = vpop.f32.mrb[25].mxu0  ;;  %18210 = vmatmul.mubr.bf16.gmra.mrb[64].mxu1 %v10709_v33  ;;  %v11122_v10 = vrot.slane %v24356_v3, 4  ;;  %v24355_v53 = vshrl.u32 %v22909_v0, 16  ;;  %v24485_v23 = vld [vmem:[#allocation9_spill] sm:$0xff]  ;;  %v22969_v13 = vpop.permute.xlu1 %10431  ;;  %v24495_v21 = vld [vmem:[#allocation18_spill] sm:$0xff] }
 0x5e3   : > { %v10525_v12 = vmul.f32 %v22775_v1, %v10189_v37  ;;  %v18794_v20 = vadd.f32 %v9970_v57, %v24483_v40  ;;  %v18156_v48 = vpop.f32.mrb[26].mxu0  ;;  %18213 = vmatprep.mubr.bf16.mxu1 %v10711_v51  ;;  %v24354_v46 = vshll.u32 %v22909_v0, 16  ;;  %v22957_v1 = vpop.permute.xlu0 %10426 }
 0x5e4   : > { %v22952_v58 = vpack.c.bf16 %v10527_v35, %v10526_v22  ;;  %v10146_v31 = vadd.f32 %v18793_v52, %v22731_v18  ;;  %v18795_v42 = vadd.f32 %v18156_v48, %v24484_v38  ;;  %v9973_v27 = vpop.f32.mrb[27].mxu0  ;;  %v11128_v35 = vrot.slane %v24355_v53, 3 }
 0x5e5   : > { %v22959_v47 = vpack.c.bf16 %v10525_v12, %v10524_v11  ;;  %v10144_v25 = vadd.f32 %v18794_v20, %v22731_v18  ;;  %v18796_v37 = vadd.f32 %v9973_v27, %v24485_v23  ;;  %v22974_v12 = vor.u32 %v11122_v10, %v11119_v19  ;;  %v24486_v19 = vld [vmem:[#allocation10_spill] sm:$0xff] }
 0x5e6   : > { %10591 = vst [vmem:[#allocation2 + $0x68] sm:$0xff] %v22952_v58  ;;  %v10194_v22 = vmax.f32 %v10146_v31, 0.0  ;;  %v10147_v33 = vadd.f32 %v18795_v42, %v22731_v18  ;;  %v10714_v51 = vrot.slane %v22952_v58, 4  ;;  %v11131_v48 = vrot.slane %v24354_v46, 4 }
 0x5e7   : > { %10590 = vst [vmem:[#allocation2 + $0x60] sm:$0xff] %v22959_v47  ;;  %v10192_v11 = vmax.f32 %v10144_v25, 0.0  ;;  %v10145_v52 = vadd.f32 %v18796_v37, %v22731_v18  ;;  %v10712_v57 = vrot.slane %v22959_v47, 4  ;;  %v24352_v31 = vshrl.u32 %v22898_v16, 16 }
 0x5e8   : > { %v10530_v40 = vmul.f32 %v22842_v28, %v10194_v22  ;;  %v10195_v20 = vmax.f32 %v10147_v33, 0.0  ;;  %v11132_v28 = vor.u32 %v11131_v48, %v11128_v35  ;;  %v22987_v33 = vpop.permute.xlu0 %10436  ;;  %v24488_v35 = vld [vmem:[#allocation12_spill] sm:$0xff] }
 0x5e9   : > { %v10528_v38 = vmul.f32 %v22820_v30, %v10192_v11  ;;  %v10193_v42 = vmax.f32 %v10145_v52, 0.0  ;;  %v18159_v27 = vpop.f32.mrb[28].mxu0  ;;  %v10713_v25 = vsel %vm10688_vm2, %v10710_v26, %v10712_v57  ;;  %v10715_v23 = vsel %vm10688_vm2, %v10712_v57, %v10714_v51  ;;  %v24487_v11 = vld [vmem:[#allocation11_spill] sm:$0xff] }
 0x5ea   : > { %v10531_v37 = vmul.f32 %v22854_v55, %v10195_v20  ;;  %v18797_v10 = vadd.f32 %v18159_v27, %v24486_v19  ;;  %v9986_v60 = vpop.f32.mrb[29].mxu0  ;;  %18214 = vmatmul.mubr.bf16.gmra.mrb[68].mxu1 %v10713_v25  ;;  %v11137_v22 = vrot.slane %v24352_v31, 3  ;;  %v24351_v26 = vshll.u32 %v22898_v16, 16 }
 0x5eb   : > { %v10529_v30 = vmul.f32 %v22829_v54, %v10193_v42  ;;  %v18798_v52 = vadd.f32 %v9986_v60, %v24487_v11  ;;  %v18160_v24 = vpop.f32.mrb[30].mxu0  ;;  %18217 = vmatprep.mubr.bf16.mxu1 %v10715_v23  ;;  %v24353_v55 = vshrl.u32 %v22959_v47, 16  ;;  %v22999_v25 = vsel %vm11035_vm3, %v22974_v12, %v11132_v28  ;;  %v23001_v54 = vpop.permute.xlu1 %10441  ;;  %v24489_v23 = vld [vmem:[#allocation13_spill] sm:$0xff] }
 0x5ec   : > { %v22993_v57 = vpack.c.bf16 %v10531_v37, %v10530_v40  ;;  %v10150_v20 = vadd.f32 %v18797_v10, %v22731_v18  ;;  %v18799_v48 = vadd.f32 %v18160_v24, %v24488_v35  ;;  %v9989_v27 = vpop.f32.mrb[31].mxu0  ;;  %v11140_v40 = vrot.slane %v24351_v26, 4  ;;  %v23020_v26 = vpop.permute.xlu0 %10446 }
 0x5ed   : > { %v23003_v60 = vpack.c.bf16 %v10529_v30, %v10528_v38  ;;  %v10148_v42 = vadd.f32 %v18798_v52, %v22731_v18  ;;  %v18800_v19 = vadd.f32 %v9989_v27, %v24489_v23  ;;  %v11146_v11 = vrot.slane %v24353_v55, 3 }
 0x5ee   : > { %10593 = vst [vmem:[#allocation2 + $0x78] sm:$0xff] %v22993_v57  ;;  %v10198_v37 = vmax.f32 %v10150_v20, 0.0  ;;  %v10151_v24 = vadd.f32 %v18799_v48, %v22731_v18  ;;  %v10718_v10 = vrot.slane %v22993_v57, 4  ;;  %v11141_v35 = vor.u32 %v11140_v40, %v11137_v22  ;;  %v24490_v22 = vld [vmem:[#allocation14_spill] sm:$0xff] }
 0x5ef   : > { %10592 = vst [vmem:[#allocation2 + $0x70] sm:$0xff] %v23003_v60  ;;  %v10196_v38 = vmax.f32 %v10148_v42, 0.0  ;;  %v10149_v30 = vadd.f32 %v18800_v19, %v22731_v18  ;;  %v10716_v52 = vrot.slane %v23003_v60, 4  ;;  %v24357_v20 = vshll.u32 %v22959_v47, 16  ;;  %v23032_v3 = vpop.permute.xlu1 %10451 }
 0x5f0   : > { %v10534_v27 = vmul.f32 %v22922_v29, %v10198_v37  ;;  %v10199_v23 = vmax.f32 %v10151_v24, 0.0  ;;  %v24360_v48 = vshrl.u32 %v22952_v58, 16  ;;  %v23028_v37 = vsel %vm11035_vm3, %v11132_v28, %v11141_v35 }
 0x5f1   : > { %v10532_v31 = vmul.f32 %v22878_v34, %v10196_v38  ;;  %v10197_v55 = vmax.f32 %v10149_v30, 0.0  ;;  %v18163_v46 = vpop.f32.mrb[32].mxu0  ;;  %v10717_v42 = vsel %vm10688_vm2, %v10714_v51, %v10716_v52  ;;  %v10719_v19 = vsel %vm10688_vm2, %v10716_v52, %v10718_v10  ;;  %v24491_v38 = vld [vmem:[#allocation15_spill] sm:$0xff] }
 0x5f2   : > { %v10535_v53 = vmul.f32 %v22935_v59, %v10199_v23  ;;  %v18801_v40 = vadd.f32 %v18163_v46, %v24490_v22  ;;  %v10002_v29 = vpop.f32.mrb[33].mxu0  ;;  %18218 = vmatmul.mubr.bf16.gmra.mrb[72].mxu1 %v10717_v42  ;;  %v11149_v24 = vrot.slane %v24357_v20, 4  ;;  %v11155_v59 = vrot.slane %v24360_v48, 3  ;;  %v24492_v23 = vld [vmem:[#allocation16_spill] sm:$0xff] }
 0x5f3   : > { %v10533_v34 = vmul.f32 %v22892_v62, %v10197_v55  ;;  %v18802_v51 = vadd.f32 %v10002_v29, %v24491_v38  ;;  %v18164_v30 = vpop.f32.mrb[34].mxu0  ;;  %18221 = vmatprep.mubr.bf16.mxu1 %v10719_v19  ;;  %v24359_v46 = vshll.u32 %v22952_v58, 16  ;;  %v24493_v55 = vld [vmem:[#allocation17_spill] sm:$0xff] }
 0x5f4   : > { %v23039_v52 = vpack.c.bf16 %v10535_v53, %v10534_v27  ;;  %v10154_v28 = vadd.f32 %v18801_v40, %v22731_v18  ;;  %v18803_v42 = vadd.f32 %v18164_v30, %v24492_v23  ;;  %v10005_v22 = vpop.f32.mrb[35].mxu0  ;;  %v11150_v20 = vor.u32 %v11149_v24, %v11146_v11  ;;  %v10457_v11 = vpop.permute.xlu0 %10456 }
 0x5f5   : > { %v23043_v9 = vpack.c.bf16 %v10533_v34, %v10532_v31  ;;  %v10152_v62 = vadd.f32 %v18802_v51, %v22731_v18  ;;  %v18804_v29 = vadd.f32 %v10005_v22, %v24493_v55  ;;  %v11158_v19 = vrot.slane %v24359_v46, 4  ;;  %v10462_v22 = vpop.permute.xlu1 %10461 }
 0x5f6   : > { %10595 = vst [vmem:[#allocation2 + $0x88] sm:$0xff] %v23039_v52  ;;  %v10202_v38 = vmax.f32 %v10154_v28, 0.0  ;;  %v10155_v53 = vadd.f32 %v18803_v42, %v22731_v18  ;;  %v10722_v27 = vrot.slane %v23039_v52, 4  ;;  %v23053_v40 = vsel %vm11035_vm3, %v11141_v35, %v11150_v20 }
 0x5f7   : > { %24494 = vst [vmem:[#allocation4_spill] sm:$0xff] %v23053_v40  ;;  %10594 = vst [vmem:[#allocation2 + $0x80] sm:$0xff] %v23043_v9  ;;  %v10200_v31 = vmax.f32 %v10152_v62, 0.0  ;;  %v10153_v24 = vadd.f32 %v18804_v29, %v22731_v18  ;;  %v10720_v34 = vrot.slane %v23043_v9, 4  ;;  %v11159_v51 = vor.u32 %v11158_v19, %v11155_v59 }
 0x5f8   : > { %v10538_v30 = vmul.f32 %v22987_v33, %v10202_v38  ;;  %v10203_v23 = vmax.f32 %v10155_v53, 0.0  ;;  %v24361_v28 = vshrl.u32 %v23003_v60, 16  ;;  %v24363_v42 = vshll.u32 %v23003_v60, 16  ;;  %v24497_v53 = vld [vmem:[#allocation19_spill] sm:$0xff] }
 0x5f9   : > { %v10536_v35 = vmul.f32 %v22957_v1, %v10200_v31  ;;  %v10201_v55 = vmax.f32 %v10153_v24, 0.0  ;;  %v18167_v46 = vpop.f32.mrb[36].mxu0  ;;  %v10721_v48 = vsel %vm10688_vm2, %v10718_v10, %v10720_v34  ;;  %v10723_v62 = vsel %vm10688_vm2, %v10720_v34, %v10722_v27 }
 0x5fa   : > { %v10539_v29 = vmul.f32 %v23001_v54, %v10203_v23  ;;  %v18805_v59 = vadd.f32 %v18167_v46, %v24495_v21  ;;  %v10018_v19 = vpop.f32.mrb[37].mxu0  ;;  %18222 = vmatmul.mubr.bf16.gmra.mrb[76].mxu1 %v10721_v48  ;;  %v23067_v33 = vsel %vm11035_vm3, %v11150_v20, %v11159_v51  ;;  %v11164_v38 = vrot.slane %v24361_v28, 3  ;;  %v24498_v20 = vld [vmem:[#allocation20_spill] sm:$0xff]  ;;  %v23081_v28 = vpop.permute.xlu0 %10466 }
 0x5fb   : > { %24496 = vst [vmem:[#allocation3_spill] sm:$0xff] %v23067_v33  ;;  %v10537_v1 = vmul.f32 %v22969_v13, %v10201_v55  ;;  %v18806_v31 = vadd.f32 %v10018_v19, %v24497_v53  ;;  %v18168_v24 = vpop.f32.mrb[38].mxu0  ;;  %18225 = vmatprep.mubr.bf16.mxu1 %v10723_v62  ;;  %v11167_v10 = vrot.slane %v24363_v42, 4  ;;  %v24362_v54 = vshrl.u32 %v22993_v57, 16  ;;  %v24499_v62 = vld [vmem:[#allocation21_spill] sm:$0xff] }
 0x5fc   : > { %v23076_v21 = vpack.c.bf16 %v10539_v29, %v10538_v30  ;;  %v10158_v48 = vadd.f32 %v18805_v59, %v22731_v18  ;;  %v18807_v46 = vadd.f32 %v18168_v24, %v24498_v20  ;;  %v10021_v34 = vpop.f32.mrb[39].mxu0  ;;  %v24367_v23 = vshll.u32 %v22993_v57, 16  ;;  %v23092_v20 = vpop.permute.xlu1 %10471 }
 0x5fd   : > { %v23083_v13 = vpack.c.bf16 %v10537_v1, %v10536_v35  ;;  %v10156_v55 = vadd.f32 %v18806_v31, %v22731_v18  ;;  %v18808_v19 = vadd.f32 %v10021_v34, %v24499_v62  ;;  %v11168_v53 = vor.u32 %v11167_v10, %v11164_v38 }
 0x5fe   : > { %10597 = vst [vmem:[#allocation2 + $0x98] sm:$0xff] %v23076_v21  ;;  %v10206_v30 = vmax.f32 %v10158_v48, 0.0  ;;  %v10159_v29 = vadd.f32 %v18807_v46, %v22731_v18  ;;  %v10726_v59 = vrot.slane %v23076_v21, 4  ;;  %v11173_v24 = vrot.slane %v24362_v54, 3 }
 0x5ff   : > { %10596 = vst [vmem:[#allocation2 + $0x90] sm:$0xff] %v23083_v13  ;;  %v10204_v35 = vmax.f32 %v10156_v55, 0.0  ;;  %v10157_v1 = vadd.f32 %v18808_v19, %v22731_v18  ;;  %v10724_v31 = vrot.slane %v23083_v13, 4  ;;  %v23098_v38 = vsel %vm11035_vm3, %v11159_v51, %v11168_v53 }
 0x600   : > { %24500 = vst [vmem:[#allocation5_spill] sm:$0xff] %v23098_v38  ;;  %v10542_v10 = vmul.f32 %v10457_v11, %v10206_v30  ;;  %v10207_v48 = vmax.f32 %v10159_v29, 0.0  ;;  %v11176_v46 = vrot.slane %v24367_v23, 4  ;;  %v24369_v34 = vshrl.u32 %v23043_v9, 16  ;;  %v10477_v29 = vpop.permute.xlu0 %10476  ;;  %v24502_v38 = vld [vmem:[#allocation23_spill] sm:$0xff] }
 0x601   : > { %v10540_v62 = vmul.f32 %v23020_v26, %v10204_v35  ;;  %v10205_v54 = vmax.f32 %v10157_v1, 0.0  ;;  %v18171_v42 = vpop.f32.mrb[40].mxu0  ;;  %v10725_v55 = vsel %vm10688_vm2, %v10722_v27, %v10724_v31  ;;  %v10727_v19 = vsel %vm10688_vm2, %v10724_v31, %v10726_v59 }
 0x602   : > { %v10543_v8 = vmul.f32 %v10462_v22, %v10207_v48  ;;  %v18809_v7 = vadd.f32 %v18171_v42, %v24501_v15  ;;  %v10034_v51 = vpop.f32.mrb[41].mxu0  ;;  %18226 = vmatmul.mubr.bf16.gmra.mrb[80].mxu1 %v10725_v55  ;;  %v11177_v11 = vor.u32 %v11176_v46, %v11173_v24  ;;  %v11182_v30 = vrot.slane %v24369_v34, 3  ;;  %v24503_v42 = vld [vmem:[#allocation24_spill] sm:$0xff]  ;;  %v10482_v46 = vpop.permute.xlu1 %10481 }
 0x603   : > { %v10541_v23 = vmul.f32 %v23032_v3, %v10205_v54  ;;  %v18810_v26 = vadd.f32 %v10034_v51, %v24502_v38  ;;  %v18172_v35 = vpop.f32.mrb[42].mxu0  ;;  %18229 = vmatprep.mubr.bf16.mxu1 %v10727_v19  ;;  %v24368_v27 = vshll.u32 %v23043_v9, 16  ;;  %v24370_v1 = vshrl.u32 %v23039_v52, 16  ;;  %v24505_v38 = vld [vmem:[#allocation25_spill] sm:$0xff] }
 0x604   : > { %v23113_v22 = vpack.c.bf16 %v10543_v8, %v10542_v10  ;;  %v10162_v15 = vadd.f32 %v18809_v7, %v22731_v18  ;;  %v18811_v24 = vadd.f32 %v18172_v35, %v24503_v42  ;;  %v10037_v31 = vpop.f32.mrb[43].mxu0  ;;  %v23118_v48 = vsel %vm11035_vm3, %v11168_v53, %v11177_v11 }
 0x605   : > { %24504 = vst [vmem:[#allocation6_spill] sm:$0xff] %v23118_v48  ;;  %v23120_v3 = vpack.c.bf16 %v10541_v23, %v10540_v62  ;;  %v10160_v54 = vadd.f32 %v18810_v26, %v22731_v18  ;;  %v18812_v55 = vadd.f32 %v10037_v31, %v24505_v38  ;;  %v11185_v19 = vrot.slane %v24368_v27, 4 }
 0x606   : > { %10599 = vst [vmem:[#allocation2 + $0xa8] sm:$0xff] %v23113_v22  ;;  %v10210_v8 = vmax.f32 %v10162_v15, 0.0  ;;  %v10163_v7 = vadd.f32 %v18811_v24, %v22731_v18  ;;  %v10730_v10 = vrot.slane %v23113_v22, 4  ;;  %v11191_v53 = vrot.slane %v24370_v1, 3  ;;  %v10487_v24 = vpop.permute.xlu0 %10486 }
 0x607   : > { %10598 = vst [vmem:[#allocation2 + $0xa0] sm:$0xff] %v23120_v3  ;;  %v10208_v23 = vmax.f32 %v10160_v54, 0.0  ;;  %v10161_v62 = vadd.f32 %v18812_v55, %v22731_v18  ;;  %v10728_v51 = vrot.slane %v23120_v3, 4  ;;  %v11186_v26 = vor.u32 %v11185_v19, %v11182_v30  ;;  %v24506_v55 = vld [vmem:[#allocation26_spill] sm:$0xff]  ;;  %v10492_v19 = vpop.permute.xlu1 %10491 }
 0x608   : > { %v10546_v35 = vmul.f32 %v10477_v29, %v10210_v8  ;;  %v10211_v42 = vmax.f32 %v10163_v7, 0.0  ;;  %v11192_v31 = vshll.u32 %v23039_v52, 16  ;;  %v11198_v15 = vshrl.u32 %v23083_v13, 16  ;;  %v24507_v8 = vld [vmem:[#allocation27_spill] sm:$0xff] }
 0x609   : > { %v10544_v38 = vmul.f32 %v23081_v28, %v10208_v23  ;;  %v10209_v27 = vmax.f32 %v10161_v62, 0.0  ;;  %v18175_v34 = vpop.f32.mrb[44].mxu0  ;;  %v10729_v1 = vsel %vm10688_vm2, %v10726_v59, %v10728_v51  ;;  %v10731_v54 = vsel %vm10688_vm2, %v10728_v51, %v10730_v10 }
 0x60a   : > { %v10547_v48 = vmul.f32 %v10482_v46, %v10211_v42  ;;  %v18813_v33 = vadd.f32 %v18175_v34, %v24506_v55  ;;  %v10050_v40 = vpop.f32.mrb[45].mxu0  ;;  %18230 = vmatmul.mubr.bf16.gmra.mrb[84].mxu1 %v10729_v1  ;;  %v23141_v30 = vsel %vm11035_vm3, %v11177_v11, %v11186_v26  ;;  %v11194_v29 = vrot.slane %v11192_v31, 4  ;;  %v24508_v1 = vld [vmem:[#allocation28_spill] sm:$0xff] }
 0x60b   : > { %v10545_v28 = vmul.f32 %v23092_v20, %v10209_v27  ;;  %v18814_v7 = vadd.f32 %v10050_v40, %v24507_v8  ;;  %v18176_v23 = vpop.f32.mrb[46].mxu0  ;;  %18233 = vmatprep.mubr.bf16.mxu1 %v10731_v54  ;;  %v11200_v59 = vrot.slane %v11198_v15, 3  ;;  %v24371_v34 = vshll.u32 %v23083_v13, 16  ;;  %v24509_v40 = vld [vmem:[#allocation29_spill] sm:$0xff] }
 0x60c   : > { %v23150_v46 = vpack.c.bf16 %v10547_v48, %v10546_v35  ;;  %v10166_v11 = vadd.f32 %v18813_v33, %v22731_v18  ;;  %v18815_v62 = vadd.f32 %v18176_v23, %v24508_v1  ;;  %v10053_v51 = vpop.f32.mrb[47].mxu0  ;;  %v11195_v42 = vor.u32 %v11194_v29, %v11191_v53  ;;  %v10497_v53 = vpop.permute.xlu0 %10496 }
 0x60d   : > { %v23154_v55 = vpack.c.bf16 %v10545_v28, %v10544_v38  ;;  %v10164_v20 = vadd.f32 %v18814_v7, %v22731_v18  ;;  %v18816_v27 = vadd.f32 %v10053_v51, %v24509_v40  ;;  %v11203_v54 = vrot.slane %v24371_v34, 4  ;;  %v10502_v51 = vpop.permute.xlu1 %10501 }
 0x60e   : > { %10601 = vst [vmem:[#allocation2 + $0xb8] sm:$0xff] %v23150_v46  ;;  %v10214_v8 = vmax.f32 %v10166_v11, 0.0  ;;  %v10167_v48 = vadd.f32 %v18815_v62, %v22731_v18  ;;  %v10734_v33 = vrot.slane %v23150_v46, 4  ;;  %v23164_v35 = vsel %vm11035_vm3, %v11186_v26, %v11195_v42 }
 0x60f   : > { %10600 = vst [vmem:[#allocation2 + $0xb0] sm:$0xff] %v23154_v55  ;;  %v10212_v38 = vmax.f32 %v10164_v20, 0.0  ;;  %v10165_v29 = vadd.f32 %v18816_v27, %v22731_v18  ;;  %v10732_v28 = vrot.slane %v23154_v55, 4  ;;  %v11204_v7 = vor.u32 %v11203_v54, %v11200_v59 }
 0x610   : > { %v10550_v23 = vmul.f32 %v10497_v53, %v10214_v8  ;;  %v10215_v1 = vmax.f32 %v10167_v48, 0.0  ;;  %v11207_v11 = vshrl.u32 %v23076_v21, 16  ;;  %v11210_v62 = vshll.u32 %v23076_v21, 16 }
 0x611   : > { %v10548_v40 = vmul.f32 %v10487_v24, %v10212_v38  ;;  %v10213_v34 = vmax.f32 %v10165_v29, 0.0  ;;  %v10733_v26 = vsel %vm10688_vm2, %v10730_v10, %v10732_v28  ;;  %v10735_v20 = vsel %vm10688_vm2, %v10732_v28, %v10734_v33 }
 0x612   : > { %v10551_v18 = vmul.f32 %v10502_v51, %v10215_v1  ;;  %18234 = vmatmul.mubr.bf16.gmra.mrb[88].mxu1 %v10733_v26  ;;  %v23176_v59 = vsel %vm11035_vm3, %v11195_v42, %v11204_v7  ;;  %v11209_v27 = vrot.slane %v11207_v11, 3  ;;  %v11212_v54 = vrot.slane %v11210_v62, 4 }
 0x613   : > { %v10549_v24 = vmul.f32 %v10492_v19, %v10213_v34  ;;  %18237 = vmatprep.mubr.bf16.mxu1 %v10735_v20  ;;  %v24379_v10 = vshrl.u32 %v23120_v3, 16  ;;  %v24375_v8 = vshll.u32 %v23120_v3, 16  ;;  %v24373_v48 = vshrl.u32 %v23113_v22, 16 }
 0x614   : > { %v10579_v53 = vpack.c.bf16 %v10551_v18, %v10550_v23  ;;  %v11213_v38 = vor.u32 %v11212_v54, %v11209_v27  ;;  %v24372_v29 = vshll.u32 %v23113_v22, 16  ;;  %v24374_v42 = vshrl.u32 %v23154_v55, 16 }
 0x615   : > { %v10578_v28 = vpack.c.bf16 %v10549_v24, %v10548_v40  ;;  %v11218_v1 = vrot.slane %v24379_v10, 3  ;;  %v11221_v19 = vrot.slane %v24375_v8, 4  ;;  %v11227_v34 = vrot.slane %v24373_v48, 3 }
 0x616   : > { %10603 = vst [vmem:[#allocation2 + $0xc8] sm:$0xff] %v10579_v53  ;;  %v23194_v51 = vsel %vm11035_vm3, %v11204_v7, %v11213_v38  ;;  %v11230_v23 = vrot.slane %v24372_v29, 4  ;;  %v11236_v26 = vrot.slane %v24374_v42, 3  ;;  %v24376_v40 = vshll.u32 %v23154_v55, 16 }
 0x617   : > { %10602 = vst [vmem:[#allocation2 + $0xc0] sm:$0xff] %v10578_v28  ;;  %v24382_v20 = vshrl.u32 %v22781_v14, 16  ;;  %v11222_v18 = vor.u32 %v11221_v19, %v11218_v1  ;;  %v24377_v27 = vshrl.u32 %v23150_v46, 16  ;;  %v24378_v54 = vshll.u32 %v23150_v46, 16 }
 0x618   : > { %v24380_v24 = vshll.u32 %v22781_v14, 16  ;;  %v11231_v7 = vor.u32 %v11230_v23, %v11227_v34  ;;  %v11239_v53 = vrot.slane %v24376_v40, 4  ;;  %v24510_v29 = vshll.u32 %v22755_v56, 16 }
 0x619   : > { %v24511_v42 = vshrl.u32 %v22788_v41, 16  ;;  %v23212_v28 = vsel %vm11035_vm3, %v11213_v38, %v11222_v18  ;;  %v11245_v1 = vrot.slane %v24377_v27, 3  ;;  %v11248_v19 = vrot.slane %v24378_v54, 4 }
 0x61a   : > { %v11589_v48 = vrot.slane %v24510_v29, 5  ;;  %v24512_v34 = vshll.u32 %v22788_v41, 16  ;;  %v23221_v40 = vsel %vm11035_vm3, %v11222_v18, %v11231_v7  ;;  %v11240_v56 = vor.u32 %v11239_v53, %v11236_v26 }
 0x61b   : > { %v11074_v8 = vrot.slane %v24511_v42, 3  ;;  %v11043_v38 = vor.u32 %v22875_v49, %v22873_v50  ;;  %v11249_v42 = vor.u32 %v11248_v19, %v11245_v1  ;;  %v11083_v27 = vrot.slane %v24382_v20, 3 }
 0x61c   : > { %v11077_v23 = vrot.slane %v24512_v34, 4  ;;  %v23224_v29 = vor.u32 %v11589_v48, %v22920_v17  ;;  %v11086_v54 = vrot.slane %v24380_v24, 4  ;;  %v23233_v10 = vsel %vm11035_vm3, %v11231_v7, %v11240_v56 }
 0x61d   : > { %v23241_v17 = vsel %vm11035_vm3, %v11240_v56, %v11249_v42  ;;  %v11051_v50 = vor.u32 %v22861_v2, %v22692_v44  ;;  %v11060_v49 = vor.u32 %v22915_v61, %v22902_v32  ;;  %v11069_v18 = vor.u32 %v22929_v63, %v22890_v6 }
 0x61e   : > { %v23238_v26 = vsel %vm11575_vm4, %v22704_v45, %v23224_v29  ;;  %v10628_v48 = vld [vmem:[#allocation2 + $0xc0] sm:$0xf]  ;;  %v11078_v7 = vor.u32 %v11077_v23, %v11074_v8  ;;  %v24381_v1 = vshrl.u32 %v22822_v4, 16  ;;  %v23251_v56 = vor.u32 %v11086_v54, %v11083_v27 }
 0x61f   : > { %v10736_v53 = vrot.slane %v10628_v48, 4  ;;  %v11252_v19 = vshrl.u32 %v10628_v48, 16  ;;  %v11255_v34 = vshll.u32 %v10628_v48, 16  ;;  %v11052_v24 = vsel %vm11035_vm3, %v11043_v38, %v11051_v50 }
 0x620   : > { %v24383_v2 = vshll.u32 %v22822_v4, 16  ;;  %v11061_v6 = vsel %vm11035_vm3, %v11051_v50, %v11060_v49  ;;  %v11070_v63 = vsel %vm11035_vm3, %v11060_v49, %v11069_v18  ;;  %v23260_v8 = vsel %vm11035_vm3, %v11069_v18, %v11078_v7 }
 0x621   : > { %v10737_v44 = vsel %vm10688_vm2, %v10734_v33, %v10736_v53  ;;  %v11254_v32 = vrot.slane %v11252_v19, 3  ;;  %v11257_v61 = vrot.slane %v11255_v34, 4  ;;  %v23264_v27 = vrot.slane %v24381_v1, 3 }
 0x622   : > { %18238 = vmatmul.mubr.bf16.gmra.mrb[92].mxu1 %v10737_v44  ;;  %v24513_v33 = vshrl.u32 %v22847_v39, 16  ;;  %v24514_v38 = vshll.u32 %v22847_v39, 16  ;;  %v24515_v50 = vshrl.u32 %v22909_v0, 16  ;;  %v24516_v18 = vshll.u32 %v22909_v0, 16 }
 0x623   : > { %18257 = vmatprep.mubr.bf16.mxu1 %v11052_v24  ;;  %v11258_v54 = vor.u32 %v11257_v61, %v11254_v32  ;;  %v24517_v24 = vshrl.u32 %v22898_v16, 16  ;;  %v23279_v44 = vsel %vm11035_vm3, %v11078_v7, %v23251_v56  ;;  %v23283_v32 = vrot.slane %v24383_v2, 4 }
 0x624   : > { %v11616_v23 = vrot.slane %v24513_v33, 4  ;;  %v11617_v48 = vrot.slane %v24514_v38, 5  ;;  %v11620_v49 = vrot.slane %v24515_v50, 4  ;;  %v11621_v19 = vrot.slane %v24516_v18, 5 }
 0x625   : > { %v11624_v34 = vrot.slane %v24517_v24, 4  ;;  %v23286_v39 = vsel %vm11035_vm3, %v11249_v42, %v11258_v54  ;;  %v24518_v61 = vshll.u32 %v22898_v16, 16  ;;  %v24519_v50 = vshrl.u32 %v22959_v47, 16  ;;  %v20419_v16 = vld [vmem:[%s24342_s6 + $0x88] sm:$0xff]  }
 0x626   : > { %v23290_v38 = vor.u32 %v11617_v48, %v11616_v23  ;;  %v11622_v0 = vor.u32 %v11621_v19, %v11620_v49  ;;  %v24520_v24 = vshll.u32 %v22959_v47, 16  ;;  %v11102_v1 = vshll.u32 %v22813_v43, 16 }
 0x627   : > { %v11625_v33 = vrot.slane %v24518_v61, 5  ;;  %v11628_v18 = vrot.slane %v24519_v50, 4  ;;  %v24521_v2 = vshrl.u32 %v22952_v58, 16  ;;  %v24522_v42 = vshll.u32 %v22952_v58, 16 }
 0x628   : > { %v11629_v7 = vrot.slane %v24520_v24, 5  ;;  %v23306_v23 = vsel %vm11575_vm4, %v23290_v38, %v11622_v0  ;;  %v24523_v47 = vshrl.u32 %v23003_v60, 16  ;;  %v24524_v19 = vshll.u32 %v23003_v60, 16 }
 0x629   : > { %v11626_v20 = vor.u32 %v11625_v33, %v11624_v34  ;;  %v11632_v53 = vrot.slane %v24521_v2, 4  ;;  %v11633_v54 = vrot.slane %v24522_v42, 5  ;;  %v24525_v61 = vshrl.u32 %v22993_v57, 16 }
 0x62a   : > { %v11630_v48 = vor.u32 %v11629_v7, %v11628_v18  ;;  %v11636_v49 = vrot.slane %v24523_v47, 4  ;;  %v11637_v34 = vrot.slane %v24524_v19, 5  ;;  %v24526_v50 = vshll.u32 %v22993_v57, 16  ;;  %18258 = vmatmul.mubr.bf16.vlgmr.msra.gmra.mrb[48].mxu1 %v11061_v6 }
 0x62b   : > { %v23313_v2 = vsel %vm11575_vm4, %v11622_v0, %v11626_v20  ;;  %v11634_v58 = vor.u32 %v11633_v54, %v11632_v53  ;;  %v11640_v33 = vrot.slane %v24525_v61, 4  ;;  %v24527_v7 = vshrl.u32 %v23043_v9, 16  ;;  %18261 = vmatprep.mubr.bf16.mxu1 %v11070_v63  ;;  %18306 = vmatpush3.bf16.msra.mxu1 %v22907_v36  ;;  %v20420_v54 = vld [vmem:[%s24342_s6 + $0x90] sm:$0xff]  }
 0x62c   : > { %v11641_v24 = vrot.slane %v24526_v50, 5  ;;  %v23320_v42 = vsel %vm11575_vm4, %v11626_v20, %v11630_v48  ;;  %v11638_v18 = vor.u32 %v11637_v34, %v11636_v49  ;;  %v24528_v60 = vshll.u32 %v23043_v9, 16  ;;  %18307 = vmatprep.subr.bf16.mxu1 %v20419_v16 }
 0x62d   : > { %v11644_v47 = vrot.slane %v24527_v7, 4  ;;  %v23328_v53 = vsel %vm11575_vm4, %v11630_v48, %v11634_v58  ;;  %v24529_v57 = vshrl.u32 %v23039_v52, 16  ;;  %v11649_v20 = vrot.slane %v11192_v31, 5 }
 0x62e   : > { %v11645_v19 = vrot.slane %v24528_v60, 5  ;;  %v11642_v0 = vor.u32 %v11641_v24, %v11640_v33  ;;  %v23338_v9 = vsel %vm11575_vm4, %v11634_v58, %v11638_v18  ;;  %v11652_v36 = vrot.slane %v11198_v15, 4  ;;  %v20421_v60 = vld [vmem:[%s24342_s6 + $0x98] sm:$0xff]  }
 0x62f   : > { %v11648_v6 = vrot.slane %v24529_v57, 4  ;;  %v24530_v48 = vshll.u32 %v23083_v13, 16  ;;  %v11656_v31 = vrot.slane %v11207_v11, 4  ;;  %v11657_v61 = vrot.slane %v11210_v62, 5  ;;  %18308 = vmatpush3.bf16.msra.mxu1 %v20419_v16 }
 0x630   : > { %v11646_v63 = vor.u32 %v11645_v19, %v11644_v47  ;;  %v23345_v34 = vsel %vm11575_vm4, %v11638_v18, %v11642_v0  ;;  %v24531_v50 = vshrl.u32 %v23120_v3, 16  ;;  %v24532_v13 = vshll.u32 %v23120_v3, 16  ;;  %18309 = vmatprep.subr.bf16.mxu1 %v20420_v54 }
 0x631   : > { %v11653_v49 = vrot.slane %v24530_v48, 5  ;;  %v11650_v52 = vor.u32 %v11649_v20, %v11648_v6  ;;  %v11658_v7 = vor.u32 %v11657_v61, %v11656_v31  ;;  %v24533_v11 = vshrl.u32 %v23113_v22, 16 }
 0x632   : > { %v23352_v58 = vsel %vm11575_vm4, %v11642_v0, %v11646_v63  ;;  %v11660_v15 = vrot.slane %v24531_v50, 4  ;;  %v11661_v24 = vrot.slane %v24532_v13, 5  ;;  %v24534_v21 = vshll.u32 %v23113_v22, 16  ;;  %18262 = vmatmul.mubr.bf16.gmra.mrb[52].mxu1 %v23260_v8  ;;  %v20422_v8 = vld [vmem:[%s24342_s6 + $0xa0] sm:$0xff]  }
 0x633   : > { %v11654_v33 = vor.u32 %v11653_v49, %v11652_v36  ;;  %v23359_v18 = vsel %vm11575_vm4, %v11646_v63, %v11650_v52  ;;  %v11664_v47 = vrot.slane %v24533_v11, 4  ;;  %v24535_v16 = vshrl.u32 %v23154_v55, 16  ;;  %18265 = vmatprep.mubr.bf16.mxu1 %v23279_v44  ;;  %18310 = vmatpush3.bf16.msra.mxu1 %v20420_v54  ;;  %v20423_v11 = vld [vmem:[%s24342_s6 + $0xa8] sm:$0xff]  }
 0x634   : > { %v11665_v62 = vrot.slane %v24534_v21, 5  ;;  %v11662_v3 = vor.u32 %v11661_v24, %v11660_v15  ;;  %v24536_v57 = vshll.u32 %v23154_v55, 16  ;;  %v24537_v63 = vshrl.u32 %v23150_v46, 16  ;;  %18311 = vmatprep.subr.bf16.mxu1 %v20421_v60 }
 0x635   : > { %v23369_v19 = vsel %vm11575_vm4, %v11650_v52, %v11654_v33  ;;  %v11668_v0 = vrot.slane %v24535_v16, 4  ;;  %v23376_v20 = vsel %vm11575_vm4, %v11654_v33, %v11658_v7  ;;  %v24538_v48 = vshll.u32 %v23150_v46, 16 }
 0x636   : > { %v11669_v6 = vrot.slane %v24536_v57, 5  ;;  %v11666_v22 = vor.u32 %v11665_v62, %v11664_v47  ;;  %v11672_v36 = vrot.slane %v24537_v63, 4  ;;  %v24539_v52 = vshrl.u32 %v22813_v43, 16  ;;  %v20424_v62 = vld [vmem:[%s24342_s6 + $0xb0] sm:$0xff]  }
 0x637   : > { %v11673_v49 = vrot.slane %v24538_v48, 5  ;;  %v11104_v61 = vrot.slane %v11102_v1, 4  ;;  %v23388_v55 = vsel %vm11575_vm4, %v11658_v7, %v11662_v3  ;;  %v11096_v13 = vor.u32 %v23283_v32, %v23264_v27  ;;  %18312 = vmatpush3.bf16.msra.mxu1 %v20421_v60  ;;  %v23433_v57 = vld [vmem:[#allocation2 + $0x10] sm:$0xff] }
 0x638   : > { %v11101_v31 = vrot.slane %v24539_v52, 3  ;;  %v11670_v33 = vor.u32 %v11669_v6, %v11668_v0  ;;  %v23392_v50 = vsel %vm11575_vm4, %v11662_v3, %v11666_v22  ;;  %v11108_v24 = vshrl.u32 %v22856_v5, 16  ;;  %18313 = vmatprep.subr.bf16.mxu1 %v20422_v8  ;;  %v20426_v0 = vld [vmem:[%s24342_s6 + $0xc0] sm:$0xff]   ;;  %v23435_v6 = vld [vmem:[#allocation2 + $0x18] sm:$0xff] }
 0x639   : > { %v23394_v46 = vor.u32 %v11673_v49, %v11672_v36  ;;  %v11111_v44 = vshll.u32 %v22856_v5, 16  ;;  %v11097_v47 = vsel %vm11035_vm3, %v23251_v56, %v11096_v13  ;;  %v20425_v56 = vld [vmem:[%s24342_s6 + $0xb8] sm:$0xff]   ;;  %v12078_v63 = vshrl.u32 %v23433_v57, 16  ;;  %v24540_v49 = vld [vmem:[#allocation4_spill] sm:$0xff]  ;;  %v24541_v52 = vld [vmem:[#allocation3_spill] sm:$0xff] }
 0x63a   : > { %v23400_v15 = vsel %vm11575_vm4, %v11666_v22, %v11670_v33  ;;  %v11105_v7 = vor.u32 %v11104_v61, %v11101_v31  ;;  %v11110_v27 = vrot.slane %v11108_v24, 3  ;;  %18266 = vmatmul.mubr.bf16.gmra.mrb[56].mxu1 %v11097_v47  ;;  %v12081_v22 = vshll.u32 %v23433_v57, 16 }
 0x63b   : > { %v23408_v54 = vsel %vm11575_vm4, %v11670_v33, %v23394_v46  ;;  %v11113_v32 = vrot.slane %v11111_v44, 4  ;;  %18314 = vmatpush3.bf16.msra.mxu1 %v20422_v8  ;;  %v12086_v36 = vshrl.u32 %v23435_v6, 16  ;;  %v24542_v33 = vld [vmem:[#allocation5_spill] sm:$0xff]  ;;  %v24543_v8 = vld [vmem:[#allocation6_spill] sm:$0xff] }
 0x63c   : > { %v11106_v21 = vsel %vm11035_vm3, %v11096_v13, %v11105_v7  ;;  %18315 = vmatprep.subr.bf16.mxu1 %v20423_v11  ;;  %v12999_v48 = vrot.slane %v12081_v22, 1  ;;  %v20509_v13 = vld [vmem:[#allocation2] sm:$0xf0] }
 0x63d   : > { %18269 = vmatprep.mubr.bf16.mxu1 %v11106_v21  ;;  %v11114_v60 = vor.u32 %v11113_v32, %v11110_v27 }
 0x63f   : > { %18316 = vmatpush3.bf16.msra.mxu1 %v20423_v11  ;;  %v11115_v3 = vsel %vm11035_vm3, %v11105_v7, %v11114_v60  ;;  %v11124_v16 = vsel %vm11035_vm3, %v11114_v60, %v22974_v12  ;;  %v12089_v12 = vshll.u32 %v23435_v6, 16  ;;  %v11577_v7 = vshrl.u32 %v20509_v13, 16 }
 0x640   : > { %18317 = vmatprep.subr.bf16.mxu1 %v20424_v62  ;;  %v11580_v11 = vshll.u32 %v20509_v13, 16  ;;  %v24548_v60 = vshll.u32 %v22788_v41, 16 }
 0x641   : > { %v11579_v47 = vrot.slane %v11577_v7, 4  ;;  %v11609_v7 = vrot.slane %v11102_v1, 5  ;;  %v11613_v1 = vrot.slane %v11111_v44, 5  ;;  %v20433_v44 = vld [vmem:[%s24342_s6 + $0xf8] sm:$0xff]  }
 0x642   : > { %18270 = vmatmul.mubr.bf16.gmra.mrb[60].mxu1 %v11115_v3  ;;  %v11582_v27 = vrot.slane %v11580_v11, 5  ;;  %v20430_v11 = vld [vmem:[%s24342_s6 + $0xe0] sm:$0xff]  }
 0x643   : > { %18273 = vmatprep.mubr.bf16.mxu1 %v11124_v16  ;;  %18318 = vmatpush3.bf16.msra.mxu1 %v20424_v62  ;;  %v24550_v16 = vshll.u32 %v22781_v14, 16 }
 0x644   : > { %18319 = vmatprep.subr.bf16.mxu1 %v20425_v56 }
 0x647   : > { %18320 = vmatpush3.bf16.msra.mxu1 %v20425_v56  ;;  %v24549_v56 = vshrl.u32 %v22781_v14, 16  ;;  %v24551_v14 = vshrl.u32 %v22822_v4, 16 }
 0x648   : > { %18369 = vmatprep.subr.bf16.mxu1 %v20426_v0 }
 0x649   : > { %v11600_v3 = vrot.slane %v24549_v56, 4 }
 0x64a   : > { %18274 = vmatmul.mubr.bf16.gmra.mrb[64].mxu1 %v22999_v25  ;;  %v13004_v25 = vrot.slane %v12089_v12, 1 }
 0x64b   : > { %18277 = vmatprep.mubr.bf16.mxu1 %v23028_v37  ;;  %v13000_v37 = vor.u32 %v12999_v48, %v12078_v63  ;;  %v11601_v48 = vrot.slane %v24550_v16, 5  ;;  %v20435_v16 = vld [vmem:[%s24342_s6 + $0x108] sm:$0xff]  }
 0x64c   : > { %v23452_v31 = vor.u32 %v13004_v25, %v12086_v36 }
 0x64d   : > { %v23455_v61 = vsel %vm532_vm0, %v13000_v37, %v13004_v25  ;;  %v20428_v25 = vld [vmem:[%s24342_s6 + $0xd0] sm:$0xff]  }
 0x652   : > { %18278 = vmatmul.mubr.bf16.gmra.mrb[68].mxu1 %v24540_v49  ;;  %v11602_v49 = vor.u32 %v11601_v48, %v11600_v3 }
 0x653   : > { %18281 = vmatprep.mubr.bf16.mxu1 %v24541_v52  ;;  %v11604_v52 = vrot.slane %v24551_v14, 4 }
 0x65a   : > { %18282 = vmatmul.mubr.bf16.gmra.mrb[72].mxu1 %v24542_v33 }
 0x65b   : > { %18285 = vmatprep.mubr.bf16.mxu1 %v24543_v8  ;;  %v24553_v8 = vshrl.u32 %v22813_v43, 16  ;;  %v11612_v43 = vrot.slane %v11108_v24, 4 }
 0x65d   : > { %v11608_v13 = vrot.slane %v24553_v8, 4  ;;  %v11614_v24 = vor.u32 %v11613_v1, %v11612_v43  ;;  %v23623_v43 = vld [vmem:[#allocation2 + $0x50] sm:$0xff] }
 0x65e   : > { %24562 = vst [vmem:[#allocation15_spill] sm:$0xff] %v23623_v43 }
 0x662   : > { %18286 = vmatmul.mubr.bf16.gmra.mrb[76].mxu1 %v23141_v30  ;;  %v11583_v30 = vor.u32 %v11582_v27, %v11579_v47  ;;  %v11610_v27 = vor.u32 %v11609_v7, %v11608_v13  ;;  %v20437_v13 = vld [vmem:[%s24342_s6 + $0x118] sm:$0xff]  }
 0x663   : > { %18289 = vmatprep.mubr.bf16.mxu1 %v23164_v35 }
 0x664   : > { %v11587_v35 = vsel %vm11575_vm4, %v11583_v30, %v22704_v45  ;;  %v11597_v45 = vrot.slane %v24548_v60, 5  ;;  %v12088_v60 = vrot.slane %v12086_v36, 7 }
 0x666   : > { %v12091_v56 = vor.u32 %v12089_v12, %v12088_v60 }
 0x66a   : > { %18290 = vmatmul.mubr.bf16.gmra.mrb[80].mxu1 %v23176_v59  ;;  %v24544_v59 = vld [vmem:[#allocation30_spill] sm:$0xff] }
 0x66b   : > { %18293 = vmatprep.mubr.bf16.mxu1 %v23194_v51  ;;  %v24545_v51 = vshrl.u32 %v24544_v59, 16 }
 0x672   : > { %18294 = vmatmul.mubr.bf16.gmra.mrb[84].mxu1 %v23212_v28  ;;  %v11592_v28 = vrot.slane %v24545_v51, 4 }
 0x673   : > { %18297 = vmatprep.mubr.bf16.mxu1 %v23221_v40  ;;  %v24546_v40 = vshll.u32 %v24544_v59, 16  ;;  %v23516_v59 = vld [vmem:[#allocation2] sm:$0xff] }
 0x674   : > { %24554 = vst [vmem:[#allocation7_spill] sm:$0xff] %v23516_v59  ;;  %v24385_v51 = vshrl.u32 %v23516_v59, 16 }
 0x675   : > { %v11593_v32 = vrot.slane %v24546_v40, 5  ;;  %v24384_v40 = vshll.u32 %v23516_v59, 16  ;;  %v23768_v59 = vld [vmem:[#allocation2 + $0xa8] sm:$0xff] }
 0x676   : > { %v14697_v5 = vrot.slane %v24385_v51, 4  ;;  %24582 = vst [vmem:[#allocation31_spill] sm:$0xff] %v23768_v59 }
 0x677   : > { %v11594_v21 = vor.u32 %v11593_v32, %v11592_v28  ;;  %v20432_v28 = vld [vmem:[%s24342_s6 + $0xf0] sm:$0xff]   ;;  %v14698_v32 = vrot.slane %v24384_v40, 5 }
 0x67a   : > { %18298 = vmatmul.mubr.bf16.gmra.mrb[88].mxu1 %v23233_v10  ;;  %v20427_v10 = vld [vmem:[%s24342_s6 + $0xc8] sm:$0xff]  }
 0x67b   : > { %18301 = vmatprep.mubr.bf16.mxu1 %v23241_v17  ;;  %v24547_v17 = vshrl.u32 %v22788_v41, 16 }
 0x67d   : > { %v11596_v62 = vrot.slane %v24547_v17, 4  ;;  %v23533_v17 = vor.u32 %v14698_v32, %v14697_v5  ;;  %v20439_v32 = vld [vmem:[%s24342_s6 + $0x128] sm:$0xff]  }
 0x67f   : > { %v11598_v41 = vor.u32 %v11597_v45, %v11596_v62  ;;  %24555 = vst [vmem:[#allocation8_spill] sm:$0xff] %v23533_v17  ;;  %v20434_v62 = vld [vmem:[%s24342_s6 + $0x100] sm:$0xff]   ;;  %v23567_v45 = vld [vmem:[#allocation2 + $0x28] sm:$0xff] }
 0x680   : > { %24557 = vst [vmem:[#allocation10_spill] sm:$0xff] %v23567_v45 }
 0x681   : > { %v11603_v33 = vsel %vm11575_vm4, %v11598_v41, %v11602_v49 }
 0x682   : > { %18302 = vmatmul.mubr.bf16.gmra.mrb[92].mxu1 %v23286_v39  ;;  %v11595_v39 = vsel %vm11575_vm4, %v23224_v29, %v11594_v21  ;;  %v20429_v29 = vld [vmem:[%s24342_s6 + $0xd8] sm:$0xff]  }
 0x683   : > { %18321 = vmatprep.mubr.bf16.mxu1 %v11587_v35 }
 0x68a   : > { %18322 = vmatmul.mubr.bf16.vlgmr.msra.gmra.mrb[48].mxu1 %v23238_v26  ;;  %v11599_v26 = vsel %vm11575_vm4, %v11594_v21, %v11598_v41  ;;  %v11615_v21 = vsel %vm11575_vm4, %v11610_v27, %v11614_v24 }
 0x68b   : > { %18325 = vmatprep.mubr.bf16.mxu1 %v11595_v39  ;;  %18370 = vmatpush3.bf16.msra.mxu1 %v20426_v0  ;;  %v24552_v0 = vshll.u32 %v22822_v4, 16  ;;  %v20431_v4 = vld [vmem:[%s24342_s6 + $0xe8] sm:$0xff]   ;;  %v23569_v39 = vld [vmem:[#allocation2 + $0x30] sm:$0xff] }
 0x68c   : > { %18371 = vmatprep.subr.bf16.mxu1 %v20427_v10  ;;  %24558 = vst [vmem:[#allocation11_spill] sm:$0xff] %v23569_v39  ;;  %v23581_v3 = vshrl.u32 %v23569_v39, 16  ;;  %v23598_v14 = vshll.u32 %v23569_v39, 16 }
 0x68d   : > { %v11605_v37 = vrot.slane %v24552_v0, 5 }
 0x68e   : > { %v12112_v12 = vrot.slane %v23581_v3, 7 }
 0x68f   : > { %18372 = vmatpush3.bf16.msra.mxu1 %v20427_v10  ;;  %v11606_v47 = vor.u32 %v11605_v37, %v11604_v52  ;;  %v11619_v10 = vsel %vm11575_vm4, %v11614_v24, %v23290_v38  ;;  %v11557_v38 = vld [vmem:[#allocation2 + $0xc0] sm:$0x1f]  ;;  %v20436_v52 = vld [vmem:[%s24342_s6 + $0x110] sm:$0xff]  }
 0x690   : > { %18373 = vmatprep.subr.bf16.mxu1 %v20428_v25 }
 0x691   : > { %v11607_v30 = vsel %vm11575_vm4, %v11602_v49, %v11606_v47  ;;  %v11611_v35 = vsel %vm11575_vm4, %v11606_v47, %v11610_v27  ;;  %v23590_v49 = vld [vmem:[#allocation2 + $0x38] sm:$0xff] }
 0x692   : > { %18326 = vmatmul.mubr.bf16.gmra.mrb[52].mxu1 %v11599_v26  ;;  %24559 = vst [vmem:[#allocation12_spill] sm:$0xff] %v23590_v49  ;;  %v23595_v26 = vld [vmem:[#allocation2 + $0x40] sm:$0xff]  ;;  %v23605_v37 = vshrl.u32 %v23590_v49, 16 }
 0x693   : > { %18329 = vmatprep.mubr.bf16.mxu1 %v11603_v33  ;;  %18374 = vmatpush3.bf16.msra.mxu1 %v20428_v25  ;;  %24560 = vst [vmem:[#allocation13_spill] sm:$0xff] %v23595_v26  ;;  %v12115_v33 = vor.u32 %v23598_v14, %v12112_v12  ;;  %v23609_v8 = vshrl.u32 %v23595_v26, 16  ;;  %v23626_v1 = vshll.u32 %v23595_v26, 16 }
 0x694   : > { %18375 = vmatprep.subr.bf16.mxu1 %v20429_v29 }
 0x695   : > { %v12128_v27 = vrot.slane %v23609_v8, 7 }
 0x697   : > { %18376 = vmatpush3.bf16.msra.mxu1 %v20429_v29  ;;  %v23593_v29 = vshll.u32 %v23567_v45, 16  ;;  %v12131_v5 = vor.u32 %v23626_v1, %v12128_v27 }
 0x698   : > { %18377 = vmatprep.subr.bf16.mxu1 %v20430_v11 }
 0x69a   : > { %18330 = vmatmul.mubr.bf16.gmra.mrb[56].mxu1 %v11607_v30  ;;  %v23621_v30 = vshll.u32 %v23590_v49, 16 }
 0x69b   : > { %18333 = vmatprep.mubr.bf16.mxu1 %v11611_v35  ;;  %18378 = vmatpush3.bf16.msra.mxu1 %v20430_v11  ;;  %v12120_v11 = vrot.slane %v23605_v37, 7  ;;  %v20438_v35 = vld [vmem:[%s24342_s6 + $0x120] sm:$0xff]  }
 0x69c   : > { %18379 = vmatprep.subr.bf16.mxu1 %v20431_v4 }
 0x69f   : > { %18380 = vmatpush3.bf16.msra.mxu1 %v20431_v4  ;;  %v23618_v4 = vld [vmem:[#allocation2 + $0x48] sm:$0xff] }
 0x6a0   : > { %18381 = vmatprep.subr.bf16.mxu1 %v20432_v28  ;;  %24561 = vst [vmem:[#allocation14_spill] sm:$0xff] %v23618_v4  ;;  %v23633_v24 = vshrl.u32 %v23618_v4, 16 }
 0x6a2   : > { %18334 = vmatmul.mubr.bf16.gmra.mrb[60].mxu1 %v11615_v21 }
 0x6a3   : > { %18337 = vmatprep.mubr.bf16.mxu1 %v11619_v10  ;;  %18382 = vmatpush3.bf16.msra.mxu1 %v20432_v28  ;;  %v12123_v28 = vor.u32 %v23621_v30, %v12120_v11  ;;  %v12136_v10 = vrot.slane %v23633_v24, 7 }
 0x6a4   : > { %18383 = vmatprep.subr.bf16.mxu1 %v20433_v44 }
 0x6a5   : > { %v12124_v21 = vsel %vm12072_vm5, %v12112_v12, %v12123_v28 }
 0x6a7   : > { %18384 = vmatpush3.bf16.msra.mxu1 %v20433_v44  ;;  %v23637_v44 = vshrl.u32 %v23623_v43, 16 }
 0x6a8   : > { %18433 = vmatprep.subr.bf16.mxu1 %v20434_v62 }
 0x6aa   : > { %18338 = vmatmul.mubr.bf16.gmra.mrb[64].mxu1 %v23306_v23  ;;  %v11677_v23 = vshrl.u32 %v11557_v38, 16 }
 0x6ab   : > { %18341 = vmatprep.mubr.bf16.mxu1 %v23313_v2  ;;  %v11680_v2 = vshll.u32 %v11557_v38, 16  ;;  %v12144_v38 = vrot.slane %v23637_v44, 7 }
 0x6b2   : > { %18342 = vmatmul.mubr.bf16.gmra.mrb[68].mxu1 %v23320_v42  ;;  %v12030_v42 = vld [vmem:[#allocation2 + $0x8] sm:$0x80] }
 0x6b3   : > { %18345 = vmatprep.mubr.bf16.mxu1 %v23328_v53  ;;  %v11679_v53 = vrot.slane %v11677_v23, 4  ;;  %v23646_v23 = vld [vmem:[#allocation2 + $0x58] sm:$0xff] }
 0x6b4   : > { %24563 = vst [vmem:[#allocation16_spill] sm:$0xff] %v23646_v23 }
 0x6ba   : > { %18346 = vmatmul.mubr.bf16.gmra.mrb[72].mxu1 %v23338_v9  ;;  %v11682_v9 = vrot.slane %v11680_v2, 5  ;;  %v23649_v2 = vshll.u32 %v23618_v4, 16 }
 0x6bb   : > { %18349 = vmatprep.mubr.bf16.mxu1 %v23345_v34  ;;  %v12074_v34 = vshrl.u32 %v12030_v42, 16  ;;  %v23651_v42 = vld [vmem:[#allocation2 + $0x60] sm:$0xff] }
 0x6bc   : > { %24564 = vst [vmem:[#allocation17_spill] sm:$0xff] %v23651_v42 }
 0x6c2   : > { %18350 = vmatmul.mubr.bf16.gmra.mrb[76].mxu1 %v23352_v58  ;;  %v12080_v58 = vrot.slane %v12078_v63, 7 }
 0x6c3   : > { %18353 = vmatprep.mubr.bf16.mxu1 %v23359_v18  ;;  %v23554_v18 = vld [vmem:[#allocation2 + $0x20] sm:$0xff] }
 0x6c4   : > { %24556 = vst [vmem:[#allocation9_spill] sm:$0xff] %v23554_v18  ;;  %v12092_v48 = vsel %vm12072_vm5, %v12080_v58, %v12091_v56  ;;  %v23674_v56 = vld [vmem:[#allocation2 + $0x68] sm:$0xff] }
 0x6c5   : > { %24565 = vst [vmem:[#allocation18_spill] sm:$0xff] %v23674_v56  ;;  %v23691_v12 = vshrl.u32 %v23674_v56, 16 }
 0x6ca   : > { %18354 = vmatmul.mubr.bf16.gmra.mrb[80].mxu1 %v23369_v19  ;;  %v11683_v19 = vor.u32 %v11682_v9, %v11679_v53  ;;  %v23654_v53 = vshll.u32 %v23623_v43, 16  ;;  %v20440_v9 = vld [vmem:[%s24342_s6 + $0x130] sm:$0xff]  }
 0x6cb   : > { %18357 = vmatprep.mubr.bf16.mxu1 %v23376_v20  ;;  %v12076_v20 = vrot.slane %v12074_v34, 7  ;;  %v12139_v34 = vor.u32 %v23649_v2, %v12136_v10 }
 0x6d2   : > { %18358 = vmatmul.mubr.bf16.gmra.mrb[84].mxu1 %v23388_v55  ;;  %v12083_v55 = vor.u32 %v12081_v22, %v12080_v58  ;;  %v23572_v22 = vshll.u32 %v23554_v18, 16  ;;  %v23661_v58 = vshrl.u32 %v23646_v23, 16 }
 0x6d3   : > { %18361 = vmatprep.mubr.bf16.mxu1 %v23392_v50  ;;  %v23559_v50 = vshrl.u32 %v23554_v18, 16 }
 0x6d5   : > { %v12096_v63 = vrot.slane %v23559_v50, 7 }
 0x6d7   : > { %v12099_v36 = vor.u32 %v23572_v22, %v12096_v63 }
 0x6d9   : > { %v12100_v41 = vsel %vm12072_vm5, %v12088_v60, %v12099_v36  ;;  %v12152_v60 = vrot.slane %v23661_v58, 7  ;;  %v23677_v36 = vshll.u32 %v23646_v23, 16 }
 0x6da   : > { %18362 = vmatmul.mubr.bf16.gmra.mrb[88].mxu1 %v23400_v15  ;;  %v11684_v15 = vsel %vm11575_vm4, %v23394_v46, %v11683_v19  ;;  %v23577_v46 = vshrl.u32 %v23567_v45, 16  ;;  %v12147_v19 = vor.u32 %v23654_v53, %v12144_v38 }
 0x6db   : > { %18365 = vmatprep.mubr.bf16.mxu1 %v23408_v54  ;;  %v12084_v54 = vsel %vm12072_vm5, %v12076_v20, %v12083_v55  ;;  %v23665_v20 = vshrl.u32 %v23651_v42, 16  ;;  %v20441_v55 = vld [vmem:[%s24342_s6 + $0x138] sm:$0xff]  }
 0x6dc   : > { %v12104_v25 = vrot.slane %v23577_v46, 7 }
 0x6de   : > { %v12107_v0 = vor.u32 %v23593_v29, %v12104_v25  ;;  %v12116_v47 = vsel %vm12072_vm5, %v12104_v25, %v12115_v33  ;;  %v23687_v25 = vld [vmem:[%s24342_s6 + $0x140] sm:$0xff]  }
 0x6e0   : > { %v12108_v7 = vsel %vm12072_vm5, %v12096_v63, %v12107_v0  ;;  %v12160_v63 = vrot.slane %v23665_v20, 7 }
 0x6e2   : > { %18366 = vmatmul.mubr.bf16.gmra.mrb[92].mxu1 %v11684_v15  ;;  %v12140_v15 = vsel %vm12072_vm5, %v12128_v27, %v12139_v34  ;;  %v23705_v27 = vshll.u32 %v23674_v56, 16 }
 0x6e3   : > { %18385 = vmatprep.mubr.bf16.mxu1 %v12084_v54  ;;  %v12148_v54 = vsel %vm12072_vm5, %v12136_v10, %v12147_v19  ;;  %v23724_v19 = vld [vmem:[#allocation2 + $0x88] sm:$0xff] }
 0x6e4   : > { %24571 = vst [vmem:[#allocation24_spill] sm:$0xff] %v23724_v19 }
 0x6ea   : > { %18386 = vmatmul.mubr.bf16.vlgmr.msra.gmra.mrb[48].mxu1 %v12092_v48  ;;  %v23682_v48 = vshll.u32 %v23651_v42, 16 }
 0x6eb   : > { %18389 = vmatprep.mubr.bf16.mxu1 %v12100_v41  ;;  %18434 = vmatpush3.bf16.msra.mxu1 %v20434_v62  ;;  %v12132_v62 = vsel %vm12072_vm5, %v12120_v11, %v12131_v5  ;;  %v12155_v41 = vor.u32 %v23677_v36, %v12152_v60 }
 0x6ec   : > { %18435 = vmatprep.subr.bf16.mxu1 %v20435_v16 }
 0x6ed   : > { %v12156_v33 = vsel %vm12072_vm5, %v12144_v38, %v12155_v41 }
 0x6ef   : > { %18436 = vmatpush3.bf16.msra.mxu1 %v20435_v16  ;;  %v23679_v16 = vld [vmem:[#allocation2 + $0x70] sm:$0xff] }
 0x6f0   : > { %18437 = vmatprep.subr.bf16.mxu1 %v20436_v52  ;;  %24566 = vst [vmem:[#allocation19_spill] sm:$0xff] %v23679_v16  ;;  %v23695_v0 = vshrl.u32 %v23679_v16, 16  ;;  %v23710_v28 = vshll.u32 %v23679_v16, 16 }
 0x6f2   : > { %18390 = vmatmul.mubr.bf16.gmra.mrb[52].mxu1 %v12108_v7  ;;  %v12176_v11 = vrot.slane %v23695_v0, 7 }
 0x6f3   : > { %18393 = vmatprep.mubr.bf16.mxu1 %v12116_v47  ;;  %18438 = vmatpush3.bf16.msra.mxu1 %v20436_v52  ;;  %v12163_v52 = vor.u32 %v23682_v48, %v12160_v63  ;;  %v23702_v47 = vld [vmem:[#allocation2 + $0x78] sm:$0xff] }
 0x6f4   : > { %18439 = vmatprep.subr.bf16.mxu1 %v20437_v13  ;;  %24567 = vst [vmem:[#allocation20_spill] sm:$0xff] %v23702_v47 }
 0x6f5   : > { %v12164_v7 = vsel %vm12072_vm5, %v12152_v60, %v12163_v52 }
 0x6f7   : > { %18440 = vmatpush3.bf16.msra.mxu1 %v20437_v13  ;;  %v12168_v13 = vrot.slane %v23691_v12, 7 }
 0x6f8   : > { %18441 = vmatprep.subr.bf16.mxu1 %v20438_v35 }
 0x6f9   : > { %v12171_v5 = vor.u32 %v23705_v27, %v12168_v13 }
 0x6fa   : > { %18394 = vmatmul.mubr.bf16.gmra.mrb[56].mxu1 %v12124_v21  ;;  %v12179_v21 = vor.u32 %v23710_v28, %v12176_v11 }
 0x6fb   : > { %18397 = vmatprep.mubr.bf16.mxu1 %v12132_v62  ;;  %18442 = vmatpush3.bf16.msra.mxu1 %v20438_v35  ;;  %v23707_v35 = vld [vmem:[#allocation2 + $0x80] sm:$0xff]  ;;  %v12172_v62 = vsel %vm12072_vm5, %v12160_v63, %v12171_v5  ;;  %v23736_v63 = vshrl.u32 %v23724_v19, 16 }
 0x6fc   : > { %18443 = vmatprep.subr.bf16.mxu1 %v20439_v32  ;;  %24568 = vst [vmem:[#allocation21_spill] sm:$0xff] %v23707_v35  ;;  %v23718_v10 = vshrl.u32 %v23707_v35, 16  ;;  %v23732_v60 = vshll.u32 %v23707_v35, 16 }
 0x6fd   : > { %24574 = vst [vmem:[#allocation27_spill] sm:$0xff] %v23736_v63 }
 0x6fe   : > { %24570 = vst [vmem:[#allocation23_spill] sm:$0xff] %v23718_v10  ;;  %v12192_v34 = vrot.slane %v23718_v10, 7  ;;  %24573 = vst [vmem:[#allocation26_spill] sm:$0xff] %v23732_v60  ;;  %v23812_v10 = vld [vmem:[#allocation2 + $0xc8] sm:$0xff] }
 0x6ff   : > { %18444 = vmatpush3.bf16.msra.mxu1 %v20439_v32  ;;  %v23714_v32 = vshrl.u32 %v23702_v47, 16  ;;  %24594 = vst [vmem:[#allocation43_spill] sm:$0xff] %v23812_v10 }
 0x700   : > { %18445 = vmatprep.subr.bf16.mxu1 %v20440_v9  ;;  %v12195_v41 = vor.u32 %v23732_v60, %v12192_v34 }
 0x701   : > { %24569 = vst [vmem:[#allocation22_spill] sm:$0xff] %v23714_v32  ;;  %v12184_v38 = vrot.slane %v23714_v32, 7  ;;  %v23795_v32 = vld [vmem:[#allocation2 + $0xc0] sm:$0xff] }
 0x702   : > { %18398 = vmatmul.mubr.bf16.gmra.mrb[60].mxu1 %v12140_v15  ;;  %v23729_v15 = vld [vmem:[#allocation2 + $0x90] sm:$0xff]  ;;  %24590 = vst [vmem:[#allocation39_spill] sm:$0xff] %v23795_v32 }
 0x703   : > { %18401 = vmatprep.mubr.bf16.mxu1 %v12148_v54  ;;  %18446 = vmatpush3.bf16.msra.mxu1 %v20440_v9  ;;  %v12180_v9 = vsel %vm12072_vm5, %v12168_v13, %v12179_v21  ;;  %24572 = vst [vmem:[#allocation25_spill] sm:$0xff] %v23729_v15  ;;  %v23740_v52 = vshrl.u32 %v23729_v15, 16  ;;  %v12200_v13 = vrot.slane %v23736_v63, 7  ;;  %v23746_v21 = vld [vmem:[#allocation2 + $0x98] sm:$0xff]  ;;  %v23754_v40 = vshll.u32 %v23729_v15, 16 }
 0x704   : > { %18447 = vmatprep.subr.bf16.mxu1 %v20441_v55  ;;  %24576 = vst [vmem:[#allocation29_spill] sm:$0xff] %v23746_v21  ;;  %v23771_v63 = vshll.u32 %v23746_v21, 16 }
 0x705   : > { %24575 = vst [vmem:[#allocation28_spill] sm:$0xff] %v23740_v52  ;;  %v12208_v5 = vrot.slane %v23740_v52, 7  ;;  %24579 = vst [vmem:[#allocation5_spill] sm:$0xff] %v23754_v40  ;;  %v23773_v52 = vld [vmem:[#allocation2 + $0xb0] sm:$0xff] }
 0x706   : > { %24583 = vst [vmem:[#allocation32_spill] sm:$0xff] %v23771_v63  ;;  %24584 = vst [vmem:[#allocation33_spill] sm:$0xff] %v23773_v52 }
 0x707   : > { %18448 = vmatpush3.bf16.msra.mxu1 %v20441_v55  ;;  %v23727_v55 = vshll.u32 %v23702_v47, 16 }
 0x708   : > { %18497 = vmatprep.subr.bf16.mxu1 %v23687_v25 }
 0x709   : > { %v12187_v54 = vor.u32 %v23727_v55, %v12184_v38 }
 0x70a   : > { %18402 = vmatmul.mubr.bf16.gmra.mrb[64].mxu1 %v12156_v33 }
 0x70b   : > { %18405 = vmatprep.mubr.bf16.mxu1 %v12164_v7  ;;  %v12188_v33 = vsel %vm12072_vm5, %v12176_v11, %v12187_v54  ;;  %v12196_v7 = vsel %vm12072_vm5, %v12184_v38, %v12195_v41  ;;  %v23758_v54 = vshrl.u32 %v23746_v21, 16  ;;  %v12211_v38 = vor.u32 %v23754_v40, %v12208_v5 }
 0x70d   : > { %24580 = vst [vmem:[#allocation6_spill] sm:$0xff] %v23758_v54  ;;  %v12212_v51 = vsel %vm12072_vm5, %v12200_v13, %v12211_v38  ;;  %v23784_v38 = vshrl.u32 %v23773_v52, 16 }
 0x70f   : > { %24587 = vst [vmem:[#allocation36_spill] sm:$0xff] %v23784_v38 }
 0x712   : > { %18406 = vmatmul.mubr.bf16.gmra.mrb[68].mxu1 %v12172_v62  ;;  %v23749_v62 = vshll.u32 %v23724_v19, 16 }
 0x713   : > { %18409 = vmatprep.mubr.bf16.mxu1 %v12180_v9  ;;  %v23751_v9 = vld [vmem:[#allocation2 + $0xa0] sm:$0xff] }
 0x714   : > { %24577 = vst [vmem:[#allocation4_spill] sm:$0xff] %v23749_v62  ;;  %24578 = vst [vmem:[#allocation3_spill] sm:$0xff] %v23751_v9  ;;  %v12203_v11 = vor.u32 %v23749_v62, %v12200_v13  ;;  %v23762_v41 = vshrl.u32 %v23751_v9, 16  ;;  %v23776_v40 = vshll.u32 %v23751_v9, 16  ;;  %v23790_v62 = vld [vmem:[#allocation2 + $0xb8] sm:$0xff] }
 0x715   : > { %24588 = vst [vmem:[#allocation37_spill] sm:$0xff] %v23790_v62 }
 0x716   : > { %24581 = vst [vmem:[#allocation30_spill] sm:$0xff] %v23762_v41  ;;  %v12224_v17 = vrot.slane %v23762_v41, 7  ;;  %24585 = vst [vmem:[#allocation34_spill] sm:$0xff] %v23776_v40  ;;  %v12240_v41 = vrot.slane %v23784_v38, 7 }
 0x718   : > { %v12227_v13 = vor.u32 %v23776_v40, %v12224_v17  ;;  %v23798_v40 = vshll.u32 %v23773_v52, 16 }
 0x71a   : > { %18410 = vmatmul.mubr.bf16.gmra.mrb[72].mxu1 %v12188_v33  ;;  %v12204_v33 = vsel %vm12072_vm5, %v12192_v34, %v12203_v11  ;;  %v23780_v11 = vshrl.u32 %v23768_v59, 16  ;;  %24591 = vst [vmem:[#allocation40_spill] sm:$0xff] %v23798_v40 }
 0x71b   : > { %18413 = vmatprep.mubr.bf16.mxu1 %v12196_v7  ;;  %v12216_v7 = vrot.slane %v23758_v54, 7 }
 0x71c   : > { %24586 = vst [vmem:[#allocation35_spill] sm:$0xff] %v23780_v11 }
 0x71d   : > { %v12219_v34 = vor.u32 %v23771_v63, %v12216_v7  ;;  %v12228_v54 = vsel %vm12072_vm5, %v12216_v7, %v12227_v13  ;;  %v23793_v63 = vshll.u32 %v23768_v59, 16  ;;  %v12243_v7 = vor.u32 %v23798_v40, %v12240_v41 }
 0x71e   : > { %v23806_v13 = vshrl.u32 %v23795_v32, 16  ;;  %v23818_v40 = vshll.u32 %v23795_v32, 16 }
 0x71f   : > { %24589 = vst [vmem:[#allocation38_spill] sm:$0xff] %v23793_v63 }
 0x720   : > { %24593 = vst [vmem:[#allocation42_spill] sm:$0xff] %v23806_v13  ;;  %v12256_v38 = vrot.slane %v23806_v13, 7 }
 0x722   : > { %18414 = vmatmul.mubr.bf16.gmra.mrb[76].mxu1 %v12204_v33  ;;  %v12232_v33 = vrot.slane %v23780_v11, 7 }
 0x723   : > { %18417 = vmatprep.mubr.bf16.mxu1 %v12212_v51  ;;  %v12220_v51 = vsel %vm12072_vm5, %v12208_v5, %v12219_v34  ;;  %v23802_v34 = vshrl.u32 %v23790_v62, 16 }
 0x724   : > { %v12235_v5 = vor.u32 %v23793_v63, %v12232_v33  ;;  %v12244_v11 = vsel %vm12072_vm5, %v12232_v33, %v12243_v7  ;;  %v23815_v63 = vshll.u32 %v23790_v62, 16 }
 0x725   : > { %24592 = vst [vmem:[#allocation41_spill] sm:$0xff] %v23802_v34 }
 0x72a   : > { %18418 = vmatmul.mubr.bf16.gmra.mrb[80].mxu1 %v12220_v51  ;;  %v12248_v51 = vrot.slane %v23802_v34, 7 }
 0x72b   : > { %18421 = vmatprep.mubr.bf16.mxu1 %v12228_v54  ;;  %v12236_v54 = vsel %vm12072_vm5, %v12224_v17, %v12235_v5  ;;  %v23822_v17 = vshrl.u32 %v23812_v10, 16  ;;  %v12259_v5 = vor.u32 %v23818_v40, %v12256_v38 }
 0x72c   : > { %v12251_v60 = vor.u32 %v23815_v63, %v12248_v51 }
 0x72d   : > { %v12264_v7 = vrot.slane %v23822_v17, 7 }
 0x72e   : > { %v12252_v33 = vsel %vm12072_vm5, %v12240_v41, %v12251_v60  ;;  %v20443_v60 = vld [vmem:[%s24342_s6 + $0x148] sm:$0xff]   ;;  %v20444_v41 = vld [vmem:[%s24342_s6 + $0x150] sm:$0xff]  }
 0x732   : > { %18422 = vmatmul.mubr.bf16.gmra.mrb[84].mxu1 %v12236_v54  ;;  %v23829_v54 = vshll.u32 %v23812_v10, 16 }
 0x733   : > { %18425 = vmatprep.mubr.bf16.mxu1 %v12244_v11  ;;  %v12260_v11 = vsel %vm12072_vm5, %v12248_v51, %v12259_v5  ;;  %v13012_v51 = vrot.slane %v23572_v22, 1 }
 0x734   : > { %24595 = vst [vmem:[#allocation44_spill] sm:$0xff] %v23829_v54  ;;  %v12267_v34 = vor.u32 %v23829_v54, %v12264_v7  ;;  %v20451_v7 = vld [vmem:[%s24342_s6 + $0x188] sm:$0xff]  }
 0x735   : > { %v13016_v5 = vor.u32 %v13012_v51, %v23559_v50 }
 0x736   : > { %v12268_v13 = vsel %vm12072_vm5, %v12256_v38, %v12267_v34  ;;  %v20448_v38 = vld [vmem:[%s24342_s6 + $0x170] sm:$0xff]   ;;  %v20449_v34 = vld [vmem:[%s24342_s6 + $0x178] sm:$0xff]  }
 0x73a   : > { %18426 = vmatmul.mubr.bf16.gmra.mrb[88].mxu1 %v12252_v33  ;;  %v13020_v33 = vrot.slane %v23593_v29, 1 }
 0x73b   : > { %18429 = vmatprep.mubr.bf16.mxu1 %v12260_v11  ;;  %v13013_v11 = vsel %vm532_vm0, %v23452_v31, %v13012_v51  ;;  %v20453_v31 = vld [vmem:[%s24342_s6 + $0x198] sm:$0xff]   ;;  %v20454_v51 = vld [vmem:[%s24342_s6 + $0x1a0] sm:$0xff]  }
 0x742   : > { %18430 = vmatmul.mubr.bf16.gmra.mrb[92].mxu1 %v12268_v13  ;;  %v20450_v13 = vld [vmem:[%s24342_s6 + $0x180] sm:$0xff]  }
 0x743   : > { %18449 = vmatprep.mubr.bf16.mxu1 %v23433_v57  ;;  %v20445_v57 = vld [vmem:[%s24342_s6 + $0x158] sm:$0xff]  }
 0x74a   : > { %18450 = vmatmul.mubr.bf16.vlgmr.msra.gmra.mrb[48].mxu1 %v23435_v6  ;;  %v20446_v6 = vld [vmem:[%s24342_s6 + $0x160] sm:$0xff]  }
 0x74b   : > { %18453 = vmatprep.mubr.bf16.mxu1 %v23554_v18  ;;  %18498 = vmatpush3.bf16.msra.mxu1 %v23687_v25  ;;  %v20447_v25 = vld [vmem:[%s24342_s6 + $0x168] sm:$0xff]  }
 0x74c   : > { %18499 = vmatprep.subr.bf16.mxu1 %v20443_v60 }
 0x74f   : > { %18500 = vmatpush3.bf16.msra.mxu1 %v20443_v60  ;;  %v13021_v60 = vsel %vm532_vm0, %v13016_v5, %v13020_v33 }
 0x750   : > { %18501 = vmatprep.subr.bf16.mxu1 %v20444_v41 }
 0x752   : > { %18454 = vmatmul.mubr.bf16.gmra.mrb[52].mxu1 %v23567_v45 }
 0x753   : > { %18457 = vmatprep.mubr.bf16.mxu1 %v23569_v39  ;;  %18502 = vmatpush3.bf16.msra.mxu1 %v20444_v41  ;;  %v13028_v41 = vrot.slane %v23598_v14, 1 }
 0x754   : > { %18503 = vmatprep.subr.bf16.mxu1 %v20445_v57 }
 0x757   : > { %18504 = vmatpush3.bf16.msra.mxu1 %v20445_v57  ;;  %v13032_v57 = vor.u32 %v13028_v41, %v23581_v3 }
 0x758   : > { %18505 = vmatprep.subr.bf16.mxu1 %v20446_v6 }
 0x75a   : > { %18458 = vmatmul.mubr.bf16.gmra.mrb[56].mxu1 %v23590_v49 }
 0x75b   : > { %18461 = vmatprep.mubr.bf16.mxu1 %v23595_v26  ;;  %18506 = vmatpush3.bf16.msra.mxu1 %v20446_v6  ;;  %v13024_v6 = vor.u32 %v13020_v33, %v23577_v46 }
 0x75c   : > { %18507 = vmatprep.subr.bf16.mxu1 %v20447_v25 }
 0x75f   : > { %18508 = vmatpush3.bf16.msra.mxu1 %v20447_v25  ;;  %v13036_v25 = vrot.slane %v23621_v30, 1 }
 0x760   : > { %18509 = vmatprep.subr.bf16.mxu1 %v20448_v38 }
 0x761   : > { %v13040_v33 = vor.u32 %v13036_v25, %v23605_v37 }
 0x762   : > { %18462 = vmatmul.mubr.bf16.gmra.mrb[60].mxu1 %v23618_v4 }
 0x763   : > { %18465 = vmatprep.mubr.bf16.mxu1 %v23623_v43  ;;  %18510 = vmatpush3.bf16.msra.mxu1 %v20448_v38  ;;  %v13029_v38 = vsel %vm532_vm0, %v13024_v6, %v13028_v41  ;;  %v13180_v43 = vrot.slane %v23829_v54, 1 }
 0x764   : > { %18511 = vmatprep.subr.bf16.mxu1 %v20449_v34 }
 0x765   : > { %v13184_v39 = vor.u32 %v13180_v43, %v23822_v17 }
 0x767   : > { %18512 = vmatpush3.bf16.msra.mxu1 %v20449_v34  ;;  %v13037_v34 = vsel %vm532_vm0, %v13032_v57, %v13036_v25  ;;  %v20456_v57 = vld [vmem:[%s24342_s6 + $0x1b0] sm:$0xff]  }
 0x768   : > { %18561 = vmatprep.subr.bf16.mxu1 %v20450_v13 }
 0x76a   : > { %18466 = vmatmul.mubr.bf16.gmra.mrb[64].mxu1 %v23646_v23  ;;  %v24612_v23 = vld [vmem:[#allocation41_spill] sm:$0xff] }
 0x76b   : > { %18469 = vmatprep.mubr.bf16.mxu1 %v23651_v42  ;;  %v13172_v42 = vrot.slane %v23818_v40, 1 }
 0x772   : > { %18470 = vmatmul.mubr.bf16.gmra.mrb[68].mxu1 %v23674_v56 }
 0x773   : > { %18473 = vmatprep.mubr.bf16.mxu1 %v23679_v16 }
 0x77a   : > { %18474 = vmatmul.mubr.bf16.gmra.mrb[72].mxu1 %v23702_v47  ;;  %v24608_v47 = vld [vmem:[#allocation40_spill] sm:$0xff] }
 0x77b   : > { %18477 = vmatprep.mubr.bf16.mxu1 %v23707_v35  ;;  %v13156_v16 = vrot.slane %v24608_v47, 1 }
 0x782   : > { %18478 = vmatmul.mubr.bf16.gmra.mrb[76].mxu1 %v23724_v19  ;;  %v24607_v19 = vld [vmem:[#allocation38_spill] sm:$0xff] }
 0x783   : > { %18481 = vmatprep.mubr.bf16.mxu1 %v23729_v15 }
 0x78a   : > { %18482 = vmatmul.mubr.bf16.gmra.mrb[80].mxu1 %v23746_v21  ;;  %v24604_v21 = vld [vmem:[#allocation34_spill] sm:$0xff] }
 0x78b   : > { %18485 = vmatprep.mubr.bf16.mxu1 %v23751_v9  ;;  %v13140_v15 = vrot.slane %v24604_v21, 1 }
 0x792   : > { %18486 = vmatmul.mubr.bf16.gmra.mrb[84].mxu1 %v23768_v59  ;;  %v24603_v59 = vld [vmem:[#allocation32_spill] sm:$0xff] }
 0x793   : > { %18489 = vmatprep.mubr.bf16.mxu1 %v23773_v52 }
 0x79a   : > { %18490 = vmatmul.mubr.bf16.gmra.mrb[88].mxu1 %v23790_v62  ;;  %v24600_v62 = vld [vmem:[#allocation5_spill] sm:$0xff] }
 0x79b   : > { %18493 = vmatprep.mubr.bf16.mxu1 %v23795_v32  ;;  %v13124_v52 = vrot.slane %v24600_v62, 1 }
 0x7a2   : > { %18494 = vmatmul.mubr.bf16.gmra.mrb[92].mxu1 %v23812_v10  ;;  %v24599_v10 = vld [vmem:[#allocation4_spill] sm:$0xff] }
 0x7a3   : > { %18513 = vmatprep.mubr.bf16.mxu1 %v23455_v61  ;;  %v20452_v61 = vld [vmem:[%s24342_s6 + $0x190] sm:$0xff]  }
 0x7aa   : > { %18514 = vmatmul.mubr.bf16.vlgmr.msra.gmra.mrb[48].mxu1 %v13013_v11  ;;  %v20455_v11 = vld [vmem:[%s24342_s6 + $0x1a8] sm:$0xff]  }
 0x7ab   : > { %18517 = vmatprep.mubr.bf16.mxu1 %v13021_v60  ;;  %18562 = vmatpush3.bf16.msra.mxu1 %v20450_v13  ;;  %v13044_v13 = vrot.slane %v23626_v1, 1 }
 0x7ac   : > { %18563 = vmatprep.subr.bf16.mxu1 %v20451_v7 }
 0x7ad   : > { %v13048_v5 = vor.u32 %v13044_v13, %v23609_v8  ;;  %v13045_v60 = vsel %vm532_vm0, %v13040_v33, %v13044_v13 }
 0x7af   : > { %18564 = vmatpush3.bf16.msra.mxu1 %v20451_v7  ;;  %v13052_v7 = vrot.slane %v23649_v2, 1 }
 0x7b0   : > { %18565 = vmatprep.subr.bf16.mxu1 %v20452_v61 }
 0x7b1   : > { %v13053_v41 = vsel %vm532_vm0, %v13048_v5, %v13052_v7  ;;  %v13056_v25 = vor.u32 %v13052_v7, %v23633_v24  ;;  %v23932_v5 = vld [vmem:[%s24342_s6 + $0x1c0] sm:$0xff]  }
 0x7b2   : > { %18518 = vmatmul.mubr.bf16.gmra.mrb[52].mxu1 %v13029_v38  ;;  %v20457_v38 = vld [vmem:[%s24342_s6 + $0x1b8] sm:$0xff]  }
 0x7b3   : > { %18521 = vmatprep.mubr.bf16.mxu1 %v13037_v34  ;;  %18566 = vmatpush3.bf16.msra.mxu1 %v20452_v61  ;;  %v13060_v61 = vrot.slane %v23654_v53, 1 }
 0x7b4   : > { %18567 = vmatprep.subr.bf16.mxu1 %v20453_v31 }
 0x7b5   : > { %v13064_v6 = vor.u32 %v13060_v61, %v23637_v44  ;;  %v13061_v34 = vsel %vm532_vm0, %v13056_v25, %v13060_v61  ;;  %v13092_v61 = vrot.slane %v23710_v28, 1  ;;  %v13100_v25 = vrot.slane %v23727_v55, 1 }
 0x7b7   : > { %18568 = vmatpush3.bf16.msra.mxu1 %v20453_v31  ;;  %v13068_v31 = vrot.slane %v23677_v36, 1 }
 0x7b8   : > { %18569 = vmatprep.subr.bf16.mxu1 %v20454_v51 }
 0x7b9   : > { %v13069_v13 = vsel %vm532_vm0, %v13064_v6, %v13068_v31  ;;  %v13072_v7 = vor.u32 %v13068_v31, %v23661_v58 }
 0x7ba   : > { %18522 = vmatmul.mubr.bf16.gmra.mrb[56].mxu1 %v13045_v60 }
 0x7bb   : > { %18525 = vmatprep.mubr.bf16.mxu1 %v13053_v41  ;;  %18570 = vmatpush3.bf16.msra.mxu1 %v20454_v51  ;;  %v13076_v51 = vrot.slane %v23682_v48, 1 }
 0x7bc   : > { %18571 = vmatprep.subr.bf16.mxu1 %v20455_v11 }
 0x7bd   : > { %v13080_v33 = vor.u32 %v13076_v51, %v23665_v20  ;;  %v13077_v60 = vsel %vm532_vm0, %v13072_v7, %v13076_v51  ;;  %v24597_v51 = vld [vmem:[#allocation23_spill] sm:$0xff] }
 0x7bf   : > { %18572 = vmatpush3.bf16.msra.mxu1 %v20455_v11  ;;  %v13084_v11 = vrot.slane %v23705_v27, 1 }
 0x7c0   : > { %18573 = vmatprep.subr.bf16.mxu1 %v20456_v57 }
 0x7c1   : > { %v13085_v41 = vsel %vm532_vm0, %v13080_v33, %v13084_v11  ;;  %v13088_v6 = vor.u32 %v13084_v11, %v23691_v12  ;;  %v24598_v33 = vld [vmem:[#allocation22_spill] sm:$0xff] }
 0x7c2   : > { %18526 = vmatmul.mubr.bf16.gmra.mrb[60].mxu1 %v13061_v34  ;;  %v24596_v34 = vld [vmem:[#allocation26_spill] sm:$0xff] }
 0x7c3   : > { %18529 = vmatprep.mubr.bf16.mxu1 %v13069_v13  ;;  %18574 = vmatpush3.bf16.msra.mxu1 %v20456_v57  ;;  %v13096_v57 = vor.u32 %v13092_v61, %v23695_v0  ;;  %v13093_v31 = vsel %vm532_vm0, %v13088_v6, %v13092_v61  ;;  %v13108_v13 = vrot.slane %v24596_v34, 1  ;;  %v24601_v61 = vld [vmem:[#allocation28_spill] sm:$0xff] }
 0x7c4   : > { %18575 = vmatprep.subr.bf16.mxu1 %v20457_v38  ;;  %v13128_v6 = vor.u32 %v13124_v52, %v24601_v61 }
 0x7c5   : > { %v13112_v7 = vor.u32 %v13108_v13, %v24597_v51 }
 0x7c7   : > { %18576 = vmatpush3.bf16.msra.mxu1 %v20457_v38  ;;  %v13101_v38 = vsel %vm532_vm0, %v13096_v57, %v13100_v25  ;;  %v24602_v57 = vld [vmem:[#allocation27_spill] sm:$0xff] }
 0x7c8   : > { %18625 = vmatprep.subr.bf16.mxu1 %v23932_v5 }
 0x7ca   : > { %18530 = vmatmul.mubr.bf16.gmra.mrb[64].mxu1 %v13077_v60  ;;  %v13104_v60 = vor.u32 %v13100_v25, %v24598_v33 }
 0x7cb   : > { %18533 = vmatprep.mubr.bf16.mxu1 %v13085_v41  ;;  %v13116_v41 = vrot.slane %v24599_v10, 1 }
 0x7cc   : > { %v13109_v32 = vsel %vm532_vm0, %v13104_v60, %v13108_v13 }
 0x7cd   : > { %v13117_v11 = vsel %vm532_vm0, %v13112_v7, %v13116_v41  ;;  %v24606_v7 = vld [vmem:[#allocation6_spill] sm:$0xff] }
 0x7d2   : > { %18534 = vmatmul.mubr.bf16.gmra.mrb[68].mxu1 %v13093_v31  ;;  %v13120_v31 = vor.u32 %v13116_v41, %v24602_v57 }
 0x7d3   : > { %18537 = vmatprep.mubr.bf16.mxu1 %v13101_v38  ;;  %v13132_v38 = vrot.slane %v24603_v59, 1 }
 0x7d4   : > { %v13125_v9 = vsel %vm532_vm0, %v13120_v31, %v13124_v52  ;;  %v24609_v52 = vld [vmem:[#allocation36_spill] sm:$0xff] }
 0x7d5   : > { %v13133_v25 = vsel %vm532_vm0, %v13128_v6, %v13132_v38  ;;  %v13136_v60 = vor.u32 %v13132_v38, %v24606_v7  ;;  %v24610_v6 = vld [vmem:[#allocation35_spill] sm:$0xff] }
 0x7d7   : > { %v13141_v35 = vsel %vm532_vm0, %v13136_v60, %v13140_v15  ;;  %v12976_v60 = vld [vmem:[#allocation2 + $0xd0] sm:$0x1] }
 0x7d8   : > { %v13186_v49 = vshll.u32 %v12976_v60, 16  ;;  %v13606_v60 = vrot.slane %v23581_v3, 3 }
 0x7da   : > { %18538 = vmatmul.mubr.bf16.gmra.mrb[72].mxu1 %v13109_v32  ;;  %v24605_v32 = vld [vmem:[#allocation30_spill] sm:$0xff] }
 0x7db   : > { %18541 = vmatprep.mubr.bf16.mxu1 %v13117_v11  ;;  %v13144_v13 = vor.u32 %v13140_v15, %v24605_v32  ;;  %v13148_v11 = vrot.slane %v24607_v19, 1  ;;  %v24611_v15 = vld [vmem:[#allocation42_spill] sm:$0xff] }
 0x7dd   : > { %v13149_v41 = vsel %vm532_vm0, %v13144_v13, %v13148_v11  ;;  %v13152_v31 = vor.u32 %v13148_v11, %v24610_v6  ;;  %v13176_v13 = vor.u32 %v13172_v42, %v24611_v15 }
 0x7df   : > { %v13157_v56 = vsel %vm532_vm0, %v13152_v31, %v13156_v16 }
 0x7e2   : > { %18542 = vmatmul.mubr.bf16.gmra.mrb[76].mxu1 %v13125_v9  ;;  %v13160_v9 = vor.u32 %v13156_v16, %v24609_v52  ;;  %v13588_v16 = vrot.slane %v23559_v50, 3 }
 0x7e3   : > { %18545 = vmatprep.mubr.bf16.mxu1 %v13133_v25  ;;  %v13164_v25 = vrot.slane %v23815_v63, 1 }
 0x7e5   : > { %v13165_v38 = vsel %vm532_vm0, %v13160_v9, %v13164_v25  ;;  %v13591_v9 = vrot.slane %v23572_v22, 4 }
 0x7e7   : > { %v13592_v45 = vor.u32 %v13591_v9, %v13588_v16  ;;  %v13624_v16 = vrot.slane %v23609_v8, 3  ;;  %v13627_v9 = vrot.slane %v23626_v1, 4 }
 0x7ea   : > { %18546 = vmatmul.mubr.bf16.gmra.mrb[80].mxu1 %v13141_v35  ;;  %v13535_v35 = vld [vmem:[#allocation2 + $0x18] sm:$0xf8] }
 0x7eb   : > { %18549 = vmatprep.mubr.bf16.mxu1 %v13149_v41  ;;  %v13168_v41 = vor.u32 %v13164_v25, %v24612_v23  ;;  %v13578_v4 = vshrl.u32 %v13535_v35, 16  ;;  %v13581_v11 = vshll.u32 %v13535_v35, 16  ;;  %v13188_v25 = vrot.slane %v13186_v49, 1  ;;  %v20459_v49 = vld [vmem:[%s24342_s6 + $0x1c8] sm:$0xff]  }
 0x7ed   : > { %v13173_v26 = vsel %vm532_vm0, %v13168_v41, %v13172_v42  ;;  %v13580_v31 = vrot.slane %v13578_v4, 3  ;;  %v13189_v35 = vsel %vm532_vm0, %v13184_v39, %v13188_v25  ;;  %v13597_v42 = vrot.slane %v23577_v46, 3  ;;  %v20461_v25 = vld [vmem:[%s24342_s6 + $0x1d8] sm:$0xff]  }
 0x7ee   : > { %v13609_v41 = vrot.slane %v23598_v14, 4 }
 0x7f2   : > { %18550 = vmatmul.mubr.bf16.gmra.mrb[84].mxu1 %v13157_v56  ;;  %v13181_v56 = vsel %vm532_vm0, %v13176_v13, %v13180_v43  ;;  %v13615_v43 = vrot.slane %v23605_v37, 3 }
 0x7f3   : > { %18553 = vmatprep.mubr.bf16.mxu1 %v13165_v38  ;;  %v13583_v38 = vrot.slane %v13581_v11, 4  ;;  %v13610_v11 = vor.u32 %v13609_v41, %v13606_v60  ;;  %v13645_v60 = vrot.slane %v23654_v53, 4  ;;  %v20462_v41 = vld [vmem:[%s24342_s6 + $0x1e0] sm:$0xff]  }
 0x7f5   : > { %v13584_v18 = vor.u32 %v13583_v38, %v13580_v31  ;;  %v20460_v31 = vld [vmem:[%s24342_s6 + $0x1d0] sm:$0xff]   ;;  %v13628_v38 = vor.u32 %v13627_v9, %v13624_v16  ;;  %v13660_v16 = vrot.slane %v23665_v20, 3  ;;  %v13663_v9 = vrot.slane %v23682_v48, 4 }
 0x7f7   : > { %v13593_v13 = vsel %vm11035_vm3, %v13584_v18, %v13592_v45 }
 0x7fa   : > { %18554 = vmatmul.mubr.bf16.gmra.mrb[88].mxu1 %v13173_v26  ;;  %v13600_v26 = vrot.slane %v23593_v29, 4 }
 0x7fb   : > { %18557 = vmatprep.mubr.bf16.mxu1 %v13181_v56  ;;  %v13618_v56 = vrot.slane %v23621_v30, 4 }
 0x7fc   : > { %v13601_v4 = vor.u32 %v13600_v26, %v13597_v42  ;;  %v13633_v42 = vrot.slane %v23633_v24, 3  ;;  %v13636_v26 = vrot.slane %v23649_v2, 4 }
 0x7fe   : > { %v13602_v39 = vsel %vm11035_vm3, %v13592_v45, %v13601_v4  ;;  %v13611_v18 = vsel %vm11035_vm3, %v13601_v4, %v13610_v11  ;;  %v13619_v45 = vor.u32 %v13618_v56, %v13615_v43  ;;  %v13637_v4 = vor.u32 %v13636_v26, %v13633_v42 }
 0x7ff   : > { %v13651_v43 = vrot.slane %v23661_v58, 3  ;;  %v13654_v56 = vrot.slane %v23677_v36, 4  ;;  %v13669_v42 = vrot.slane %v23691_v12, 3  ;;  %v13672_v26 = vrot.slane %v23705_v27, 4 }
 0x802   : > { %18558 = vmatmul.mubr.bf16.gmra.mrb[92].mxu1 %v13189_v35  ;;  %v13620_v35 = vsel %vm11035_vm3, %v13610_v11, %v13619_v45 }
 0x803   : > { %18577 = vmatprep.mubr.bf16.mxu1 %v13593_v13  ;;  %v13642_v13 = vrot.slane %v23637_v44, 3 }
 0x805   : > { %v13646_v11 = vor.u32 %v13645_v60, %v13642_v13  ;;  %v13678_v13 = vrot.slane %v23695_v0, 3  ;;  %v13681_v60 = vrot.slane %v23710_v28, 4 }
 0x80a   : > { %18578 = vmatmul.mubr.bf16.vlgmr.msra.gmra.mrb[48].mxu1 %v13602_v39  ;;  %v13638_v39 = vsel %vm11035_vm3, %v13628_v38, %v13637_v4 }
 0x80b   : > { %18581 = vmatprep.mubr.bf16.mxu1 %v13611_v18  ;;  %18626 = vmatpush3.bf16.msra.mxu1 %v23932_v5  ;;  %v13629_v5 = vsel %vm11035_vm3, %v13619_v45, %v13628_v38  ;;  %v13647_v18 = vsel %vm11035_vm3, %v13637_v4, %v13646_v11  ;;  %v13655_v45 = vor.u32 %v13654_v56, %v13651_v43  ;;  %v13690_v43 = vrot.slane %v23727_v55, 4 }
 0x80c   : > { %18627 = vmatprep.subr.bf16.mxu1 %v20459_v49  ;;  %v13664_v38 = vor.u32 %v13663_v9, %v13660_v16  ;;  %v13673_v4 = vor.u32 %v13672_v26, %v13669_v42  ;;  %v13699_v16 = vrot.slane %v24596_v34, 4  ;;  %v13714_v42 = vrot.slane %v24601_v61, 3 }
 0x80d   : > { %v13717_v26 = vrot.slane %v24600_v62, 4 }
 0x80f   : > { %18628 = vmatpush3.bf16.msra.mxu1 %v20459_v49  ;;  %v20463_v49 = vld [vmem:[%s24342_s6 + $0x1e8] sm:$0xff]  }
 0x810   : > { %18629 = vmatprep.subr.bf16.mxu1 %v20460_v31 }
 0x812   : > { %18582 = vmatmul.mubr.bf16.gmra.mrb[52].mxu1 %v13620_v35  ;;  %v13656_v35 = vsel %vm11035_vm3, %v13646_v11, %v13655_v45  ;;  %v13682_v11 = vor.u32 %v13681_v60, %v13678_v13  ;;  %v13718_v13 = vor.u32 %v13717_v26, %v13714_v42 }
 0x813   : > { %18585 = vmatprep.mubr.bf16.mxu1 %v13629_v5  ;;  %18630 = vmatpush3.bf16.msra.mxu1 %v20460_v31  ;;  %v20464_v31 = vld [vmem:[%s24342_s6 + $0x1f0] sm:$0xff]   ;;  %v13665_v5 = vsel %vm11035_vm3, %v13655_v45, %v13664_v38 }
 0x814   : > { %18631 = vmatprep.subr.bf16.mxu1 %v20461_v25  ;;  %v13683_v56 = vsel %vm11035_vm3, %v13673_v4, %v13682_v11 }
 0x817   : > { %18632 = vmatpush3.bf16.msra.mxu1 %v20461_v25  ;;  %v20465_v25 = vld [vmem:[%s24342_s6 + $0x1f8] sm:$0xff]  }
 0x818   : > { %18633 = vmatprep.subr.bf16.mxu1 %v20462_v41 }
 0x81a   : > { %18586 = vmatmul.mubr.bf16.gmra.mrb[56].mxu1 %v13638_v39  ;;  %v13687_v39 = vrot.slane %v24598_v33, 3 }
 0x81b   : > { %18589 = vmatprep.mubr.bf16.mxu1 %v13647_v18  ;;  %18634 = vmatpush3.bf16.msra.mxu1 %v20462_v41  ;;  %v24034_v41 = vld [vmem:[%s24342_s6 + $0x200] sm:$0xff]   ;;  %v13696_v18 = vrot.slane %v24597_v51, 3 }
 0x81c   : > { %18635 = vmatprep.subr.bf16.mxu1 %v20463_v49  ;;  %v13691_v9 = vor.u32 %v13690_v43, %v13687_v39  ;;  %v13732_v39 = vrot.slane %v24605_v32, 3  ;;  %v13735_v43 = vrot.slane %v24604_v21, 4 }
 0x81e   : > { %v13692_v45 = vsel %vm11035_vm3, %v13682_v11, %v13691_v9  ;;  %v13726_v11 = vrot.slane %v24603_v59, 4 }
 0x81f   : > { %18636 = vmatpush3.bf16.msra.mxu1 %v20463_v49  ;;  %v13674_v49 = vsel %vm11035_vm3, %v13664_v38, %v13673_v4  ;;  %v13708_v38 = vrot.slane %v24599_v10, 4  ;;  %v13723_v4 = vrot.slane %v24606_v7, 3 }
 0x820   : > { %18637 = vmatprep.subr.bf16.mxu1 %v20464_v31 }
 0x822   : > { %18590 = vmatmul.mubr.bf16.gmra.mrb[60].mxu1 %v13656_v35 }
 0x823   : > { %18593 = vmatprep.mubr.bf16.mxu1 %v13665_v5  ;;  %18638 = vmatpush3.bf16.msra.mxu1 %v20464_v31  ;;  %v13700_v31 = vor.u32 %v13699_v16, %v13696_v18  ;;  %v13736_v18 = vor.u32 %v13735_v43, %v13732_v39  ;;  %v24067_v43 = vld [vmem:[#allocation2 + $0xd8] sm:$0xf] }
 0x824   : > { %18639 = vmatprep.subr.bf16.mxu1 %v20465_v25 }
 0x825   : > { %v13701_v35 = vsel %vm11035_vm3, %v13691_v9, %v13700_v31  ;;  %v13741_v9 = vrot.slane %v24610_v6, 3 }
 0x827   : > { %18640 = vmatpush3.bf16.msra.mxu1 %v20465_v25  ;;  %v13705_v25 = vrot.slane %v24602_v57, 3 }
 0x828   : > { %18689 = vmatprep.subr.bf16.mxu1 %v24034_v41 }
 0x829   : > { %v13709_v5 = vor.u32 %v13708_v38, %v13705_v25  ;;  %v13750_v25 = vrot.slane %v24609_v52, 3  ;;  %v13753_v38 = vrot.slane %v24608_v47, 4 }
 0x82a   : > { %18594 = vmatmul.mubr.bf16.gmra.mrb[64].mxu1 %v13674_v49 }
 0x82b   : > { %18597 = vmatprep.mubr.bf16.mxu1 %v13683_v56  ;;  %v13710_v60 = vsel %vm11035_vm3, %v13700_v31, %v13709_v5  ;;  %v13719_v49 = vsel %vm11035_vm3, %v13709_v5, %v13718_v13  ;;  %v13727_v56 = vor.u32 %v13726_v11, %v13723_v4  ;;  %v13744_v31 = vrot.slane %v24607_v19, 4 }
 0x82c   : > { %v13754_v42 = vor.u32 %v13753_v38, %v13750_v25  ;;  %v13759_v5 = vrot.slane %v24612_v23, 3  ;;  %v13768_v4 = vrot.slane %v24611_v15, 3  ;;  %v13771_v11 = vrot.slane %v23818_v40, 4 }
 0x82d   : > { %v13728_v16 = vsel %vm11035_vm3, %v13718_v13, %v13727_v56  ;;  %v13762_v13 = vrot.slane %v23815_v63, 4 }
 0x82e   : > { %v13772_v39 = vor.u32 %v13771_v11, %v13768_v4 }
 0x832   : > { %18598 = vmatmul.mubr.bf16.gmra.mrb[68].mxu1 %v13692_v45  ;;  %v13737_v45 = vsel %vm11035_vm3, %v13727_v56, %v13736_v18 }
 0x833   : > { %18601 = vmatprep.mubr.bf16.mxu1 %v13701_v35  ;;  %v13745_v35 = vor.u32 %v13744_v31, %v13741_v9  ;;  %v24613_v31 = vld [vmem:[#allocation7_spill] sm:$0xff] }
 0x834   : > { %v24615_v38 = vshll.u32 %v24613_v31, 16 }
 0x835   : > { %v13746_v26 = vsel %vm11035_vm3, %v13736_v18, %v13745_v35  ;;  %v13777_v18 = vrot.slane %v23822_v17, 3 }
 0x83a   : > { %18602 = vmatmul.mubr.bf16.gmra.mrb[72].mxu1 %v13710_v60  ;;  %v13755_v60 = vsel %vm11035_vm3, %v13745_v35, %v13754_v42  ;;  %v13789_v35 = vrot.slane %v24615_v38, 4 }
 0x83b   : > { %18605 = vmatprep.mubr.bf16.mxu1 %v13719_v49  ;;  %v13763_v49 = vor.u32 %v13762_v13, %v13759_v5  ;;  %v13796_v5 = vshll.u32 %v24067_v43, 16 }
 0x83d   : > { %v13764_v56 = vsel %vm11035_vm3, %v13754_v42, %v13763_v49  ;;  %v13773_v9 = vsel %vm11035_vm3, %v13763_v49, %v13772_v39  ;;  %v13798_v4 = vrot.slane %v13796_v5, 4 }
 0x842   : > { %18606 = vmatmul.mubr.bf16.gmra.mrb[76].mxu1 %v13728_v16  ;;  %v13780_v16 = vrot.slane %v23829_v54, 4 }
 0x843   : > { %18609 = vmatprep.mubr.bf16.mxu1 %v13737_v45  ;;  %v24614_v45 = vshrl.u32 %v24613_v31, 16  ;;  %v24616_v31 = vld [vmem:[#allocation9_spill] sm:$0xff] }
 0x844   : > { %v13781_v13 = vor.u32 %v13780_v16, %v13777_v18  ;;  %v14190_v38 = vrot.slane %v24616_v31, 4  ;;  %v24617_v16 = vld [vmem:[#allocation10_spill] sm:$0xff]  ;;  %v20470_v31 = vld [vmem:[%s24342_s6 + $0x220] sm:$0xff]  }
 0x845   : > { %v13786_v25 = vrot.slane %v24614_v45, 3  ;;  %v24081_v45 = vld [vmem:[#allocation2 + $0x18] sm:$0xf0] }
 0x846   : > { %v13782_v11 = vsel %vm11035_vm3, %v13772_v39, %v13781_v13  ;;  %v14189_v54 = vrot.slane %v24081_v45, 4  ;;  %v24618_v39 = vld [vmem:[#allocation11_spill] sm:$0xff] }
 0x847   : > { %v13790_v42 = vor.u32 %v13789_v35, %v13786_v25  ;;  %v14192_v25 = vrot.slane %v24617_v16, 4  ;;  %v14194_v35 = vrot.slane %v24618_v39, 4 }
 0x848   : > { %v14191_v18 = vsel %vm10688_vm2, %v14189_v54, %v14190_v38  ;;  %v20468_v54 = vld [vmem:[%s24342_s6 + $0x210] sm:$0xff]  }
 0x849   : > { %v13791_v49 = vsel %vm11035_vm3, %v13781_v13, %v13790_v42  ;;  %v14193_v5 = vsel %vm10688_vm2, %v14190_v38, %v14192_v25  ;;  %v14195_v13 = vsel %vm10688_vm2, %v14192_v25, %v14194_v35  ;;  %v24621_v38 = vld [vmem:[#allocation14_spill] sm:$0xff]  ;;  %v20471_v25 = vld [vmem:[%s24342_s6 + $0x228] sm:$0xff]  }
 0x84a   : > { %18610 = vmatmul.mubr.bf16.gmra.mrb[80].mxu1 %v13746_v26  ;;  %v13793_v26 = vshrl.u32 %v24067_v43, 16 }
 0x84b   : > { %18613 = vmatprep.mubr.bf16.mxu1 %v13755_v60 }
 0x84c   : > { %v13795_v60 = vrot.slane %v13793_v26, 3  ;;  %v20467_v26 = vld [vmem:[%s24342_s6 + $0x208] sm:$0xff]  }
 0x852   : > { %18614 = vmatmul.mubr.bf16.gmra.mrb[84].mxu1 %v13764_v56  ;;  %v13799_v56 = vor.u32 %v13798_v4, %v13795_v60  ;;  %v24620_v4 = vld [vmem:[#allocation13_spill] sm:$0xff] }
 0x853   : > { %18617 = vmatprep.mubr.bf16.mxu1 %v13773_v9 }
 0x854   : > { %v13800_v9 = vsel %vm11035_vm3, %v13790_v42, %v13799_v56  ;;  %v24619_v42 = vld [vmem:[#allocation12_spill] sm:$0xff] }
 0x855   : > { %v14196_v60 = vrot.slane %v24619_v42, 4 }
 0x857   : > { %v14197_v56 = vsel %vm10688_vm2, %v14194_v35, %v14196_v60 }
 0x85a   : > { %18618 = vmatmul.mubr.bf16.gmra.mrb[88].mxu1 %v13782_v11  ;;  %v14198_v11 = vrot.slane %v24620_v4, 4 }
 0x85b   : > { %18621 = vmatprep.mubr.bf16.mxu1 %v13791_v49  ;;  %v20469_v49 = vld [vmem:[%s24342_s6 + $0x218] sm:$0xff]  }
 0x862   : > { %18622 = vmatmul.mubr.bf16.gmra.mrb[92].mxu1 %v13800_v9  ;;  %v14200_v9 = vrot.slane %v24621_v38, 4 }
 0x863   : > { %18641 = vmatprep.mubr.bf16.mxu1 %v14191_v18  ;;  %v24622_v18 = vld [vmem:[#allocation15_spill] sm:$0xff] }
 0x864   : > { %v14202_v16 = vrot.slane %v24622_v18, 4  ;;  %v14201_v39 = vsel %vm10688_vm2, %v14198_v11, %v14200_v9  ;;  %v24627_v18 = vld [vmem:[#allocation20_spill] sm:$0xff] }
 0x866   : > { %v14203_v35 = vsel %vm10688_vm2, %v14200_v9, %v14202_v16 }
 0x86a   : > { %18642 = vmatmul.mubr.bf16.vlgmr.msra.gmra.mrb[48].mxu1 %v14193_v5  ;;  %v24623_v5 = vld [vmem:[#allocation16_spill] sm:$0xff] }
 0x86b   : > { %18645 = vmatprep.mubr.bf16.mxu1 %v14195_v13  ;;  %18690 = vmatpush3.bf16.msra.mxu1 %v24034_v41  ;;  %v14199_v41 = vsel %vm10688_vm2, %v14196_v60, %v14198_v11  ;;  %v14204_v13 = vrot.slane %v24623_v5, 4  ;;  %v20473_v60 = vld [vmem:[%s24342_s6 + $0x238] sm:$0xff]   ;;  %v24629_v5 = vld [vmem:[#allocation24_spill] sm:$0xff] }
 0x86c   : > { %18691 = vmatprep.subr.bf16.mxu1 %v20467_v26 }
 0x86d   : > { %v14205_v4 = vsel %vm10688_vm2, %v14202_v16, %v14204_v13  ;;  %v24628_v16 = vld [vmem:[#allocation21_spill] sm:$0xff] }
 0x86f   : > { %18692 = vmatpush3.bf16.msra.mxu1 %v20467_v26  ;;  %v20472_v26 = vld [vmem:[%s24342_s6 + $0x230] sm:$0xff]  }
 0x870   : > { %18693 = vmatprep.subr.bf16.mxu1 %v20468_v54 }
 0x872   : > { %18646 = vmatmul.mubr.bf16.gmra.mrb[52].mxu1 %v14197_v56 }
 0x873   : > { %18649 = vmatprep.mubr.bf16.mxu1 %v14199_v41  ;;  %18694 = vmatpush3.bf16.msra.mxu1 %v20468_v54  ;;  %v24624_v54 = vld [vmem:[#allocation17_spill] sm:$0xff]  ;;  %v24626_v41 = vld [vmem:[#allocation19_spill] sm:$0xff] }
 0x874   : > { %18695 = vmatprep.subr.bf16.mxu1 %v20469_v49  ;;  %v14206_v42 = vrot.slane %v24624_v54, 4  ;;  %v24630_v54 = vld [vmem:[#allocation25_spill] sm:$0xff] }
 0x876   : > { %v14207_v11 = vsel %vm10688_vm2, %v14204_v13, %v14206_v42  ;;  %v14216_v13 = vrot.slane %v24629_v5, 4 }
 0x877   : > { %18696 = vmatpush3.bf16.msra.mxu1 %v20469_v49  ;;  %v24625_v49 = vld [vmem:[#allocation18_spill] sm:$0xff] }
 0x878   : > { %18697 = vmatprep.subr.bf16.mxu1 %v20470_v31  ;;  %v14208_v56 = vrot.slane %v24625_v49, 4 }
 0x87a   : > { %18650 = vmatmul.mubr.bf16.gmra.mrb[56].mxu1 %v14201_v39  ;;  %v14209_v38 = vsel %vm10688_vm2, %v14206_v42, %v14208_v56  ;;  %v14214_v39 = vrot.slane %v24628_v16, 4 }
 0x87b   : > { %18653 = vmatprep.mubr.bf16.mxu1 %v14203_v35  ;;  %18698 = vmatpush3.bf16.msra.mxu1 %v20470_v31  ;;  %v14210_v31 = vrot.slane %v24626_v41, 4 }
 0x87c   : > { %18699 = vmatprep.subr.bf16.mxu1 %v20471_v25  ;;  %v14217_v42 = vsel %vm10688_vm2, %v14214_v39, %v14216_v13 }
 0x87d   : > { %v14211_v9 = vsel %vm10688_vm2, %v14208_v56, %v14210_v31  ;;  %v24632_v56 = vld [vmem:[#allocation3_spill] sm:$0xff] }
 0x87e   : > { %v14222_v41 = vrot.slane %v24632_v56, 4 }
 0x87f   : > { %18700 = vmatpush3.bf16.msra.mxu1 %v20471_v25  ;;  %v14212_v25 = vrot.slane %v24627_v18, 4 }
 0x880   : > { %18701 = vmatprep.subr.bf16.mxu1 %v20472_v26 }
 0x881   : > { %v14213_v35 = vsel %vm10688_vm2, %v14210_v31, %v14212_v25 }
 0x882   : > { %18654 = vmatmul.mubr.bf16.gmra.mrb[60].mxu1 %v14205_v4 }
 0x883   : > { %18657 = vmatprep.mubr.bf16.mxu1 %v14207_v11  ;;  %18702 = vmatpush3.bf16.msra.mxu1 %v20472_v26  ;;  %v14215_v26 = vsel %vm10688_vm2, %v14212_v25, %v14214_v39  ;;  %v24631_v11 = vld [vmem:[#allocation29_spill] sm:$0xff] }
 0x884   : > { %18703 = vmatprep.subr.bf16.mxu1 %v20473_v60  ;;  %v14220_v49 = vrot.slane %v24631_v11, 4  ;;  %v24634_v25 = vld [vmem:[#allocation33_spill] sm:$0xff] }
 0x885   : > { %v14226_v16 = vrot.slane %v24634_v25, 4  ;;  %v14610_v25 = vrot.slane %v23572_v22, 5  ;;  %v14618_v22 = vrot.slane %v23598_v14, 5 }
 0x887   : > { %18704 = vmatpush3.bf16.msra.mxu1 %v20473_v60  ;;  %v14218_v60 = vrot.slane %v24630_v54, 4 }
 0x889   : > { %v14219_v4 = vsel %vm10688_vm2, %v14216_v13, %v14218_v60  ;;  %v14221_v31 = vsel %vm10688_vm2, %v14218_v60, %v14220_v49  ;;  %v24636_v13 = vld [vmem:[#allocation39_spill] sm:$0xff] }
 0x88a   : > { %18658 = vmatmul.mubr.bf16.gmra.mrb[64].mxu1 %v14209_v38  ;;  %v14223_v38 = vsel %vm10688_vm2, %v14220_v49, %v14222_v41  ;;  %v14230_v54 = vrot.slane %v24636_v13, 4  ;;  %v20511_v49 = vld [vmem:[#allocation2] sm:$0xff] }
 0x88b   : > { %18661 = vmatprep.mubr.bf16.mxu1 %v14211_v9  ;;  %v24633_v9 = vld [vmem:[#allocation31_spill] sm:$0xff]  ;;  %v14234_v56 = vrot.slane %v20511_v49, 4  ;;  %v14622_v49 = vrot.slane %v23621_v30, 5  ;;  %v14633_v30 = vrot.slane %v23637_v44, 4 }
 0x88c   : > { %v14224_v18 = vrot.slane %v24633_v9, 4 }
 0x88e   : > { %v14225_v39 = vsel %vm10688_vm2, %v14222_v41, %v14224_v18  ;;  %v14602_v41 = vshrl.u32 %v24081_v45, 16 }
 0x892   : > { %18662 = vmatmul.mubr.bf16.gmra.mrb[68].mxu1 %v14213_v35  ;;  %v14227_v35 = vsel %vm10688_vm2, %v14224_v18, %v14226_v16  ;;  %v14609_v18 = vrot.slane %v23559_v50, 4  ;;  %v14617_v50 = vrot.slane %v23581_v3, 4 }
 0x893   : > { %18665 = vmatprep.mubr.bf16.mxu1 %v14215_v26  ;;  %v24635_v26 = vld [vmem:[#allocation37_spill] sm:$0xff] }
 0x894   : > { %v14228_v5 = vrot.slane %v24635_v26, 4  ;;  %v14611_v26 = vor.u32 %v14610_v25, %v14609_v18  ;;  %v14637_v25 = vrot.slane %v23661_v58, 4 }
 0x896   : > { %v14229_v60 = vsel %vm10688_vm2, %v14226_v16, %v14228_v5  ;;  %v14236_v16 = vrot.slane %v24067_v43, 4  ;;  %v14619_v43 = vor.u32 %v14618_v22, %v14617_v50  ;;  %v14658_v50 = vrot.slane %v24596_v34, 5 }
 0x89a   : > { %18666 = vmatmul.mubr.bf16.gmra.mrb[72].mxu1 %v14217_v42  ;;  %v14231_v42 = vsel %vm10688_vm2, %v14228_v5, %v14230_v54  ;;  %v14237_v5 = vsel %vm10688_vm2, %v14234_v56, %v14236_v16  ;;  %v14638_v16 = vrot.slane %v23677_v36, 5  ;;  %v14649_v36 = vrot.slane %v23695_v0, 4 }
 0x89b   : > { %18669 = vmatprep.mubr.bf16.mxu1 %v14219_v4  ;;  %v24637_v4 = vld [vmem:[#allocation43_spill] sm:$0xff] }
 0x89c   : > { %v14232_v11 = vrot.slane %v24637_v4, 4  ;;  %v14639_v44 = vor.u32 %v14638_v16, %v14637_v25 }
 0x89e   : > { %v14235_v9 = vsel %vm10688_vm2, %v14232_v11, %v14234_v56  ;;  %v14626_v56 = vrot.slane %v23626_v1, 5 }
 0x8a2   : > { %18670 = vmatmul.mubr.bf16.gmra.mrb[76].mxu1 %v14221_v31  ;;  %v14605_v31 = vshll.u32 %v24081_v45, 16  ;;  %v14613_v45 = vrot.slane %v23577_v46, 4 }
 0x8a3   : > { %18673 = vmatprep.mubr.bf16.mxu1 %v14223_v38  ;;  %v14233_v38 = vsel %vm10688_vm2, %v14230_v54, %v14232_v11  ;;  %v14614_v54 = vrot.slane %v23593_v29, 5  ;;  %v14621_v11 = vrot.slane %v23605_v37, 4  ;;  %v14625_v29 = vrot.slane %v23609_v8, 4 }
 0x8a5   : > { %v14623_v3 = vor.u32 %v14622_v49, %v14621_v11  ;;  %v14669_v49 = vrot.slane %v24606_v7, 4 }
 0x8a7   : > { %v14624_v14 = vsel %vm11575_vm4, %v14619_v43, %v14623_v3 }
 0x8aa   : > { %18674 = vmatmul.mubr.bf16.gmra.mrb[80].mxu1 %v14225_v39  ;;  %v14604_v39 = vrot.slane %v14602_v41, 4  ;;  %v14627_v41 = vor.u32 %v14626_v56, %v14625_v29  ;;  %v14674_v29 = vrot.slane %v24604_v21, 5 }
 0x8ab   : > { %18677 = vmatprep.mubr.bf16.mxu1 %v14227_v35  ;;  %v14607_v35 = vrot.slane %v14605_v31, 5  ;;  %v14629_v31 = vrot.slane %v23633_v24, 4 }
 0x8ac   : > { %v14628_v37 = vsel %vm11575_vm4, %v14623_v3, %v14627_v41  ;;  %v14677_v3 = vrot.slane %v24610_v6, 4 }
 0x8ad   : > { %v14608_v13 = vor.u32 %v14607_v35, %v14604_v39  ;;  %v14642_v39 = vrot.slane %v23682_v48, 5 }
 0x8b2   : > { %18678 = vmatmul.mubr.bf16.gmra.mrb[84].mxu1 %v14229_v60  ;;  %v14612_v60 = vsel %vm11575_vm4, %v14608_v13, %v14611_v26  ;;  %v14650_v13 = vrot.slane %v23710_v28, 5 }
 0x8b3   : > { %18681 = vmatprep.mubr.bf16.mxu1 %v14231_v42  ;;  %v14615_v42 = vor.u32 %v14614_v54, %v14613_v45  ;;  %v14653_v54 = vrot.slane %v24598_v33, 4 }
 0x8b4   : > { %v14651_v45 = vor.u32 %v14650_v13, %v14649_v36 }
 0x8b5   : > { %v14616_v4 = vsel %vm11575_vm4, %v14611_v26, %v14615_v42  ;;  %v14620_v46 = vsel %vm11575_vm4, %v14615_v42, %v14619_v43  ;;  %v14645_v26 = vrot.slane %v23691_v12, 4  ;;  %v14661_v42 = vrot.slane %v24602_v57, 4 }
 0x8b6   : > { %v14662_v43 = vrot.slane %v24599_v10, 5  ;;  %v14673_v10 = vrot.slane %v24605_v32, 4 }
 0x8b8   : > { %v14675_v56 = vor.u32 %v14674_v29, %v14673_v10 }
 0x8ba   : > { %18682 = vmatmul.mubr.bf16.gmra.mrb[88].mxu1 %v14233_v38  ;;  %v14630_v38 = vrot.slane %v23649_v2, 5  ;;  %v14641_v2 = vrot.slane %v23665_v20, 4 }
 0x8bb   : > { %18685 = vmatprep.mubr.bf16.mxu1 %v14235_v9  ;;  %v14634_v9 = vrot.slane %v23654_v53, 5 }
 0x8bc   : > { %v14631_v8 = vor.u32 %v14630_v38, %v14629_v31  ;;  %v14643_v35 = vor.u32 %v14642_v39, %v14641_v2  ;;  %v14685_v38 = vrot.slane %v24612_v23, 4  ;;  %v24639_v39 = vld [vmem:[#allocation8_spill] sm:$0xff] }
 0x8bd   : > { %v14635_v18 = vor.u32 %v14634_v9, %v14633_v30  ;;  %v14690_v30 = vrot.slane %v23818_v40, 5 }
 0x8be   : > { %v14632_v1 = vsel %vm11575_vm4, %v14627_v41, %v14631_v8  ;;  %v14644_v58 = vsel %vm11575_vm4, %v14639_v44, %v14643_v35  ;;  %v14678_v41 = vrot.slane %v24607_v19, 5  ;;  %v14689_v19 = vrot.slane %v24611_v15, 4 }
 0x8bf   : > { %v14636_v24 = vsel %vm11575_vm4, %v14631_v8, %v14635_v18  ;;  %v14640_v53 = vsel %vm11575_vm4, %v14635_v18, %v14639_v44  ;;  %v14693_v18 = vrot.slane %v23822_v17, 4 }
 0x8c0   : > { %v14679_v32 = vor.u32 %v14678_v41, %v14677_v3  ;;  %v14691_v9 = vor.u32 %v14690_v30, %v14689_v19 }
 0x8c2   : > { %18686 = vmatmul.mubr.bf16.gmra.mrb[92].mxu1 %v14237_v5  ;;  %v14646_v5 = vrot.slane %v23705_v27, 5  ;;  %v14657_v27 = vrot.slane %v24597_v51, 4  ;;  %v14663_v51 = vor.u32 %v14662_v43, %v14661_v42  ;;  %v14680_v21 = vsel %vm11575_vm4, %v14675_v56, %v14679_v32 }
 0x8c3   : > { %18705 = vmatprep.mubr.bf16.mxu1 %v14612_v60  ;;  %v14654_v60 = vrot.slane %v23727_v55, 5  ;;  %v14665_v55 = vrot.slane %v24601_v61, 4 }
 0x8c4   : > { %v14647_v20 = vor.u32 %v14646_v5, %v14645_v26  ;;  %v14659_v22 = vor.u32 %v14658_v50, %v14657_v27 }
 0x8c5   : > { %v14655_v0 = vor.u32 %v14654_v60, %v14653_v54 }
 0x8c6   : > { %v14648_v48 = vsel %vm11575_vm4, %v14643_v35, %v14647_v20  ;;  %v14652_v12 = vsel %vm11575_vm4, %v14647_v20, %v14651_v45  ;;  %v14664_v34 = vsel %vm11575_vm4, %v14659_v22, %v14663_v51 }
 0x8c7   : > { %v14656_v28 = vsel %vm11575_vm4, %v14651_v45, %v14655_v0  ;;  %v14660_v33 = vsel %vm11575_vm4, %v14655_v0, %v14659_v22 }
 0x8ca   : > { %18706 = vmatmul.mubr.bf16.vlgmr.msra.gmra.mrb[48].mxu1 %v14616_v4  ;;  %v14666_v4 = vrot.slane %v24600_v62, 5 }
 0x8cb   : > { %18709 = vmatprep.mubr.bf16.mxu1 %v14620_v46  ;;  %v14670_v46 = vrot.slane %v24603_v59, 5  ;;  %v14681_v59 = vrot.slane %v24609_v52, 4 }
 0x8cc   : > { %v14667_v11 = vor.u32 %v14666_v4, %v14665_v55 }
 0x8cd   : > { %v14671_v61 = vor.u32 %v14670_v46, %v14669_v49 }
 0x8ce   : > { %v14668_v57 = vsel %vm11575_vm4, %v14663_v51, %v14667_v11 }
 0x8cf   : > { %v14672_v62 = vsel %vm11575_vm4, %v14667_v11, %v14671_v61  ;;  %v14676_v7 = vsel %vm11575_vm4, %v14671_v61, %v14675_v56 }
 0x8d2   : > { %18710 = vmatmul.mubr.bf16.gmra.mrb[52].mxu1 %v14624_v14  ;;  %v14682_v14 = vrot.slane %v24608_v47, 5  ;;  %v14583_v47 = vld [vmem:[#allocation2 + $0xd8] sm:$0x1f] }
 0x8d3   : > { %18713 = vmatprep.mubr.bf16.mxu1 %v14628_v37  ;;  %v14686_v37 = vrot.slane %v23815_v63, 5  ;;  %v14702_v63 = vshrl.u32 %v14583_v47, 16  ;;  %v14705_v16 = vshll.u32 %v14583_v47, 16 }
 0x8d4   : > { %v14683_v31 = vor.u32 %v14682_v14, %v14681_v59 }
 0x8d5   : > { %v14687_v52 = vor.u32 %v14686_v37, %v14685_v38  ;;  %v14707_v40 = vrot.slane %v14705_v16, 5 }
 0x8d6   : > { %v14684_v6 = vsel %vm11575_vm4, %v14679_v32, %v14683_v31 }
 0x8d7   : > { %v14688_v8 = vsel %vm11575_vm4, %v14683_v31, %v14687_v52  ;;  %v14692_v23 = vsel %vm11575_vm4, %v14687_v52, %v14691_v9 }
 0x8da   : > { %18714 = vmatmul.mubr.bf16.gmra.mrb[56].mxu1 %v14632_v1  ;;  %v24638_v1 = vld [vmem:[#allocation44_spill] sm:$0xff] }
 0x8db   : > { %18717 = vmatprep.mubr.bf16.mxu1 %v14636_v24  ;;  %v14694_v25 = vrot.slane %v24638_v1, 5  ;;  %v14704_v24 = vrot.slane %v14702_v63, 4 }
 0x8dd   : > { %v14695_v15 = vor.u32 %v14694_v25, %v14693_v18  ;;  %v14708_v17 = vor.u32 %v14707_v40, %v14704_v24 }
 0x8df   : > { %v14696_v2 = vsel %vm11575_vm4, %v14691_v9, %v14695_v15  ;;  %v14700_v44 = vsel %vm11575_vm4, %v14695_v15, %v24639_v39  ;;  %v14709_v35 = vsel %vm11575_vm4, %v24639_v39, %v14708_v17 }
 0x8e2   : > { %18718 = vmatmul.mubr.bf16.gmra.mrb[60].mxu1 %v14640_v53  ;;  %v24230_v53 = vld [vmem:[%s24343_s7] ss:$0 sm:$0xff] }
 0x8e3   : > { %18721 = vmatprep.mubr.bf16.mxu1 %v14644_v58 }
 0x8ea   : > { %18722 = vmatmul.mubr.bf16.gmra.mrb[64].mxu1 %v14648_v48 }
 0x8eb   : > { %18725 = vmatprep.mubr.bf16.mxu1 %v14652_v12 }
 0x8f2   : > { %18726 = vmatmul.mubr.bf16.gmra.mrb[68].mxu1 %v14656_v28 }
 0x8f3   : > { %18729 = vmatprep.mubr.bf16.mxu1 %v14660_v33 }
 0x8fa   : > { %18730 = vmatmul.mubr.bf16.gmra.mrb[72].mxu1 %v14664_v34 }
 0x8fb   : > { %18733 = vmatprep.mubr.bf16.mxu1 %v14668_v57 }
 0x902   : > { %18734 = vmatmul.mubr.bf16.gmra.mrb[76].mxu1 %v14672_v62 }
 0x903   : > { %18737 = vmatprep.mubr.bf16.mxu1 %v14676_v7 }
 0x90a   : > { %18738 = vmatmul.mubr.bf16.gmra.mrb[80].mxu1 %v14680_v21 }
 0x90b   : > { %18741 = vmatprep.mubr.bf16.mxu1 %v14684_v6 }
 0x912   : > { %18742 = vmatmul.mubr.bf16.gmra.mrb[84].mxu1 %v14688_v8 }
 0x913   : > { %18745 = vmatprep.mubr.bf16.mxu1 %v14692_v23 }
 0x91a   : > { %18746 = vmatmul.mubr.bf16.gmra.mrb[88].mxu1 %v14696_v2 }
 0x91b   : > { %18749 = vmatprep.mubr.bf16.mxu1 %v14700_v44 }
 0x922   : > { %18750 = vmatmul.mubr.bf16.gmra.mrb[92].mxu1 %v14709_v35 }
 0x99d   : > { %v18707_v26 = vpop.f32.mrb[48].mxu1 }
 0x99e   : > { %v15064_v5 = vadd.f32 %v18707_v26, %v24230_v53  ;;  %v14816_v58 = vpop.f32.mrb[49].mxu1 }
 0x99f   : > { %v15062_v36 = vadd.f32 %v24230_v53, %v14816_v58  ;;  %v18708_v13 = vpop.f32.mrb[50].mxu1 }
 0x9a0   : > { %v15112_v20 = vmax.f32 %v15064_v5, 0.0  ;;  %v15065_v45 = vadd.f32 %v18708_v13, %v24230_v53  ;;  %v14819_v48 = vpop.f32.mrb[51].mxu1 }
 0x9a1   : > { %v15110_v54 = vmax.f32 %v15062_v36, 0.0  ;;  %v15063_v60 = vadd.f32 %v24230_v53, %v14819_v48 }
 0x9a2   : > { %15160 = vst [vmem:[%s24236_s18 + $0x10] sm:$0xff] %v15112_v20  ;;  %v15113_v12 = vmax.f32 %v15065_v45, 0.0 }
 0x9a3   : > { %15158 = vst [vmem:[%s24236_s18] sm:$0xff] %v15110_v54  ;;  %v15111_v27 = vmax.f32 %v15063_v60, 0.0 }
 0x9a4   : > { %15161 = vst [vmem:[%s24236_s18 + $0x18] sm:$0xff] %v15113_v12 }
 0x9a5   : > { %15159 = vst [vmem:[%s24236_s18 + $0x8] sm:$0xff] %v15111_v27  ;;  %v18711_v50 = vpop.f32.mrb[52].mxu1 }
 0x9a6   : > { %v15068_v0 = vadd.f32 %v18711_v50, %v24230_v53  ;;  %v14832_v22 = vpop.f32.mrb[53].mxu1 }
 0x9a7   : > { %v15066_v28 = vadd.f32 %v24230_v53, %v14832_v22  ;;  %v18712_v42 = vpop.f32.mrb[54].mxu1 }
 0x9a8   : > { %v15116_v43 = vmax.f32 %v15068_v0, 0.0  ;;  %v15069_v33 = vadd.f32 %v18712_v42, %v24230_v53  ;;  %v14835_v55 = vpop.f32.mrb[55].mxu1 }
 0x9a9   : > { %v15114_v4 = vmax.f32 %v15066_v28, 0.0  ;;  %v15067_v51 = vadd.f32 %v24230_v53, %v14835_v55 }
 0x9aa   : > { %15164 = vst [vmem:[%s24236_s18 + $0x30] sm:$0xff] %v15116_v43  ;;  %v15117_v11 = vmax.f32 %v15069_v33, 0.0 }
 0x9ab   : > { %15162 = vst [vmem:[%s24236_s18 + $0x20] sm:$0xff] %v15114_v4  ;;  %v15115_v34 = vmax.f32 %v15067_v51, 0.0 }
 0x9ac   : > { %15165 = vst [vmem:[%s24236_s18 + $0x38] sm:$0xff] %v15117_v11 }
 0x9ad   : > { %15163 = vst [vmem:[%s24236_s18 + $0x28] sm:$0xff] %v15115_v34  ;;  %v18715_v49 = vpop.f32.mrb[56].mxu1 }
 0x9ae   : > { %v15072_v46 = vadd.f32 %v18715_v49, %v24230_v53  ;;  %v14848_v57 = vpop.f32.mrb[57].mxu1 }
 0x9af   : > { %v15070_v10 = vadd.f32 %v24230_v53, %v14848_v57  ;;  %v18716_v29 = vpop.f32.mrb[58].mxu1 }
 0x9b0   : > { %v15120_v61 = vmax.f32 %v15072_v46, 0.0  ;;  %v15073_v56 = vadd.f32 %v18716_v29, %v24230_v53  ;;  %v14851_v62 = vpop.f32.mrb[59].mxu1 }
 0x9b1   : > { %v15118_v3 = vmax.f32 %v15070_v10, 0.0  ;;  %v15071_v41 = vadd.f32 %v24230_v53, %v14851_v62 }
 0x9b2   : > { %15168 = vst [vmem:[%s24236_s18 + $0x50] sm:$0xff] %v15120_v61  ;;  %v15121_v7 = vmax.f32 %v15073_v56, 0.0 }
 0x9b3   : > { %15166 = vst [vmem:[%s24236_s18 + $0x40] sm:$0xff] %v15118_v3  ;;  %v15119_v59 = vmax.f32 %v15071_v41, 0.0 }
 0x9b4   : > { %15169 = vst [vmem:[%s24236_s18 + $0x58] sm:$0xff] %v15121_v7 }
 0x9b5   : > { %15167 = vst [vmem:[%s24236_s18 + $0x48] sm:$0xff] %v15119_v59  ;;  %v18719_v14 = vpop.f32.mrb[60].mxu1 }
 0x9b6   : > { %v15076_v32 = vadd.f32 %v18719_v14, %v24230_v53  ;;  %v14864_v31 = vpop.f32.mrb[61].mxu1 }
 0x9b7   : > { %v15074_v21 = vadd.f32 %v24230_v53, %v14864_v31  ;;  %v18720_v38 = vpop.f32.mrb[62].mxu1 }
 0x9b8   : > { %v15124_v37 = vmax.f32 %v15076_v32, 0.0  ;;  %v15077_v6 = vadd.f32 %v18720_v38, %v24230_v53  ;;  %v14867_v19 = vpop.f32.mrb[63].mxu1 }
 0x9b9   : > { %v15122_v30 = vmax.f32 %v15074_v21, 0.0  ;;  %v15075_v52 = vadd.f32 %v24230_v53, %v14867_v19 }
 0x9ba   : > { %15172 = vst [vmem:[%s24236_s18 + $0x70] sm:$0xff] %v15124_v37  ;;  %v15125_v9 = vmax.f32 %v15077_v6, 0.0 }
 0x9bb   : > { %15170 = vst [vmem:[%s24236_s18 + $0x60] sm:$0xff] %v15122_v30  ;;  %v15123_v47 = vmax.f32 %v15075_v52, 0.0 }
 0x9bc   : > { %15173 = vst [vmem:[%s24236_s18 + $0x78] sm:$0xff] %v15125_v9 }
 0x9bd   : > { %15171 = vst [vmem:[%s24236_s18 + $0x68] sm:$0xff] %v15123_v47  ;;  %v18723_v8 = vpop.f32.mrb[64].mxu1 }
 0x9be   : > { %v15080_v18 = vadd.f32 %v18723_v8, %v24230_v53  ;;  %v14880_v1 = vpop.f32.mrb[65].mxu1 }
 0x9bf   : > { %v15078_v25 = vadd.f32 %v24230_v53, %v14880_v1  ;;  %v18724_v23 = vpop.f32.mrb[66].mxu1 }
 0x9c0   : > { %v15128_v63 = vmax.f32 %v15080_v18, 0.0  ;;  %v15081_v16 = vadd.f32 %v18724_v23, %v24230_v53  ;;  %v14883_v15 = vpop.f32.mrb[67].mxu1 }
 0x9c1   : > { %v15126_v24 = vmax.f32 %v15078_v25, 0.0  ;;  %v15079_v40 = vadd.f32 %v24230_v53, %v14883_v15 }
 0x9c2   : > { %15176 = vst [vmem:[%s24236_s18 + $0x90] sm:$0xff] %v15128_v63  ;;  %v15129_v2 = vmax.f32 %v15081_v16, 0.0 }
 0x9c3   : > { %15174 = vst [vmem:[%s24236_s18 + $0x80] sm:$0xff] %v15126_v24  ;;  %v15127_v39 = vmax.f32 %v15079_v40, 0.0 }
 0x9c4   : > { %15177 = vst [vmem:[%s24236_s18 + $0x98] sm:$0xff] %v15129_v2 }
 0x9c5   : > { %15175 = vst [vmem:[%s24236_s18 + $0x88] sm:$0xff] %v15127_v39  ;;  %v18727_v44 = vpop.f32.mrb[68].mxu1 }
 0x9c6   : > { %v15084_v17 = vadd.f32 %v18727_v44, %v24230_v53  ;;  %v14896_v35 = vpop.f32.mrb[69].mxu1 }
 0x9c7   : > { %v15082_v26 = vadd.f32 %v24230_v53, %v14896_v35  ;;  %v18728_v5 = vpop.f32.mrb[70].mxu1 }
 0x9c8   : > { %v15132_v58 = vmax.f32 %v15084_v17, 0.0  ;;  %v15085_v36 = vadd.f32 %v18728_v5, %v24230_v53  ;;  %v14899_v13 = vpop.f32.mrb[71].mxu1 }
 0x9c9   : > { %v15130_v20 = vmax.f32 %v15082_v26, 0.0  ;;  %v15083_v45 = vadd.f32 %v24230_v53, %v14899_v13 }
 0x9ca   : > { %15180 = vst [vmem:[%s24236_s18 + $0xb0] sm:$0xff] %v15132_v58  ;;  %v15133_v48 = vmax.f32 %v15085_v36, 0.0 }
 0x9cb   : > { %15178 = vst [vmem:[%s24236_s18 + $0xa0] sm:$0xff] %v15130_v20  ;;  %v15131_v54 = vmax.f32 %v15083_v45, 0.0 }
 0x9cc   : > { %15181 = vst [vmem:[%s24236_s18 + $0xb8] sm:$0xff] %v15133_v48 }
 0x9cd   : > { %15179 = vst [vmem:[%s24236_s18 + $0xa8] sm:$0xff] %v15131_v54  ;;  %v18731_v60 = vpop.f32.mrb[72].mxu1 }
 0x9ce   : > { %v15088_v12 = vadd.f32 %v18731_v60, %v24230_v53  ;;  %v14912_v27 = vpop.f32.mrb[73].mxu1 }
 0x9cf   : > { %v15086_v50 = vadd.f32 %v24230_v53, %v14912_v27  ;;  %v18732_v0 = vpop.f32.mrb[74].mxu1 }
 0x9d0   : > { %v15136_v22 = vmax.f32 %v15088_v12, 0.0  ;;  %v15089_v28 = vadd.f32 %v18732_v0, %v24230_v53  ;;  %v14915_v42 = vpop.f32.mrb[75].mxu1 }
 0x9d1   : > { %v15134_v43 = vmax.f32 %v15086_v50, 0.0  ;;  %v15087_v33 = vadd.f32 %v24230_v53, %v14915_v42 }
 0x9d2   : > { %15184 = vst [vmem:[%s24236_s18 + $0xd0] sm:$0xff] %v15136_v22  ;;  %v15137_v55 = vmax.f32 %v15089_v28, 0.0 }
 0x9d3   : > { %15182 = vst [vmem:[%s24236_s18 + $0xc0] sm:$0xff] %v15134_v43  ;;  %v15135_v4 = vmax.f32 %v15087_v33, 0.0 }
 0x9d4   : > { %15185 = vst [vmem:[%s24236_s18 + $0xd8] sm:$0xff] %v15137_v55 }
 0x9d5   : > { %15183 = vst [vmem:[%s24236_s18 + $0xc8] sm:$0xff] %v15135_v4  ;;  %v18735_v51 = vpop.f32.mrb[76].mxu1 }
 0x9d6   : > { %v15092_v11 = vadd.f32 %v18735_v51, %v24230_v53  ;;  %v14928_v34 = vpop.f32.mrb[77].mxu1 }
 0x9d7   : > { %v15090_v49 = vadd.f32 %v24230_v53, %v14928_v34  ;;  %v18736_v46 = vpop.f32.mrb[78].mxu1 }
 0x9d8   : > { %v15140_v57 = vmax.f32 %v15092_v11, 0.0  ;;  %v15093_v10 = vadd.f32 %v18736_v46, %v24230_v53  ;;  %v14931_v29 = vpop.f32.mrb[79].mxu1 }
 0x9d9   : > { %v15138_v61 = vmax.f32 %v15090_v49, 0.0  ;;  %v15091_v56 = vadd.f32 %v24230_v53, %v14931_v29 }
 0x9da   : > { %15188 = vst [vmem:[%s24236_s18 + $0xf0] sm:$0xff] %v15140_v57  ;;  %v15141_v62 = vmax.f32 %v15093_v10, 0.0 }
 0x9db   : > { %15186 = vst [vmem:[%s24236_s18 + $0xe0] sm:$0xff] %v15138_v61  ;;  %v15139_v3 = vmax.f32 %v15091_v56, 0.0 }
 0x9dc   : > { %15189 = vst [vmem:[%s24236_s18 + $0xf8] sm:$0xff] %v15141_v62 }
 0x9dd   : > { %15187 = vst [vmem:[%s24236_s18 + $0xe8] sm:$0xff] %v15139_v3  ;;  %v18739_v41 = vpop.f32.mrb[80].mxu1 }
 0x9de   : > { %v15096_v7 = vadd.f32 %v18739_v41, %v24230_v53  ;;  %v14944_v59 = vpop.f32.mrb[81].mxu1 }
 0x9df   : > { %v15094_v14 = vadd.f32 %v24230_v53, %v14944_v59  ;;  %v18740_v32 = vpop.f32.mrb[82].mxu1 }
 0x9e0   : > { %v15144_v31 = vmax.f32 %v15096_v7, 0.0  ;;  %v15097_v21 = vadd.f32 %v18740_v32, %v24230_v53  ;;  %v14947_v38 = vpop.f32.mrb[83].mxu1 }
 0x9e1   : > { %v15142_v37 = vmax.f32 %v15094_v14, 0.0  ;;  %v15095_v6 = vadd.f32 %v24230_v53, %v14947_v38 }
 0x9e2   : > { %15192 = vst [vmem:[%s24236_s18 + $0x110] sm:$0xff] %v15144_v31  ;;  %v15145_v19 = vmax.f32 %v15097_v21, 0.0 }
 0x9e3   : > { %15190 = vst [vmem:[%s24236_s18 + $0x100] sm:$0xff] %v15142_v37  ;;  %v15143_v30 = vmax.f32 %v15095_v6, 0.0 }
 0x9e4   : > { %15193 = vst [vmem:[%s24236_s18 + $0x118] sm:$0xff] %v15145_v19 }
 0x9e5   : > { %15191 = vst [vmem:[%s24236_s18 + $0x108] sm:$0xff] %v15143_v30  ;;  %v18743_v52 = vpop.f32.mrb[84].mxu1 }
 0x9e6   : > { %v15100_v9 = vadd.f32 %v18743_v52, %v24230_v53  ;;  %v14960_v47 = vpop.f32.mrb[85].mxu1 }
 0x9e7   : > { %v15098_v8 = vadd.f32 %v24230_v53, %v14960_v47  ;;  %v18744_v18 = vpop.f32.mrb[86].mxu1 }
 0x9e8   : > { %v15148_v1 = vmax.f32 %v15100_v9, 0.0  ;;  %v15101_v25 = vadd.f32 %v18744_v18, %v24230_v53  ;;  %v14963_v23 = vpop.f32.mrb[87].mxu1 }
 0x9e9   : > { %v15146_v63 = vmax.f32 %v15098_v8, 0.0  ;;  %v15099_v16 = vadd.f32 %v24230_v53, %v14963_v23 }
 0x9ea   : > { %15196 = vst [vmem:[%s24236_s18 + $0x130] sm:$0xff] %v15148_v1  ;;  %v15149_v15 = vmax.f32 %v15101_v25, 0.0 }
 0x9eb   : > { %15194 = vst [vmem:[%s24236_s18 + $0x120] sm:$0xff] %v15146_v63  ;;  %v15147_v24 = vmax.f32 %v15099_v16, 0.0 }
 0x9ec   : > { %15197 = vst [vmem:[%s24236_s18 + $0x138] sm:$0xff] %v15149_v15 }
 0x9ed   : > { %15195 = vst [vmem:[%s24236_s18 + $0x128] sm:$0xff] %v15147_v24  ;;  %v18747_v40 = vpop.f32.mrb[88].mxu1 }
 0x9ee   : > { %v15104_v2 = vadd.f32 %v18747_v40, %v24230_v53  ;;  %v14976_v39 = vpop.f32.mrb[89].mxu1 }
 0x9ef   : > { %v15102_v44 = vadd.f32 %v24230_v53, %v14976_v39  ;;  %v18748_v17 = vpop.f32.mrb[90].mxu1 }
 0x9f0   : > { %v15152_v35 = vmax.f32 %v15104_v2, 0.0  ;;  %v15105_v26 = vadd.f32 %v18748_v17, %v24230_v53  ;;  %v14979_v5 = vpop.f32.mrb[91].mxu1 }
 0x9f1   : > { %v15150_v58 = vmax.f32 %v15102_v44, 0.0  ;;  %v15103_v36 = vadd.f32 %v24230_v53, %v14979_v5 }
 0x9f2   : > { %15200 = vst [vmem:[%s24236_s18 + $0x150] sm:$0xff] %v15152_v35  ;;  %v15153_v13 = vmax.f32 %v15105_v26, 0.0 }
 0x9f3   : > { %15198 = vst [vmem:[%s24236_s18 + $0x140] sm:$0xff] %v15150_v58  ;;  %v15151_v20 = vmax.f32 %v15103_v36, 0.0 }
 0x9f4   : > { %15201 = vst [vmem:[%s24236_s18 + $0x158] sm:$0xff] %v15153_v13 }
 0x9f5   : > { %15199 = vst [vmem:[%s24236_s18 + $0x148] sm:$0xff] %v15151_v20  ;;  %v18751_v45 = vpop.f32.mrb[92].mxu1 }
 0x9f6   : > { %v15108_v48 = vadd.f32 %v18751_v45, %v24230_v53  ;;  %v14992_v54 = vpop.f32.mrb[93].mxu1 }
 0x9f7   : > { %v15106_v60 = vadd.f32 %v24230_v53, %v14992_v54  ;;  %v18752_v12 = vpop.f32.mrb[94].mxu1 }
 0x9f8   : > { %v15156_v27 = vmax.f32 %v15108_v48, 0.0  ;;  %v15109_v50 = vadd.f32 %v18752_v12, %v24230_v53  ;;  %v14995_v0 = vpop.f32.mrb[95].mxu1 }
 0x9f9   : > { %v15154_v22 = vmax.f32 %v15106_v60, 0.0  ;;  %v15107_v28 = vadd.f32 %v24230_v53, %v14995_v0 }
 0x9fa   : > { %15204 = vst [vmem:[%s24236_s18 + $0x170] sm:$0xff] %v15156_v27  ;;  %v15157_v42 = vmax.f32 %v15109_v50, 0.0 }
 0x9fb   : > { %15202 = vst [vmem:[%s24236_s18 + $0x160] sm:$0xff] %v15154_v22  ;;  %v15155_v43 = vmax.f32 %v15107_v28, 0.0 }
 0x9fc   : > { %15205 = vst [vmem:[%s24236_s18 + $0x178] sm:$0xff] %v15157_v42 }
 0x9fd   : > { %15203 = vst [vmem:[%s24236_s18 + $0x168] sm:$0xff] %v15155_v43 }
 0x9fe PF: > { %s18_s27 = sadd.s32 1, %s20518_s27  }
 0x9ff   : > { %p15_p4 = scmp.ge.s32.totalorder %s18_s27, 4  }
 0xa01   :  { %17 = sbr.rel (!%p15_p4) target bundleno = 1 (0x1), region = 109 }

</bundles_post_ra>
